<compile_context>
chip_gen: v6e
topology: v6e:2x2x1
jax: 0.10.0
libtpu: 0.0.40
codegen_flags: <defaults>
</compile_context>

<pallas_src>
import math
import jax
import jax.numpy as jnp
from jax.experimental import pallas as pl
from jax.experimental.pallas import tpu as pltpu

# ---- small, module-consistent sizes (hidden must be divisible by 12 heads) ----
HIDDEN    = 96          # stands in for the module's default 768
PADDED    = 128         # lane-dense padded embedding width
NUM_HEADS = 12
HEAD_DIM  = HIDDEN // NUM_HEADS      # 8
LN_EPS    = 1e-5
# bf16 operands on every MXU matmul (v5e/v6e/v7x are bf16-native); f32 accumulate.
MXU_DTYPE = jnp.bfloat16


def _attention_fusion_kernel(x_ref, wqkv_ref, bqkv_ref, wo_ref, bo_ref,
                             gamma_ref, beta_ref, out_ref):
    BG, S, EP = x_ref.shape          # one batch group per grid step
    M = BG * S
    E = HIDDEN
    Dh = HEAD_DIM
    H = NUM_HEADS

    # Fold the batch group into the token (sublane) dim for all pointwise work.
    x = x_ref[...].astype(jnp.float32).reshape(M, EP)            # (M, 128) f32

    # --- fused QKV projection: one (M,128) x (128,384) bf16 MXU matmul -------
    qkv = jnp.dot(x.astype(MXU_DTYPE), wqkv_ref[...],
                  preferred_element_type=jnp.float32) + bqkv_ref[...]

    # Lane-aligned (128-boundary) slices of the fused projection.
    q = qkv[:, 0 * EP:1 * EP]                                    # (M, 128) f32
    k = qkv[:, 1 * EP:2 * EP]
    v = qkv[:, 2 * EP:3 * EP]

    # (M, EP) -> (H*BG, S, Dh): heads stacked on the leading (batch) axis so
    # both attention matmuls below run as ONE batched dot_general over all
    # 12 heads (no per-head Python loop of tiny matmuls).
    def split_heads(t):
        return jnp.concatenate(
            [t[:, h * Dh:(h + 1) * Dh].reshape(BG, S, Dh) for h in range(H)],
            axis=0).astype(MXU_DTYPE)

    qh = split_heads(q)                                          # (H*BG, S, Dh)
    kh = split_heads(k)
    vh = split_heads(v)

    # Softmax scale already folded into Wq/bq in the wrapper.
    s = jnp.einsum("bqd,bkd->bqk", qh, kh,
                   preferred_element_type=jnp.float32)           # (H*BG, S, S)
    s = s - jnp.max(s, axis=-1, keepdims=True)
    p = jnp.exp(s)
    p = p * pl.reciprocal(jnp.sum(p, axis=-1, keepdims=True), approx=True)
    oh = jnp.einsum("bqk,bkd->bqd", p.astype(MXU_DTYPE), vh,
                    preferred_element_type=jnp.float32)          # (H*BG, S, Dh)

    # Re-assemble the head-concat layout (head h -> lanes [h*Dh,(h+1)*Dh)) and
    # run ONE fused (M,96)x(96,128) output projection instead of 12 K=8 matmuls.
    oh_cat = jnp.concatenate([oh[h * BG:(h + 1) * BG] for h in range(H)],
                             axis=-1)                            # (BG, S, 96)
    attn = jnp.dot(oh_cat.reshape(M, E).astype(MXU_DTYPE), wo_ref[...],
                   preferred_element_type=jnp.float32) + bo_ref[...]   # (M, 128)

    # --- residual + LayerNorm over the real E=96 channels (masked) -----------
    y = attn + x
    lane = jax.lax.broadcasted_iota(jnp.int32, (M, EP), 1)
    valid = lane < E
    ym = jnp.where(valid, y, 0.0)
    mean = jnp.sum(ym, axis=-1, keepdims=True) * (1.0 / E)
    yc = jnp.where(valid, y - mean, 0.0)
    var = jnp.sum(yc * yc, axis=-1, keepdims=True) * (1.0 / E)
    normed = yc * jax.lax.rsqrt(var + LN_EPS)
    out = normed * gamma_ref[...] + beta_ref[...]                # padding lanes -> 0

    # Lane-dense (last dim = 128) store.
    out_ref[...] = out.reshape(BG, S, EP).astype(out_ref.dtype)


def _pick_batch_split(batch):
    """Batch-group split: 1 on single-TensorCore chips (v5e/v6e), 2-way
    core-parallel only on dual-TC v7x (where it actually lands on both cores)."""
    try:
        kind = jax.devices()[0].device_kind.lower()
    except Exception:
        kind = ""
    dual_tc = ("v7" in kind) or ("7x" in kind)
    if dual_tc and batch % 2 == 0:
        return 2, (pltpu.CORE_PARALLEL,)
    return 1, ("arbitrary",)


def self_attention_fusion(image_tokens, text_tokens, params):
    """image_tokens: (B, S_img, E), text_tokens: (B, S_txt, E) -> (B, S_img+S_txt, E)."""
    x = jnp.concatenate([image_tokens, text_tokens], axis=1)     # glue: concat in plain JAX
    B, S, E = x.shape
    assert E == HIDDEN
    assert S % 8 == 0, "total sequence length must be sublane (8) aligned"
    EP = PADDED
    scale = 1.0 / math.sqrt(HEAD_DIM)

    def pad_mat(w_t, rows=EP):       # (E,E) -> (rows, EP), zero padded, bf16
        out = jnp.zeros((rows, EP), jnp.float32).at[:E, :E].set(w_t)
        return out.astype(MXU_DTYPE)

    def pad_vec(b):                  # (E,) -> (1, EP), zero padded, f32
        return jnp.zeros((1, EP), jnp.float32).at[0, :E].set(b)

    # PyTorch Linear is x @ W.T + b, so pre-transpose.  Fuse QKV into one
    # lane-padded (128, 384) bf16 matrix (sections at lane offsets 0/128/256)
    # and fold the 1/sqrt(head_dim) softmax scale into Wq / bq.
    w_qkv = jnp.concatenate([pad_mat((params["wq"] * scale).T),
                             pad_mat(params["wk"].T),
                             pad_mat(params["wv"].T)], axis=1)    # (128, 384) bf16
    b_qkv = jnp.concatenate([pad_vec(params["bq"] * scale),
                             pad_vec(params["bk"]),
                             pad_vec(params["bv"])], axis=1)      # (1, 384) f32
    w_o   = pad_mat(params["wo"].T, rows=E)                       # (96, 128) bf16
    b_o   = pad_vec(params["bo"])                                 # (1, 128) f32
    gamma = pad_vec(params["ln_w"])
    beta  = pad_vec(params["ln_b"])

    x_pad = jnp.pad(x, ((0, 0), (0, 0), (0, EP - E)))             # (B, S, 128)

    G, dim_sem = _pick_batch_split(B)
    BG = B // G
    const = lambda g: (0, 0)   # weights / biases: constant block, fetched once

    out_padded = pl.pallas_call(
        _attention_fusion_kernel,
        out_shape=jax.ShapeDtypeStruct((B, S, EP), x.dtype),
        grid_spec=pltpu.PrefetchScalarGridSpec(
            num_scalar_prefetch=0,
            grid=(G,),
            in_specs=[
                pl.BlockSpec((BG, S, EP), lambda g: (g, 0, 0)),   # tokens (batch group)
                pl.BlockSpec((EP, 3 * EP), const),                # fused Wqkv^T (bf16)
                pl.BlockSpec((1, 3 * EP), const),                 # fused QKV bias
                pl.BlockSpec((E, EP), const),                     # Wo^T (bf16)
                pl.BlockSpec((1, EP), const),                     # bo
                pl.BlockSpec((1, EP), const),                     # ln gamma
                pl.BlockSpec((1, EP), const),                     # ln beta
            ],
            out_specs=pl.BlockSpec((BG, S, EP), lambda g: (g, 0, 0)),
        ),
        compiler_params=pltpu.CompilerParams(dimension_semantics=dim_sem),
    )(x_pad, w_qkv, b_qkv, w_o, b_o, gamma, beta)

    # TODO(synk): at production size (E=768) give the constant weight blocks
    # pipeline_mode=pl.Buffered(1) / persistent scratch and set vmem_limit_bytes
    # for v7x's 64 MiB VMEM; if the consumer accepts a lane-dense (B,S,128)
    # output, drop this narrowing slice as well.
    return out_padded[..., :E]


def _reference(image_tokens, text_tokens, params):
    """Pure-JAX reference mirroring nn.MultiheadAttention + residual LayerNorm."""
    x = jnp.concatenate([image_tokens, text_tokens], axis=1)     # (B, S, E)
    B, S, E = x.shape
    q = x @ params["wq"].T + params["bq"]
    k = x @ params["wk"].T + params["bk"]
    v = x @ params["wv"].T + params["bv"]
    qh = q.reshape(B, S, NUM_HEADS, HEAD_DIM).transpose(0, 2, 1, 3)
    kh = k.reshape(B, S, NUM_HEADS, HEAD_DIM).transpose(0, 2, 1, 3)
    vh = v.reshape(B, S, NUM_HEADS, HEAD_DIM).transpose(0, 2, 1, 3)
    s = jnp.einsum("bhqd,bhkd->bhqk", qh, kh) / math.sqrt(HEAD_DIM)
    p = jax.nn.softmax(s, axis=-1)
    o = jnp.einsum("bhqk,bhkd->bhqd", p, vh).transpose(0, 2, 1, 3).reshape(B, S, E)
    o = o @ params["wo"].T + params["bo"]
    y = o + x
    mean = jnp.mean(y, axis=-1, keepdims=True)
    var = jnp.mean((y - mean) ** 2, axis=-1, keepdims=True)
    return (y - mean) / jnp.sqrt(var + LN_EPS) * params["ln_w"] + params["ln_b"]


def _init_params(key):
    ks = jax.random.split(key, 6)
    E = HIDDEN
    in_proj_w = jax.random.normal(ks[0], (3 * E, E), jnp.float32) * 0.05
    in_proj_b = jax.random.normal(ks[1], (3 * E,), jnp.float32) * 0.05
    out_w = jax.random.normal(ks[2], (E, E), jnp.float32) * 0.05
    out_b = jax.random.normal(ks[3], (E,), jnp.float32) * 0.05
    ln_w = jnp.ones((E,), jnp.float32)
    ln_b = jnp.zeros((E,), jnp.float32)
    return {
        "wq": in_proj_w[:E], "wk": in_proj_w[E:2 * E], "wv": in_proj_w[2 * E:],
        "bq": in_proj_b[:E], "bk": in_proj_b[E:2 * E], "bv": in_proj_b[2 * E:],
        "wo": out_w, "bo": out_b, "ln_w": ln_w, "ln_b": ln_b,
    }


if __name__ == "__main__":
    key = jax.random.PRNGKey(0)
    k_img, k_txt, k_par = jax.random.split(key, 3)

    B, S_IMG, S_TXT = 4, 16, 8          # total seq = 24 (sublane aligned)
    image_tokens = jax.random.normal(k_img, (B, S_IMG, HIDDEN), jnp.float32)
    text_tokens = jax.random.normal(k_txt, (B, S_TXT, HIDDEN), jnp.float32)
    params = _init_params(k_par)

    out = self_attention_fusion(image_tokens, text_tokens, params)
    out = jax.block_until_ready(out)

    ref = _reference(image_tokens, text_tokens, params)
    assert out.shape == (B, S_IMG + S_TXT, HIDDEN)
    # Tolerance accounts for bf16 MXU operands + pl.reciprocal(approx=True).
    max_err = float(jnp.max(jnp.abs(out - ref)))
    assert jnp.allclose(out, ref, atol=3e-2, rtol=3e-2), (
        "mismatch vs reference; max abs err = %g" % max_err)

    print("KERNEL_OK")
</pallas_src>

<mosaic_0001>
module attributes {stable_mosaic.version = 11 : i64} {
  func.func @_attention_fusion_kernel(%arg0: i32, %arg1: memref<4x24x128xf32, #tpu.memory_space<vmem>>, %arg2: memref<128x384xbf16, #tpu.memory_space<vmem>>, %arg3: memref<1x384xf32, #tpu.memory_space<vmem>>, %arg4: memref<96x128xbf16, #tpu.memory_space<vmem>>, %arg5: memref<1x128xf32, #tpu.memory_space<vmem>>, %arg6: memref<1x128xf32, #tpu.memory_space<vmem>>, %arg7: memref<1x128xf32, #tpu.memory_space<vmem>>, %arg8: memref<4x24x128xf32, #tpu.memory_space<vmem>>) attributes {dimension_semantics = [#tpu.dimension_semantics<arbitrary>], iteration_bounds = array<i64: 1>, scalar_prefetch = 0 : i64, scratch_operands = 0 : i64, tpu.core_type = #tpu.core_type<tc>, window_params = [{transform_indices = @transform_0, window_bounds = array<i64: 4, 24, 128>}, {pipeline_mode = #tpu.pipeline_mode<synchronous>, transform_indices = @transform_1, window_bounds = array<i64: 128, 384>}, {pipeline_mode = #tpu.pipeline_mode<synchronous>, transform_indices = @transform_2, window_bounds = array<i64: 1, 384>}, {pipeline_mode = #tpu.pipeline_mode<synchronous>, transform_indices = @transform_3, window_bounds = array<i64: 96, 128>}, {pipeline_mode = #tpu.pipeline_mode<synchronous>, transform_indices = @transform_4, window_bounds = array<i64: 1, 128>}, {pipeline_mode = #tpu.pipeline_mode<synchronous>, transform_indices = @transform_5, window_bounds = array<i64: 1, 128>}, {pipeline_mode = #tpu.pipeline_mode<synchronous>, transform_indices = @transform_6, window_bounds = array<i64: 1, 128>}, {transform_indices = @transform_7, window_bounds = array<i64: 4, 24, 128>}]} {
    %c0 = arith.constant 0 : index
    %c0_0 = arith.constant 0 : index
    %c0_1 = arith.constant 0 : index
    %0 = vector.load %arg1[%c0, %c0_0, %c0_1] : memref<4x24x128xf32, #tpu.memory_space<vmem>>, vector<4x24x128xf32>
    %1 = vector.shape_cast %0 : vector<4x24x128xf32> to vector<96x128xf32>
    %2 = arith.truncf %1 : vector<96x128xf32> to vector<96x128xbf16>
    %c0_2 = arith.constant 0 : index
    %c0_3 = arith.constant 0 : index
    %3 = vector.load %arg2[%c0_2, %c0_3] : memref<128x384xbf16, #tpu.memory_space<vmem>>, vector<128x384xbf16>
    %cst = arith.constant dense<0.000000e+00> : vector<96x384xf32>
    %4 = tpu.matmul %2, %3, %cst {dimension_numbers = #tpu.dot_dimension_numbers<[1], [0], [0], [1], [0, 0, 1, 1], [], []>} : vector<96x128xbf16>, vector<128x384xbf16>, vector<96x384xf32> -> vector<96x384xf32>
    %c0_4 = arith.constant 0 : index
    %c0_5 = arith.constant 0 : index
    %5 = vector.load %arg3[%c0_4, %c0_5] : memref<1x384xf32, #tpu.memory_space<vmem>>, vector<1x384xf32>
    %6 = vector.broadcast %5 : vector<1x384xf32> to vector<96x384xf32>
    %7 = arith.addf %4, %6 : vector<96x384xf32>
    %8 = vector.extract_strided_slice %7 {offsets = [0, 0], sizes = [96, 128], strides = [1, 1]} : vector<96x384xf32> to vector<96x128xf32>
    %9 = vector.extract_strided_slice %7 {offsets = [0, 128], sizes = [96, 128], strides = [1, 1]} : vector<96x384xf32> to vector<96x128xf32>
    %10 = vector.extract_strided_slice %7 {offsets = [0, 256], sizes = [96, 128], strides = [1, 1]} : vector<96x384xf32> to vector<96x128xf32>
    %11 = vector.extract_strided_slice %8 {offsets = [0, 0], sizes = [96, 8], strides = [1, 1]} : vector<96x128xf32> to vector<96x8xf32>
    %12 = vector.shape_cast %11 : vector<96x8xf32> to vector<4x24x8xf32>
    %13 = vector.extract_strided_slice %8 {offsets = [0, 8], sizes = [96, 8], strides = [1, 1]} : vector<96x128xf32> to vector<96x8xf32>
    %14 = vector.shape_cast %13 : vector<96x8xf32> to vector<4x24x8xf32>
    %15 = vector.extract_strided_slice %8 {offsets = [0, 16], sizes = [96, 8], strides = [1, 1]} : vector<96x128xf32> to vector<96x8xf32>
    %16 = vector.shape_cast %15 : vector<96x8xf32> to vector<4x24x8xf32>
    %17 = vector.extract_strided_slice %8 {offsets = [0, 24], sizes = [96, 8], strides = [1, 1]} : vector<96x128xf32> to vector<96x8xf32>
    %18 = vector.shape_cast %17 : vector<96x8xf32> to vector<4x24x8xf32>
    %19 = vector.extract_strided_slice %8 {offsets = [0, 32], sizes = [96, 8], strides = [1, 1]} : vector<96x128xf32> to vector<96x8xf32>
    %20 = vector.shape_cast %19 : vector<96x8xf32> to vector<4x24x8xf32>
    %21 = vector.extract_strided_slice %8 {offsets = [0, 40], sizes = [96, 8], strides = [1, 1]} : vector<96x128xf32> to vector<96x8xf32>
    %22 = vector.shape_cast %21 : vector<96x8xf32> to vector<4x24x8xf32>
    %23 = vector.extract_strided_slice %8 {offsets = [0, 48], sizes = [96, 8], strides = [1, 1]} : vector<96x128xf32> to vector<96x8xf32>
    %24 = vector.shape_cast %23 : vector<96x8xf32> to vector<4x24x8xf32>
    %25 = vector.extract_strided_slice %8 {offsets = [0, 56], sizes = [96, 8], strides = [1, 1]} : vector<96x128xf32> to vector<96x8xf32>
    %26 = vector.shape_cast %25 : vector<96x8xf32> to vector<4x24x8xf32>
    %27 = vector.extract_strided_slice %8 {offsets = [0, 64], sizes = [96, 8], strides = [1, 1]} : vector<96x128xf32> to vector<96x8xf32>
    %28 = vector.shape_cast %27 : vector<96x8xf32> to vector<4x24x8xf32>
    %29 = vector.extract_strided_slice %8 {offsets = [0, 72], sizes = [96, 8], strides = [1, 1]} : vector<96x128xf32> to vector<96x8xf32>
    %30 = vector.shape_cast %29 : vector<96x8xf32> to vector<4x24x8xf32>
    %31 = vector.extract_strided_slice %8 {offsets = [0, 80], sizes = [96, 8], strides = [1, 1]} : vector<96x128xf32> to vector<96x8xf32>
    %32 = vector.shape_cast %31 : vector<96x8xf32> to vector<4x24x8xf32>
    %33 = vector.extract_strided_slice %8 {offsets = [0, 88], sizes = [96, 8], strides = [1, 1]} : vector<96x128xf32> to vector<96x8xf32>
    %34 = vector.shape_cast %33 : vector<96x8xf32> to vector<4x24x8xf32>
    %35 = tpu.concatenate %12, %14, %16, %18, %20, %22, %24, %26, %28, %30, %32, %34 in 0 : vector<4x24x8xf32>, vector<4x24x8xf32>, vector<4x24x8xf32>, vector<4x24x8xf32>, vector<4x24x8xf32>, vector<4x24x8xf32>, vector<4x24x8xf32>, vector<4x24x8xf32>, vector<4x24x8xf32>, vector<4x24x8xf32>, vector<4x24x8xf32>, vector<4x24x8xf32> -> vector<48x24x8xf32>
    %36 = arith.truncf %35 : vector<48x24x8xf32> to vector<48x24x8xbf16>
    %37 = vector.extract_strided_slice %9 {offsets = [0, 0], sizes = [96, 8], strides = [1, 1]} : vector<96x128xf32> to vector<96x8xf32>
    %38 = vector.shape_cast %37 : vector<96x8xf32> to vector<4x24x8xf32>
    %39 = vector.extract_strided_slice %9 {offsets = [0, 8], sizes = [96, 8], strides = [1, 1]} : vector<96x128xf32> to vector<96x8xf32>
    %40 = vector.shape_cast %39 : vector<96x8xf32> to vector<4x24x8xf32>
    %41 = vector.extract_strided_slice %9 {offsets = [0, 16], sizes = [96, 8], strides = [1, 1]} : vector<96x128xf32> to vector<96x8xf32>
    %42 = vector.shape_cast %41 : vector<96x8xf32> to vector<4x24x8xf32>
    %43 = vector.extract_strided_slice %9 {offsets = [0, 24], sizes = [96, 8], strides = [1, 1]} : vector<96x128xf32> to vector<96x8xf32>
    %44 = vector.shape_cast %43 : vector<96x8xf32> to vector<4x24x8xf32>
    %45 = vector.extract_strided_slice %9 {offsets = [0, 32], sizes = [96, 8], strides = [1, 1]} : vector<96x128xf32> to vector<96x8xf32>
    %46 = vector.shape_cast %45 : vector<96x8xf32> to vector<4x24x8xf32>
    %47 = vector.extract_strided_slice %9 {offsets = [0, 40], sizes = [96, 8], strides = [1, 1]} : vector<96x128xf32> to vector<96x8xf32>
    %48 = vector.shape_cast %47 : vector<96x8xf32> to vector<4x24x8xf32>
    %49 = vector.extract_strided_slice %9 {offsets = [0, 48], sizes = [96, 8], strides = [1, 1]} : vector<96x128xf32> to vector<96x8xf32>
    %50 = vector.shape_cast %49 : vector<96x8xf32> to vector<4x24x8xf32>
    %51 = vector.extract_strided_slice %9 {offsets = [0, 56], sizes = [96, 8], strides = [1, 1]} : vector<96x128xf32> to vector<96x8xf32>
    %52 = vector.shape_cast %51 : vector<96x8xf32> to vector<4x24x8xf32>
    %53 = vector.extract_strided_slice %9 {offsets = [0, 64], sizes = [96, 8], strides = [1, 1]} : vector<96x128xf32> to vector<96x8xf32>
    %54 = vector.shape_cast %53 : vector<96x8xf32> to vector<4x24x8xf32>
    %55 = vector.extract_strided_slice %9 {offsets = [0, 72], sizes = [96, 8], strides = [1, 1]} : vector<96x128xf32> to vector<96x8xf32>
    %56 = vector.shape_cast %55 : vector<96x8xf32> to vector<4x24x8xf32>
    %57 = vector.extract_strided_slice %9 {offsets = [0, 80], sizes = [96, 8], strides = [1, 1]} : vector<96x128xf32> to vector<96x8xf32>
    %58 = vector.shape_cast %57 : vector<96x8xf32> to vector<4x24x8xf32>
    %59 = vector.extract_strided_slice %9 {offsets = [0, 88], sizes = [96, 8], strides = [1, 1]} : vector<96x128xf32> to vector<96x8xf32>
    %60 = vector.shape_cast %59 : vector<96x8xf32> to vector<4x24x8xf32>
    %61 = tpu.concatenate %38, %40, %42, %44, %46, %48, %50, %52, %54, %56, %58, %60 in 0 : vector<4x24x8xf32>, vector<4x24x8xf32>, vector<4x24x8xf32>, vector<4x24x8xf32>, vector<4x24x8xf32>, vector<4x24x8xf32>, vector<4x24x8xf32>, vector<4x24x8xf32>, vector<4x24x8xf32>, vector<4x24x8xf32>, vector<4x24x8xf32>, vector<4x24x8xf32> -> vector<48x24x8xf32>
    %62 = arith.truncf %61 : vector<48x24x8xf32> to vector<48x24x8xbf16>
    %63 = vector.extract_strided_slice %10 {offsets = [0, 0], sizes = [96, 8], strides = [1, 1]} : vector<96x128xf32> to vector<96x8xf32>
    %64 = vector.shape_cast %63 : vector<96x8xf32> to vector<4x24x8xf32>
    %65 = vector.extract_strided_slice %10 {offsets = [0, 8], sizes = [96, 8], strides = [1, 1]} : vector<96x128xf32> to vector<96x8xf32>
    %66 = vector.shape_cast %65 : vector<96x8xf32> to vector<4x24x8xf32>
    %67 = vector.extract_strided_slice %10 {offsets = [0, 16], sizes = [96, 8], strides = [1, 1]} : vector<96x128xf32> to vector<96x8xf32>
    %68 = vector.shape_cast %67 : vector<96x8xf32> to vector<4x24x8xf32>
    %69 = vector.extract_strided_slice %10 {offsets = [0, 24], sizes = [96, 8], strides = [1, 1]} : vector<96x128xf32> to vector<96x8xf32>
    %70 = vector.shape_cast %69 : vector<96x8xf32> to vector<4x24x8xf32>
    %71 = vector.extract_strided_slice %10 {offsets = [0, 32], sizes = [96, 8], strides = [1, 1]} : vector<96x128xf32> to vector<96x8xf32>
    %72 = vector.shape_cast %71 : vector<96x8xf32> to vector<4x24x8xf32>
    %73 = vector.extract_strided_slice %10 {offsets = [0, 40], sizes = [96, 8], strides = [1, 1]} : vector<96x128xf32> to vector<96x8xf32>
    %74 = vector.shape_cast %73 : vector<96x8xf32> to vector<4x24x8xf32>
    %75 = vector.extract_strided_slice %10 {offsets = [0, 48], sizes = [96, 8], strides = [1, 1]} : vector<96x128xf32> to vector<96x8xf32>
    %76 = vector.shape_cast %75 : vector<96x8xf32> to vector<4x24x8xf32>
    %77 = vector.extract_strided_slice %10 {offsets = [0, 56], sizes = [96, 8], strides = [1, 1]} : vector<96x128xf32> to vector<96x8xf32>
    %78 = vector.shape_cast %77 : vector<96x8xf32> to vector<4x24x8xf32>
    %79 = vector.extract_strided_slice %10 {offsets = [0, 64], sizes = [96, 8], strides = [1, 1]} : vector<96x128xf32> to vector<96x8xf32>
    %80 = vector.shape_cast %79 : vector<96x8xf32> to vector<4x24x8xf32>
    %81 = vector.extract_strided_slice %10 {offsets = [0, 72], sizes = [96, 8], strides = [1, 1]} : vector<96x128xf32> to vector<96x8xf32>
    %82 = vector.shape_cast %81 : vector<96x8xf32> to vector<4x24x8xf32>
    %83 = vector.extract_strided_slice %10 {offsets = [0, 80], sizes = [96, 8], strides = [1, 1]} : vector<96x128xf32> to vector<96x8xf32>
    %84 = vector.shape_cast %83 : vector<96x8xf32> to vector<4x24x8xf32>
    %85 = vector.extract_strided_slice %10 {offsets = [0, 88], sizes = [96, 8], strides = [1, 1]} : vector<96x128xf32> to vector<96x8xf32>
    %86 = vector.shape_cast %85 : vector<96x8xf32> to vector<4x24x8xf32>
    %87 = tpu.concatenate %64, %66, %68, %70, %72, %74, %76, %78, %80, %82, %84, %86 in 0 : vector<4x24x8xf32>, vector<4x24x8xf32>, vector<4x24x8xf32>, vector<4x24x8xf32>, vector<4x24x8xf32>, vector<4x24x8xf32>, vector<4x24x8xf32>, vector<4x24x8xf32>, vector<4x24x8xf32>, vector<4x24x8xf32>, vector<4x24x8xf32>, vector<4x24x8xf32> -> vector<48x24x8xf32>
    %88 = arith.truncf %87 : vector<48x24x8xf32> to vector<48x24x8xbf16>
    "tpu.trace_start"() <{level = 10 : i32, message = "bqd,bkd->bqk"}> : () -> ()
    %cst_6 = arith.constant dense<0.000000e+00> : vector<48x24x24xf32>
    %89 = tpu.matmul %36, %62, %cst_6 {dimension_numbers = #tpu.dot_dimension_numbers<[2], [2], [1], [1], [0, 0, 0, 1, 1, 1], [0], [0]>} : vector<48x24x8xbf16>, vector<48x24x8xbf16>, vector<48x24x24xf32> -> vector<48x24x24xf32>
    "tpu.trace_stop"() : () -> ()
    %cst_7 = arith.constant dense<0xFF800000> : vector<48x24xf32>
    %90 = vector.multi_reduction <maximumf>, %89, %cst_7 [2] : vector<48x24x24xf32> to vector<48x24xf32>
    %91 = vector.shape_cast %90 : vector<48x24xf32> to vector<48x24x1xf32>
    %92 = vector.broadcast %91 : vector<48x24x1xf32> to vector<48x24x24xf32>
    %93 = arith.subf %89, %92 : vector<48x24x24xf32>
    %94 = math.exp %93 : vector<48x24x24xf32>
    %cst_8 = arith.constant dense<0.000000e+00> : vector<48x24xf32>
    %95 = vector.multi_reduction <add>, %94, %cst_8 [2] : vector<48x24x24xf32> to vector<48x24xf32>
    %96 = vector.shape_cast %95 : vector<48x24xf32> to vector<48x24x1xf32>
    %97 = tpu.reciprocal %96 {approx = true} : vector<48x24x1xf32> -> vector<48x24x1xf32>
    %98 = vector.broadcast %97 : vector<48x24x1xf32> to vector<48x24x24xf32>
    %99 = arith.mulf %94, %98 : vector<48x24x24xf32>
    %100 = arith.truncf %99 : vector<48x24x24xf32> to vector<48x24x24xbf16>
    "tpu.trace_start"() <{level = 10 : i32, message = "bqk,bkd->bqd"}> : () -> ()
    %cst_9 = arith.constant dense<0.000000e+00> : vector<48x24x8xf32>
    %101 = tpu.matmul %100, %88, %cst_9 {dimension_numbers = #tpu.dot_dimension_numbers<[2], [1], [1], [2], [0, 0, 0, 1, 1, 2], [0], [0]>} : vector<48x24x24xbf16>, vector<48x24x8xbf16>, vector<48x24x8xf32> -> vector<48x24x8xf32>
    "tpu.trace_stop"() : () -> ()
    %102 = vector.extract_strided_slice %101 {offsets = [0, 0, 0], sizes = [4, 24, 8], strides = [1, 1, 1]} : vector<48x24x8xf32> to vector<4x24x8xf32>
    %103 = vector.extract_strided_slice %101 {offsets = [4, 0, 0], sizes = [4, 24, 8], strides = [1, 1, 1]} : vector<48x24x8xf32> to vector<4x24x8xf32>
    %104 = vector.extract_strided_slice %101 {offsets = [8, 0, 0], sizes = [4, 24, 8], strides = [1, 1, 1]} : vector<48x24x8xf32> to vector<4x24x8xf32>
    %105 = vector.extract_strided_slice %101 {offsets = [12, 0, 0], sizes = [4, 24, 8], strides = [1, 1, 1]} : vector<48x24x8xf32> to vector<4x24x8xf32>
    %106 = vector.extract_strided_slice %101 {offsets = [16, 0, 0], sizes = [4, 24, 8], strides = [1, 1, 1]} : vector<48x24x8xf32> to vector<4x24x8xf32>
    %107 = vector.extract_strided_slice %101 {offsets = [20, 0, 0], sizes = [4, 24, 8], strides = [1, 1, 1]} : vector<48x24x8xf32> to vector<4x24x8xf32>
    %108 = vector.extract_strided_slice %101 {offsets = [24, 0, 0], sizes = [4, 24, 8], strides = [1, 1, 1]} : vector<48x24x8xf32> to vector<4x24x8xf32>
    %109 = vector.extract_strided_slice %101 {offsets = [28, 0, 0], sizes = [4, 24, 8], strides = [1, 1, 1]} : vector<48x24x8xf32> to vector<4x24x8xf32>
    %110 = vector.extract_strided_slice %101 {offsets = [32, 0, 0], sizes = [4, 24, 8], strides = [1, 1, 1]} : vector<48x24x8xf32> to vector<4x24x8xf32>
    %111 = vector.extract_strided_slice %101 {offsets = [36, 0, 0], sizes = [4, 24, 8], strides = [1, 1, 1]} : vector<48x24x8xf32> to vector<4x24x8xf32>
    %112 = vector.extract_strided_slice %101 {offsets = [40, 0, 0], sizes = [4, 24, 8], strides = [1, 1, 1]} : vector<48x24x8xf32> to vector<4x24x8xf32>
    %113 = vector.extract_strided_slice %101 {offsets = [44, 0, 0], sizes = [4, 24, 8], strides = [1, 1, 1]} : vector<48x24x8xf32> to vector<4x24x8xf32>
    %114 = tpu.concatenate %102, %103, %104, %105, %106, %107, %108, %109, %110, %111, %112, %113 in 2 : vector<4x24x8xf32>, vector<4x24x8xf32>, vector<4x24x8xf32>, vector<4x24x8xf32>, vector<4x24x8xf32>, vector<4x24x8xf32>, vector<4x24x8xf32>, vector<4x24x8xf32>, vector<4x24x8xf32>, vector<4x24x8xf32>, vector<4x24x8xf32>, vector<4x24x8xf32> -> vector<4x24x96xf32>
    %115 = vector.shape_cast %114 : vector<4x24x96xf32> to vector<96x96xf32>
    %116 = arith.truncf %115 : vector<96x96xf32> to vector<96x96xbf16>
    %c0_10 = arith.constant 0 : index
    %c0_11 = arith.constant 0 : index
    %117 = vector.load %arg4[%c0_10, %c0_11] : memref<96x128xbf16, #tpu.memory_space<vmem>>, vector<96x128xbf16>
    %cst_12 = arith.constant dense<0.000000e+00> : vector<96x128xf32>
    %118 = tpu.matmul %116, %117, %cst_12 {dimension_numbers = #tpu.dot_dimension_numbers<[1], [0], [0], [1], [0, 0, 1, 1], [], []>} : vector<96x96xbf16>, vector<96x128xbf16>, vector<96x128xf32> -> vector<96x128xf32>
    %c0_13 = arith.constant 0 : index
    %c0_14 = arith.constant 0 : index
    %119 = vector.load %arg5[%c0_13, %c0_14] : memref<1x128xf32, #tpu.memory_space<vmem>>, vector<1x128xf32>
    %120 = vector.broadcast %119 : vector<1x128xf32> to vector<96x128xf32>
    %121 = arith.addf %118, %120 : vector<96x128xf32>
    %122 = arith.addf %121, %1 : vector<96x128xf32>
    %123 = tpu.iota {dimensions = array<i32: 1>} : vector<96x128xi32>
    %c96_i32 = arith.constant 96 : i32
    %124 = vector.broadcast %c96_i32 : i32 to vector<96x128xi32>
    %125 = arith.cmpi slt, %123, %124 : vector<96x128xi32>
    %cst_15 = arith.constant 0.000000e+00 : f32
    %126 = vector.broadcast %cst_15 : f32 to vector<96x128xf32>
    %127 = arith.select %125, %122, %126 : vector<96x128xi1>, vector<96x128xf32>
    %cst_16 = arith.constant dense<0.000000e+00> : vector<96xf32>
    %128 = vector.multi_reduction <add>, %127, %cst_16 [1] : vector<96x128xf32> to vector<96xf32>
    %129 = vector.shape_cast %128 : vector<96xf32> to vector<96x1xf32>
    %cst_17 = arith.constant 0.010416667 : f32
    %130 = vector.broadcast %cst_17 : f32 to vector<96x1xf32>
    %131 = arith.mulf %129, %130 : vector<96x1xf32>
    %132 = vector.broadcast %131 : vector<96x1xf32> to vector<96x128xf32>
    %133 = arith.subf %122, %132 : vector<96x128xf32>
    %cst_18 = arith.constant 0.000000e+00 : f32
    %134 = vector.broadcast %cst_18 : f32 to vector<96x128xf32>
    %135 = arith.select %125, %133, %134 : vector<96x128xi1>, vector<96x128xf32>
    %136 = arith.mulf %135, %135 : vector<96x128xf32>
    %cst_19 = arith.constant dense<0.000000e+00> : vector<96xf32>
    %137 = vector.multi_reduction <add>, %136, %cst_19 [1] : vector<96x128xf32> to vector<96xf32>
    %138 = vector.shape_cast %137 : vector<96xf32> to vector<96x1xf32>
    %cst_20 = arith.constant 0.010416667 : f32
    %139 = vector.broadcast %cst_20 : f32 to vector<96x1xf32>
    %140 = arith.mulf %138, %139 : vector<96x1xf32>
    %cst_21 = arith.constant 9.99999974E-6 : f32
    %141 = vector.broadcast %cst_21 : f32 to vector<96x1xf32>
    %142 = arith.addf %140, %141 : vector<96x1xf32>
    %143 = math.rsqrt %142 : vector<96x1xf32>
    %144 = vector.broadcast %143 : vector<96x1xf32> to vector<96x128xf32>
    %145 = arith.mulf %135, %144 : vector<96x128xf32>
    %c0_22 = arith.constant 0 : index
    %c0_23 = arith.constant 0 : index
    %146 = vector.load %arg6[%c0_22, %c0_23] : memref<1x128xf32, #tpu.memory_space<vmem>>, vector<1x128xf32>
    %147 = vector.broadcast %146 : vector<1x128xf32> to vector<96x128xf32>
    %148 = arith.mulf %145, %147 : vector<96x128xf32>
    %c0_24 = arith.constant 0 : index
    %c0_25 = arith.constant 0 : index
    %149 = vector.load %arg7[%c0_24, %c0_25] : memref<1x128xf32, #tpu.memory_space<vmem>>, vector<1x128xf32>
    %150 = vector.broadcast %149 : vector<1x128xf32> to vector<96x128xf32>
    %151 = arith.addf %148, %150 : vector<96x128xf32>
    %152 = vector.shape_cast %151 : vector<96x128xf32> to vector<4x24x128xf32>
    %c0_26 = arith.constant 0 : index
    %c0_27 = arith.constant 0 : index
    %c0_28 = arith.constant 0 : index
    %153 = vector.load %arg8[%c0_26, %c0_27, %c0_28] : memref<4x24x128xf32, #tpu.memory_space<vmem>>, vector<4x24x128xf32>
    tpu.vector_store %arg8[%c0_26, %c0_27, %c0_28], %152 {strides = array<i32>} : memref<4x24x128xf32, #tpu.memory_space<vmem>>, vector<4x24x128xf32>,
    return
  }
  func.func @transform_0(%arg0: i32) -> (i32, i32, i32) {
    %c0_i32 = arith.constant 0 : i32
    %c0_i32_0 = arith.constant 0 : i32
    %c0_i32_1 = arith.constant 0 : i32
    return %arg0, %c0_i32, %c0_i32_0 : i32, i32, i32
  }
  func.func @transform_1(%arg0: i32) -> (i32, i32) {
    %c0_i32 = arith.constant 0 : i32
    %c0_i32_0 = arith.constant 0 : i32
    %c0_i32_1 = arith.constant 0 : i32
    return %c0_i32, %c0_i32_0 : i32, i32
  }
  func.func @transform_2(%arg0: i32) -> (i32, i32) {
    %c0_i32 = arith.constant 0 : i32
    %c0_i32_0 = arith.constant 0 : i32
    %c0_i32_1 = arith.constant 0 : i32
    return %c0_i32, %c0_i32_0 : i32, i32
  }
  func.func @transform_3(%arg0: i32) -> (i32, i32) {
    %c0_i32 = arith.constant 0 : i32
    %c0_i32_0 = arith.constant 0 : i32
    %c0_i32_1 = arith.constant 0 : i32
    return %c0_i32, %c0_i32_0 : i32, i32
  }
  func.func @transform_4(%arg0: i32) -> (i32, i32) {
    %c0_i32 = arith.constant 0 : i32
    %c0_i32_0 = arith.constant 0 : i32
    %c0_i32_1 = arith.constant 0 : i32
    return %c0_i32, %c0_i32_0 : i32, i32
  }
  func.func @transform_5(%arg0: i32) -> (i32, i32) {
    %c0_i32 = arith.constant 0 : i32
    %c0_i32_0 = arith.constant 0 : i32
    %c0_i32_1 = arith.constant 0 : i32
    return %c0_i32, %c0_i32_0 : i32, i32
  }
  func.func @transform_6(%arg0: i32) -> (i32, i32) {
    %c0_i32 = arith.constant 0 : i32
    %c0_i32_0 = arith.constant 0 : i32
    %c0_i32_1 = arith.constant 0 : i32
    return %c0_i32, %c0_i32_0 : i32, i32
  }
  func.func @transform_7(%arg0: i32) -> (i32, i32, i32) {
    %c0_i32 = arith.constant 0 : i32
    %c0_i32_0 = arith.constant 0 : i32
    %c0_i32_1 = arith.constant 0 : i32
    return %arg0, %c0_i32, %c0_i32_0 : i32, i32, i32
  }
}

</mosaic_0001>

<bundles_post_ra>
// kernel: tpu_custom_call.1
= control target key start
LH: loop header
LB: loop body
LE: loop exit
PB: predicated region body
PF: predicated region fallthrough
CT: control target
= control target key end

     0   :  { %12 = vsyncpa [#allocation3], 0  ;;  %s18654_s0 = inlined_call_operand.hbm [shape: f32[4,24,128], index: 0, kind: input, shape index: {}]   ;;  %s18655_s1 = inlined_call_operand.hbm [shape: bf16[128,384], index: 1, kind: input, shape index: {}]   ;;  %s18656_s2 = inlined_call_operand.vmem [shape: f32[1,384], index: 2, kind: input, shape index: {}]   ;;  %s18657_s3 = inlined_call_operand.hbm [shape: bf16[96,128], index: 3, kind: input, shape index: {}]   ;;  %s18658_s4 = inlined_call_operand.vmem [shape: f32[1,128], index: 4, kind: input, shape index: {}]   ;;  %s18659_s5 = inlined_call_operand.vmem [shape: f32[1,128], index: 5, kind: input, shape index: {}]   ;;  %s18660_s6 = inlined_call_operand.vmem [shape: f32[1,128], index: 6, kind: input, shape index: {}]   ;;  %s18661_s7 = inlined_call_operand.hbm [shape: f32[4,24,128], index: 7, kind: output, shape index: {}]  }
   0x1   :  { %13 = vsyncpa [#allocation6], 0 }
   0x2   :  { %14 = vsyncpa [#allocation4], 0  ;;  %s13998_s24 = smov [#allocation5]  }
   0x3   :  { %s32_s25 = sshll.u32 %s13998_s24, 4  ;;  %s33_s25 = int_to_ptr.vmem [resolvable:$true] %s32_s25 }
   0x4   :  { %s13920_s26 = scalar_lea.vmem %s33_s25, 3072  ;;  %p13925_p1 = scmp.lt.s32.totalorder %s33_s25, %s33_s25 }
   0x5   :  { %p13921_p0 = scmp.ne.s32.totalorder %s33_s25, %s13920_s26  ;;  %p13926_p2 = scmp.lt.s32.totalorder %s13920_s26, %s13920_s26 }
   0x7   :  { %p13927_p3 = por %p13926_p2, %p13925_p1 }
   0x9   :  { %p13928_p4 = pnand %p13927_p3, %p13921_p0 }
   0xb   :  { %13931 = shalt.err (!%p13928_p4)
}
   0xc   :  { %s13999_s27 = smov 192   ;;  %s14000_s28 = smov 12  }
   0xd   :  { %38 = dma.hbm_to_vmem [thread:$0]  %s18655_s1, 3072, %s33_s25, [#allocation6], %s13999_s27, %s13999_s27, %s14000_s28  }
   0xe   :  { %s14001_s8 = smov [#allocation2]  }
   0xf   :  { %s20_s9 = sshll.u32 %s14001_s8, 4  ;;  %s21_s9 = int_to_ptr.vmem [resolvable:$true] %s20_s9 }
  0x10   :  { %s13940_s10 = scalar_lea.vmem %s21_s9, 1536  ;;  %p13945_p6 = scmp.lt.s32.totalorder %s21_s9, %s21_s9 }
  0x11   :  { %p13941_p5 = scmp.ne.s32.totalorder %s21_s9, %s13940_s10  ;;  %p13946_p7 = scmp.lt.s32.totalorder %s13940_s10, %s13940_s10 }
  0x13   :  { %p13947_p8 = por %p13946_p7, %p13945_p6 }
  0x15   :  { %p13948_p9 = pnand %p13947_p8, %p13941_p5 }
  0x17   :  { %13951 = shalt.err (!%p13948_p9)
}
  0x18   :  { %s14002_s11 = smov 128   ;;  %s14003_s12 = smov 8  }
  0x19   :  { %26 = dma.hbm_to_vmem [thread:$0]  %s18654_s0, 1536, %s21_s9, [#allocation3], %s14002_s11, %s14002_s11, %s14003_s12  }
  0x1a   :  { %s14004_s1 = smov [#allocation7]  }
  0x1b   :  { %s46_s15 = sshll.u32 %s14004_s1, 4  ;;  %s47_s15 = int_to_ptr.vmem [resolvable:$true] %s46_s15 }
  0x1c   :  { %s13960_s16 = scalar_lea.vmem %s47_s15, 768  ;;  %p13965_p11 = scmp.lt.s32.totalorder %s47_s15, %s47_s15 }
  0x1d   :  { %p13961_p10 = scmp.ne.s32.totalorder %s47_s15, %s13960_s16  ;;  %p13966_p12 = scmp.lt.s32.totalorder %s13960_s16, %s13960_s16 }
  0x1f   :  { %p13967_p13 = por %p13966_p12, %p13965_p11 }
  0x21   :  { %p13968_p0 = pnand %p13967_p13, %p13961_p10 }
  0x23   :  { %13971 = shalt.err (!%p13968_p0)
}
  0x24   :  { %s14005_s17 = smov 64   ;;  %s14006_s18 = smov 4  }
  0x25   :  { %52 = dma.hbm_to_vmem [thread:$0]  %s18657_s3, 768, %s47_s15, [#allocation6], %s14005_s17, %s14005_s17, %s14006_s18  }
  0x26   :  { %13992 = dma.done.wait [#allocation3], 1536  }
  0x27   :  { %13993 = vsyncadd [#allocation3], 4294965760 }
  0x28   :  { %13994 = dma.done.wait [#allocation6], 3840  }
  0x29   :  { %13995 = vsyncadd [#allocation6], 4294963456  ;;  %v14007_v0 = vmov 0   ;;  %v13262_v1 = vld [vmem:[#allocation5 + $0xac] ss:$12 sps:$4 sm:$0xff]   ;;  %v69_v18 = vld [vmem:[#allocation2] sm:$0xff]  ;;  %v18662_v43 = vlaneseq }
  0x2a   :  { %296 = vmatprep.mubr.bf16.mxu0 %v14007_v0  ;;  %v13264_v2 = vld [vmem:[#allocation5 + $0xb0] ss:$12 sps:$4 sm:$0xff]   ;;  %264 = vmatprep.subr.bf16.mxu0 %v13262_v1  ;;  %v13265_v3 = vld [vmem:[#allocation5 + $0xa8] ss:$12 sps:$4 sm:$0xff]   ;;  %v13268_v5 = vld [vmem:[#allocation5 + $0x98] ss:$12 sps:$4 sm:$0xff]  }
  0x2b   :  { %10959 = vmatprep.subr.bf16.mxu1 %v13264_v2  ;;  %v13266_v4 = vld [vmem:[#allocation5 + $0x94] ss:$12 sps:$4 sm:$0xff]   ;;  %265 = vmatpush1.bf16.msra.mxu0 %v13265_v3  ;;  %v13269_v6 = vld [vmem:[#allocation5 + $0x90] ss:$12 sps:$4 sm:$0xff]   ;;  %v13273_v9 = vld [vmem:[#allocation5 + $0x78] ss:$12 sps:$4 sm:$0xff]  }
  0x2c   :  { %10960 = vmatpush3.bf16.msra.mxu1 %v13264_v2  ;;  %266 = vmatprep.subr.bf16.mxu0 %v13266_v4  ;;  %v13270_v7 = vld [vmem:[#allocation5 + $0x7c] ss:$12 sps:$4 sm:$0xff]   ;;  %v13272_v8 = vld [vmem:[#allocation5 + $0x80] ss:$12 sps:$4 sm:$0xff]   ;;  %v13274_v10 = vld [vmem:[#allocation5 + $0x64] ss:$12 sps:$4 sm:$0xff]  }
  0x2d   :  { %10961 = vmatprep.subr.bf16.mxu1 %v13268_v5  ;;  %v13276_v11 = vld [vmem:[#allocation5 + $0x68] ss:$12 sps:$4 sm:$0xff]   ;;  %v13277_v12 = vld [vmem:[#allocation5 + $0x60] ss:$12 sps:$4 sm:$0xff]   ;;  %v13280_v14 = vld [vmem:[#allocation5 + $0x50] ss:$12 sps:$4 sm:$0xff]  }
  0x2e   :  { %v13278_v13 = vld [vmem:[#allocation5 + $0x4c] ss:$12 sps:$4 sm:$0xff]   ;;  %v13281_v15 = vld [vmem:[#allocation5 + $0x48] ss:$12 sps:$4 sm:$0xff]   ;;  %v13285_v20 = vld [vmem:[#allocation5 + $0x30] ss:$12 sps:$4 sm:$0xff]  }
  0x2f   :  { %267 = vmatpush1.bf16.msra.mxu0 %v13269_v6  ;;  %v13282_v16 = vld [vmem:[#allocation5 + $0x34] ss:$12 sps:$4 sm:$0xff]   ;;  %v13284_v17 = vld [vmem:[#allocation5 + $0x38] ss:$12 sps:$4 sm:$0xff]   ;;  %v70_v19 = vld [vmem:[#allocation2 + $0x8] sm:$0xff]  ;;  %v122_v44 = vshrl.u32 %v18662_v43, 7 }
  0x30   :  { %10962 = vmatpush3.bf16.msra.mxu1 %v13268_v5  ;;  %268 = vmatprep.subr.bf16.mxu0 %v13270_v7  ;;  %v81_v21 = vpack.c.bf16 %v70_v19, %v69_v18  ;;  %v13286_v22 = vld [vmem:[#allocation5 + $0x1c] ss:$12 sps:$4 sm:$0xff]   ;;  %v13288_v23 = vld [vmem:[#allocation5 + $0x20] ss:$12 sps:$4 sm:$0xff]   ;;  %v13289_v24 = vld [vmem:[#allocation5 + $0x18] ss:$12 sps:$4 sm:$0xff]  }
  0x31   :  { %10963 = vmatprep.subr.bf16.mxu1 %v13272_v8  ;;  %v13290_v25 = vld [vmem:[#allocation5 + $0x4] ss:$12 sps:$4 sm:$0xff]   ;;  %v13292_v26 = vld [vmem:[#allocation5 + $0x8] ss:$12 sps:$4 sm:$0xff]   ;;  %v13293_v27 = vld [vmem:[#allocation5] ss:$12 sps:$4 sm:$0xff]  }
  0x32   :  { %10975 = vmatprep.mubr.bf16.mxu1 %v81_v21  ;;  %v71_v28 = vld [vmem:[#allocation2 + $0x10] sm:$0xff]  ;;  %v72_v29 = vld [vmem:[#allocation2 + $0x18] sm:$0xff]  ;;  %v73_v30 = vld [vmem:[#allocation2 + $0x20] sm:$0xff]  ;;  %v131_v45 = vsub.s32 2, %v122_v44  ;;  %v123_v47 = vsub.s32 0, %v122_v44  ;;  %v127_v56 = vsub.s32 1, %v122_v44 }
  0x33   :  { %269 = vmatpush1.bf16.msra.mxu0 %v13273_v9  ;;  %v74_v31 = vld [vmem:[#allocation2 + $0x28] sm:$0xff]  ;;  %v82_v32 = vpack.c.bf16 %v72_v29, %v71_v28  ;;  %v75_v34 = vld [vmem:[#allocation2 + $0x30] sm:$0xff]  ;;  %v76_v35 = vld [vmem:[#allocation2 + $0x38] sm:$0xff]  ;;  %vm1950_vm0 = vcmask 64512   ;;  %s14009_s21 = smov 112   ;;  %s14010_s22 = smov 104  }
  0x34   :  { %10964 = vmatpush3.bf16.msra.mxu1 %v13272_v8  ;;  %270 = vmatprep.subr.bf16.mxu0 %v13274_v10  ;;  %v83_v33 = vpack.c.bf16 %v74_v31, %v73_v30  ;;  %v77_v36 = vld [vmem:[#allocation2 + $0x40] sm:$0xff]  ;;  %v78_v37 = vld [vmem:[#allocation2 + $0x48] sm:$0xff]  ;;  %v84_v38 = vpack.c.bf16 %v76_v35, %v75_v34  ;;  %v79_v40 = vld [vmem:[#allocation2 + $0x50] sm:$0xff]  ;;  %s14011_s23 = smov 96   ;;  %s14012_s24 = smov 88   ;;  %vm4831_vm1 = vcmask 195584  }
  0x35   :  { %10965 = vmatprep.subr.bf16.mxu1 %v13276_v11  ;;  %v85_v39 = vpack.c.bf16 %v78_v37, %v77_v36  ;;  %v80_v41 = vld [vmem:[#allocation2 + $0x58] sm:$0xff]  ;;  %v119_v46 = vld [vmem:[%s18656_s2] sm:$0x7]  ;;  %s14008_s2 = smov 120   ;;  %s14013_s25 = smov 80   ;;  %vm6518_vm2 = vcmask 1043456  }
  0x36   :  { %v86_v42 = vpack.c.bf16 %v80_v41, %v79_v40  ;;  %v14086_v48 = vrot.slane %v119_v46, %v131_v45  ;;  %v14088_v51 = vrot.slane %v119_v46, %v123_v47  ;;  %v14111_v6 = vrot.slane %v119_v46, %v127_v56  ;;  %s14014_s26 = smov 72   ;;  %s14015_s27 = smov 56  }
  0x37   :  { %271 = vmatpush1.bf16.msra.mxu0 %v13277_v12  ;;  %s14016_s28 = smov 48   ;;  %s14017_s29 = smov 40   ;;  %vm9789_vm3 = vcmask 130048   ;;  %vm9814_vm4 = vcmask 261120   ;;  %vm9827_vm5 = vcmask 326656   ;;  %vm9840_vm6 = vcmask 392192  }
  0x38   :  { %10966 = vmatpush3.bf16.msra.mxu1 %v13276_v11  ;;  %272 = vmatprep.subr.bf16.mxu0 %v13278_v13  ;;  %s14018_s30 = smov 16   ;;  %s14019_s8 = smov 24   ;;  %vm9853_vm7 = vcmask 457728   ;;  %vm9866_vm8 = vcmask 523264   ;;  %vm9879_vm9 = vcmask 588800   ;;  %vm9892_vm10 = vcmask 654336  }
  0x39   :  { %10967 = vmatprep.subr.bf16.mxu1 %v13280_v14  ;;  %s14020_s9 = smov 32   ;;  %vm9905_vm11 = vcmask 719872   ;;  %vm9979_vm12 = vcmask 785408  }
  0x3b   :  { %273 = vmatpush1.bf16.msra.mxu0 %v13281_v15 }
  0x3c   :  { %10968 = vmatpush3.bf16.msra.mxu1 %v13280_v14  ;;  %274 = vmatprep.subr.bf16.mxu0 %v13282_v16 }
  0x3d   :  { %10969 = vmatprep.subr.bf16.mxu1 %v13284_v17 }
  0x3f   :  { %275 = vmatpush1.bf16.msra.mxu0 %v13285_v20 }
  0x40   :  { %10970 = vmatpush3.bf16.msra.mxu1 %v13284_v17  ;;  %276 = vmatprep.subr.bf16.mxu0 %v13286_v22 }
  0x41   :  { %10971 = vmatprep.subr.bf16.mxu1 %v13288_v23 }
  0x43   :  { %277 = vmatpush1.bf16.msra.mxu0 %v13289_v24 }
  0x44   :  { %10972 = vmatpush3.bf16.msra.mxu1 %v13288_v23  ;;  %278 = vmatprep.subr.bf16.mxu0 %v13290_v25 }
  0x45   :  { %10973 = vmatprep.subr.bf16.mxu1 %v13292_v26 }
  0x47   :  { %279 = vmatpush1.bf16.msra.mxu0 %v13293_v27 }
  0x48   :  { %10974 = vmatpush3.bf16.msra.mxu1 %v13292_v26 }
  0x4a   :  { %297 = vmatmul.mubr.bf16.vlgmr.msra.gmra.mxu0 %v81_v21 }
  0x4b   :  { %10976 = vmatmul.mubr.bf16.vlgmr.msra.gmra.mxu1 %v82_v32  ;;  %306 = vmatprep.mubr.bf16.mxu0 %v14007_v0 }
  0x4c   :  { %10979 = vmatprep.mubr.bf16.mxu1 %v83_v33 }
  0x52   :  { %307 = vmatmul.mubr.bf16.gmra.mxu0 %v82_v32 }
  0x53   :  { %10980 = vmatmul.mubr.bf16.gmra.mxu1 %v84_v38  ;;  %316 = vmatprep.mubr.bf16.mxu0 %v14007_v0 }
  0x54   :  { %10983 = vmatprep.mubr.bf16.mxu1 %v85_v39 }
  0x5a   :  { %317 = vmatmul.mubr.bf16.gmra.mxu0 %v83_v33 }
  0x5b   :  { %10984 = vmatmul.mubr.bf16.gmra.mxu1 %v86_v42  ;;  %326 = vmatprep.mubr.bf16.mxu0 %v14007_v0 }
  0x62   :  { %327 = vmatmul.mubr.bf16.gmra.mxu0 %v84_v38 }
  0x63   :  { %336 = vmatprep.mubr.bf16.mxu0 %v14007_v0 }
  0x6a   :  { %337 = vmatmul.mubr.bf16.gmra.mxu0 %v85_v39 }
  0x6b   :  { %346 = vmatprep.mubr.bf16.mxu0 %v14007_v0 }
  0x72   :  { %347 = vmatmul.mubr.bf16.gmra.mxu0 %v86_v42 }
 0x10a   :  { %v298_v49 = vpop.f32.mrf.mxu0 }
 0x10b   :  { %v10977_v50 = vpop.f32.mrf.mxu1  ;;  %v299_v59 = vadd.f32 %v298_v49, %v14088_v51 }
 0x10c   :  { %v14091_v52 = vadd.f32 %v10977_v50, %v14086_v48  ;;  %v300_v53 = vpop.f32.mrf.mxu0 }
 0x10d   :  { %v391_v54 = vpop.f32.mrf.mxu1  ;;  %v301_v13 = vadd.f32 %v300_v53, %v14111_v6 }
 0x10e   :  { %19017 = vst [vmem:[#allocation12_spill] sm:$0xff] %v14091_v52  ;;  %v14094_v55 = vadd.f32 %v391_v54, %v14086_v48  ;;  %v302_v57 = vpop.f32.mrf.mxu0 }
 0x10f   :  { %v10978_v58 = vpop.f32.mrf.mxu1  ;;  %v303_v60 = vadd.f32 %v302_v57, %v14088_v51 }
 0x110   :  { %v14099_v61 = vadd.f32 %v10978_v58, %v14086_v48  ;;  %v14103_v62 = vpack.i.bf16 %v14094_v55, %v14091_v52  ;;  %v304_v63 = vpop.f32.mrf.mxu0 }
 0x111   :  { %v394_v0 = vpop.f32.mrf.mxu1  ;;  %v14109_v2 = vpack.i.bf16 %v303_v60, %v299_v59  ;;  %v846_v5 = vpack.c.bf16 %v303_v60, %v299_v59  ;;  %v305_v9 = vadd.f32 %v304_v63, %v14111_v6 }
 0x112   :  { %19018 = vst [vmem:[#allocation13_spill] sm:$0xff] %v14099_v61  ;;  %19019 = vst [vmem:[#allocation14_spill] sm:$0xff] %v14103_v62  ;;  %v14107_v1 = vpack.i.bf16 %v14099_v61, %v14091_v52  ;;  %v308_v3 = vpop.f32.mrf.mxu0  ;;  %v14139_v25 = vadd.f32 %v394_v0, %v14086_v48 }
 0x113   :  { %v10981_v4 = vpop.f32.mrf.mxu1  ;;  %11948 = vrot.lane.b32.xlu0 %v14109_v2, %s14008_s2  ;;  %10991 = vmatprep.mubr.msk.bf16.mxu0 %vm1950_vm0, %v846_v5  ;;  %v14122_v14 = vadd.f32 %v308_v3, %v14088_v51  ;;  %v1350_v21 = vpack.c.bf16 %v305_v9, %v301_v13  ;;  %v14161_v37 = vpack.i.bf16 %v305_v9, %v301_v13 }
 0x114   :  { %12003 = vrot.lane.b32.xlu1 %v14107_v1, %s14008_s2  ;;  %v310_v7 = vpop.f32.mrf.mxu0  ;;  %v14147_v30 = vadd.f32 %v10981_v4, %v14086_v48  ;;  %v14180_v49 = vpack.i.bf16 %v14139_v25, %v14094_v55 }
 0x115   :  { %v407_v8 = vpop.f32.mrf.mxu1  ;;  %v311_v10 = vadd.f32 %v310_v7, %v14111_v6  ;;  %v1958_v35 = vsel %vm1950_vm0, %v1350_v21, 0  ;;  %v847_v36 = vpack.c.bf16 %v14122_v14, %v14122_v14 }
 0x116   :  { %v312_v11 = vpop.f32.mrf.mxu0  ;;  %v14151_v33 = vadd.f32 %v407_v8, %v14086_v48 }
 0x117   :  { %v10982_v12 = vpop.f32.mrf.mxu1  ;;  %v313_v15 = vadd.f32 %v312_v11, %v14088_v51  ;;  %11953 = vrot.lane.b32.xlu0 %v14109_v2, %s14009_s21  ;;  %v1351_v16 = vpack.c.bf16 %v311_v10, %v311_v10 }
 0x118   :  { %v314_v17 = vpop.f32.mrf.mxu0  ;;  %19021 = vst [vmem:[#allocation16_spill] sm:$0xff] %v14151_v33  ;;  %v14166_v40 = vadd.f32 %v10982_v12, %v14086_v48 }
 0x119   :  { %v410_v18 = vpop.f32.mrf.mxu1  ;;  %11779 = vmatprep.subr.msk.bf16.mxu0 %vm1950_vm0, %v1351_v16  ;;  %v1961_v19 = vsel %vm1950_vm0, %v1351_v16, 0  ;;  %v14130_v20 = vpack.i.bf16 %v313_v15, %v14122_v14  ;;  %v315_v31 = vadd.f32 %v314_v17, %v14111_v6 }
 0x11a   :  { %v318_v22 = vpop.f32.mrf.mxu0  ;;  %10988 = vmatpush3.bf16.xpose.msra.mxu0 %v1961_v19  ;;  %v14171_v44 = vadd.f32 %v410_v18, %v14086_v48 }
 0x11b   :  { %v14132_v23 = vpop.f32.mrf.mxu1  ;;  %v319_v24 = vadd.f32 %v318_v22, %v14088_v51  ;;  %12073 = vrot.lane.b32.xlu1 %v14130_v20, %s14009_s21  ;;  %11780 = vmatprep.subr.msk.bf16.mxu0 %vm1950_vm0, %v1350_v21  ;;  %v14168_v42 = vpack.i.bf16 %v315_v31, %v311_v10 }
 0x11c   :  { %11958 = vrot.lane.b32.xlu0 %v14109_v2, %s14010_s22  ;;  %v320_v26 = vpop.f32.mrf.mxu0  ;;  %19022 = vst [vmem:[#allocation17_spill] sm:$0xff] %v14171_v44  ;;  %v14231_v17 = vpack.i.bf16 %v14171_v44, %v14151_v33 }
 0x11d   :  { %v423_v27 = vpop.f32.mrf.mxu1  ;;  %v848_v29 = vpack.c.bf16 %v319_v24, %v313_v15  ;;  %v321_v38 = vadd.f32 %v320_v26, %v14111_v6  ;;  %v14226_v15 = vpack.i.bf16 %v14166_v40, %v14147_v30 }
 0x11e   :  { %v14144_v28 = vadd.f32 %v423_v27, %v14086_v48  ;;  %v322_v32 = vpop.f32.mrf.mxu0 }
 0x11f   :  { %10999 = vmatprep.mubr.msk.bf16.mxu1 %vm1950_vm0, %v848_v29  ;;  %12078 = vrot.lane.b32.xlu1 %v14130_v20, %s14010_s22  ;;  %v323_v46 = vadd.f32 %v322_v32, %v14088_v51  ;;  %v1352_v53 = vpack.c.bf16 %v321_v38, %v315_v31  ;;  %19023 = vst [vmem:[#allocation18_spill] sm:$0xff] %v14226_v15  ;;  %v10986_v21 = vpop.f32.mrf.mxu1 }
 0x120   :  { %19020 = vst [vmem:[#allocation15_spill] sm:$0xff] %v14144_v28  ;;  %11963 = vrot.lane.b32.xlu0 %v14109_v2, %s14011_s23  ;;  %v324_v34 = vpop.f32.mrf.mxu0  ;;  %v14240_v26 = vadd.f32 %v10986_v21, %v14086_v48 }
 0x121   :  { %v325_v39 = vadd.f32 %v324_v34, %v14111_v6  ;;  %v14186_v58 = vpack.i.bf16 %v323_v46, %v319_v24  ;;  %v2018_v5 = vsel %vm1950_vm0, %v1352_v53, 0  ;;  %v849_v8 = vpack.c.bf16 %v323_v46, %v323_v46  ;;  %v426_v32 = vpop.f32.mrf.mxu1 }
 0x122   :  { %10990 = vmatpush3.bf16.xpose.msra.mxu0 %v1958_v35  ;;  %v328_v41 = vpop.f32.mrf.mxu0  ;;  %19024 = vst [vmem:[#allocation19_spill] sm:$0xff] %v14240_v26  ;;  %v14250_v35 = vpack.i.bf16 %v14240_v26, %v14166_v40  ;;  %v14273_v46 = vpack.c.bf16 %v14151_v33, %v14099_v61 }
 0x123   :  { %12083 = vrot.lane.b32.xlu1 %v14130_v20, %s14011_s23  ;;  %v1353_v45 = vpack.c.bf16 %v325_v39, %v325_v39  ;;  %v329_v54 = vadd.f32 %v328_v41, %v14088_v51  ;;  %v14207_v11 = vpack.i.bf16 %v325_v39, %v321_v38  ;;  %v14257_v38 = vpack.i.bf16 %v14171_v44, %v14139_v25 }
 0x124   :  { %11968 = vrot.lane.b32.xlu0 %v14109_v2, %s14012_s24  ;;  %v330_v47 = vpop.f32.mrf.mxu0  ;;  %19025 = vst [vmem:[#allocation20_spill] sm:$0xff] %v14250_v35  ;;  %v14266_v39 = vpack.c.bf16 %v14166_v40, %v14147_v30  ;;  %v14269_v41 = vadd.f32 %v426_v32, %v14086_v48  ;;  %19030 = vst [vmem:[#allocation25_spill] sm:$0xff] %v14273_v46 }
 0x125   :  { %11781 = vmatprep.subr.msk.bf16.mxu1 %vm1950_vm0, %v1353_v45  ;;  %v2021_v50 = vsel %vm1950_vm0, %v1353_v45, 0  ;;  %v331_v56 = vadd.f32 %v330_v47, %v14111_v6  ;;  %19026 = vst [vmem:[#allocation21_spill] sm:$0xff] %v14257_v38  ;;  %v14279_v47 = vpack.i.bf16 %v14147_v30, %v14151_v33 }
 0x126   :  { %10996 = vmatpush3.bf16.xpose.msra.mxu1 %v2021_v50  ;;  %v332_v57 = vpop.f32.mrf.mxu0  ;;  %19028 = vst [vmem:[#allocation23_spill] sm:$0xff] %v14266_v39  ;;  %19029 = vst [vmem:[#allocation24_spill] sm:$0xff] %v14269_v41 }
 0x127   :  { %11782 = vmatprep.subr.msk.bf16.mxu1 %vm1950_vm0, %v1352_v53  ;;  %12088 = vrot.lane.b32.xlu1 %v14130_v20, %s14012_s24  ;;  %v333_v59 = vadd.f32 %v332_v57, %v14088_v51  ;;  %19031 = vst [vmem:[#allocation26_spill] sm:$0xff] %v14279_v47  ;;  %v14521_v53 = vpack.i.bf16 %v14269_v41, %v14144_v28 }
 0x128   :  { %11973 = vrot.lane.b32.xlu0 %v14109_v2, %s14013_s25  ;;  %v334_v60 = vpop.f32.mrf.mxu0 }
 0x129   :  { %10992 = vmatmul.mubr.msk.bf16.vlgmr.msra.gmra.mxu0 %vm1950_vm0, %v847_v36  ;;  %v335_v63 = vadd.f32 %v334_v60, %v14111_v6  ;;  %v850_v0 = vpack.c.bf16 %v333_v59, %v329_v54  ;;  %v14196_v3 = vpack.i.bf16 %v333_v59, %v329_v54 }
 0x12a   :  { %v338_v4 = vpop.f32.mrf.mxu0 }
 0x12b   :  { %12093 = vrot.lane.b32.xlu1 %v14130_v20, %s14013_s25  ;;  %11007 = vmatprep.mubr.msk.bf16.mxu0 %vm1950_vm0, %v850_v0  ;;  %v1354_v10 = vpack.c.bf16 %v335_v63, %v331_v56  ;;  %v14209_v12 = vpack.i.bf16 %v335_v63, %v331_v56  ;;  %v339_v22 = vadd.f32 %v338_v4, %v14088_v51 }
 0x12c   :  { %11978 = vrot.lane.b32.xlu0 %v14109_v2, %s14014_s26  ;;  %v340_v7 = vpop.f32.mrf.mxu0 }
 0x12d   :  { %v14205_v9 = vadd.f32 %v340_v7, %v14111_v6  ;;  %v2078_v18 = vsel %vm1950_vm0, %v1354_v10, 0  ;;  %v851_v29 = vpack.c.bf16 %v339_v22, %v339_v22 }
 0x12e   :  { %10998 = vmatpush3.bf16.xpose.msra.mxu1 %v2018_v5  ;;  %v342_v16 = vpop.f32.mrf.mxu0  ;;  %v14351_v5 = vadd.f32 %v14132_v23, %v14086_v48 }
 0x12f   :  { %12098 = vrot.lane.b32.xlu1 %v14130_v20, %s14014_s26  ;;  %v1355_v13 = vpack.c.bf16 %v14205_v9, %v14205_v9  ;;  %v343_v54 = vadd.f32 %v342_v16, %v14088_v51 }
 0x130   :  { %11983 = vrot.lane.b32.xlu0 %v14109_v2, %s14005_s17  ;;  %v344_v19 = vpop.f32.mrf.mxu0  ;;  %19032 = vst [vmem:[#allocation27_spill] sm:$0xff] %v14351_v5 }
 0x131   :  { %11783 = vmatprep.subr.msk.bf16.mxu0 %vm1950_vm0, %v1355_v13  ;;  %v2081_v14 = vsel %vm1950_vm0, %v1355_v13, 0  ;;  %v14309_v63 = vpack.i.bf16 %v343_v54, %v339_v22 }
 0x132   :  { %11004 = vmatpush3.bf16.xpose.msra.mxu0 %v2081_v14  ;;  %v348_v24 = vpop.f32.mrf.mxu0 }
 0x133   :  { %12103 = vrot.lane.b32.xlu1 %v14130_v20, %s14005_s17  ;;  %11784 = vmatprep.subr.msk.bf16.mxu0 %vm1950_vm0, %v1354_v10  ;;  %v349_v56 = vadd.f32 %v348_v24, %v14088_v51 }
 0x134   :  { %11988 = vrot.lane.b32.xlu0 %v14109_v2, %s14015_s27  ;;  %v350_v27 = vpop.f32.mrf.mxu0 }
 0x135   :  { %11000 = vmatmul.mubr.msk.bf16.vlgmr.msra.gmra.mxu1 %vm1950_vm0, %v849_v8  ;;  %v852_v60 = vpack.c.bf16 %v349_v56, %v343_v54 }
 0x136   :  { %v352_v31 = vpop.f32.mrf.mxu0 }
 0x137   :  { %12108 = vrot.lane.b32.xlu1 %v14130_v20, %s14015_s27  ;;  %v353_v57 = vadd.f32 %v352_v31, %v14088_v51  ;;  %11015 = vmatprep.mubr.msk.bf16.mxu1 %vm1950_vm0, %v852_v60 }
 0x138   :  { %11993 = vrot.lane.b32.xlu0 %v14109_v2, %s14016_s28  ;;  %v354_v34 = vpop.f32.mrf.mxu0 }
 0x139   :  { %v355_v36 = vadd.f32 %v354_v34, %v14111_v6  ;;  %v853_v0 = vpack.c.bf16 %v353_v57, %v353_v57  ;;  %v14324_v51 = vpack.i.bf16 %v353_v57, %v349_v56 }
 0x13a   :  { %11006 = vmatpush3.bf16.xpose.msra.mxu0 %v2078_v18 }
 0x13b   :  { %12113 = vrot.lane.b32.xlu1 %v14130_v20, %s14016_s28  ;;  %v1357_v45 = vpack.c.bf16 %v355_v36, %v355_v36 }
 0x13c   :  { %11998 = vrot.lane.b32.xlu0 %v14109_v2, %s14017_s29  ;;  %v14262_v2 = vpack.c.bf16 %v14139_v25, %v14094_v55  ;;  %v345_v55 = vadd.f32 %v344_v19, %v14111_v6  ;;  %v351_v25 = vadd.f32 %v350_v27, %v14111_v6 }
 0x13d   :  { %11785 = vmatprep.subr.msk.bf16.mxu1 %vm1950_vm0, %v1357_v45  ;;  %v2141_v40 = vsel %vm1950_vm0, %v1357_v45, 0 }
 0x13e   :  { %19027 = vst [vmem:[#allocation22_spill] sm:$0xff] %v14262_v2  ;;  %11012 = vmatpush3.bf16.xpose.msra.mxu1 %v2141_v40  ;;  %v1356_v6 = vpack.c.bf16 %v351_v25, %v345_v55  ;;  %v14343_v4 = vpack.i.bf16 %v345_v55, %v14205_v9 }
 0x13f   :  { %12118 = vrot.lane.b32.xlu1 %v14130_v20, %s14017_s29 }
 0x140   :  { %12008 = vrot.lane.b32.xlu0 %v14161_v37, %s14008_s2  ;;  %11786 = vmatprep.subr.msk.bf16.mxu1 %vm1950_vm0, %v1356_v6  ;;  %v2138_v59 = vsel %vm1950_vm0, %v1356_v6, 0 }
 0x141   :  { %11008 = vmatmul.mubr.msk.bf16.vlgmr.msra.gmra.mxu0 %vm1950_vm0, %v851_v29 }
 0x143   :  { %12123 = vrot.lane.b32.xlu1 %v14226_v15, %s14008_s2 }
 0x144   :  { %12013 = vrot.lane.b32.xlu0 %v14161_v37, %s14009_s21 }
 0x146   :  { %11014 = vmatpush3.bf16.xpose.msra.mxu1 %v2138_v59 }
 0x147   :  { %12128 = vrot.lane.b32.xlu1 %v14168_v42, %s14008_s2 }
 0x148   :  { %12018 = vrot.lane.b32.xlu0 %v14161_v37, %s14010_s22 }
 0x14b   :  { %12133 = vrot.lane.b32.xlu1 %v14168_v42, %s14009_s21 }
 0x14c   :  { %12023 = vrot.lane.b32.xlu0 %v14161_v37, %s14011_s23 }
 0x14d   :  { %11016 = vmatmul.mubr.msk.bf16.vlgmr.msra.gmra.mxu1 %vm1950_vm0, %v853_v0 }
 0x14f   :  { %12138 = vrot.lane.b32.xlu1 %v14168_v42, %s14010_s22 }
 0x150   :  { %12028 = vrot.lane.b32.xlu0 %v14161_v37, %s14012_s24 }
 0x153   :  { %12143 = vrot.lane.b32.xlu1 %v14168_v42, %s14011_s23 }
 0x154   :  { %12033 = vrot.lane.b32.xlu0 %v14161_v37, %s14013_s25 }
 0x157   :  { %12148 = vrot.lane.b32.xlu1 %v14168_v42, %s14012_s24 }
 0x158   :  { %12038 = vrot.lane.b32.xlu0 %v14161_v37, %s14014_s26 }
 0x15b   :  { %12153 = vrot.lane.b32.xlu1 %v14168_v42, %s14013_s25 }
 0x15c   :  { %12043 = vrot.lane.b32.xlu0 %v14161_v37, %s14005_s17 }
 0x15f   :  { %12158 = vrot.lane.b32.xlu1 %v14168_v42, %s14014_s26 }
 0x160   :  { %12048 = vrot.lane.b32.xlu0 %v14161_v37, %s14015_s27 }
 0x163   :  { %12163 = vrot.lane.b32.xlu1 %v14168_v42, %s14005_s17 }
 0x164   :  { %12053 = vrot.lane.b32.xlu0 %v14161_v37, %s14016_s28 }
 0x167   :  { %12168 = vrot.lane.b32.xlu1 %v14168_v42, %s14015_s27 }
 0x168   :  { %12058 = vrot.lane.b32.xlu0 %v14161_v37, %s14017_s29  ;;  %v14359_v37 = vpack.i.bf16 %v14240_v26, %v14351_v5 }
 0x16b   :  { %12173 = vrot.lane.b32.xlu1 %v14168_v42, %s14016_s28 }
 0x16c   :  { %12063 = vrot.lane.b32.xlu0 %v14180_v49, %s14008_s2 }
 0x16f   :  { %12178 = vrot.lane.b32.xlu1 %v14168_v42, %s14017_s29 }
 0x170   :  { %12068 = vrot.lane.b32.xlu0 %v14130_v20, %s14008_s2  ;;  %v14365_v20 = vpack.i.bf16 %v355_v36, %v351_v25 }
 0x173   :  { %12188 = vrot.lane.b32.xlu1 %v14186_v58, %s14008_s2 }
 0x174   :  { %12183 = vrot.lane.b32.xlu0 %v14231_v17, %s14008_s2 }
 0x177   :  { %12243 = vrot.lane.b32.xlu1 %v14359_v37, %s14008_s2 }
 0x178   :  { %12193 = vrot.lane.b32.xlu0 %v14186_v58, %s14009_s21 }
 0x17b   :  { %12308 = vrot.lane.b32.xlu1 %v14196_v3, %s14008_s2 }
 0x17c   :  { %12198 = vrot.lane.b32.xlu0 %v14186_v58, %s14010_s22 }
 0x17f   :  { %12313 = vrot.lane.b32.xlu1 %v14196_v3, %s14009_s21 }
 0x180   :  { %12203 = vrot.lane.b32.xlu0 %v14186_v58, %s14011_s23 }
 0x183   :  { %12318 = vrot.lane.b32.xlu1 %v14196_v3, %s14010_s22 }
 0x184   :  { %12208 = vrot.lane.b32.xlu0 %v14186_v58, %s14012_s24 }
 0x185   :  { %v11949_v48 = vpop.permute.xlu0 %11948 }
 0x186   :  { %v11951_v23 = vunpack.i.h.bf16 %v11949_v48  ;;  %v11950_v42 = vunpack.i.l.bf16 %v11949_v48  ;;  %v14383_v8 = vpop.permute.xlu1 %12003 }
 0x187   :  { %12323 = vrot.lane.b32.xlu1 %v14196_v3, %s14011_s23  ;;  %19033 = vst [vmem:[#allocation28_spill] sm:$0xff] %v14383_v8 }
 0x188   :  { %v854_v7 = vpack.c.bf16 %v11951_v23, %v11950_v42  ;;  %12213 = vrot.lane.b32.xlu0 %v14186_v58, %s14013_s25 }
 0x189   :  { %v14385_v9 = vpop.permute.xlu0 %11953 }
 0x18a   :  { %11023 = vmatprep.mubr.msk.bf16.mxu0 %vm1950_vm0, %v854_v7 }
 0x18b   :  { %12328 = vrot.lane.b32.xlu1 %v14196_v3, %s14012_s24 }
 0x18c   :  { %12218 = vrot.lane.b32.xlu0 %v14186_v58, %s14014_s26 }
 0x18d   :  { %v14392_v10 = vpop.permute.xlu1 %12073 }
 0x18e   :  { %v14394_v13 = vpop.permute.xlu0 %11958 }
 0x18f   :  { %12333 = vrot.lane.b32.xlu1 %v14196_v3, %s14013_s25 }
 0x190   :  { %12223 = vrot.lane.b32.xlu0 %v14186_v58, %s14005_s17 }
 0x191   :  { %v14400_v14 = vpop.permute.xlu1 %12078 }
 0x192   :  { %v14402_v16 = vpop.permute.xlu0 %11963 }
 0x193   :  { %12338 = vrot.lane.b32.xlu1 %v14196_v3, %s14014_s26 }
 0x194   :  { %12228 = vrot.lane.b32.xlu0 %v14186_v58, %s14015_s27 }
 0x195   :  { %v14408_v18 = vpop.permute.xlu1 %12083 }
 0x196   :  { %v14410_v19 = vpop.permute.xlu0 %11968 }
 0x197   :  { %19034 = vst [vmem:[#allocation29_spill] sm:$0xff] %v14410_v19  ;;  %12343 = vrot.lane.b32.xlu1 %v14196_v3, %s14005_s17 }
 0x198   :  { %12233 = vrot.lane.b32.xlu0 %v14186_v58, %s14016_s28 }
 0x199   :  { %v14416_v21 = vpop.permute.xlu1 %12088 }
 0x19a   :  { %19035 = vst [vmem:[#allocation30_spill] sm:$0xff] %v14416_v21  ;;  %v14418_v22 = vpop.permute.xlu0 %11973 }
 0x19b   :  { %19036 = vst [vmem:[#allocation31_spill] sm:$0xff] %v14418_v22  ;;  %12348 = vrot.lane.b32.xlu1 %v14196_v3, %s14015_s27 }
 0x19c   :  { %12238 = vrot.lane.b32.xlu0 %v14186_v58, %s14017_s29 }
 0x19d   :  { %v14424_v24 = vpop.permute.xlu1 %12093 }
 0x19e   :  { %19037 = vst [vmem:[#allocation32_spill] sm:$0xff] %v14424_v24  ;;  %v14426_v27 = vpop.permute.xlu0 %11978 }
 0x19f   :  { %19038 = vst [vmem:[#allocation33_spill] sm:$0xff] %v14426_v27  ;;  %12353 = vrot.lane.b32.xlu1 %v14196_v3, %s14016_s28 }
 0x1a0   :  { %12248 = vrot.lane.b32.xlu0 %v14207_v11, %s14008_s2 }
 0x1a1   :  { %v14432_v29 = vpop.permute.xlu1 %12098 }
 0x1a2   :  { %19039 = vst [vmem:[#allocation34_spill] sm:$0xff] %v14432_v29  ;;  %v14434_v31 = vpop.permute.xlu0 %11983 }
 0x1a3   :  { %19040 = vst [vmem:[#allocation35_spill] sm:$0xff] %v14434_v31  ;;  %12358 = vrot.lane.b32.xlu1 %v14196_v3, %s14017_s29 }
 0x1a4   :  { %12253 = vrot.lane.b32.xlu0 %v14207_v11, %s14009_s21 }
 0x1a5   :  { %v14440_v58 = vpop.permute.xlu1 %12103 }
 0x1a6   :  { %19041 = vst [vmem:[#allocation36_spill] sm:$0xff] %v14440_v58  ;;  %v14442_v32 = vpop.permute.xlu0 %11988 }
 0x1a7   :  { %19042 = vst [vmem:[#allocation37_spill] sm:$0xff] %v14442_v32  ;;  %12363 = vrot.lane.b32.xlu1 %v14209_v12, %s14008_s2 }
 0x1a8   :  { %12258 = vrot.lane.b32.xlu0 %v14207_v11, %s14010_s22 }
 0x1a9   :  { %v14448_v34 = vpop.permute.xlu1 %12108 }
 0x1aa   :  { %19043 = vst [vmem:[#allocation38_spill] sm:$0xff] %v14448_v34  ;;  %v14450_v36 = vpop.permute.xlu0 %11993 }
 0x1ab   :  { %19044 = vst [vmem:[#allocation39_spill] sm:$0xff] %v14450_v36  ;;  %12368 = vrot.lane.b32.xlu1 %v14209_v12, %s14009_s21 }
 0x1ac   :  { %12263 = vrot.lane.b32.xlu0 %v14207_v11, %s14011_s23 }
 0x1ad   :  { %v14456_v3 = vpop.permute.xlu1 %12113 }
 0x1ae   :  { %19045 = vst [vmem:[#allocation40_spill] sm:$0xff] %v14456_v3  ;;  %v14458_v45 = vpop.permute.xlu0 %11998 }
 0x1af   :  { %19046 = vst [vmem:[#allocation41_spill] sm:$0xff] %v14458_v45  ;;  %12373 = vrot.lane.b32.xlu1 %v14209_v12, %s14010_s22 }
 0x1b0   :  { %12268 = vrot.lane.b32.xlu0 %v14207_v11, %s14012_s24 }
 0x1b1   :  { %v14464_v55 = vpop.permute.xlu1 %12118 }
 0x1b2   :  { %19047 = vst [vmem:[#allocation42_spill] sm:$0xff] %v14464_v55  ;;  %v12009_v25 = vpop.permute.xlu0 %12008 }
 0x1b3   :  { %12378 = vrot.lane.b32.xlu1 %v14209_v12, %s14011_s23  ;;  %v12011_v6 = vunpack.i.h.bf16 %v12009_v25  ;;  %v12010_v57 = vunpack.i.l.bf16 %v12009_v25 }
 0x1b4   :  { %12273 = vrot.lane.b32.xlu0 %v14207_v11, %s14013_s25 }
 0x1b5   :  { %v14470_v40 = vpop.permute.xlu1 %12123  ;;  %v1358_v23 = vpack.c.bf16 %v12011_v6, %v12010_v57 }
 0x1b6   :  { %19048 = vst [vmem:[#allocation43_spill] sm:$0xff] %v14470_v40  ;;  %v14472_v54 = vpop.permute.xlu0 %12013 }
 0x1b7   :  { %12383 = vrot.lane.b32.xlu1 %v14209_v12, %s14012_s24 }
 0x1b8   :  { %12278 = vrot.lane.b32.xlu0 %v14207_v11, %s14014_s26 }
 0x1b9   :  { %v14478_v56 = vpop.permute.xlu1 %12128 }
 0x1ba   :  { %v12130_v59 = vunpack.i.l.bf16 %v14478_v56  ;;  %v14481_v60 = vpop.permute.xlu0 %12018 }
 0x1bb   :  { %12388 = vrot.lane.b32.xlu1 %v14209_v12, %s14013_s25 }
 0x1bc   :  { %v1359_v0 = vpack.c.bf16 %v12130_v59, %v12130_v59  ;;  %12283 = vrot.lane.b32.xlu0 %v14207_v11, %s14005_s17 }
 0x1bd   :  { %v14487_v48 = vpop.permute.xlu1 %12133 }
 0x1be   :  { %v14489_v42 = vpop.permute.xlu0 %12023  ;;  %11787 = vmatprep.subr.msk.bf16.mxu0 %vm1950_vm0, %v1359_v0  ;;  %v2201_v7 = vsel %vm1950_vm0, %v1359_v0, 0  ;;  %v2198_v0 = vsel %vm1950_vm0, %v1358_v23, 0 }
 0x1bf   :  { %12393 = vrot.lane.b32.xlu1 %v14209_v12, %s14014_s26  ;;  %11020 = vmatpush3.bf16.xpose.msra.mxu0 %v2201_v7 }
 0x1c0   :  { %12288 = vrot.lane.b32.xlu0 %v14207_v11, %s14015_s27  ;;  %11788 = vmatprep.subr.msk.bf16.mxu0 %vm1950_vm0, %v1358_v23 }
 0x1c1   :  { %v14498_v25 = vpop.permute.xlu1 %12138 }
 0x1c2   :  { %v14500_v59 = vpop.permute.xlu0 %12028 }
 0x1c3   :  { %19049 = vst [vmem:[#allocation44_spill] sm:$0xff] %v14500_v59  ;;  %12398 = vrot.lane.b32.xlu1 %v14209_v12, %s14005_s17 }
 0x1c4   :  { %12293 = vrot.lane.b32.xlu0 %v14207_v11, %s14016_s28 }
 0x1c5   :  { %v14506_v6 = vpop.permute.xlu1 %12143 }
 0x1c6   :  { %v14508_v57 = vpop.permute.xlu0 %12033 }
 0x1c7   :  { %19050 = vst [vmem:[#allocation45_spill] sm:$0xff] %v14508_v57  ;;  %12403 = vrot.lane.b32.xlu1 %v14209_v12, %s14015_s27  ;;  %11022 = vmatpush3.bf16.xpose.msra.mxu0 %v2198_v0 }
 0x1c8   :  { %12298 = vrot.lane.b32.xlu0 %v14207_v11, %s14017_s29 }
 0x1c9   :  { %v14515_v7 = vpop.permute.xlu1 %12148 }
 0x1ca   :  { %v14517_v43 = vpop.permute.xlu0 %12038 }
 0x1cb   :  { %19051 = vst [vmem:[#allocation46_spill] sm:$0xff] %v14517_v43  ;;  %12408 = vrot.lane.b32.xlu1 %v14209_v12, %s14016_s28 }
 0x1cc   :  { %12303 = vrot.lane.b32.xlu0 %v14521_v53, %s14008_s2 }
 0x1cd   :  { %v14527_v23 = vpop.permute.xlu1 %12153 }
 0x1ce   :  { %19052 = vst [vmem:[#allocation47_spill] sm:$0xff] %v14527_v23  ;;  %v14529_v0 = vpop.permute.xlu0 %12043 }
 0x1cf   :  { %19053 = vst [vmem:[#allocation48_spill] sm:$0xff] %v14529_v0  ;;  %12413 = vrot.lane.b32.xlu1 %v14209_v12, %s14017_s29 }
 0x1d0   :  { %12418 = vrot.lane.b32.xlu0 %v14309_v63, %s14008_s2 }
 0x1d1   :  { %v14535_v11 = vpop.permute.xlu1 %12158 }
 0x1d2   :  { %19054 = vst [vmem:[#allocation49_spill] sm:$0xff] %v14535_v11  ;;  %v14537_v50 = vpop.permute.xlu0 %12048 }
 0x1d3   :  { %19055 = vst [vmem:[#allocation50_spill] sm:$0xff] %v14537_v50  ;;  %12533 = vrot.lane.b32.xlu1 %v14107_v1, %s14009_s21 }
 0x1d4   :  { %12423 = vrot.lane.b32.xlu0 %v14309_v63, %s14009_s21 }
 0x1d5   :  { %v14543_v33 = vpop.permute.xlu1 %12163 }
 0x1d6   :  { %19056 = vst [vmem:[#allocation51_spill] sm:$0xff] %v14543_v33  ;;  %v14545_v47 = vpop.permute.xlu0 %12053 }
 0x1d7   :  { %19057 = vst [vmem:[#allocation52_spill] sm:$0xff] %v14545_v47  ;;  %12543 = vrot.lane.b32.xlu1 %v14226_v15, %s14009_s21 }
 0x1d8   :  { %12428 = vrot.lane.b32.xlu0 %v14309_v63, %s14010_s22 }
 0x1d9   :  { %v14551_v12 = vpop.permute.xlu1 %12168 }
 0x1da   :  { %19058 = vst [vmem:[#allocation53_spill] sm:$0xff] %v14551_v12  ;;  %v14553_v40 = vpop.permute.xlu0 %12058 }
 0x1db   :  { %19059 = vst [vmem:[#allocation54_spill] sm:$0xff] %v14553_v40  ;;  %12553 = vrot.lane.b32.xlu1 %v14324_v51, %s14008_s2 }
 0x1dc   :  { %12433 = vrot.lane.b32.xlu0 %v14309_v63, %s14011_s23 }
 0x1dd   :  { %v14559_v26 = vpop.permute.xlu1 %12173 }
 0x1de   :  { %19060 = vst [vmem:[#allocation55_spill] sm:$0xff] %v14559_v26  ;;  %v14561_v46 = vpop.permute.xlu0 %12063 }
 0x1df   :  { %19061 = vst [vmem:[#allocation56_spill] sm:$0xff] %v14561_v46  ;;  %12558 = vrot.lane.b32.xlu1 %v14324_v51, %s14009_s21 }
 0x1e0   :  { %12438 = vrot.lane.b32.xlu0 %v14309_v63, %s14012_s24 }
 0x1e1   :  { %v14567_v39 = vpop.permute.xlu1 %12178 }
 0x1e2   :  { %19062 = vst [vmem:[#allocation57_spill] sm:$0xff] %v14567_v39  ;;  %v12069_v8 = vpop.permute.xlu0 %12068 }
 0x1e3   :  { %v12070_v44 = vunpack.i.l.bf16 %v12069_v8  ;;  %12563 = vrot.lane.b32.xlu1 %v14324_v51, %s14010_s22  ;;  %v12071_v46 = vunpack.i.h.bf16 %v12069_v8 }
 0x1e4   :  { %12443 = vrot.lane.b32.xlu0 %v14309_v63, %s14013_s25 }
 0x1e5   :  { %v855_v2 = vpack.c.bf16 %v12070_v44, %v12070_v44  ;;  %v14573_v52 = vpop.permute.xlu1 %12188 }
 0x1e6   :  { %v12190_v55 = vunpack.i.l.bf16 %v14573_v52  ;;  %v14576_v40 = vpop.permute.xlu0 %12183 }
 0x1e7   :  { %19063 = vst [vmem:[#allocation58_spill] sm:$0xff] %v14576_v40  ;;  %11024 = vmatmul.mubr.msk.bf16.vlgmr.msra.gmra.mxu0 %vm1950_vm0, %v855_v2  ;;  %12568 = vrot.lane.b32.xlu1 %v14324_v51, %s14011_s23 }
 0x1e8   :  { %v856_v45 = vpack.c.bf16 %v12190_v55, %v12071_v46  ;;  %12448 = vrot.lane.b32.xlu0 %v14309_v63, %s14014_s26 }
 0x1e9   :  { %v14583_v39 = vpop.permute.xlu1 %12243  ;;  %v14585_v3 = vpop.f32.mrf.mxu0 }
 0x1ea   :  { %19064 = vst [vmem:[#allocation59_spill] sm:$0xff] %v14583_v39  ;;  %v14587_v44 = vpop.permute.xlu0 %12193  ;;  %11031 = vmatprep.mubr.msk.bf16.mxu1 %vm1950_vm0, %v856_v45 }
 0x1eb   :  { %12573 = vrot.lane.b32.xlu1 %v14324_v51, %s14012_s24  ;;  %v14592_v8 = vpop.f32.mrf.mxu0 }
 0x1ec   :  { %12453 = vrot.lane.b32.xlu0 %v14309_v63, %s14005_s17 }
 0x1ed   :  { %v12309_v2 = vpop.permute.xlu1 %12308  ;;  %v10994_v46 = vpop.f32.mrf.mxu0 }
 0x1ee   :  { %v12311_v55 = vunpack.i.h.bf16 %v12309_v2  ;;  %v12310_v40 = vunpack.i.l.bf16 %v12309_v2  ;;  %v14596_v47 = vpop.permute.xlu0 %12198 }
 0x1ef   :  { %12578 = vrot.lane.b32.xlu1 %v14324_v51, %s14013_s25  ;;  %v14651_v0 = vpop.f32.mrf.mxu0 }
 0x1f0   :  { %v858_v39 = vpack.c.bf16 %v12311_v55, %v12310_v40  ;;  %12458 = vrot.lane.b32.xlu0 %v14309_v63, %s14015_s27 }
 0x1f1   :  { %v14602_v45 = vpop.permute.xlu1 %12313 }
 0x1f2   :  { %v14604_v36 = vpop.permute.xlu0 %12203  ;;  %11039 = vmatprep.mubr.msk.bf16.mxu0 %vm1950_vm0, %v858_v39 }
 0x1f3   :  { %12583 = vrot.lane.b32.xlu1 %v14324_v51, %s14014_s26 }
 0x1f4   :  { %12463 = vrot.lane.b32.xlu0 %v14309_v63, %s14016_s28 }
 0x1f5   :  { %v14611_v2 = vpop.permute.xlu1 %12318  ;;  %v14613_v46 = vpop.f32.mrf.mxu1 }
 0x1f6   :  { %v14615_v40 = vpop.permute.xlu0 %12208 }
 0x1f7   :  { %19065 = vst [vmem:[#allocation60_spill] sm:$0xff] %v14615_v40  ;;  %12588 = vrot.lane.b32.xlu1 %v14324_v51, %s14005_s17  ;;  %v14619_v55 = vpop.f32.mrf.mxu1 }
 0x1f8   :  { %12468 = vrot.lane.b32.xlu0 %v14309_v63, %s14017_s29 }
 0x1f9   :  { %v14623_v39 = vpop.permute.xlu1 %12323  ;;  %v11002_v26 = vpop.f32.mrf.mxu1 }
 0x1fa   :  { %v14625_v34 = vpop.permute.xlu0 %12213 }
 0x1fb   :  { %19066 = vst [vmem:[#allocation61_spill] sm:$0xff] %v14625_v34  ;;  %12593 = vrot.lane.b32.xlu1 %v14324_v51, %s14015_s27  ;;  %v14681_v27 = vpop.f32.mrf.mxu1 }
 0x1fc   :  { %12473 = vrot.lane.b32.xlu0 %v14343_v4, %s14008_s2 }
 0x1fd   :  { %v14631_v50 = vpop.permute.xlu1 %12328 }
 0x1fe   :  { %19067 = vst [vmem:[#allocation62_spill] sm:$0xff] %v14631_v50  ;;  %v14633_v32 = vpop.permute.xlu0 %12218 }
 0x1ff   :  { %19068 = vst [vmem:[#allocation63_spill] sm:$0xff] %v14633_v32  ;;  %12598 = vrot.lane.b32.xlu1 %v14324_v51, %s14016_s28 }
 0x200   :  { %12478 = vrot.lane.b32.xlu0 %v14343_v4, %s14009_s21 }
 0x201   :  { %v14639_v63 = vpop.permute.xlu1 %12333 }
 0x202   :  { %19069 = vst [vmem:[#allocation64_spill] sm:$0xff] %v14639_v63  ;;  %v14641_v26 = vpop.permute.xlu0 %12223 }
 0x203   :  { %19070 = vst [vmem:[#allocation65_spill] sm:$0xff] %v14641_v26  ;;  %12603 = vrot.lane.b32.xlu1 %v14324_v51, %s14017_s29  ;;  %v14659_v26 = vpop.f32.mrf.mxu0 }
 0x204   :  { %12483 = vrot.lane.b32.xlu0 %v14343_v4, %s14010_s22 }
 0x205   :  { %v14647_v12 = vpop.permute.xlu1 %12338  ;;  %v14665_v33 = vpop.f32.mrf.mxu0 }
 0x206   :  { %19071 = vst [vmem:[#allocation66_spill] sm:$0xff] %v14647_v12  ;;  %v14649_v58 = vpop.permute.xlu0 %12228 }
 0x207   :  { %19072 = vst [vmem:[#allocation67_spill] sm:$0xff] %v14649_v58  ;;  %12608 = vrot.lane.b32.xlu1 %v14365_v20, %s14008_s2  ;;  %v11010_v12 = vpop.f32.mrf.mxu0 }
 0x208   :  { %12488 = vrot.lane.b32.xlu0 %v14343_v4, %s14011_s23  ;;  %v12131_v12 = vunpack.i.h.bf16 %v14478_v56 }
 0x209   :  { %v14657_v31 = vpop.permute.xlu1 %12343 }
 0x20a   :  { %19073 = vst [vmem:[#allocation68_spill] sm:$0xff] %v14657_v31  ;;  %v14661_v51 = vpop.permute.xlu0 %12233 }
 0x20b   :  { %19074 = vst [vmem:[#allocation69_spill] sm:$0xff] %v14661_v51  ;;  %12613 = vrot.lane.b32.xlu1 %v14365_v20, %s14009_s21 }
 0x20c   :  { %12493 = vrot.lane.b32.xlu0 %v14343_v4, %s14012_s24 }
 0x20d   :  { %v14669_v58 = vpop.permute.xlu1 %12348  ;;  %v14688_v11 = vpop.f32.mrf.mxu1 }
 0x20e   :  { %19075 = vst [vmem:[#allocation70_spill] sm:$0xff] %v14669_v58  ;;  %v14671_v29 = vpop.permute.xlu0 %12238 }
 0x20f   :  { %19076 = vst [vmem:[#allocation71_spill] sm:$0xff] %v14671_v29  ;;  %12618 = vrot.lane.b32.xlu1 %v14365_v20, %s14010_s22  ;;  %v14696_v24 = vpop.f32.mrf.mxu1 }
 0x210   :  { %12498 = vrot.lane.b32.xlu0 %v14343_v4, %s14013_s25 }
 0x211   :  { %v14677_v51 = vpop.permute.xlu1 %12353  ;;  %v11018_v56 = vpop.f32.mrf.mxu1 }
 0x212   :  { %19077 = vst [vmem:[#allocation72_spill] sm:$0xff] %v14677_v51  ;;  %v12249_v31 = vpop.permute.xlu0 %12248 }
 0x213   :  { %v12251_v32 = vunpack.i.h.bf16 %v12249_v31  ;;  %v12250_v43 = vunpack.i.l.bf16 %v12249_v31  ;;  %12623 = vrot.lane.b32.xlu1 %v14365_v20, %s14011_s23 }
 0x214   :  { %12503 = vrot.lane.b32.xlu0 %v14343_v4, %s14014_s26 }
 0x215   :  { %v1361_v29 = vpack.c.bf16 %v12251_v32, %v12251_v32  ;;  %v14686_v58 = vpop.permute.xlu1 %12358  ;;  %v1360_v51 = vpack.c.bf16 %v12250_v43, %v12131_v12 }
 0x216   :  { %19078 = vst [vmem:[#allocation73_spill] sm:$0xff] %v14686_v58  ;;  %v14690_v63 = vpop.permute.xlu0 %12253 }
 0x217   :  { %11789 = vmatprep.subr.msk.bf16.mxu1 %vm1950_vm0, %v1361_v29  ;;  %12628 = vrot.lane.b32.xlu1 %v14365_v20, %s14012_s24  ;;  %v2261_v31 = vsel %vm1950_vm0, %v1361_v29, 0  ;;  %v2258_v12 = vsel %vm1950_vm0, %v1360_v51, 0 }
 0x218   :  { %12508 = vrot.lane.b32.xlu0 %v14343_v4, %s14005_s17  ;;  %11028 = vmatpush3.bf16.xpose.msra.mxu1 %v2261_v31  ;;  %v12191_v31 = vunpack.i.h.bf16 %v14573_v52 }
 0x219   :  { %11790 = vmatprep.subr.msk.bf16.mxu1 %vm1950_vm0, %v1360_v51  ;;  %v14701_v32 = vpop.permute.xlu1 %12363 }
 0x21a   :  { %v14703_v58 = vpop.permute.xlu0 %12258  ;;  %v857_v57 = vpack.c.bf16 %v12191_v31, %v12191_v31  ;;  %v12365_v19 = vunpack.i.l.bf16 %v14701_v32 }
 0x21b   :  { %12633 = vrot.lane.b32.xlu1 %v14365_v20, %s14013_s25 }
 0x21c   :  { %12513 = vrot.lane.b32.xlu0 %v14343_v4, %s14015_s27 }
 0x21d   :  { %v14709_v43 = vpop.permute.xlu1 %12368 }
 0x21e   :  { %v14711_v29 = vpop.permute.xlu0 %12263 }
 0x21f   :  { %12638 = vrot.lane.b32.xlu1 %v14365_v20, %s14014_s26 }
 0x220   :  { %12518 = vrot.lane.b32.xlu0 %v14343_v4, %s14016_s28  ;;  %11030 = vmatpush3.bf16.xpose.msra.mxu1 %v2258_v12 }
 0x221   :  { %v14719_v56 = vpop.permute.xlu1 %12373 }
 0x222   :  { %v14721_v34 = vpop.permute.xlu0 %12268 }
 0x223   :  { %19079 = vst [vmem:[#allocation74_spill] sm:$0xff] %v14721_v34  ;;  %12643 = vrot.lane.b32.xlu1 %v14365_v20, %s14005_s17 }
 0x224   :  { %12523 = vrot.lane.b32.xlu0 %v14343_v4, %s14017_s29 }
 0x225   :  { %v14727_v22 = vpop.permute.xlu1 %12378 }
 0x226   :  { %v14729_v51 = vpop.permute.xlu0 %12273 }
 0x227   :  { %19080 = vst [vmem:[#allocation75_spill] sm:$0xff] %v14729_v51  ;;  %11032 = vmatmul.mubr.msk.bf16.vlgmr.msra.gmra.mxu1 %vm1950_vm0, %v857_v57  ;;  %12648 = vrot.lane.b32.xlu1 %v14365_v20, %s14015_s27 }
 0x228   :  { %12528 = vrot.lane.b32.xlu0 %v14180_v49, %s14009_s21 }
 0x229   :  { %v14736_v52 = vpop.permute.xlu1 %12383 }
 0x22a   :  { %19081 = vst [vmem:[#allocation76_spill] sm:$0xff] %v14736_v52  ;;  %v14738_v12 = vpop.permute.xlu0 %12278 }
 0x22b   :  { %19082 = vst [vmem:[#allocation77_spill] sm:$0xff] %v14738_v12  ;;  %12653 = vrot.lane.b32.xlu1 %v14365_v20, %s14016_s28 }
 0x22c   :  { %12538 = vrot.lane.b32.xlu0 %v14231_v17, %s14009_s21 }
 0x22d   :  { %v14744_v4 = vpop.permute.xlu1 %12388 }
 0x22e   :  { %19083 = vst [vmem:[#allocation78_spill] sm:$0xff] %v14744_v4  ;;  %v14746_v31 = vpop.permute.xlu0 %12283 }
 0x22f   :  { %19084 = vst [vmem:[#allocation79_spill] sm:$0xff] %v14746_v31  ;;  %12658 = vrot.lane.b32.xlu1 %v14365_v20, %s14017_s29 }
 0x230   :  { %12548 = vrot.lane.b32.xlu0 %v14521_v53, %s14009_s21 }
 0x231   :  { %v14752_v57 = vpop.permute.xlu1 %12393 }
 0x232   :  { %19085 = vst [vmem:[#allocation80_spill] sm:$0xff] %v14752_v57  ;;  %v14754_v51 = vpop.permute.xlu0 %12288 }
 0x233   :  { %19086 = vst [vmem:[#allocation81_spill] sm:$0xff] %v14754_v51  ;;  %12663 = vrot.lane.b32.xlu1 %v14359_v37, %s14009_s21 }
 0x234   :  { %12668 = vrot.lane.b32.xlu0 %v14180_v49, %s14010_s22 }
 0x235   :  { %v14760_v12 = vpop.permute.xlu1 %12398 }
 0x236   :  { %19087 = vst [vmem:[#allocation82_spill] sm:$0xff] %v14760_v12  ;;  %v14762_v4 = vpop.permute.xlu0 %12293 }
 0x237   :  { %19088 = vst [vmem:[#allocation83_spill] sm:$0xff] %v14762_v4  ;;  %12673 = vrot.lane.b32.xlu1 %v14107_v1, %s14010_s22 }
 0x238   :  { %12678 = vrot.lane.b32.xlu0 %v14231_v17, %s14010_s22 }
 0x239   :  { %v14768_v20 = vpop.permute.xlu1 %12403 }
 0x23a   :  { %19089 = vst [vmem:[#allocation84_spill] sm:$0xff] %v14768_v20  ;;  %v14770_v31 = vpop.permute.xlu0 %12298 }
 0x23b   :  { %19090 = vst [vmem:[#allocation85_spill] sm:$0xff] %v14770_v31  ;;  %12683 = vrot.lane.b32.xlu1 %v14226_v15, %s14010_s22 }
 0x23c   :  { %12688 = vrot.lane.b32.xlu0 %v14521_v53, %s14010_s22 }
 0x23d   :  { %v14776_v51 = vpop.permute.xlu1 %12408 }
 0x23e   :  { %19091 = vst [vmem:[#allocation86_spill] sm:$0xff] %v14776_v51  ;;  %v14778_v12 = vpop.permute.xlu0 %12303 }
 0x23f   :  { %19092 = vst [vmem:[#allocation87_spill] sm:$0xff] %v14778_v12  ;;  %12693 = vrot.lane.b32.xlu1 %v14359_v37, %s14010_s22 }
 0x240   :  { %12698 = vrot.lane.b32.xlu0 %v14180_v49, %s14011_s23 }
 0x241   :  { %v14784_v4 = vpop.permute.xlu1 %12413 }
 0x242   :  { %19093 = vst [vmem:[#allocation88_spill] sm:$0xff] %v14784_v4  ;;  %v14786_v20 = vpop.permute.xlu0 %12418 }
 0x243   :  { %12703 = vrot.lane.b32.xlu1 %v14107_v1, %s14011_s23 }
 0x244   :  { %12708 = vrot.lane.b32.xlu0 %v14231_v17, %s14011_s23 }
 0x245   :  { %v14792_v31 = vpop.permute.xlu1 %12533 }
 0x246   :  { %19094 = vst [vmem:[#allocation89_spill] sm:$0xff] %v14792_v31  ;;  %v14794_v51 = vpop.permute.xlu0 %12423  ;;  %v12421_v31 = vunpack.i.h.bf16 %v14786_v20 }
 0x247   :  { %12713 = vrot.lane.b32.xlu1 %v14226_v15, %s14011_s23 }
 0x248   :  { %12718 = vrot.lane.b32.xlu0 %v14521_v53, %s14011_s23 }
 0x249   :  { %v14800_v12 = vpop.permute.xlu1 %12543 }
 0x24a   :  { %19095 = vst [vmem:[#allocation90_spill] sm:$0xff] %v14800_v12  ;;  %v14802_v4 = vpop.permute.xlu0 %12428 }
 0x24b   :  { %12723 = vrot.lane.b32.xlu1 %v14359_v37, %s14011_s23 }
 0x24c   :  { %12728 = vrot.lane.b32.xlu0 %v14180_v49, %s14012_s24 }
 0x24d   :  { %v14808_v57 = vpop.permute.xlu1 %12553 }
 0x24e   :  { %v12555_v23 = vunpack.i.l.bf16 %v14808_v57  ;;  %v14812_v52 = vpop.permute.xlu0 %12433 }
 0x24f   :  { %19096 = vst [vmem:[#allocation91_spill] sm:$0xff] %v14812_v52  ;;  %12733 = vrot.lane.b32.xlu1 %v14107_v1, %s14012_s24 }
 0x250   :  { %v860_v12 = vpack.c.bf16 %v12555_v23, %v12421_v31  ;;  %12738 = vrot.lane.b32.xlu0 %v14231_v17, %s14012_s24 }
 0x251   :  { %v14818_v50 = vpop.permute.xlu1 %12558 }
 0x252   :  { %v14820_v21 = vpop.permute.xlu0 %12438  ;;  %11047 = vmatprep.mubr.msk.bf16.mxu1 %vm1950_vm0, %v860_v12 }
 0x253   :  { %19097 = vst [vmem:[#allocation92_spill] sm:$0xff] %v14820_v21  ;;  %12743 = vrot.lane.b32.xlu1 %v14226_v15, %s14012_s24 }
 0x254   :  { %12748 = vrot.lane.b32.xlu0 %v14521_v53, %s14012_s24 }
 0x255   :  { %v14827_v40 = vpop.permute.xlu1 %12563 }
 0x256   :  { %v14829_v34 = vpop.permute.xlu0 %12443 }
 0x257   :  { %19098 = vst [vmem:[#allocation93_spill] sm:$0xff] %v14829_v34  ;;  %12753 = vrot.lane.b32.xlu1 %v14359_v37, %s14012_s24 }
 0x258   :  { %12758 = vrot.lane.b32.xlu0 %v14180_v49, %s14013_s25 }
 0x259   :  { %v14835_v23 = vpop.permute.xlu1 %12568 }
 0x25a   :  { %v14837_v31 = vpop.permute.xlu0 %12448 }
 0x25b   :  { %19099 = vst [vmem:[#allocation94_spill] sm:$0xff] %v14837_v31  ;;  %12763 = vrot.lane.b32.xlu1 %v14107_v1, %s14013_s25 }
 0x25c   :  { %12768 = vrot.lane.b32.xlu0 %v14231_v17, %s14013_s25 }
 0x25d   :  { %v14843_v12 = vpop.permute.xlu1 %12573 }
 0x25e   :  { %19100 = vst [vmem:[#allocation95_spill] sm:$0xff] %v14843_v12  ;;  %v14845_v21 = vpop.permute.xlu0 %12453 }
 0x25f   :  { %19101 = vst [vmem:[#allocation96_spill] sm:$0xff] %v14845_v21  ;;  %12773 = vrot.lane.b32.xlu1 %v14226_v15, %s14013_s25 }
 0x260   :  { %12778 = vrot.lane.b32.xlu0 %v14521_v53, %s14013_s25 }
 0x261   :  { %v14851_v34 = vpop.permute.xlu1 %12578 }
 0x262   :  { %19102 = vst [vmem:[#allocation97_spill] sm:$0xff] %v14851_v34  ;;  %v14853_v59 = vpop.permute.xlu0 %12458 }
 0x263   :  { %19103 = vst [vmem:[#allocation98_spill] sm:$0xff] %v14853_v59  ;;  %12783 = vrot.lane.b32.xlu1 %v14359_v37, %s14013_s25 }
 0x264   :  { %12788 = vrot.lane.b32.xlu0 %v14180_v49, %s14014_s26 }
 0x265   :  { %v14859_v31 = vpop.permute.xlu1 %12583 }
 0x266   :  { %19104 = vst [vmem:[#allocation99_spill] sm:$0xff] %v14859_v31  ;;  %v14861_v12 = vpop.permute.xlu0 %12463 }
 0x267   :  { %19105 = vst [vmem:[#allocation100_spill] sm:$0xff] %v14861_v12  ;;  %12793 = vrot.lane.b32.xlu1 %v14107_v1, %s14014_s26  ;;  %v12366_v12 = vunpack.i.h.bf16 %v14701_v32 }
 0x268   :  { %12798 = vrot.lane.b32.xlu0 %v14231_v17, %s14014_s26 }
 0x269   :  { %v14867_v21 = vpop.permute.xlu1 %12588 }
 0x26a   :  { %19106 = vst [vmem:[#allocation101_spill] sm:$0xff] %v14867_v21  ;;  %v14869_v34 = vpop.permute.xlu0 %12468 }
 0x26b   :  { %19107 = vst [vmem:[#allocation102_spill] sm:$0xff] %v14869_v34  ;;  %12803 = vrot.lane.b32.xlu1 %v14226_v15, %s14014_s26  ;;  %v1362_v15 = vpack.c.bf16 %v12366_v12, %v12365_v19  ;;  %v12135_v19 = vunpack.i.l.bf16 %v14487_v48 }
 0x26c   :  { %12808 = vrot.lane.b32.xlu0 %v14521_v53, %s14014_s26 }
 0x26d   :  { %v14875_v59 = vpop.permute.xlu1 %12593 }
 0x26e   :  { %v12474_v31 = vpop.permute.xlu0 %12473 }
 0x26f   :  { %v12475_v52 = vunpack.i.l.bf16 %v12474_v31  ;;  %12813 = vrot.lane.b32.xlu1 %v14359_v37, %s14014_s26  ;;  %v12476_v12 = vunpack.i.h.bf16 %v12474_v31  ;;  %v12015_v31 = vunpack.i.l.bf16 %v14472_v54 }
 0x270   :  { %12818 = vrot.lane.b32.xlu0 %v14180_v49, %s14005_s17  ;;  %v12832_v49 = vpack.i.bf16 %v14147_v30, %v14144_v28  ;;  %v2318_v30 = vsel %vm1950_vm0, %v1362_v15, 0 }
 0x271   :  { %v1363_v34 = vpack.c.bf16 %v12475_v52, %v12475_v52  ;;  %v14883_v21 = vpop.permute.xlu1 %12598  ;;  %v1367_v52 = vpack.c.bf16 %v12135_v19, %v12135_v19 }
 0x273   :  { %11791 = vmatprep.subr.msk.bf16.mxu0 %vm1950_vm0, %v1363_v34  ;;  %12823 = vrot.lane.b32.xlu1 %v14107_v1, %s14005_s17  ;;  %v2321_v53 = vsel %vm1950_vm0, %v1363_v34, 0 }
 0x274   :  { %12828 = vrot.lane.b32.xlu0 %v14231_v17, %s14005_s17  ;;  %11036 = vmatpush3.bf16.xpose.msra.mxu0 %v2321_v53  ;;  %v14902_v17 = vpack.i.bf16 %v14351_v5, %v14269_v41  ;;  %v12141_v5 = vunpack.i.h.bf16 %v14498_v25 }
 0x275   :  { %11792 = vmatprep.subr.msk.bf16.mxu0 %vm1950_vm0, %v1362_v15  ;;  %v14892_v37 = vpop.permute.xlu1 %12603  ;;  %v12016_v15 = vunpack.i.h.bf16 %v14472_v54  ;;  %v2441_v54 = vsel %vm1950_vm0, %v1367_v52, 0 }
 0x276   :  { %19108 = vst [vmem:[#allocation103_spill] sm:$0xff] %v14902_v17 }
 0x277   :  { %12833 = vrot.lane.b32.xlu1 %v12832_v49, %s14005_s17  ;;  %v12420_v49 = vunpack.i.l.bf16 %v14786_v20 }
 0x278   :  { %12838 = vrot.lane.b32.xlu0 %v14250_v35, %s14005_s17  ;;  %v11955_v35 = vunpack.i.l.bf16 %v14385_v9 }
 0x279   :  { %v12609_v1 = vpop.permute.xlu1 %12608  ;;  %v859_v20 = vpack.c.bf16 %v12420_v49, %v12420_v49 }
 0x27a   :  { %v12611_v34 = vunpack.i.h.bf16 %v12609_v1  ;;  %v12610_v32 = vunpack.i.l.bf16 %v12609_v1  ;;  %v11956_v1 = vunpack.i.h.bf16 %v14385_v9  ;;  %v14924_v9 = vpack.i.bf16 %v14099_v61, %v14144_v28 }
 0x27b   :  { %12843 = vrot.lane.b32.xlu1 %v14103_v62, %s14015_s27  ;;  %v12316_v61 = vunpack.i.h.bf16 %v14602_v45 }
 0x27c   :  { %v1365_v53 = vpack.c.bf16 %v12611_v34, %v12611_v34  ;;  %12848 = vrot.lane.b32.xlu0 %v14902_v17, %s14005_s17  ;;  %11038 = vmatpush3.bf16.xpose.msra.mxu0 %v2318_v30  ;;  %v1364_v19 = vpack.c.bf16 %v12610_v32, %v12476_v12  ;;  %v14917_v34 = vpop.permute.xlu0 %12478  ;;  %19109 = vst [vmem:[#allocation104_spill] sm:$0xff] %v14924_v9  ;;  %v12256_v30 = vunpack.i.h.bf16 %v14690_v63  ;;  %v12080_v17 = vunpack.i.l.bf16 %v14400_v14 }
 0x27d   :  { %11795 = vmatprep.subr.msk.bf16.mxu0 %vm1950_vm0, %v1367_v52  ;;  %v862_v32 = vpack.c.bf16 %v11956_v1, %v11955_v35  ;;  %v1366_v12 = vpack.c.bf16 %v12016_v15, %v12015_v31  ;;  %v12480_v49 = vunpack.i.l.bf16 %v14917_v34  ;;  %v12556_v1 = vunpack.i.h.bf16 %v14808_v57 }
 0x27e   :  { %11793 = vmatprep.subr.msk.bf16.mxu1 %vm1950_vm0, %v1365_v53  ;;  %v2381_v62 = vsel %vm1950_vm0, %v1365_v53, 0  ;;  %v1369_v53 = vpack.c.bf16 %v12256_v30, %v12256_v30  ;;  %v2378_v35 = vsel %vm1950_vm0, %v1364_v19, 0  ;;  %v12195_v15 = vunpack.i.l.bf16 %v14587_v44 }
 0x27f   :  { %12853 = vrot.lane.b32.xlu1 %v14257_v38, %s14015_s27  ;;  %11044 = vmatpush3.bf16.xpose.msra.mxu1 %v2381_v62  ;;  %v12255_v52 = vunpack.i.l.bf16 %v14690_v63  ;;  %v12076_v31 = vunpack.i.h.bf16 %v14392_v10  ;;  %v2438_v30 = vsel %vm1950_vm0, %v1366_v12, 0  ;;  %v12315_v63 = vunpack.i.l.bf16 %v14602_v45  ;;  %v12614_v38 = vpop.permute.xlu1 %12613 }
 0x280   :  { %11794 = vmatprep.subr.msk.bf16.mxu1 %vm1950_vm0, %v1364_v19  ;;  %v14932_v62 = vpop.permute.xlu0 %12483  ;;  %v12136_v19 = vunpack.i.h.bf16 %v14487_v48  ;;  %v12370_v48 = vunpack.i.l.bf16 %v14709_v43  ;;  %v12616_v45 = vunpack.i.h.bf16 %v12614_v38 }
 0x281   :  { %v864_v57 = vpack.c.bf16 %v12195_v15, %v12076_v31  ;;  %v866_v15 = vpack.c.bf16 %v12316_v61, %v12315_v63  ;;  %v12196_v61 = vunpack.i.h.bf16 %v14587_v44  ;;  %v4838_v63 = vsel %vm4831_vm1, %v14585_v3, -inf }
 0x282   :  { %v11961_v44 = vunpack.i.h.bf16 %v14394_v13 }
 0x283   :  { %11040 = vmatmul.mubr.msk.bf16.vlgmr.msra.gmra.mxu0 %vm1950_vm0, %v859_v20  ;;  %12858 = vrot.lane.b32.xlu1 %v14924_v9, %s14015_s27  ;;  %v1371_v20 = vpack.c.bf16 %v12480_v49, %v12480_v49  ;;  %v1368_v9 = vpack.c.bf16 %v12255_v52, %v12136_v19  ;;  %v2501_v49 = vsel %vm1950_vm0, %v1369_v53, 0  ;;  %v12140_v19 = vunpack.i.l.bf16 %v14498_v25 }
 0x284   :  { %11052 = vmatpush3.bf16.xpose.msra.mxu0 %v2441_v54  ;;  %11055 = vmatprep.mubr.msk.bf16.mxu0 %vm1950_vm0, %v862_v32  ;;  %v14942_v32 = vpop.permute.xlu0 %12488  ;;  %v861_v54 = vpack.c.bf16 %v12556_v1, %v12556_v1 }
 0x285   :  { %11796 = vmatprep.subr.msk.bf16.mxu0 %vm1950_vm0, %v1366_v12  ;;  %v12371_v12 = vunpack.i.h.bf16 %v14709_v43  ;;  %v2561_v31 = vsel %vm1950_vm0, %v1371_v20, 0  ;;  %v1373_v43 = vpack.c.bf16 %v12616_v45, %v12616_v45 }
 0x287   :  { %11046 = vmatpush3.bf16.xpose.msra.mxu1 %v2378_v35  ;;  %v12075_v35 = vunpack.i.l.bf16 %v14392_v10  ;;  %v1370_v52 = vpack.c.bf16 %v12371_v12, %v12370_v48  ;;  %v865_v12 = vpack.c.bf16 %v12196_v61, %v12196_v61  ;;  %v12426_v48 = vunpack.i.h.bf16 %v14794_v51 }
 0x288   :  { %11797 = vmatprep.subr.msk.bf16.mxu1 %vm1950_vm0, %v1369_v53  ;;  %v14956_v1 = vpop.permute.xlu0 %12493  ;;  %v14960_v53 = vpop.permute.xlu1 %12618  ;;  %v12020_v61 = vunpack.i.l.bf16 %v14481_v60 }
 0x289   :  { %v863_v10 = vpack.c.bf16 %v12075_v35, %v12075_v35  ;;  %v12615_v35 = vunpack.i.l.bf16 %v12614_v38  ;;  %v12425_v38 = vunpack.i.l.bf16 %v14794_v51 }
 0x28b   :  { %v867_v51 = vpack.c.bf16 %v12425_v38, %v12425_v38  ;;  %v12485_v38 = vunpack.i.l.bf16 %v14932_v62 }
 0x28c   :  { %11054 = vmatpush3.bf16.xpose.msra.mxu0 %v2438_v30  ;;  %v2498_v30 = vsel %vm1950_vm0, %v1368_v9, 0 }
 0x28d   :  { %11799 = vmatprep.subr.msk.bf16.mxu0 %vm1950_vm0, %v1371_v20  ;;  %v12560_v20 = vunpack.i.l.bf16 %v14818_v50 }
 0x28e   :  { %11048 = vmatmul.mubr.msk.bf16.vlgmr.msra.gmra.mxu1 %vm1950_vm0, %v861_v54  ;;  %v14966_v54 = vpop.permute.xlu0 %12498 }
 0x28f   :  { %11060 = vmatpush3.bf16.xpose.msra.mxu1 %v2501_v49  ;;  %11063 = vmatprep.mubr.msk.bf16.mxu1 %vm1950_vm0, %v864_v57  ;;  %v14971_v57 = vpop.permute.xlu1 %12623  ;;  %v1375_v49 = vpack.c.bf16 %v12140_v19, %v12140_v19  ;;  %v12021_v19 = vunpack.i.h.bf16 %v14481_v60 }
 0x290   :  { %11798 = vmatprep.subr.msk.bf16.mxu1 %vm1950_vm0, %v1368_v9  ;;  %v2558_v9 = vsel %vm1950_vm0, %v1370_v52, 0 }
 0x291   :  { %v2681_v60 = vsel %vm1950_vm0, %v1375_v49, 0 }
 0x292   :  { %v14981_v45 = vpop.permute.xlu0 %12503 }
 0x293   :  { %11056 = vmatmul.mubr.msk.bf16.vlgmr.msra.gmra.mxu0 %vm1950_vm0, %v863_v10  ;;  %v12481_v10 = vunpack.i.h.bf16 %v14917_v34  ;;  %v2621_v34 = vsel %vm1950_vm0, %v1373_v43, 0 }
 0x294   :  { %11068 = vmatpush3.bf16.xpose.msra.mxu0 %v2561_v31  ;;  %11071 = vmatprep.mubr.msk.bf16.mxu0 %vm1950_vm0, %v866_v15  ;;  %v11960_v15 = vunpack.i.l.bf16 %v14394_v13  ;;  %v868_v31 = vpack.c.bf16 %v12560_v20, %v12426_v48  ;;  %v14990_v13 = vpop.permute.xlu1 %12628 }
 0x295   :  { %11800 = vmatprep.subr.msk.bf16.mxu0 %vm1950_vm0, %v1370_v52  ;;  %v4835_v52 = vsel %vm4831_vm1, %v14651_v0, -inf }
 0x296   :  { %v870_v20 = vpack.c.bf16 %v11961_v44, %v11960_v15  ;;  %v4856_v44 = vsel %vm4831_vm1, %v14659_v26, -inf }
 0x297   :  { %11062 = vmatpush3.bf16.xpose.msra.mxu1 %v2498_v30  ;;  %v1372_v30 = vpack.c.bf16 %v12615_v35, %v12481_v10  ;;  %v12261_v35 = vunpack.i.h.bf16 %v14703_v58 }
 0x298   :  { %11801 = vmatprep.subr.msk.bf16.mxu1 %vm1950_vm0, %v1373_v43  ;;  %v1374_v43 = vpack.c.bf16 %v12021_v19, %v12020_v61  ;;  %v15005_v10 = vpop.permute.xlu1 %12633 }
 0x299   :  { %v1377_v48 = vpack.c.bf16 %v12261_v35, %v12261_v35  ;;  %v2618_v15 = vsel %vm1950_vm0, %v1372_v30, 0  ;;  %v1379_v35 = vpack.c.bf16 %v12485_v38, %v12485_v38  ;;  %v12321_v38 = vunpack.i.h.bf16 %v14611_v2 }
 0x29b   :  { %4839 = vmax.xlane.f32.xlu0 %v4838_v63  ;;  %v4844_v63 = vsel %vm4831_vm1, %v14681_v27, -inf }
 0x29c   :  { %11070 = vmatpush3.bf16.xpose.msra.mxu0 %v2558_v9  ;;  %v14997_v9 = vpop.permute.xlu0 %12508 }
 0x29d   :  { %11803 = vmatprep.subr.msk.bf16.mxu0 %vm1950_vm0, %v1375_v49  ;;  %v4832_v49 = vsel %vm4831_vm1, %v14592_v8, -inf }
 0x29e   :  { %11064 = vmatmul.mubr.msk.bf16.vlgmr.msra.gmra.mxu1 %vm1950_vm0, %v865_v12  ;;  %v15002_v12 = vpop.f32.mrf.mxu0 }
 0x29f   :  { %4836 = vmax.xlane.f32.xlu0 %v4835_v52  ;;  %11076 = vmatpush3.bf16.xpose.msra.mxu1 %v2621_v34  ;;  %v12561_v52 = vunpack.i.h.bf16 %v14818_v50  ;;  %v12200_v34 = vunpack.i.l.bf16 %v14596_v47 }
 0x2a0   :  { %11079 = vmatprep.mubr.msk.bf16.mxu1 %vm1950_vm0, %v868_v31  ;;  %11802 = vmatprep.subr.msk.bf16.mxu1 %vm1950_vm0, %v1372_v30  ;;  %v15018_v19 = vpop.permute.xlu0 %12513  ;;  %v12081_v30 = vunpack.i.h.bf16 %v14400_v14  ;;  %v12375_v14 = vunpack.i.l.bf16 %v14719_v56 }
 0x2a3   :  { %11072 = vmatmul.mubr.msk.bf16.vlgmr.msra.gmra.mxu0 %vm1950_vm0, %v867_v51  ;;  %4845 = vmax.xlane.f32.xlu0 %v4844_v63  ;;  %v4850_v51 = vsel %vm4831_vm1, %v14665_v33, -inf  ;;  %v15026_v63 = vpop.f32.mrf.mxu1 }
 0x2a4   :  { %11084 = vmatpush3.bf16.xpose.msra.mxu0 %v2681_v60  ;;  %11087 = vmatprep.mubr.msk.bf16.mxu0 %vm1950_vm0, %v870_v20  ;;  %v12260_v20 = vunpack.i.l.bf16 %v14703_v58  ;;  %v2678_v60 = vsel %vm1950_vm0, %v1374_v43, 0  ;;  %v872_v58 = vpack.c.bf16 %v12200_v34, %v12081_v30  ;;  %v15044_v25 = vpop.permute.xlu0 %12518  ;;  %v4841_v34 = vsel %vm4831_vm1, %v14619_v55, -inf }
 0x2a5   :  { %11804 = vmatprep.subr.msk.bf16.mxu0 %vm1950_vm0, %v1374_v43  ;;  %v4862_v43 = vsel %vm4831_vm1, %v15026_v63, -inf }
 0x2a7   :  { %4857 = vmax.xlane.f32.xlu0 %v4856_v44  ;;  %v15011_v31 = vpop.f32.mrf.mxu0  ;;  %11078 = vmatpush3.bf16.xpose.msra.mxu1 %v2618_v15  ;;  %v4847_v44 = vsel %vm4831_vm1, %v14613_v46, -inf  ;;  %v869_v15 = vpack.c.bf16 %v12561_v52, %v12561_v52  ;;  %v2741_v52 = vsel %vm1950_vm0, %v1377_v48, 0 }
 0x2a8   :  { %4833 = vmax.xlane.f32.xlu1 %v4832_v49  ;;  %11805 = vmatprep.subr.msk.bf16.mxu1 %vm1950_vm0, %v1377_v48  ;;  %v15031_v49 = vpop.permute.xlu1 %12638 }
 0x2a9   :  { %v15020_v61 = vpop.f32.mrf.mxu0 }
 0x2ab   :  { %4851 = vmax.xlane.f32.xlu0 %v4850_v51  ;;  %v11026_v50 = vpop.f32.mrf.mxu0  ;;  %v12320_v51 = vunpack.i.l.bf16 %v14611_v2  ;;  %v871_v2 = vpack.c.bf16 %v12080_v17, %v12080_v17  ;;  %v4853_v17 = vsel %vm4831_vm1, %v15002_v12, -inf }
 0x2ac   :  { %11086 = vmatpush3.bf16.xpose.msra.mxu0 %v2678_v60  ;;  %4848 = vmax.xlane.f32.xlu1 %v4847_v44  ;;  %v1376_v50 = vpack.c.bf16 %v12260_v20, %v12141_v5  ;;  %v12376_v60 = vunpack.i.h.bf16 %v14719_v56  ;;  %v12621_v5 = vunpack.i.h.bf16 %v14960_v53  ;;  %v15051_v48 = vpop.permute.xlu1 %12643  ;;  %v4874_v56 = vsel %vm4831_vm1, %v15011_v31, -inf }
 0x2ad   :  { %11807 = vmatprep.subr.msk.bf16.mxu0 %vm1950_vm0, %v1379_v35  ;;  %v874_v30 = vpack.c.bf16 %v12321_v38, %v12320_v51  ;;  %v2801_v44 = vsel %vm1950_vm0, %v1379_v35, 0  ;;  %v4868_v38 = vsel %vm4831_vm1, %v15020_v61, -inf  ;;  %v12201_v35 = vunpack.i.h.bf16 %v14596_v47 }
 0x2ae   :  { %11080 = vmatmul.mubr.msk.bf16.vlgmr.msra.gmra.mxu1 %vm1950_vm0, %v869_v15  ;;  %v1378_v20 = vpack.c.bf16 %v12376_v60, %v12375_v14  ;;  %v15060_v15 = vpop.permute.xlu0 %12523  ;;  %v2738_v51 = vsel %vm1950_vm0, %v1376_v50, 0  ;;  %v4865_v60 = vsel %vm4831_vm1, %v14688_v11, -inf  ;;  %v12565_v14 = vunpack.i.l.bf16 %v14827_v40 }
 0x2af   :  { %4863 = vmax.xlane.f32.xlu0 %v4862_v43  ;;  %11092 = vmatpush3.bf16.xpose.msra.mxu1 %v2741_v52  ;;  %v12145_v43 = vunpack.i.l.bf16 %v14506_v6  ;;  %v873_v47 = vpack.c.bf16 %v12201_v35, %v12201_v35 }
 0x2b0   :  { %11095 = vmatprep.mubr.msk.bf16.mxu1 %vm1950_vm0, %v872_v58  ;;  %4842 = vmax.xlane.f32.xlu1 %v4841_v34  ;;  %v1381_v58 = vpack.c.bf16 %v12621_v5, %v12621_v5  ;;  %v15068_v52 = vpop.permute.xlu1 %12648  ;;  %v12620_v34 = vunpack.i.l.bf16 %v14960_v53  ;;  %v2798_v5 = vsel %vm1950_vm0, %v1378_v20, 0  ;;  %v11966_v53 = vunpack.i.h.bf16 %v14402_v16 }
 0x2b1   :  { %11806 = vmatprep.subr.msk.bf16.mxu1 %vm1950_vm0, %v1376_v50  ;;  %v12431_v50 = vunpack.i.h.bf16 %v14802_v4 }
 0x2b3   :  { %11088 = vmatmul.mubr.msk.bf16.vlgmr.msra.gmra.mxu0 %vm1950_vm0, %v871_v2  ;;  %4875 = vmax.xlane.f32.xlu0 %v4874_v56  ;;  %v1383_v2 = vpack.c.bf16 %v12145_v43, %v12145_v43  ;;  %v12486_v56 = vunpack.i.h.bf16 %v14932_v62  ;;  %v11965_v43 = vunpack.i.l.bf16 %v14402_v16  ;;  %v2861_v62 = vsel %vm1950_vm0, %v1381_v58, 0 }
 0x2b4   :  { %11100 = vmatpush3.bf16.xpose.msra.mxu0 %v2801_v44  ;;  %11103 = vmatprep.mubr.msk.bf16.mxu0 %vm1950_vm0, %v874_v30  ;;  %v15076_v30 = vpop.permute.xlu0 %12528  ;;  %v4859_v44 = vsel %vm4831_vm1, %v14696_v24, -inf  ;;  %v15088_v35 = vpop.permute.xlu1 %12653 }
 0x2b5   :  { %4854 = vmax.xlane.f32.xlu1 %v4853_v17  ;;  %11808 = vmatprep.subr.msk.bf16.mxu0 %vm1950_vm0, %v1378_v20  ;;  %19110 = vst [vmem:[#allocation105_spill] sm:$0xff] %v15076_v30  ;;  %v12430_v17 = vunpack.i.l.bf16 %v14802_v4  ;;  %v1380_v20 = vpack.c.bf16 %v12620_v34, %v12486_v56  ;;  %v12025_v4 = vunpack.i.l.bf16 %v14489_v42 }
 0x2b7   :  { %4869 = vmax.xlane.f32.xlu0 %v4868_v38  ;;  %11094 = vmatpush3.bf16.xpose.msra.mxu1 %v2738_v51  ;;  %v876_v38 = vpack.c.bf16 %v12565_v14, %v12431_v50  ;;  %v15083_v51 = vpop.f32.mrf.mxu0  ;;  %v875_v16 = vpack.c.bf16 %v12430_v17, %v12430_v17  ;;  %v878_v50 = vpack.c.bf16 %v11966_v53, %v11965_v43  ;;  %v12490_v17 = vunpack.i.l.bf16 %v14942_v32 }
 0x2b8   :  { %11809 = vmatprep.subr.msk.bf16.mxu1 %vm1950_vm0, %v1381_v58  ;;  %v4871_v14 = vsel %vm4831_vm1, %v15083_v51, -inf  ;;  %v15098_v34 = vpop.permute.xlu0 %12538  ;;  %v12566_v53 = vunpack.i.h.bf16 %v14827_v40  ;;  %v12265_v43 = vunpack.i.l.bf16 %v14711_v29 }
 0x2b9   :  { %4866 = vmax.xlane.f32.xlu1 %v4865_v60  ;;  %v12026_v60 = vunpack.i.h.bf16 %v14489_v42  ;;  %19111 = vst [vmem:[#allocation106_spill] sm:$0xff] %v15098_v34  ;;  %v2921_v42 = vsel %vm1950_vm0, %v1383_v2, 0 }
 0x2bb   :  { %v1382_v58 = vpack.c.bf16 %v12026_v60, %v12025_v4  ;;  %v12086_v60 = vunpack.i.h.bf16 %v14408_v18  ;;  %v1387_v4 = vpack.c.bf16 %v12490_v17, %v12490_v17  ;;  %v12380_v17 = vunpack.i.l.bf16 %v14727_v22 }
 0x2bc   :  { %11102 = vmatpush3.bf16.xpose.msra.mxu0 %v2798_v5  ;;  %v12266_v5 = vunpack.i.h.bf16 %v14711_v29  ;;  %v12326_v29 = vunpack.i.h.bf16 %v14623_v39 }
 0x2bd   :  { %4860 = vmax.xlane.f32.xlu1 %v4859_v44  ;;  %11811 = vmatprep.subr.msk.bf16.mxu0 %vm1950_vm0, %v1383_v2  ;;  %v2858_v44 = vsel %vm1950_vm0, %v1380_v20, 0  ;;  %v12205_v2 = vunpack.i.l.bf16 %v14604_v36 }
 0x2be   :  { %11096 = vmatmul.mubr.msk.bf16.vlgmr.msra.gmra.mxu1 %vm1950_vm0, %v873_v47  ;;  %v15103_v47 = vpop.permute.xlu1 %12658  ;;  %v1385_v56 = vpack.c.bf16 %v12266_v5, %v12266_v5 }
 0x2bf   :  { %11108 = vmatpush3.bf16.xpose.msra.mxu1 %v2861_v62  ;;  %11111 = vmatprep.mubr.msk.bf16.mxu1 %vm1950_vm0, %v876_v38  ;;  %v15109_v38 = vpop.permute.xlu0 %12548  ;;  %v880_v40 = vpack.c.bf16 %v12205_v2, %v12086_v60 }
 0x2c0   :  { %11810 = vmatprep.subr.msk.bf16.mxu1 %vm1950_vm0, %v1380_v20  ;;  %19112 = vst [vmem:[#allocation107_spill] sm:$0xff] %v15109_v38  ;;  %v2918_v20 = vsel %vm1950_vm0, %v1382_v58, 0 }
 0x2c1   :  { %4872 = vmax.xlane.f32.xlu1 %v4871_v14  ;;  %v12146_v14 = vunpack.i.h.bf16 %v14506_v6  ;;  %v12381_v6 = vunpack.i.h.bf16 %v14727_v22 }
 0x2c2   :  { %v15115_v62 = vpop.permute.xlu1 %12663 }
 0x2c3   :  { %11104 = vmatmul.mubr.msk.bf16.vlgmr.msra.gmra.mxu0 %vm1950_vm0, %v875_v16  ;;  %19113 = vst [vmem:[#allocation108_spill] sm:$0xff] %v15115_v62  ;;  %v877_v16 = vpack.c.bf16 %v12566_v53, %v12566_v53  ;;  %v15121_v5 = vpop.permute.xlu0 %12668 }
 0x2c4   :  { %11116 = vmatpush3.bf16.xpose.msra.mxu0 %v2921_v42  ;;  %11119 = vmatprep.mubr.msk.bf16.mxu0 %vm1950_vm0, %v878_v50  ;;  %v12085_v50 = vunpack.i.l.bf16 %v14408_v18  ;;  %19114 = vst [vmem:[#allocation109_spill] sm:$0xff] %v15121_v5  ;;  %v12325_v42 = vunpack.i.l.bf16 %v14623_v39  ;;  %v12626_v39 = vunpack.i.h.bf16 %v14971_v57 }
 0x2c5   :  { %11812 = vmatprep.subr.msk.bf16.mxu0 %vm1950_vm0, %v1382_v58  ;;  %v2981_v58 = vsel %vm1950_vm0, %v1385_v56, 0 }
 0x2c6   :  { %v15131_v18 = vpop.permute.xlu1 %12673  ;;  %v879_v53 = vpack.c.bf16 %v12085_v50, %v12085_v50  ;;  %v882_v2 = vpack.c.bf16 %v12326_v29, %v12325_v42  ;;  %v1389_v22 = vpack.c.bf16 %v12626_v39, %v12626_v39  ;;  %v12206_v50 = vunpack.i.h.bf16 %v14604_v36 }
 0x2c7   :  { %11110 = vmatpush3.bf16.xpose.msra.mxu1 %v2858_v44  ;;  %v1384_v44 = vpack.c.bf16 %v12265_v43, %v12146_v14  ;;  %19115 = vst [vmem:[#allocation110_spill] sm:$0xff] %v15131_v18  ;;  %v1386_v43 = vpack.c.bf16 %v12381_v6, %v12380_v17  ;;  %v15135_v60 = vpop.permute.xlu0 %12678  ;;  %v12625_v29 = vunpack.i.l.bf16 %v14971_v57 }
 0x2c8   :  { %11813 = vmatprep.subr.msk.bf16.mxu1 %vm1950_vm0, %v1385_v56  ;;  %19116 = vst [vmem:[#allocation111_spill] sm:$0xff] %v15135_v60  ;;  %v3041_v56 = vsel %vm1950_vm0, %v1387_v4, 0 }
 0x2c9   :  { %v2978_v14 = vsel %vm1950_vm0, %v1384_v44, 0  ;;  %v3038_v17 = vsel %vm1950_vm0, %v1386_v43, 0 }
 0x2cc   :  { %11118 = vmatpush3.bf16.xpose.msra.mxu0 %v2918_v20  ;;  %v15141_v20 = vpop.permute.xlu1 %12683 }
 0x2cd   :  { %11815 = vmatprep.subr.msk.bf16.mxu0 %vm1950_vm0, %v1387_v4  ;;  %19117 = vst [vmem:[#allocation112_spill] sm:$0xff] %v15141_v20  ;;  %v15148_v4 = vpop.permute.xlu0 %12688 }
 0x2ce   :  { %11112 = vmatmul.mubr.msk.bf16.vlgmr.msra.gmra.mxu1 %vm1950_vm0, %v877_v16  ;;  %v12150_v16 = vunpack.i.l.bf16 %v14515_v7  ;;  %19118 = vst [vmem:[#allocation113_spill] sm:$0xff] %v15148_v4  ;;  %v19131_v4 = vld [vmem:[#allocation62_spill] sm:$0xff] }
 0x2cf   :  { %11124 = vmatpush3.bf16.xpose.msra.mxu1 %v2981_v58  ;;  %11127 = vmatprep.mubr.msk.bf16.mxu1 %vm1950_vm0, %v880_v40  ;;  %v12570_v40 = vunpack.i.l.bf16 %v14835_v23  ;;  %v19119_v58 = vld [vmem:[#allocation91_spill] sm:$0xff] }
 0x2d0   :  { %11814 = vmatprep.subr.msk.bf16.mxu1 %vm1950_vm0, %v1384_v44  ;;  %v1391_v42 = vpack.c.bf16 %v12150_v16, %v12150_v16  ;;  %v12436_v6 = vunpack.i.h.bf16 %v19119_v58  ;;  %v12491_v44 = vunpack.i.h.bf16 %v14942_v32  ;;  %v12435_v36 = vunpack.i.l.bf16 %v19119_v58 }
 0x2d2   :  { %v884_v39 = vpack.c.bf16 %v12570_v40, %v12436_v6  ;;  %v1388_v16 = vpack.c.bf16 %v12625_v29, %v12491_v44  ;;  %v883_v40 = vpack.c.bf16 %v12435_v36, %v12435_v36  ;;  %v19124_v6 = vld [vmem:[#allocation74_spill] sm:$0xff] }
 0x2d3   :  { %11120 = vmatmul.mubr.msk.bf16.vlgmr.msra.gmra.mxu0 %vm1950_vm0, %v879_v53  ;;  %v881_v53 = vpack.c.bf16 %v12206_v50, %v12206_v50  ;;  %v19122_v50 = vld [vmem:[#allocation44_spill] sm:$0xff] }
 0x2d4   :  { %11132 = vmatpush3.bf16.xpose.msra.mxu0 %v3041_v56  ;;  %11135 = vmatprep.mubr.msk.bf16.mxu0 %vm1950_vm0, %v882_v2  ;;  %v15154_v2 = vpop.permute.xlu1 %12693  ;;  %v19121_v56 = vld [vmem:[#allocation29_spill] sm:$0xff]  ;;  %v12031_v20 = vunpack.i.h.bf16 %v19122_v50  ;;  %v12030_v32 = vunpack.i.l.bf16 %v19122_v50  ;;  %v3098_v36 = vsel %vm1950_vm0, %v1388_v16, 0 }
 0x2d5   :  { %11816 = vmatprep.subr.msk.bf16.mxu0 %vm1950_vm0, %v1386_v43  ;;  %19120 = vst [vmem:[#allocation91_spill] sm:$0xff] %v15154_v2  ;;  %v11970_v57 = vunpack.i.l.bf16 %v19121_v56  ;;  %v3101_v43 = vsel %vm1950_vm0, %v1389_v22, 0  ;;  %v15164_v2 = vpop.permute.xlu0 %12698 }
 0x2d6   :  { %19123 = vst [vmem:[#allocation29_spill] sm:$0xff] %v15164_v2 }
 0x2d7   :  { %11126 = vmatpush3.bf16.xpose.msra.mxu1 %v2978_v14  ;;  %v11971_v14 = vunpack.i.h.bf16 %v19121_v56  ;;  %v12495_v56 = vunpack.i.l.bf16 %v14956_v1 }
 0x2d8   :  { %11817 = vmatprep.subr.msk.bf16.mxu1 %vm1950_vm0, %v1389_v22  ;;  %v15169_v29 = vpop.permute.xlu1 %12703  ;;  %v3161_v22 = vsel %vm1950_vm0, %v1391_v42, 0 }
 0x2d9   :  { %v886_v58 = vpack.c.bf16 %v11971_v14, %v11970_v57  ;;  %19125 = vst [vmem:[#allocation44_spill] sm:$0xff] %v15169_v29  ;;  %v15174_v44 = vpop.permute.xlu0 %12708 }
 0x2da   :  { %19126 = vst [vmem:[#allocation74_spill] sm:$0xff] %v15174_v44 }
 0x2dc   :  { %11134 = vmatpush3.bf16.xpose.msra.mxu0 %v3038_v17  ;;  %v12271_v17 = vunpack.i.h.bf16 %v19124_v6  ;;  %v15182_v57 = vpop.permute.xlu1 %12713 }
 0x2dd   :  { %11819 = vmatprep.subr.msk.bf16.mxu0 %vm1950_vm0, %v1391_v42  ;;  %19127 = vst [vmem:[#allocation114_spill] sm:$0xff] %v15182_v57  ;;  %v12151_v57 = vunpack.i.h.bf16 %v14515_v7 }
 0x2de   :  { %11128 = vmatmul.mubr.msk.bf16.vlgmr.msra.gmra.mxu1 %vm1950_vm0, %v881_v53  ;;  %v1390_v53 = vpack.c.bf16 %v12031_v20, %v12030_v32  ;;  %v12571_v20 = vunpack.i.h.bf16 %v14835_v23 }
 0x2df   :  { %11140 = vmatpush3.bf16.xpose.msra.mxu1 %v3101_v43  ;;  %11143 = vmatprep.mubr.msk.bf16.mxu1 %vm1950_vm0, %v884_v39  ;;  %v1393_v39 = vpack.c.bf16 %v12271_v17, %v12271_v17  ;;  %v19128_v43 = vld [vmem:[#allocation60_spill] sm:$0xff]  ;;  %v1395_v17 = vpack.c.bf16 %v12495_v56, %v12495_v56  ;;  %v12330_v56 = vunpack.i.l.bf16 %v19131_v4 }
 0x2e0   :  { %11818 = vmatprep.subr.msk.bf16.mxu1 %vm1950_vm0, %v1388_v16  ;;  %v12210_v50 = vunpack.i.l.bf16 %v19128_v43  ;;  %v12270_v16 = vunpack.i.l.bf16 %v19124_v6  ;;  %v885_v2 = vpack.c.bf16 %v12571_v20, %v12571_v20  ;;  %v12331_v6 = vunpack.i.h.bf16 %v19131_v4 }
 0x2e1   :  { %v3221_v20 = vsel %vm1950_vm0, %v1393_v39, 0 }
 0x2e3   :  { %11136 = vmatmul.mubr.msk.bf16.vlgmr.msra.gmra.mxu0 %vm1950_vm0, %v883_v40  ;;  %v19129_v40 = vld [vmem:[#allocation30_spill] sm:$0xff] }
 0x2e4   :  { %11148 = vmatpush3.bf16.xpose.msra.mxu0 %v3161_v22  ;;  %11151 = vmatprep.mubr.msk.bf16.mxu0 %vm1950_vm0, %v886_v58  ;;  %v12091_v58 = vunpack.i.h.bf16 %v19129_v40  ;;  %v15192_v22 = vpop.permute.xlu0 %12718  ;;  %v12090_v29 = vunpack.i.l.bf16 %v19129_v40 }
 0x2e5   :  { %11820 = vmatprep.subr.msk.bf16.mxu0 %vm1950_vm0, %v1390_v53  ;;  %19130 = vst [vmem:[#allocation60_spill] sm:$0xff] %v15192_v22 }
 0x2e6   :  { %v887_v4 = vpack.c.bf16 %v12090_v29, %v12090_v29 }
 0x2e7   :  { %v15179_v14 = vpop.f32.mrf.mxu1  ;;  %11142 = vmatpush3.bf16.xpose.msra.mxu1 %v3098_v36  ;;  %v3158_v36 = vsel %vm1950_vm0, %v1390_v53, 0  ;;  %v1392_v53 = vpack.c.bf16 %v12270_v16, %v12151_v57  ;;  %v890_v57 = vpack.c.bf16 %v12331_v6, %v12330_v56  ;;  %v12211_v56 = vunpack.i.h.bf16 %v19128_v43 }
 0x2e8   :  { %11821 = vmatprep.subr.msk.bf16.mxu1 %vm1950_vm0, %v1393_v39  ;;  %v4883_v42 = vsel %vm4831_vm1, %v15179_v14, -inf  ;;  %v3281_v39 = vsel %vm1950_vm0, %v1395_v17, 0 }
 0x2e9   :  { %v15188_v32 = vpop.f32.mrf.mxu1  ;;  %4884 = vmax.xlane.f32.xlu1 %v4883_v42  ;;  %v888_v42 = vpack.c.bf16 %v12210_v50, %v12091_v58  ;;  %v19133_v50 = vld [vmem:[#allocation76_spill] sm:$0xff]  ;;  %v3218_v29 = vsel %vm1950_vm0, %v1392_v53, 0 }
 0x2ea   :  { %v4877_v44 = vsel %vm4831_vm1, %v15188_v32, -inf  ;;  %v12386_v40 = vunpack.i.h.bf16 %v19133_v50  ;;  %v12385_v58 = vunpack.i.l.bf16 %v19133_v50 }
 0x2eb   :  { %v11034_v23 = vpop.f32.mrf.mxu1 }
 0x2ec   :  { %11150 = vmatpush3.bf16.xpose.msra.mxu0 %v3158_v36  ;;  %v15204_v23 = vpop.permute.xlu1 %12723  ;;  %v1394_v16 = vpack.c.bf16 %v12386_v40, %v12385_v58  ;;  %v12630_v40 = vunpack.i.l.bf16 %v14990_v13 }
 0x2ed   :  { %v15200_v5 = vpop.f32.mrf.mxu1  ;;  %11823 = vmatprep.subr.msk.bf16.mxu0 %vm1950_vm0, %v1395_v17  ;;  %4878 = vmax.xlane.f32.xlu1 %v4877_v44  ;;  %19132 = vst [vmem:[#allocation30_spill] sm:$0xff] %v15204_v23  ;;  %v15214_v44 = vpop.permute.xlu0 %12728  ;;  %v19138_v17 = vld [vmem:[#allocation95_spill] sm:$0xff] }
 0x2ee   :  { %11144 = vmatmul.mubr.msk.bf16.vlgmr.msra.gmra.mxu1 %vm1950_vm0, %v885_v2  ;;  %v4880_v7 = vsel %vm4831_vm1, %v15200_v5, -inf  ;;  %19134 = vst [vmem:[#allocation62_spill] sm:$0xff] %v15214_v44  ;;  %v12631_v2 = vunpack.i.h.bf16 %v14990_v13  ;;  %v12575_v50 = vunpack.i.l.bf16 %v19138_v17  ;;  %v12496_v44 = vunpack.i.h.bf16 %v14956_v1 }
 0x2ef   :  { %4881 = vmax.xlane.f32.xlu0 %v4880_v7  ;;  %11156 = vmatpush3.bf16.xpose.msra.mxu1 %v3221_v20  ;;  %v19136_v7 = vld [vmem:[#allocation47_spill] sm:$0xff] }
 0x2f0   :  { %11159 = vmatprep.mubr.msk.bf16.mxu1 %vm1950_vm0, %v888_v42  ;;  %11822 = vmatprep.subr.msk.bf16.mxu1 %vm1950_vm0, %v1392_v53  ;;  %v15219_v36 = vpop.permute.xlu1 %12733  ;;  %v1397_v42 = vpack.c.bf16 %v12631_v2, %v12631_v2  ;;  %v12155_v20 = vunpack.i.l.bf16 %v19136_v7  ;;  %v3278_v53 = vsel %vm1950_vm0, %v1394_v16, 0 }
 0x2f1   :  { %19135 = vst [vmem:[#allocation76_spill] sm:$0xff] %v15219_v36  ;;  %v15225_v6 = vpop.permute.xlu0 %12738  ;;  %v19142_v36 = vld [vmem:[#allocation31_spill] sm:$0xff] }
 0x2f2   :  { %19137 = vst [vmem:[#allocation47_spill] sm:$0xff] %v15225_v6  ;;  %v11976_v13 = vunpack.i.h.bf16 %v19142_v36 }
 0x2f3   :  { %11152 = vmatmul.mubr.msk.bf16.vlgmr.msra.gmra.mxu0 %vm1950_vm0, %v887_v4  ;;  %v1399_v4 = vpack.c.bf16 %v12155_v20, %v12155_v20  ;;  %v1396_v20 = vpack.c.bf16 %v12630_v40, %v12496_v44 }
 0x2f4   :  { %11164 = vmatpush3.bf16.xpose.msra.mxu0 %v3281_v39  ;;  %11167 = vmatprep.mubr.msk.bf16.mxu0 %vm1950_vm0, %v890_v57  ;;  %v15231_v58 = vpop.permute.xlu1 %12743  ;;  %v19140_v57 = vld [vmem:[#allocation92_spill] sm:$0xff]  ;;  %v889_v39 = vpack.c.bf16 %v12211_v56, %v12211_v56  ;;  %v19143_v56 = vld [vmem:[#allocation45_spill] sm:$0xff] }
 0x2f5   :  { %11824 = vmatprep.subr.msk.bf16.mxu0 %vm1950_vm0, %v1394_v16  ;;  %19139 = vst [vmem:[#allocation95_spill] sm:$0xff] %v15231_v58  ;;  %v12441_v2 = vunpack.i.h.bf16 %v19140_v57  ;;  %v15237_v6 = vpop.permute.xlu0 %12748  ;;  %v11975_v58 = vunpack.i.l.bf16 %v19142_v36  ;;  %v3341_v16 = vsel %vm1950_vm0, %v1397_v42, 0  ;;  %v12036_v23 = vunpack.i.h.bf16 %v19143_v56 }
 0x2f6   :  { %19141 = vst [vmem:[#allocation92_spill] sm:$0xff] %v15237_v6  ;;  %v12035_v1 = vunpack.i.l.bf16 %v19143_v56 }
 0x2f7   :  { %11158 = vmatpush3.bf16.xpose.msra.mxu1 %v3218_v29  ;;  %v12440_v29 = vunpack.i.l.bf16 %v19140_v57  ;;  %v892_v43 = vpack.c.bf16 %v12575_v50, %v12441_v2  ;;  %v894_v2 = vpack.c.bf16 %v11976_v13, %v11975_v58  ;;  %v12500_v58 = vunpack.i.l.bf16 %v14966_v54  ;;  %v19148_v13 = vld [vmem:[#allocation61_spill] sm:$0xff] }
 0x2f8   :  { %11825 = vmatprep.subr.msk.bf16.mxu1 %vm1950_vm0, %v1397_v42  ;;  %v15247_v50 = vpop.permute.xlu1 %12753  ;;  %v1398_v44 = vpack.c.bf16 %v12036_v23, %v12035_v1  ;;  %v3401_v42 = vsel %vm1950_vm0, %v1399_v4, 0  ;;  %v12576_v23 = vunpack.i.h.bf16 %v19138_v17  ;;  %v19150_v1 = vld [vmem:[#allocation32_spill] sm:$0xff] }
 0x2f9   :  { %19144 = vst [vmem:[#allocation31_spill] sm:$0xff] %v15247_v50  ;;  %v891_v57 = vpack.c.bf16 %v12440_v29, %v12440_v29  ;;  %v15251_v40 = vpop.permute.xlu0 %12758  ;;  %v3338_v29 = vsel %vm1950_vm0, %v1396_v20, 0  ;;  %v12095_v17 = vunpack.i.l.bf16 %v19150_v1 }
 0x2fa   :  { %19146 = vst [vmem:[#allocation45_spill] sm:$0xff] %v15251_v40 }
 0x2fc   :  { %11166 = vmatpush3.bf16.xpose.msra.mxu0 %v3278_v53  ;;  %v19145_v53 = vld [vmem:[#allocation75_spill] sm:$0xff] }
 0x2fd   :  { %11827 = vmatprep.subr.msk.bf16.mxu0 %vm1950_vm0, %v1399_v4  ;;  %v12276_v36 = vunpack.i.h.bf16 %v19145_v53  ;;  %v15264_v4 = vpop.permute.xlu0 %12768  ;;  %v12275_v56 = vunpack.i.l.bf16 %v19145_v53 }
 0x2fe   :  { %11160 = vmatmul.mubr.msk.bf16.vlgmr.msra.gmra.mxu1 %vm1950_vm0, %v889_v39  ;;  %19149 = vst [vmem:[#allocation61_spill] sm:$0xff] %v15264_v4 }
 0x2ff   :  { %11172 = vmatpush3.bf16.xpose.msra.mxu1 %v3341_v16  ;;  %11175 = vmatprep.mubr.msk.bf16.mxu1 %vm1950_vm0, %v892_v43  ;;  %v1401_v39 = vpack.c.bf16 %v12276_v36, %v12276_v36  ;;  %v15257_v43 = vpop.permute.xlu1 %12763  ;;  %v12215_v16 = vunpack.i.l.bf16 %v19148_v13  ;;  %v3398_v36 = vsel %vm1950_vm0, %v1398_v44, 0 }
 0x300   :  { %11826 = vmatprep.subr.msk.bf16.mxu1 %vm1950_vm0, %v1396_v20  ;;  %19147 = vst [vmem:[#allocation75_spill] sm:$0xff] %v15257_v43  ;;  %v12156_v20 = vunpack.i.h.bf16 %v19136_v7  ;;  %v19152_v43 = vld [vmem:[#allocation64_spill] sm:$0xff] }
 0x301   :  { %v12336_v4 = vunpack.i.h.bf16 %v19152_v43  ;;  %v12335_v53 = vunpack.i.l.bf16 %v19152_v43  ;;  %v12636_v43 = vunpack.i.h.bf16 %v15005_v10 }
 0x302   :  { %v1400_v50 = vpack.c.bf16 %v12275_v56, %v12156_v20 }
 0x303   :  { %11168 = vmatmul.mubr.msk.bf16.vlgmr.msra.gmra.mxu0 %vm1950_vm0, %v891_v57  ;;  %v12096_v57 = vunpack.i.h.bf16 %v19150_v1  ;;  %v15270_v40 = vpop.permute.xlu1 %12773  ;;  %v898_v1 = vpack.c.bf16 %v12336_v4, %v12335_v53  ;;  %v1405_v20 = vpack.c.bf16 %v12636_v43, %v12636_v43  ;;  %v19157_v4 = vld [vmem:[#allocation49_spill] sm:$0xff] }
 0x304   :  { %11180 = vmatpush3.bf16.xpose.msra.mxu0 %v3401_v42  ;;  %11183 = vmatprep.mubr.msk.bf16.mxu0 %vm1950_vm0, %v894_v2  ;;  %v1403_v2 = vpack.c.bf16 %v12500_v58, %v12500_v58  ;;  %v893_v42 = vpack.c.bf16 %v12576_v23, %v12576_v23  ;;  %19151 = vst [vmem:[#allocation32_spill] sm:$0xff] %v15270_v40  ;;  %v19153_v58 = vld [vmem:[#allocation78_spill] sm:$0xff]  ;;  %v15280_v40 = vpop.permute.xlu0 %12778 }
 0x305   :  { %11828 = vmatprep.subr.msk.bf16.mxu0 %vm1950_vm0, %v1398_v44  ;;  %v3461_v44 = vsel %vm1950_vm0, %v1401_v39, 0  ;;  %v12391_v7 = vunpack.i.h.bf16 %v19153_v58  ;;  %v12390_v23 = vunpack.i.l.bf16 %v19153_v58  ;;  %19154 = vst [vmem:[#allocation64_spill] sm:$0xff] %v15280_v40  ;;  %v12635_v58 = vunpack.i.l.bf16 %v15005_v10 }
 0x307   :  { %11174 = vmatpush3.bf16.xpose.msra.mxu1 %v3338_v29  ;;  %v896_v29 = vpack.c.bf16 %v12215_v16, %v12096_v57  ;;  %v895_v16 = vpack.c.bf16 %v12095_v17, %v12095_v17  ;;  %v15285_v56 = vpop.permute.xlu1 %12783  ;;  %v1402_v57 = vpack.c.bf16 %v12391_v7, %v12390_v23  ;;  %v12160_v17 = vunpack.i.l.bf16 %v19157_v4  ;;  %v19160_v23 = vld [vmem:[#allocation93_spill] sm:$0xff] }
 0x308   :  { %11829 = vmatprep.subr.msk.bf16.mxu1 %vm1950_vm0, %v1401_v39  ;;  %19155 = vst [vmem:[#allocation78_spill] sm:$0xff] %v15285_v56  ;;  %v3521_v39 = vsel %vm1950_vm0, %v1403_v2, 0 }
 0x309   :  { %v1407_v7 = vpack.c.bf16 %v12160_v17, %v12160_v17 }
 0x30b   :  { %v15296_v53 = vpop.permute.xlu1 %12793 }
 0x30c   :  { %11182 = vmatpush3.bf16.xpose.msra.mxu0 %v3398_v36  ;;  %v15290_v36 = vpop.permute.xlu0 %12788  ;;  %19158 = vst [vmem:[#allocation49_spill] sm:$0xff] %v15296_v53 }
 0x30d   :  { %11831 = vmatprep.subr.msk.bf16.mxu0 %vm1950_vm0, %v1403_v2  ;;  %19156 = vst [vmem:[#allocation115_spill] sm:$0xff] %v15290_v36  ;;  %v19159_v2 = vld [vmem:[#allocation97_spill] sm:$0xff] }
 0x30e   :  { %11176 = vmatmul.mubr.msk.bf16.vlgmr.msra.gmra.mxu1 %vm1950_vm0, %v893_v42  ;;  %v3458_v42 = vsel %vm1950_vm0, %v1400_v50, 0  ;;  %v19162_v36 = vld [vmem:[#allocation33_spill] sm:$0xff] }
 0x30f   :  { %11188 = vmatpush3.bf16.xpose.msra.mxu1 %v3461_v44  ;;  %11191 = vmatprep.mubr.msk.bf16.mxu1 %vm1950_vm0, %v896_v29  ;;  %v12216_v29 = vunpack.i.h.bf16 %v19148_v13  ;;  %v12580_v44 = vunpack.i.l.bf16 %v19159_v2  ;;  %v12445_v13 = vunpack.i.l.bf16 %v19160_v23  ;;  %v11981_v53 = vunpack.i.h.bf16 %v19162_v36  ;;  %v15310_v56 = vpop.permute.xlu1 %12803 }
 0x310   :  { %11830 = vmatprep.subr.msk.bf16.mxu1 %vm1950_vm0, %v1400_v50  ;;  %v3518_v50 = vsel %vm1950_vm0, %v1402_v57, 0  ;;  %v11980_v10 = vunpack.i.l.bf16 %v19162_v36  ;;  %19163 = vst [vmem:[#allocation93_spill] sm:$0xff] %v15310_v56 }
 0x311   :  { %v897_v43 = vpack.c.bf16 %v12216_v29, %v12216_v29  ;;  %v19164_v29 = vld [vmem:[#allocation46_spill] sm:$0xff] }
 0x312   :  { %v902_v36 = vpack.c.bf16 %v11981_v53, %v11980_v10 }
 0x313   :  { %11184 = vmatmul.mubr.msk.bf16.vlgmr.msra.gmra.mxu0 %vm1950_vm0, %v895_v16  ;;  %v12446_v16 = vunpack.i.h.bf16 %v19160_v23 }
 0x314   :  { %11196 = vmatpush3.bf16.xpose.msra.mxu0 %v3521_v39  ;;  %11199 = vmatprep.mubr.msk.bf16.mxu0 %vm1950_vm0, %v898_v1  ;;  %v15302_v1 = vpop.permute.xlu0 %12798  ;;  %v12501_v39 = vunpack.i.h.bf16 %v14966_v54  ;;  %v12040_v54 = vunpack.i.l.bf16 %v19164_v29 }
 0x315   :  { %11832 = vmatprep.subr.msk.bf16.mxu0 %vm1950_vm0, %v1402_v57  ;;  %19161 = vst [vmem:[#allocation97_spill] sm:$0xff] %v15302_v1  ;;  %v3581_v57 = vsel %vm1950_vm0, %v1405_v20, 0  ;;  %v12041_v1 = vunpack.i.h.bf16 %v19164_v29 }
 0x316   :  { %v1404_v17 = vpack.c.bf16 %v12635_v58, %v12501_v39  ;;  %v19166_v58 = vld [vmem:[#allocation77_spill] sm:$0xff] }
 0x317   :  { %11190 = vmatpush3.bf16.xpose.msra.mxu1 %v3458_v42  ;;  %v900_v42 = vpack.c.bf16 %v12580_v44, %v12446_v16  ;;  %v899_v44 = vpack.c.bf16 %v12445_v13, %v12445_v13  ;;  %v12281_v16 = vunpack.i.h.bf16 %v19166_v58 }
 0x318   :  { %11833 = vmatprep.subr.msk.bf16.mxu1 %vm1950_vm0, %v1405_v20  ;;  %v15318_v23 = vpop.permute.xlu0 %12808  ;;  %v3641_v20 = vsel %vm1950_vm0, %v1407_v7, 0  ;;  %v3578_v13 = vsel %vm1950_vm0, %v1404_v17, 0 }
 0x319   :  { %19165 = vst [vmem:[#allocation33_spill] sm:$0xff] %v15318_v23  ;;  %v1409_v39 = vpack.c.bf16 %v12281_v16, %v12281_v16  ;;  %v12161_v16 = vunpack.i.h.bf16 %v19157_v4 }
 0x31c   :  { %11198 = vmatpush3.bf16.xpose.msra.mxu0 %v3518_v50  ;;  %v1406_v50 = vpack.c.bf16 %v12041_v1, %v12040_v54  ;;  %v15329_v53 = vpop.permute.xlu0 %12818  ;;  %v12581_v1 = vunpack.i.h.bf16 %v19159_v2  ;;  %v19171_v54 = vld [vmem:[#allocation34_spill] sm:$0xff] }
 0x31d   :  { %11835 = vmatprep.subr.msk.bf16.mxu0 %vm1950_vm0, %v1407_v7  ;;  %19168 = vst [vmem:[#allocation77_spill] sm:$0xff] %v15329_v53  ;;  %v19169_v7 = vld [vmem:[#allocation63_spill] sm:$0xff] }
 0x31e   :  { %11192 = vmatmul.mubr.msk.bf16.vlgmr.msra.gmra.mxu1 %vm1950_vm0, %v897_v43  ;;  %v15323_v43 = vpop.permute.xlu1 %12813  ;;  %v12220_v10 = vunpack.i.l.bf16 %v19169_v7 }
 0x31f   :  { %11204 = vmatpush3.bf16.xpose.msra.mxu1 %v3581_v57  ;;  %11207 = vmatprep.mubr.msk.bf16.mxu1 %vm1950_vm0, %v900_v42  ;;  %19167 = vst [vmem:[#allocation46_spill] sm:$0xff] %v15323_v43  ;;  %v12505_v42 = vunpack.i.l.bf16 %v14981_v45  ;;  %v12280_v57 = vunpack.i.l.bf16 %v19166_v58  ;;  %v19173_v43 = vld [vmem:[#allocation66_spill] sm:$0xff] }
 0x320   :  { %11834 = vmatprep.subr.msk.bf16.mxu1 %vm1950_vm0, %v1404_v17  ;;  %v3638_v17 = vsel %vm1950_vm0, %v1406_v50, 0  ;;  %v15341_v53 = vpop.permute.xlu0 %12828  ;;  %v12341_v58 = vunpack.i.h.bf16 %v19173_v43 }
 0x321   :  { %19172 = vst [vmem:[#allocation34_spill] sm:$0xff] %v15341_v53  ;;  %v1408_v56 = vpack.c.bf16 %v12280_v57, %v12161_v16 }
 0x322   :  { %v15335_v29 = vpop.permute.xlu1 %12823 }
 0x323   :  { %11200 = vmatmul.mubr.msk.bf16.vlgmr.msra.gmra.mxu0 %vm1950_vm0, %v899_v44  ;;  %19170 = vst [vmem:[#allocation63_spill] sm:$0xff] %v15335_v29  ;;  %v12101_v44 = vunpack.i.h.bf16 %v19171_v54  ;;  %v12340_v29 = vunpack.i.l.bf16 %v19173_v43  ;;  %v12641_v43 = vunpack.i.h.bf16 %v15031_v49 }
 0x324   :  { %11212 = vmatpush3.bf16.xpose.msra.mxu0 %v3641_v20  ;;  %11215 = vmatprep.mubr.msk.bf16.mxu0 %vm1950_vm0, %v902_v36  ;;  %v1411_v36 = vpack.c.bf16 %v12505_v42, %v12505_v42  ;;  %v901_v20 = vpack.c.bf16 %v12581_v1, %v12581_v1  ;;  %v19174_v42 = vld [vmem:[#allocation80_spill] sm:$0xff] }
 0x325   :  { %11836 = vmatprep.subr.msk.bf16.mxu0 %vm1950_vm0, %v1406_v50  ;;  %v904_v2 = vpack.c.bf16 %v12220_v10, %v12101_v44  ;;  %v3701_v50 = vsel %vm1950_vm0, %v1409_v39, 0  ;;  %v12396_v4 = vunpack.i.h.bf16 %v19174_v42  ;;  %v12395_v1 = vunpack.i.l.bf16 %v19174_v42 }
 0x326   :  { %v15351_v10 = vpop.permute.xlu1 %12833  ;;  %v906_v44 = vpack.c.bf16 %v12341_v58, %v12340_v29  ;;  %v1413_v16 = vpack.c.bf16 %v12641_v43, %v12641_v43  ;;  %v19178_v29 = vld [vmem:[#allocation51_spill] sm:$0xff]  ;;  %v12221_v58 = vunpack.i.h.bf16 %v19169_v7 }
 0x327   :  { %11206 = vmatpush3.bf16.xpose.msra.mxu1 %v3578_v13  ;;  %v12100_v13 = vunpack.i.l.bf16 %v19171_v54  ;;  %19175 = vst [vmem:[#allocation66_spill] sm:$0xff] %v15351_v10  ;;  %v1410_v57 = vpack.c.bf16 %v12396_v4, %v12395_v1  ;;  %v12640_v4 = vunpack.i.l.bf16 %v15031_v49  ;;  %v12166_v23 = vunpack.i.h.bf16 %v19178_v29 }
 0x328   :  { %11837 = vmatprep.subr.msk.bf16.mxu1 %vm1950_vm0, %v1409_v39  ;;  %v3761_v39 = vsel %vm1950_vm0, %v1411_v36, 0 }
 0x329   :  { %v903_v54 = vpack.c.bf16 %v12100_v13, %v12100_v13  ;;  %v3698_v13 = vsel %vm1950_vm0, %v1408_v56, 0  ;;  %v3758_v43 = vsel %vm1950_vm0, %v1410_v57, 0 }
 0x32c   :  { %11214 = vmatpush3.bf16.xpose.msra.mxu0 %v3638_v17  ;;  %v15355_v17 = vpop.permute.xlu0 %12838 }
 0x32d   :  { %11839 = vmatprep.subr.msk.bf16.mxu0 %vm1950_vm0, %v1411_v36  ;;  %19176 = vst [vmem:[#allocation80_spill] sm:$0xff] %v15355_v17 }
 0x32e   :  { %11208 = vmatmul.mubr.msk.bf16.vlgmr.msra.gmra.mxu1 %vm1950_vm0, %v901_v20  ;;  %v15361_v20 = vpop.permute.xlu1 %12843 }
 0x32f   :  { %11220 = vmatpush3.bf16.xpose.msra.mxu1 %v3701_v50  ;;  %11223 = vmatprep.mubr.msk.bf16.mxu1 %vm1950_vm0, %v904_v2  ;;  %19177 = vst [vmem:[#allocation116_spill] sm:$0xff] %v15361_v20  ;;  %v12165_v2 = vunpack.i.l.bf16 %v19178_v29  ;;  %v19179_v50 = vld [vmem:[#allocation99_spill] sm:$0xff] }
 0x330   :  { %11838 = vmatprep.subr.msk.bf16.mxu1 %vm1950_vm0, %v1408_v56  ;;  %v12585_v42 = vunpack.i.l.bf16 %v19179_v50  ;;  %v15368_v36 = vpop.permute.xlu0 %12848  ;;  %v12506_v56 = vunpack.i.h.bf16 %v14981_v45 }
 0x331   :  { %19180 = vst [vmem:[#allocation51_spill] sm:$0xff] %v15368_v36  ;;  %v1415_v1 = vpack.c.bf16 %v12165_v2, %v12165_v2  ;;  %v19183_v36 = vld [vmem:[#allocation35_spill] sm:$0xff] }
 0x332   :  { %v15374_v20 = vpop.permute.xlu1 %12853  ;;  %v11986_v10 = vunpack.i.h.bf16 %v19183_v36  ;;  %v11985_v49 = vunpack.i.l.bf16 %v19183_v36  ;;  %v1412_v2 = vpack.c.bf16 %v12640_v4, %v12506_v56 }
 0x333   :  { %11216 = vmatmul.mubr.msk.bf16.vlgmr.msra.gmra.mxu0 %vm1950_vm0, %v903_v54  ;;  %v19181_v54 = vld [vmem:[#allocation94_spill] sm:$0xff]  ;;  %19182 = vst [vmem:[#allocation99_spill] sm:$0xff] %v15374_v20 }
 0x334   :  { %11228 = vmatpush3.bf16.xpose.msra.mxu0 %v3761_v39  ;;  %11231 = vmatprep.mubr.msk.bf16.mxu0 %vm1950_vm0, %v906_v44  ;;  %v12451_v44 = vunpack.i.h.bf16 %v19181_v54  ;;  %v905_v39 = vpack.c.bf16 %v12221_v58, %v12221_v58  ;;  %v12450_v7 = vunpack.i.l.bf16 %v19181_v54  ;;  %v4840_v17 = vpop.xlane.xlu0 %4839  ;;  %v19184_v58 = vld [vmem:[#allocation48_spill] sm:$0xff]  ;;  %v910_v54 = vpack.c.bf16 %v11986_v10, %v11985_v49 }
 0x335   :  { %11840 = vmatprep.subr.msk.bf16.mxu0 %vm1950_vm0, %v1410_v57  ;;  %v3821_v57 = vsel %vm1950_vm0, %v1413_v16, 0  ;;  %v12046_v45 = vunpack.i.h.bf16 %v19184_v58  ;;  %v12045_v20 = vunpack.i.l.bf16 %v19184_v58  ;;  %v12510_v49 = vunpack.i.l.bf16 %v14997_v9 }
 0x336   :  { %v15387_v53 = vpop.permute.xlu1 %12858  ;;  %v12586_v58 = vunpack.i.h.bf16 %v19179_v50 }
 0x337   :  { %11222 = vmatpush3.bf16.xpose.msra.mxu1 %v3698_v13  ;;  %v908_v13 = vpack.c.bf16 %v12585_v42, %v12451_v44  ;;  %v907_v42 = vpack.c.bf16 %v12450_v7, %v12450_v7  ;;  %v19185_v44 = vld [vmem:[#allocation79_spill] sm:$0xff]  ;;  %19186 = vst [vmem:[#allocation94_spill] sm:$0xff] %v15387_v53  ;;  %v1414_v36 = vpack.c.bf16 %v12046_v45, %v12045_v20 }
 0x338   :  { %11841 = vmatprep.subr.msk.bf16.mxu1 %vm1950_vm0, %v1413_v16  ;;  %v4837_v4 = vpop.xlane.xlu0 %4836  ;;  %v3881_v16 = vsel %vm1950_vm0, %v1415_v1, 0 }
 0x339   :  { %v5265_v20 = vsub.f32 %v14651_v0, %v4837_v4 }
 0x33b   :  { %v5410_v4 = vmul.f32 1.442695, %v5265_v20 }
 0x33c   :  { %11230 = vmatpush3.bf16.xpose.msra.mxu0 %v3758_v43  ;;  %v12286_v43 = vunpack.i.h.bf16 %v19185_v44 }
 0x33d   :  { %11843 = vmatprep.subr.msk.bf16.mxu0 %vm1950_vm0, %v1415_v1  ;;  %13300 = vpow2.f32 %v5410_v4 }
 0x33e   :  { %11224 = vmatmul.mubr.msk.bf16.vlgmr.msra.gmra.mxu1 %vm1950_vm0, %v905_v39  ;;  %v1417_v7 = vpack.c.bf16 %v12286_v43, %v12286_v43  ;;  %v5266_v43 = vsub.f32 %v14585_v3, %v4840_v17  ;;  %v909_v3 = vpack.c.bf16 %v12586_v58, %v12586_v58  ;;  %v19190_v58 = vld [vmem:[#allocation82_spill] sm:$0xff] }
 0x33f   :  { %11236 = vmatpush3.bf16.xpose.msra.mxu1 %v3821_v57  ;;  %11239 = vmatprep.mubr.msk.bf16.mxu1 %vm1950_vm0, %v908_v13  ;;  %v3818_v13 = vsel %vm1950_vm0, %v1412_v2, 0  ;;  %v4834_v57 = vpop.xlane.xlu1 %4833 }
 0x340   :  { %11842 = vmatprep.subr.msk.bf16.mxu1 %vm1950_vm0, %v1412_v2  ;;  %v12285_v2 = vunpack.i.l.bf16 %v19185_v44  ;;  %v5412_v44 = vmul.f32 1.442695, %v5266_v43  ;;  %v5264_v20 = vsub.f32 %v14592_v8, %v4834_v57  ;;  %v3941_v29 = vsel %vm1950_vm0, %v1417_v7, 0 }
 0x342   :  { %13302 = vpow2.f32 %v5412_v44  ;;  %v5408_v43 = vmul.f32 1.442695, %v5264_v20  ;;  %v4846_v44 = vpop.xlane.xlu0 %4845 }
 0x343   :  { %v15389_v39 = vpop.f32.mrf.mxu0  ;;  %11232 = vmatmul.mubr.msk.bf16.vlgmr.msra.gmra.mxu0 %vm1950_vm0, %v907_v42  ;;  %v19187_v42 = vld [vmem:[#allocation65_spill] sm:$0xff]  ;;  %v4849_v6 = vpop.xlane.xlu1 %4848 }
 0x344   :  { %11244 = vmatpush3.bf16.xpose.msra.mxu0 %v3881_v16  ;;  %11247 = vmatprep.mubr.msk.bf16.mxu0 %vm1950_vm0, %v910_v54  ;;  %v4892_v56 = vsel %vm4831_vm1, %v15389_v39, -inf  ;;  %v12225_v54 = vunpack.i.l.bf16 %v19187_v42  ;;  %v5269_v4 = vsub.f32 %v14613_v46, %v4849_v6  ;;  %13304 = vpow2.f32 %v5408_v43 }
 0x345   :  { %11844 = vmatprep.subr.msk.bf16.mxu0 %vm1950_vm0, %v1414_v36  ;;  %4893 = vmax.xlane.f32.xlu0 %v4892_v56  ;;  %v15397_v10 = vpop.f32.mrf.mxu0  ;;  %v19188_v56 = vld [vmem:[#allocation36_spill] sm:$0xff] }
 0x346   :  { %v4886_v45 = vsel %vm4831_vm1, %v15397_v10, -inf  ;;  %v12106_v50 = vunpack.i.h.bf16 %v19188_v56  ;;  %v12105_v53 = vunpack.i.l.bf16 %v19188_v56  ;;  %v12400_v56 = vunpack.i.l.bf16 %v19190_v58 }
 0x347   :  { %v11042_v1 = vpop.f32.mrf.mxu0  ;;  %11238 = vmatpush3.bf16.xpose.msra.mxu1 %v3818_v13  ;;  %v1419_v13 = vpack.c.bf16 %v12510_v49, %v12510_v49  ;;  %v5418_v20 = vmul.f32 1.442695, %v5269_v4 }
 0x348   :  { %11845 = vmatprep.subr.msk.bf16.mxu1 %vm1950_vm0, %v1417_v7  ;;  %v3878_v1 = vsel %vm1950_vm0, %v1414_v36, 0  ;;  %v912_v17 = vpack.c.bf16 %v12225_v54, %v12106_v50  ;;  %v12401_v54 = vunpack.i.h.bf16 %v19190_v58  ;;  %v12646_v7 = vunpack.i.h.bf16 %v15051_v48  ;;  %v19191_v58 = vld [vmem:[#allocation53_spill] sm:$0xff] }
 0x349   :  { %4887 = vmax.xlane.f32.xlu0 %v4886_v45  ;;  %v15408_v0 = vpop.f32.mrf.mxu0  ;;  %v19189_v45 = vld [vmem:[#allocation68_spill] sm:$0xff]  ;;  %13306 = vpow2.f32 %v5418_v20 }
 0x34a   :  { %v4889_v16 = vsel %vm4831_vm1, %v15408_v0, -inf  ;;  %v12346_v40 = vunpack.i.h.bf16 %v19189_v45  ;;  %v12345_v49 = vunpack.i.l.bf16 %v19189_v45  ;;  %v4001_v45 = vsel %vm1950_vm0, %v1419_v13, 0 }
 0x34b   :  { %4890 = vmax.xlane.f32.xlu1 %v4889_v16  ;;  %v1416_v16 = vpack.c.bf16 %v12285_v2, %v12166_v23  ;;  %v911_v23 = vpack.c.bf16 %v12105_v53, %v12105_v53  ;;  %v1421_v6 = vpack.c.bf16 %v12646_v7, %v12646_v7 }
 0x34c   :  { %11246 = vmatpush3.bf16.xpose.msra.mxu0 %v3878_v1  ;;  %v914_v2 = vpack.c.bf16 %v12346_v40, %v12345_v49  ;;  %v1418_v1 = vpack.c.bf16 %v12401_v54, %v12400_v56  ;;  %v12170_v54 = vunpack.i.l.bf16 %v19191_v58 }
 0x34d   :  { %11847 = vmatprep.subr.msk.bf16.mxu0 %vm1950_vm0, %v1419_v13 }
 0x34e   :  { %v15421_v36 = vpop.f32.mrf.mxu1  ;;  %11240 = vmatmul.mubr.msk.bf16.vlgmr.msra.gmra.mxu1 %vm1950_vm0, %v909_v3  ;;  %v4843_v3 = vpop.xlane.xlu1 %4842 }
 0x34f   :  { %11252 = vmatpush3.bf16.xpose.msra.mxu1 %v3941_v29  ;;  %11255 = vmatprep.mubr.msk.bf16.mxu1 %vm1950_vm0, %v912_v17  ;;  %v4901_v8 = vsel %vm4831_vm1, %v15421_v36, -inf  ;;  %v5267_v13 = vsub.f32 %v14619_v55, %v4843_v3  ;;  %v3938_v29 = vsel %vm1950_vm0, %v1416_v16, 0  ;;  %v19193_v3 = vld [vmem:[#allocation96_spill] sm:$0xff] }
 0x350   :  { %v15430_v57 = vpop.f32.mrf.mxu1  ;;  %11846 = vmatprep.subr.msk.bf16.mxu1 %vm1950_vm0, %v1416_v16  ;;  %4902 = vmax.xlane.f32.xlu1 %v4901_v8  ;;  %v12226_v8 = vunpack.i.h.bf16 %v19187_v42  ;;  %v1423_v42 = vpack.c.bf16 %v12170_v54, %v12170_v54  ;;  %v5268_v54 = vsub.f32 %v14681_v27, %v4846_v44  ;;  %v4061_v27 = vsel %vm1950_vm0, %v1421_v6, 0  ;;  %v19195_v44 = vld [vmem:[#allocation50_spill] sm:$0xff] }
 0x351   :  { %v4895_v53 = vsel %vm4831_vm1, %v15430_v57, -inf  ;;  %v5414_v4 = vmul.f32 1.442695, %v5267_v13 }
 0x352   :  { %v11050_v50 = vpop.f32.mrf.mxu1  ;;  %v913_v13 = vpack.c.bf16 %v12226_v8, %v12226_v8 }
 0x353   :  { %v15435_v17 = vpop.f32.mrf.mxu0  ;;  %11248 = vmatmul.mubr.msk.bf16.vlgmr.msra.gmra.mxu0 %vm1950_vm0, %v911_v23  ;;  %v19192_v23 = vld [vmem:[#allocation101_spill] sm:$0xff]  ;;  %v15462_v50 = vpop.eup %13300  ;;  %13308 = vpow2.f32 %v5414_v4 }
 0x354   :  { %11260 = vmatpush3.bf16.xpose.msra.mxu0 %v4001_v45  ;;  %11263 = vmatprep.mubr.msk.bf16.mxu0 %vm1950_vm0, %v914_v2  ;;  %v4910_v40 = vsel %vm4831_vm1, %v15435_v17, -inf  ;;  %v15448_v49 = vpop.f32.mrf.mxu1  ;;  %v12590_v43 = vunpack.i.l.bf16 %v19192_v23  ;;  %v12645_v2 = vunpack.i.l.bf16 %v15051_v48  ;;  %v12456_v45 = vunpack.i.h.bf16 %v19193_v3  ;;  %v19196_v4 = vld [vmem:[#allocation81_spill] sm:$0xff] }
 0x355   :  { %11848 = vmatprep.subr.msk.bf16.mxu0 %vm1950_vm0, %v1418_v1  ;;  %4896 = vmax.xlane.f32.xlu1 %v4895_v53  ;;  %v15445_v46 = vpop.f32.mrf.mxu0  ;;  %v4898_v55 = vsel %vm4831_vm1, %v15448_v49, -inf  ;;  %v12511_v53 = vunpack.i.h.bf16 %v14997_v9  ;;  %v3998_v48 = vsel %vm1950_vm0, %v1418_v1, 0  ;;  %v5699_v8 = vsel %vm4831_vm1, %v15462_v50, 0.0 }
 0x356   :  { %4911 = vmax.xlane.f32.xlu0 %v4910_v40  ;;  %v4858_v40 = vpop.xlane.xlu0 %4857  ;;  %v916_v22 = vpack.c.bf16 %v12590_v43, %v12456_v45  ;;  %v4904_v9 = vsel %vm4831_vm1, %v15445_v46, -inf  ;;  %v12051_v43 = vunpack.i.h.bf16 %v19195_v44 }
 0x357   :  { %v11058_v56 = vpop.f32.mrf.mxu0  ;;  %11254 = vmatpush3.bf16.xpose.msra.mxu1 %v3938_v29  ;;  %v19194_v29 = vld [vmem:[#allocation37_spill] sm:$0xff]  ;;  %v1420_v60 = vpack.c.bf16 %v12645_v2, %v12511_v53  ;;  %v5272_v1 = vsub.f32 %v14659_v26, %v4858_v40  ;;  %v12050_v2 = vunpack.i.l.bf16 %v19195_v44  ;;  %v5416_v53 = vmul.f32 1.442695, %v5268_v54 }
 0x358   :  { %11849 = vmatprep.subr.msk.bf16.mxu1 %vm1950_vm0, %v1421_v6  ;;  %v11991_v56 = vunpack.i.h.bf16 %v19194_v29  ;;  %v11990_v20 = vunpack.i.l.bf16 %v19194_v29  ;;  %v4121_v54 = vsel %vm1950_vm0, %v1423_v42, 0 }
 0x359   :  { %v15458_v7 = vpop.f32.mrf.mxu0  ;;  %13310 = vpow2.f32 %v5416_v53 }
 0x35a   :  { %4899 = vmax.xlane.f32.xlu0 %v4898_v55  ;;  %v4907_v16 = vsel %vm4831_vm1, %v15458_v7, -inf  ;;  %v12455_v55 = vunpack.i.l.bf16 %v19193_v3  ;;  %v12291_v3 = vunpack.i.h.bf16 %v19196_v4  ;;  %v4852_v44 = vpop.xlane.xlu0 %4851 }
 0x35b   :  { %4908 = vmax.xlane.f32.xlu1 %v4907_v16  ;;  %v15474_v16 = vpop.eup %13302 }
 0x35c   :  { %11262 = vmatpush3.bf16.xpose.msra.mxu0 %v3998_v48  ;;  %v915_v45 = vpack.c.bf16 %v12455_v55, %v12455_v55  ;;  %v5702_v40 = vsel %vm4831_vm1, %v15474_v16, 0.0  ;;  %v15492_v6 = vpop.eup %13304  ;;  %v918_v48 = vpack.c.bf16 %v11991_v56, %v11990_v20  ;;  %v1425_v56 = vpack.c.bf16 %v12291_v3, %v12291_v3 }
 0x35d   :  { %11851 = vmatprep.subr.msk.bf16.mxu0 %vm1950_vm0, %v1423_v42  ;;  %v15511_v3 = vpop.eup %13306 }
 0x35e   :  { %4905 = vmax.xlane.f32.xlu0 %v4904_v9  ;;  %v15477_v29 = vpop.f32.mrf.mxu1  ;;  %11256 = vmatmul.mubr.msk.bf16.vlgmr.msra.gmra.mxu1 %vm1950_vm0, %v913_v13  ;;  %v5424_v13 = vmul.f32 1.442695, %v5272_v1  ;;  %v4855_v9 = vpop.xlane.xlu1 %4854  ;;  %v5696_v1 = vsel %vm4831_vm1, %v15492_v6, 0.0 }
 0x35f   :  { %5700 = vadd.xlane.f32.xlu1 %v5699_v8  ;;  %11268 = vmatpush3.bf16.xpose.msra.mxu1 %v4061_v27  ;;  %v1422_v27 = vpack.c.bf16 %v12051_v43, %v12050_v2  ;;  %v5271_v20 = vsub.f32 %v15002_v12, %v4855_v9  ;;  %v5270_v2 = vsub.f32 %v14665_v33, %v4852_v44  ;;  %v12515_v12 = vunpack.i.l.bf16 %v15018_v19 }
 0x360   :  { %11271 = vmatprep.mubr.msk.bf16.mxu1 %vm1950_vm0, %v916_v22  ;;  %v15486_v26 = vpop.f32.mrf.mxu1  ;;  %11850 = vmatprep.subr.msk.bf16.mxu1 %vm1950_vm0, %v1420_v60  ;;  %v4919_v22 = vsel %vm4831_vm1, %v15477_v29, -inf  ;;  %13312 = vpow2.f32 %v5424_v13  ;;  %v12591_v9 = vunpack.i.h.bf16 %v19192_v23 }
 0x361   :  { %v4913_v42 = vsel %vm4831_vm1, %v15486_v26, -inf  ;;  %v5422_v33 = vmul.f32 1.442695, %v5271_v20  ;;  %v5420_v44 = vmul.f32 1.442695, %v5270_v2  ;;  %v1427_v23 = vpack.c.bf16 %v12515_v12, %v12515_v12 }
 0x362   :  { %5703 = vadd.xlane.f32.xlu0 %v5702_v40  ;;  %v11066_v8 = vpop.f32.mrf.mxu1  ;;  %v19197_v40 = vld [vmem:[#allocation67_spill] sm:$0xff]  ;;  %v4118_v20 = vsel %vm1950_vm0, %v1422_v27, 0  ;;  %v917_v62 = vpack.c.bf16 %v12591_v9, %v12591_v9  ;;  %v4867_v38 = vpop.xlane.xlu1 %4866  ;;  %v19200_v9 = vld [vmem:[#allocation84_spill] sm:$0xff] }
 0x363   :  { %11264 = vmatmul.mubr.msk.bf16.vlgmr.msra.gmra.mxu0 %vm1950_vm0, %v915_v45  ;;  %4920 = vmax.xlane.f32.xlu1 %v4919_v22  ;;  %v15497_v55 = vpop.f32.mrf.mxu0  ;;  %v4058_v45 = vsel %vm1950_vm0, %v1420_v60, 0  ;;  %v19198_v8 = vld [vmem:[#allocation38_spill] sm:$0xff]  ;;  %v12290_v60 = vunpack.i.l.bf16 %v19196_v4  ;;  %13314 = vpow2.f32 %v5422_v33  ;;  %v12406_v33 = vunpack.i.h.bf16 %v19200_v9 }
 0x364   :  { %11276 = vmatpush3.bf16.xpose.msra.mxu0 %v4121_v54  ;;  %11279 = vmatprep.mubr.msk.bf16.mxu0 %vm1950_vm0, %v918_v48  ;;  %v12230_v48 = vunpack.i.l.bf16 %v19197_v40  ;;  %v4928_v13 = vsel %vm4831_vm1, %v15497_v55, -inf  ;;  %v12111_v22 = vunpack.i.h.bf16 %v19198_v8  ;;  %v15521_v54 = vpop.f32.mrf.mxu1  ;;  %v19199_v4 = vld [vmem:[#allocation70_spill] sm:$0xff]  ;;  %13316 = vpow2.f32 %v5420_v44 }
 0x365   :  { %11852 = vmatprep.subr.msk.bf16.mxu0 %vm1950_vm0, %v1422_v27  ;;  %v15505_v43 = vpop.f32.mrf.mxu0  ;;  %v12351_v2 = vunpack.i.h.bf16 %v19199_v4  ;;  %v4916_v12 = vsel %vm4831_vm1, %v15521_v54, -inf  ;;  %v4864_v27 = vpop.xlane.xlu0 %4863 }
 0x366   :  { %5697 = vadd.xlane.f32.xlu0 %v5696_v1  ;;  %v5711_v1 = vsel %vm4831_vm1, %v15511_v3, 0.0  ;;  %v920_v18 = vpack.c.bf16 %v12230_v48, %v12111_v22  ;;  %v4181_v48 = vsel %vm1950_vm0, %v1425_v56, 0  ;;  %v12405_v22 = vunpack.i.l.bf16 %v19200_v9  ;;  %v4861_v30 = vpop.xlane.xlu1 %4860 }
 0x367   :  { %4914 = vmax.xlane.f32.xlu1 %v4913_v42  ;;  %v11074_v53 = vpop.f32.mrf.mxu0  ;;  %11270 = vmatpush3.bf16.xpose.msra.mxu1 %v4058_v45  ;;  %v15525_v42 = vpop.eup %13308  ;;  %v12110_v45 = vunpack.i.l.bf16 %v19198_v8  ;;  %v5274_v44 = vsub.f32 %v15026_v63, %v4864_v27 }
 0x368   :  { %11853 = vmatprep.subr.msk.bf16.mxu1 %vm1950_vm0, %v1425_v56  ;;  %v12171_v53 = vunpack.i.h.bf16 %v19191_v58  ;;  %v5705_v58 = vsel %vm4831_vm1, %v15525_v42, 0.0  ;;  %v4922_v56 = vsel %vm4831_vm1, %v15505_v43, -inf }
 0x36a   :  { %4929 = vmax.xlane.f32.xlu0 %v4928_v13  ;;  %v12350_v13 = vunpack.i.l.bf16 %v19199_v4 }
 0x36b   :  { %5712 = vadd.xlane.f32.xlu1 %v5711_v1  ;;  %v1424_v1 = vpack.c.bf16 %v12290_v60, %v12171_v53  ;;  %v15552_v53 = vpop.eup %13310 }
 0x36c   :  { %11278 = vmatpush3.bf16.xpose.msra.mxu0 %v4118_v20  ;;  %v15543_v20 = vpop.f32.mrf.mxu0  ;;  %v922_v4 = vpack.c.bf16 %v12351_v2, %v12350_v13  ;;  %v4241_v2 = vsel %vm1950_vm0, %v1427_v23, 0 }
 0x36d   :  { %11855 = vmatprep.subr.msk.bf16.mxu0 %vm1950_vm0, %v1427_v23  ;;  %v15558_v9 = vpop.eup %13312  ;;  %v4178_v27 = vsel %vm1950_vm0, %v1424_v1, 0 }
 0x36e   :  { %4917 = vmax.xlane.f32.xlu0 %v4916_v12  ;;  %v15535_v8 = vpop.f32.mrf.mxu1  ;;  %11272 = vmatmul.mubr.msk.bf16.vlgmr.msra.gmra.mxu1 %vm1950_vm0, %v917_v62  ;;  %v919_v62 = vpack.c.bf16 %v12110_v45, %v12110_v45  ;;  %v12651_v12 = vunpack.i.h.bf16 %v15068_v52  ;;  %v1426_v45 = vpack.c.bf16 %v12406_v33, %v12405_v22  ;;  %v5720_v23 = vsel %vm4831_vm1, %v15558_v9, 0.0 }
 0x36f   :  { %5706 = vadd.xlane.f32.xlu1 %v5705_v58  ;;  %11284 = vmatpush3.bf16.xpose.msra.mxu1 %v4181_v48  ;;  %v5275_v58 = vsub.f32 %v14688_v11, %v4867_v38  ;;  %v5428_v11 = vmul.f32 1.442695, %v5274_v44  ;;  %v5708_v38 = vsel %vm4831_vm1, %v15552_v53, 0.0 }
 0x370   :  { %11287 = vmatprep.mubr.msk.bf16.mxu1 %vm1950_vm0, %v920_v18  ;;  %v15546_v60 = vpop.f32.mrf.mxu1  ;;  %11854 = vmatprep.subr.msk.bf16.mxu1 %vm1950_vm0, %v1424_v1  ;;  %v4925_v18 = vsel %vm4831_vm1, %v15543_v20, -inf  ;;  %v1429_v33 = vpack.c.bf16 %v12651_v12, %v12651_v12 }
 0x371   :  { %v5430_v22 = vmul.f32 1.442695, %v5275_v58  ;;  %13318 = vpow2.f32 %v5428_v11  ;;  %v4937_v58 = vsel %vm4831_vm1, %v15535_v8, -inf  ;;  %v4238_v11 = vsel %vm1950_vm0, %v1426_v45, 0 }
 0x372   :  { %4923 = vmax.xlane.f32.xlu0 %v4922_v56  ;;  %v11082_v48 = vpop.f32.mrf.mxu1  ;;  %v19203_v56 = vld [vmem:[#allocation55_spill] sm:$0xff] }
 0x373   :  { %11280 = vmatmul.mubr.msk.bf16.vlgmr.msra.gmra.mxu0 %vm1950_vm0, %v919_v62  ;;  %4926 = vmax.xlane.f32.xlu1 %v4925_v18  ;;  %v15561_v63 = vpop.f32.mrf.mxu0  ;;  %v5273_v62 = vsub.f32 %v14696_v24, %v4861_v30  ;;  %v12231_v48 = vunpack.i.h.bf16 %v19197_v40  ;;  %v12595_v18 = vunpack.i.l.bf16 %v14875_v59  ;;  %v15580_v24 = vpop.eup %13314  ;;  %v12650_v30 = vunpack.i.l.bf16 %v15068_v52 }
 0x374   :  { %19201 = vst [vmem:[#allocation35_spill] sm:$0xff] %v15561_v63  ;;  %11292 = vmatpush3.bf16.xpose.msra.mxu0 %v4241_v2  ;;  %11295 = vmatprep.mubr.msk.bf16.mxu0 %vm1950_vm0, %v922_v4  ;;  %v12175_v4 = vunpack.i.l.bf16 %v19203_v56  ;;  %v4946_v1 = vsel %vm4831_vm1, %v15561_v63, -inf  ;;  %19204 = vst [vmem:[#allocation79_spill] sm:$0xff] %v15580_v24  ;;  %13320 = vpow2.f32 %v5430_v22  ;;  %v15585_v2 = vpop.eup %13316  ;;  %v12516_v63 = vunpack.i.h.bf16 %v15018_v19  ;;  %v15591_v52 = vpop.f32.mrf.mxu1 }
 0x375   :  { %11856 = vmatprep.subr.msk.bf16.mxu0 %vm1950_vm0, %v1426_v45  ;;  %v15568_v13 = vpop.f32.mrf.mxu0  ;;  %v5426_v12 = vmul.f32 1.442695, %v5273_v62  ;;  %19205 = vst [vmem:[#allocation65_spill] sm:$0xff] %v15585_v2  ;;  %v921_v34 = vpack.c.bf16 %v12231_v48, %v12231_v48  ;;  %19208 = vst [vmem:[#allocation36_spill] sm:$0xff] %v15591_v52  ;;  %v5714_v19 = vsel %vm4831_vm1, %v15585_v2, 0.0  ;;  %v4301_v48 = vsel %vm1950_vm0, %v1429_v33, 0 }
 0x376   :  { %19202 = vst [vmem:[#allocation48_spill] sm:$0xff] %v15568_v13  ;;  %5709 = vadd.xlane.f32.xlu0 %v5708_v38  ;;  %v1431_v40 = vpack.c.bf16 %v12175_v4, %v12175_v4  ;;  %v19206_v38 = vld [vmem:[#allocation98_spill] sm:$0xff]  ;;  %v5717_v4 = vsel %vm4831_vm1, %v15580_v24, 0.0 }
 0x377   :  { %5721 = vadd.xlane.f32.xlu1 %v5720_v23  ;;  %v11090_v44 = vpop.f32.mrf.mxu0  ;;  %11286 = vmatpush3.bf16.xpose.msra.mxu1 %v4178_v27  ;;  %v12461_v27 = vunpack.i.h.bf16 %v19206_v38  ;;  %v19207_v23 = vld [vmem:[#allocation39_spill] sm:$0xff]  ;;  %v12460_v62 = vunpack.i.l.bf16 %v19206_v38  ;;  %13322 = vpow2.f32 %v5426_v12 }
 0x378   :  { %11857 = vmatprep.subr.msk.bf16.mxu1 %vm1950_vm0, %v1429_v33  ;;  %v11996_v44 = vunpack.i.h.bf16 %v19207_v23  ;;  %v11995_v22 = vunpack.i.l.bf16 %v19207_v23  ;;  %v19211_v33 = vld [vmem:[#allocation83_spill] sm:$0xff] }
 0x379   :  { %v15610_v12 = vpop.f32.mrf.mxu0  ;;  %v12296_v23 = vunpack.i.h.bf16 %v19211_v33 }
 0x37a   :  { %4947 = vmax.xlane.f32.xlu0 %v4946_v1  ;;  %v924_v1 = vpack.c.bf16 %v12595_v18, %v12461_v27  ;;  %19210 = vst [vmem:[#allocation68_spill] sm:$0xff] %v15610_v12  ;;  %v926_v27 = vpack.c.bf16 %v11996_v44, %v11995_v22  ;;  %v4940_v44 = vsel %vm4831_vm1, %v15568_v13, -inf  ;;  %v12176_v13 = vunpack.i.h.bf16 %v19203_v56 }
 0x37b   :  { %4938 = vmax.xlane.f32.xlu1 %v4937_v58  ;;  %v1428_v58 = vpack.c.bf16 %v12650_v30, %v12516_v63  ;;  %v923_v30 = vpack.c.bf16 %v12460_v62, %v12460_v62  ;;  %v4361_v62 = vsel %vm1950_vm0, %v1431_v40, 0 }
 0x37c   :  { %11294 = vmatpush3.bf16.xpose.msra.mxu0 %v4238_v11  ;;  %v19209_v11 = vld [vmem:[#allocation52_spill] sm:$0xff] }
 0x37d   :  { %11859 = vmatprep.subr.msk.bf16.mxu0 %vm1950_vm0, %v1431_v40  ;;  %v12056_v38 = vunpack.i.h.bf16 %v19209_v11  ;;  %v12055_v18 = vunpack.i.l.bf16 %v19209_v11 }
 0x37e   :  { %5718 = vadd.xlane.f32.xlu0 %v5717_v4  ;;  %v15598_v45 = vpop.f32.mrf.mxu1  ;;  %11288 = vmatmul.mubr.msk.bf16.vlgmr.msra.gmra.mxu1 %vm1950_vm0, %v921_v34  ;;  %v4934_v34 = vsel %vm4831_vm1, %v15591_v52, -inf  ;;  %v15627_v11 = vpop.eup %13318 }
 0x37f   :  { %5715 = vadd.xlane.f32.xlu1 %v5714_v19  ;;  %11300 = vmatpush3.bf16.xpose.msra.mxu1 %v4301_v48  ;;  %v4931_v19 = vsel %vm4831_vm1, %v15546_v60, -inf  ;;  %v1430_v48 = vpack.c.bf16 %v12056_v38, %v12055_v18  ;;  %19214 = vst [vmem:[#allocation101_spill] sm:$0xff] %v15627_v11  ;;  %v1433_v38 = vpack.c.bf16 %v12296_v23, %v12296_v23  ;;  %v4943_v18 = vsel %vm4831_vm1, %v15610_v12, -inf }
 0x380   :  { %11303 = vmatprep.mubr.msk.bf16.mxu1 %vm1950_vm0, %v924_v1  ;;  %v15607_v63 = vpop.f32.mrf.mxu1  ;;  %11858 = vmatprep.subr.msk.bf16.mxu1 %vm1950_vm0, %v1428_v58  ;;  %v5726_v23 = vsel %vm4831_vm1, %v15627_v11, 0.0  ;;  %v19219_v11 = vld [vmem:[#allocation72_spill] sm:$0xff] }
 0x381   :  { %v15632_v40 = vpop.eup %13320  ;;  %v12356_v2 = vunpack.i.h.bf16 %v19219_v11 }
 0x382   :  { %4935 = vmax.xlane.f32.xlu0 %v4934_v34  ;;  %v11098_v4 = vpop.f32.mrf.mxu1  ;;  %19215 = vst [vmem:[#allocation96_spill] sm:$0xff] %v15632_v40  ;;  %v12520_v34 = vunpack.i.l.bf16 %v15044_v25 }
 0x383   :  { %11296 = vmatmul.mubr.msk.bf16.vlgmr.msra.gmra.mxu0 %vm1950_vm0, %v923_v30  ;;  %4932 = vmax.xlane.f32.xlu1 %v4931_v19  ;;  %v15618_v1 = vpop.f32.mrf.mxu0  ;;  %v4298_v30 = vsel %vm1950_vm0, %v1428_v58, 0  ;;  %v12596_v4 = vunpack.i.h.bf16 %v14875_v59  ;;  %v19216_v19 = vld [vmem:[#allocation69_spill] sm:$0xff]  ;;  %v5729_v58 = vsel %vm4831_vm1, %v15632_v40, 0.0  ;;  %v4358_v59 = vsel %vm1950_vm0, %v1430_v48, 0 }
 0x384   :  { %19212 = vst [vmem:[#allocation82_spill] sm:$0xff] %v15618_v1  ;;  %11308 = vmatpush3.bf16.xpose.msra.mxu0 %v4361_v62  ;;  %11311 = vmatprep.mubr.msk.bf16.mxu0 %vm1950_vm0, %v926_v27  ;;  %v12235_v62 = vunpack.i.l.bf16 %v19216_v19  ;;  %v15643_v12 = vpop.eup %13322  ;;  %v15648_v24 = vpop.f32.mrf.mxu1  ;;  %v4964_v40 = vsel %vm4831_vm1, %v15618_v1, -inf }
 0x385   :  { %11860 = vmatprep.subr.msk.bf16.mxu0 %vm1950_vm0, %v1430_v48  ;;  %v15625_v22 = vpop.f32.mrf.mxu0  ;;  %v925_v52 = vpack.c.bf16 %v12596_v4, %v12596_v4  ;;  %19218 = vst [vmem:[#allocation37_spill] sm:$0xff] %v15648_v24  ;;  %v5723_v56 = vsel %vm4831_vm1, %v15643_v12, 0.0  ;;  %v4421_v4 = vsel %vm1950_vm0, %v1433_v38, 0 }
 0x386   :  { %19213 = vst [vmem:[#allocation53_spill] sm:$0xff] %v15625_v22  ;;  %4941 = vmax.xlane.f32.xlu0 %v4940_v44  ;;  %v12295_v44 = vunpack.i.l.bf16 %v19211_v33 }
 0x387   :  { %4944 = vmax.xlane.f32.xlu1 %v4943_v18  ;;  %v11106_v27 = vpop.f32.mrf.mxu0  ;;  %11302 = vmatpush3.bf16.xpose.msra.mxu1 %v4298_v30  ;;  %v19217_v18 = vld [vmem:[#allocation40_spill] sm:$0xff]  ;;  %v1435_v30 = vpack.c.bf16 %v12520_v34, %v12520_v34  ;;  %v12355_v34 = vunpack.i.l.bf16 %v19219_v11 }
 0x388   :  { %11861 = vmatprep.subr.msk.bf16.mxu1 %vm1950_vm0, %v1433_v38  ;;  %v12116_v27 = vunpack.i.h.bf16 %v19217_v18  ;;  %v12115_v33 = vunpack.i.l.bf16 %v19217_v18  ;;  %v12656_v38 = vunpack.i.h.bf16 %v15088_v35 }
 0x38a   :  { %5727 = vadd.xlane.f32.xlu0 %v5726_v23  ;;  %v928_v23 = vpack.c.bf16 %v12235_v62, %v12116_v27  ;;  %v19220_v62 = vld [vmem:[#allocation86_spill] sm:$0xff] }
 0x38b   :  { %5730 = vadd.xlane.f32.xlu1 %v5729_v58  ;;  %v1432_v58 = vpack.c.bf16 %v12295_v44, %v12176_v13  ;;  %v12411_v18 = vunpack.i.h.bf16 %v19220_v62  ;;  %v12410_v27 = vunpack.i.l.bf16 %v19220_v62  ;;  %v927_v13 = vpack.c.bf16 %v12115_v33, %v12115_v33 }
 0x38c   :  { %11310 = vmatpush3.bf16.xpose.msra.mxu0 %v4358_v59  ;;  %v930_v44 = vpack.c.bf16 %v12356_v2, %v12355_v34  ;;  %v4481_v33 = vsel %vm1950_vm0, %v1435_v30, 0  ;;  %v4958_v2 = vsel %vm4831_vm1, %v15625_v22, -inf  ;;  %v1437_v62 = vpack.c.bf16 %v12656_v38, %v12656_v38 }
 0x38d   :  { %11863 = vmatprep.subr.msk.bf16.mxu0 %vm1950_vm0, %v1435_v30  ;;  %v12600_v38 = vunpack.i.l.bf16 %v14883_v21  ;;  %v12521_v22 = vunpack.i.h.bf16 %v15044_v25 }
 0x38e   :  { %4965 = vmax.xlane.f32.xlu0 %v4964_v40  ;;  %v15656_v48 = vpop.f32.mrf.mxu1  ;;  %11304 = vmatmul.mubr.msk.bf16.vlgmr.msra.gmra.mxu1 %vm1950_vm0, %v925_v52  ;;  %v15668_v40 = vpop.f32.mrf.mxu0  ;;  %v4952_v52 = vsel %vm4831_vm1, %v15648_v24, -inf }
 0x38f   :  { %5724 = vadd.xlane.f32.xlu1 %v5723_v56  ;;  %11316 = vmatpush3.bf16.xpose.msra.mxu1 %v4421_v4  ;;  %v4955_v56 = vsel %vm4831_vm1, %v15598_v45, -inf  ;;  %v1434_v4 = vpack.c.bf16 %v12411_v18, %v12410_v27  ;;  %v4949_v18 = vsel %vm4831_vm1, %v15607_v63, -inf  ;;  %v4418_v27 = vsel %vm1950_vm0, %v1432_v58, 0 }
 0x390   :  { %11319 = vmatprep.mubr.msk.bf16.mxu1 %vm1950_vm0, %v928_v23  ;;  %v15665_v11 = vpop.f32.mrf.mxu1  ;;  %11862 = vmatprep.subr.msk.bf16.mxu1 %vm1950_vm0, %v1432_v58  ;;  %v4961_v58 = vsel %vm4831_vm1, %v15668_v40, -inf  ;;  %v4973_v25 = vsel %vm4831_vm1, %v15656_v48, -inf }
 0x391   :  { %19221 = vst [vmem:[#allocation50_spill] sm:$0xff] %v15665_v11 }
 0x392   :  { %4953 = vmax.xlane.f32.xlu0 %v4952_v52  ;;  %v11114_v59 = vpop.f32.mrf.mxu1 }
 0x393   :  { %11312 = vmatmul.mubr.msk.bf16.vlgmr.msra.gmra.mxu0 %vm1950_vm0, %v927_v13  ;;  %4956 = vmax.xlane.f32.xlu1 %v4955_v56  ;;  %v15676_v23 = vpop.f32.mrf.mxu0  ;;  %v19224_v13 = vld [vmem:[#allocation57_spill] sm:$0xff]  ;;  %v12655_v56 = vunpack.i.l.bf16 %v15088_v35 }
 0x394   :  { %19222 = vst [vmem:[#allocation81_spill] sm:$0xff] %v15676_v23  ;;  %11324 = vmatpush3.bf16.xpose.msra.mxu0 %v4481_v33  ;;  %11327 = vmatprep.mubr.msk.bf16.mxu0 %vm1950_vm0, %v930_v44  ;;  %v12180_v52 = vunpack.i.l.bf16 %v19224_v13  ;;  %v12236_v44 = vunpack.i.h.bf16 %v19216_v19  ;;  %v4982_v59 = vsel %vm4831_vm1, %v15676_v23, -inf  ;;  %v15695_v33 = vpop.f32.mrf.mxu1  ;;  %v19227_v23 = vld [vmem:[#allocation41_spill] sm:$0xff] }
 0x395   :  { %11864 = vmatprep.subr.msk.bf16.mxu0 %vm1950_vm0, %v1434_v4  ;;  %v15683_v34 = vpop.f32.mrf.mxu0  ;;  %19225 = vst [vmem:[#allocation38_spill] sm:$0xff] %v15695_v33  ;;  %v12001_v1 = vunpack.i.h.bf16 %v19227_v23  ;;  %v12000_v35 = vunpack.i.l.bf16 %v19227_v23  ;;  %v19228_v23 = vld [vmem:[#allocation54_spill] sm:$0xff] }
 0x396   :  { %19223 = vst [vmem:[#allocation67_spill] sm:$0xff] %v15683_v34  ;;  %4959 = vmax.xlane.f32.xlu0 %v4958_v2  ;;  %v1439_v2 = vpack.c.bf16 %v12180_v52, %v12180_v52  ;;  %v929_v19 = vpack.c.bf16 %v12236_v44, %v12236_v44  ;;  %v4970_v52 = vsel %vm4831_vm1, %v15695_v33, -inf  ;;  %v4541_v44 = vsel %vm1950_vm0, %v1437_v62, 0 }
 0x397   :  { %4950 = vmax.xlane.f32.xlu1 %v4949_v18  ;;  %v11122_v30 = vpop.f32.mrf.mxu0  ;;  %11318 = vmatpush3.bf16.xpose.msra.mxu1 %v4418_v27  ;;  %v4478_v18 = vsel %vm1950_vm0, %v1434_v4, 0  ;;  %v19226_v27 = vld [vmem:[#allocation100_spill] sm:$0xff] }
 0x398   :  { %11865 = vmatprep.subr.msk.bf16.mxu1 %vm1950_vm0, %v1437_v62  ;;  %v12466_v30 = vunpack.i.h.bf16 %v19226_v27  ;;  %v12465_v24 = vunpack.i.l.bf16 %v19226_v27  ;;  %v12060_v27 = vunpack.i.l.bf16 %v19228_v23  ;;  %v19230_v62 = vld [vmem:[#allocation85_spill] sm:$0xff] }
 0x39a   :  { %4983 = vmax.xlane.f32.xlu0 %v4982_v59  ;;  %v932_v59 = vpack.c.bf16 %v12600_v38, %v12466_v30  ;;  %v934_v30 = vpack.c.bf16 %v12001_v1, %v12000_v35 }
 0x39b   :  { %4962 = vmax.xlane.f32.xlu1 %v4961_v58  ;;  %v1436_v58 = vpack.c.bf16 %v12655_v56, %v12521_v22  ;;  %v931_v22 = vpack.c.bf16 %v12465_v24, %v12465_v24  ;;  %v15720_v56 = vpop.f32.mrf.mxu0  ;;  %v4601_v24 = vsel %vm1950_vm0, %v1439_v2, 0 }
 0x39c   :  { %11326 = vmatpush3.bf16.xpose.msra.mxu0 %v4478_v18  ;;  %v12061_v18 = vunpack.i.h.bf16 %v19228_v23  ;;  %19229 = vst [vmem:[#allocation70_spill] sm:$0xff] %v15720_v56 }
 0x39d   :  { %11867 = vmatprep.subr.msk.bf16.mxu0 %vm1950_vm0, %v1439_v2  ;;  %v12525_v2 = vunpack.i.l.bf16 %v15060_v15 }
 0x39e   :  { %4971 = vmax.xlane.f32.xlu0 %v4970_v52  ;;  %v15708_v4 = vpop.f32.mrf.mxu1  ;;  %11320 = vmatmul.mubr.msk.bf16.vlgmr.msra.gmra.mxu1 %vm1950_vm0, %v929_v19  ;;  %v4976_v19 = vsel %vm4831_vm1, %v15683_v34, -inf  ;;  %v12301_v52 = vunpack.i.h.bf16 %v19230_v62 }
 0x39f   :  { %4974 = vmax.xlane.f32.xlu1 %v4973_v25  ;;  %11332 = vmatpush3.bf16.xpose.msra.mxu1 %v4541_v44  ;;  %v4967_v25 = vsel %vm4831_vm1, %v15665_v11, -inf  ;;  %v1438_v44 = vpack.c.bf16 %v12061_v18, %v12060_v27  ;;  %v4979_v18 = vsel %vm4831_vm1, %v15720_v56, -inf  ;;  %v4538_v27 = vsel %vm1950_vm0, %v1436_v58, 0 }
 0x3a0   :  { %11335 = vmatprep.mubr.msk.bf16.mxu1 %vm1950_vm0, %v932_v59  ;;  %v15717_v38 = vpop.f32.mrf.mxu1  ;;  %11866 = vmatprep.subr.msk.bf16.mxu1 %vm1950_vm0, %v1436_v58  ;;  %v1441_v35 = vpack.c.bf16 %v12301_v52, %v12301_v52  ;;  %v4991_v58 = vsel %vm4831_vm1, %v15708_v4, -inf }
 0x3a2   :  { %4977 = vmax.xlane.f32.xlu0 %v4976_v19  ;;  %v11130_v33 = vpop.f32.mrf.mxu1  ;;  %v12601_v19 = vunpack.i.h.bf16 %v14883_v21  ;;  %v12181_v21 = vunpack.i.h.bf16 %v19224_v13  ;;  %v4985_v13 = vsel %vm4831_vm1, %v15717_v38, -inf }
 0x3a3   :  { %11328 = vmatmul.mubr.msk.bf16.vlgmr.msra.gmra.mxu0 %vm1950_vm0, %v931_v22  ;;  %4968 = vmax.xlane.f32.xlu1 %v4967_v25  ;;  %v15728_v59 = vpop.f32.mrf.mxu0 }
 0x3a4   :  { %19231 = vst [vmem:[#allocation84_spill] sm:$0xff] %v15728_v59  ;;  %11340 = vmatpush3.bf16.xpose.msra.mxu0 %v4601_v24  ;;  %11343 = vmatprep.mubr.msk.bf16.mxu0 %vm1950_vm0, %v934_v30  ;;  %v5000_v1 = vsel %vm4831_vm1, %v15728_v59, -inf  ;;  %v15737_v23 = vpop.f32.mrf.mxu1  ;;  %v19233_v30 = vld [vmem:[#allocation71_spill] sm:$0xff]  ;;  %v12300_v24 = vunpack.i.l.bf16 %v19230_v62 }
 0x3a5   :  { %11868 = vmatprep.subr.msk.bf16.mxu0 %vm1950_vm0, %v1438_v44  ;;  %v15735_v33 = vpop.f32.mrf.mxu0  ;;  %19232 = vst [vmem:[#allocation55_spill] sm:$0xff] %v15737_v23  ;;  %v12240_v25 = vunpack.i.l.bf16 %v19233_v30  ;;  %v4988_v52 = vsel %vm4831_vm1, %v15737_v23, -inf  ;;  %v19235_v23 = vld [vmem:[#allocation73_spill] sm:$0xff] }
 0x3a6   :  { %5001 = vmax.xlane.f32.xlu0 %v5000_v1  ;;  %v19234_v1 = vld [vmem:[#allocation42_spill] sm:$0xff]  ;;  %v12361_v11 = vunpack.i.h.bf16 %v19235_v23  ;;  %v4994_v62 = vsel %vm4831_vm1, %v15735_v33, -inf }
 0x3a7   :  { %4980 = vmax.xlane.f32.xlu1 %v4979_v18  ;;  %v11138_v22 = vpop.f32.mrf.mxu0  ;;  %11334 = vmatpush3.bf16.xpose.msra.mxu1 %v4538_v27  ;;  %v12121_v59 = vunpack.i.h.bf16 %v19234_v1  ;;  %v1443_v18 = vpack.c.bf16 %v12525_v2, %v12525_v2  ;;  %v4598_v27 = vsel %vm1950_vm0, %v1438_v44, 0  ;;  %v12120_v56 = vunpack.i.l.bf16 %v19234_v1 }
 0x3a8   :  { %11869 = vmatprep.subr.msk.bf16.mxu1 %vm1950_vm0, %v1441_v35  ;;  %v933_v22 = vpack.c.bf16 %v12601_v19, %v12601_v19  ;;  %v1440_v2 = vpack.c.bf16 %v12300_v24, %v12181_v21  ;;  %v4661_v44 = vsel %vm1950_vm0, %v1441_v35, 0  ;;  %v12661_v21 = vunpack.i.h.bf16 %v15103_v47 }
 0x3a9   :  { %v936_v34 = vpack.c.bf16 %v12240_v25, %v12121_v59  ;;  %v19236_v59 = vld [vmem:[#allocation88_spill] sm:$0xff]  ;;  %v15768_v1 = vpop.f32.mrf.mxu0  ;;  %v935_v24 = vpack.c.bf16 %v12120_v56, %v12120_v56 }
 0x3aa   :  { %4989 = vmax.xlane.f32.xlu0 %v4988_v52  ;;  %v12360_v52 = vunpack.i.l.bf16 %v19235_v23  ;;  %v12416_v19 = vunpack.i.h.bf16 %v19236_v59  ;;  %v12415_v25 = vunpack.i.l.bf16 %v19236_v59  ;;  %v4997_v35 = vsel %vm4831_vm1, %v15768_v1, -inf  ;;  %v4873_v59 = vpop.xlane.xlu1 %4872 }
 0x3ab   :  { %4992 = vmax.xlane.f32.xlu1 %v4991_v58 }
 0x3ac   :  { %11342 = vmatpush3.bf16.xpose.msra.mxu0 %v4598_v27  ;;  %v938_v27 = vpack.c.bf16 %v12361_v11, %v12360_v52 }
 0x3ad   :  { %11871 = vmatprep.subr.msk.bf16.mxu0 %vm1950_vm0, %v1443_v18 }
 0x3ae   :  { %4995 = vmax.xlane.f32.xlu0 %v4994_v62  ;;  %v15760_v58 = vpop.f32.mrf.mxu1  ;;  %11336 = vmatmul.mubr.msk.bf16.vlgmr.msra.gmra.mxu1 %vm1950_vm0, %v933_v22  ;;  %v1442_v62 = vpack.c.bf16 %v12416_v19, %v12415_v25  ;;  %v1445_v19 = vpack.c.bf16 %v12661_v21, %v12661_v21  ;;  %v5277_v25 = vsub.f32 %v15083_v51, %v4873_v59  ;;  %v12660_v21 = vunpack.i.l.bf16 %v15103_v47 }
 0x3af   :  { %4986 = vmax.xlane.f32.xlu1 %v4985_v13  ;;  %11348 = vmatpush3.bf16.xpose.msra.mxu1 %v4661_v44  ;;  %v4876_v44 = vpop.xlane.xlu0 %4875 }
 0x3b0   :  { %11351 = vmatprep.mubr.msk.bf16.mxu1 %vm1950_vm0, %v936_v34  ;;  %v15771_v23 = vpop.f32.mrf.mxu1  ;;  %11870 = vmatprep.subr.msk.bf16.mxu1 %vm1950_vm0, %v1440_v2  ;;  %v4721_v34 = vsel %vm1950_vm0, %v1443_v18, 0  ;;  %v5009_v18 = vsel %vm4831_vm1, %v15760_v58, -inf  ;;  %v5278_v51 = vsub.f32 %v15011_v31, %v4876_v44  ;;  %v5434_v59 = vmul.f32 1.442695, %v5277_v25 }
 0x3b1   :  { %19237 = vst [vmem:[#allocation98_spill] sm:$0xff] %v15771_v23 }
 0x3b2   :  { %v11146_v22 = vpop.f32.mrf.mxu1  ;;  %13324 = vpow2.f32 %v5434_v59 }
 0x3b3   :  { %11344 = vmatmul.mubr.msk.bf16.vlgmr.msra.gmra.mxu0 %vm1950_vm0, %v935_v24  ;;  %4998 = vmax.xlane.f32.xlu1 %v4997_v35  ;;  %v15778_v13 = vpop.f32.mrf.mxu0  ;;  %v4658_v24 = vsel %vm1950_vm0, %v1440_v2, 0  ;;  %v12241_v22 = vunpack.i.h.bf16 %v19233_v30  ;;  %v5003_v2 = vsel %vm4831_vm1, %v15771_v23, -inf  ;;  %v12526_v30 = vunpack.i.h.bf16 %v15060_v15 }
 0x3b4   :  { %19238 = vst [vmem:[#allocation39_spill] sm:$0xff] %v15778_v13  ;;  %11356 = vmatpush3.bf16.xpose.msra.mxu0 %v4721_v34  ;;  %11359 = vmatprep.mubr.msk.bf16.mxu0 %vm1950_vm0, %v938_v27  ;;  %v5018_v11 = vsel %vm4831_vm1, %v15778_v13, -inf  ;;  %v15784_v56 = vpop.f32.mrf.mxu1  ;;  %v12605_v34 = vunpack.i.l.bf16 %v14892_v37  ;;  %v19241_v13 = vld [vmem:[#allocation12_spill] sm:$0xff]  ;;  %v4781_v15 = vsel %vm1950_vm0, %v1445_v19, 0 }
 0x3b5   :  { %19239 = vst [vmem:[#allocation52_spill] sm:$0xff] %v15784_v56  ;;  %11872 = vmatprep.subr.msk.bf16.mxu0 %vm1950_vm0, %v1442_v62  ;;  %5019 = vmax.xlane.f32.xlu0 %v5018_v11  ;;  %v15787_v52 = vpop.f32.mrf.mxu0  ;;  %v5006_v35 = vsel %vm4831_vm1, %v15784_v56, -inf  ;;  %v19240_v11 = vld [vmem:[#allocation102_spill] sm:$0xff]  ;;  %v4718_v56 = vsel %vm1950_vm0, %v1442_v62, 0  ;;  %v1855_v47 = vpack.c.bf16 %v19241_v13, %v19241_v13  ;;  %v1444_v23 = vpack.c.bf16 %v12660_v21, %v12526_v30 }
 0x3b6   :  { %v5012_v31 = vsel %vm4831_vm1, %v15787_v52, -inf  ;;  %v12470_v44 = vunpack.i.l.bf16 %v19240_v11 }
 0x3b7   :  { %5010 = vmax.xlane.f32.xlu1 %v5009_v18  ;;  %v11154_v27 = vpop.f32.mrf.mxu0  ;;  %11350 = vmatpush3.bf16.xpose.msra.mxu1 %v4658_v24  ;;  %v12471_v18 = vunpack.i.h.bf16 %v19240_v11  ;;  %v4870_v24 = vpop.xlane.xlu0 %4869 }
 0x3b8   :  { %11873 = vmatprep.subr.msk.bf16.mxu1 %vm1950_vm0, %v1445_v19  ;;  %v5276_v62 = vsub.f32 %v15020_v61, %v4870_v24  ;;  %v939_v19 = vpack.c.bf16 %v12470_v44, %v12470_v44 }
 0x3b9   :  { %5007 = vmax.xlane.f32.xlu0 %v5006_v35  ;;  %v15804_v27 = vpop.f32.mrf.mxu0  ;;  %v937_v35 = vpack.c.bf16 %v12241_v22, %v12241_v22  ;;  %v940_v25 = vpack.c.bf16 %v12605_v34, %v12471_v18  ;;  %v4885_v22 = vpop.xlane.xlu1 %4884  ;;  %v6520_v18 = vsel %vm6518_vm2, %v1855_v47, 0 }
 0x3ba   :  { %v5432_v61 = vmul.f32 1.442695, %v5276_v62  ;;  %v5281_v21 = vsub.f32 %v15179_v14, %v4885_v22 }
 0x3bb   :  { %5004 = vmax.xlane.f32.xlu1 %v5003_v2  ;;  %v5436_v2 = vmul.f32 1.442695, %v5278_v51 }
 0x3bc   :  { %11358 = vmatpush3.bf16.xpose.msra.mxu0 %v4718_v56  ;;  %v5015_v56 = vsel %vm4831_vm1, %v15804_v27, -inf  ;;  %v5442_v44 = vmul.f32 1.442695, %v5281_v21 }
 0x3bd   :  { %11875 = vmatprep.subr.msk.bf16.mxu0 %vm6518_vm2, %v1855_v47  ;;  %5013 = vmax.xlane.f32.xlu0 %v5012_v31  ;;  %13326 = vpow2.f32 %v5436_v2  ;;  %v1859_v31 = vpack.c.bf16 %v14144_v28, %v14144_v28  ;;  %v4882_v2 = vpop.xlane.xlu0 %4881 }
 0x3be   :  { %v15815_v13 = vpop.f32.mrf.mxu1  ;;  %11352 = vmatmul.mubr.msk.bf16.vlgmr.msra.gmra.mxu1 %vm1950_vm0, %v937_v35  ;;  %v19245_v35 = vld [vmem:[#allocation22_spill] sm:$0xff]  ;;  %13328 = vpow2.f32 %v5432_v61 }
 0x3bf   :  { %5016 = vmax.xlane.f32.xlu1 %v5015_v56  ;;  %11364 = vmatpush3.bf16.xpose.msra.mxu1 %v4781_v15  ;;  %v5027_v59 = vsel %vm4831_vm1, %v15815_v13, -inf  ;;  %v4778_v15 = vsel %vm1950_vm0, %v1444_v23, 0  ;;  %v19246_v56 = vld [vmem:[#allocation17_spill] sm:$0xff]  ;;  %13330 = vpow2.f32 %v5442_v44 }
 0x3c0   :  { %11367 = vmatprep.mubr.msk.bf16.mxu1 %vm1950_vm0, %v940_v25  ;;  %v15821_v34 = vpop.f32.mrf.mxu1  ;;  %11874 = vmatprep.subr.msk.bf16.mxu1 %vm1950_vm0, %v1444_v23  ;;  %v4879_v25 = vpop.xlane.xlu1 %4878  ;;  %v15845_v22 = vpack.c.bf16 %v19246_v56, %v19246_v56  ;;  %v5280_v23 = vsub.f32 %v15200_v5, %v4882_v2 }
 0x3c1   :  { %19242 = vst [vmem:[#allocation83_spill] sm:$0xff] %v15821_v34  ;;  %v5021_v47 = vsel %vm4831_vm1, %v15821_v34, -inf  ;;  %v5279_v61 = vsub.f32 %v15188_v32, %v4879_v25 }
 0x3c2   :  { %v11162_v51 = vpop.f32.mrf.mxu1 }
 0x3c3   :  { %11360 = vmatmul.mubr.msk.bf16.vlgmr.msra.gmra.mxu0 %vm1950_vm0, %v939_v19  ;;  %5028 = vmax.xlane.f32.xlu1 %v5027_v59  ;;  %v15828_v11 = vpop.f32.mrf.mxu0  ;;  %v12606_v19 = vunpack.i.h.bf16 %v14892_v37  ;;  %v15860_v59 = vpop.eup %13324  ;;  %v5438_v32 = vmul.f32 1.442695, %v5279_v61 }
 0x3c4   :  { %19243 = vst [vmem:[#allocation69_spill] sm:$0xff] %v15828_v11  ;;  %11372 = vmatpush3.bf16.msra.mxu0 %v6520_v18  ;;  %v15831_v30 = vpop.f32.mrf.mxu1  ;;  %v5036_v51 = vsel %vm4831_vm1, %v15828_v11, -inf  ;;  %v5735_v44 = vsel %vm4831_vm1, %v15860_v59, 0.0 }
 0x3c5   :  { %v15833_v24 = vpop.f32.mrf.mxu0  ;;  %11373 = vmatprep.subr.bf16.mxu0 %v19245_v35  ;;  %v5024_v14 = vsel %vm4831_vm1, %v15831_v30, -inf  ;;  %v941_v18 = vpack.c.bf16 %v12606_v19, %v12606_v19  ;;  %13332 = vpow2.f32 %v5438_v32  ;;  %v19251_v19 = vld [vmem:[#allocation23_spill] sm:$0xff] }
 0x3c6   :  { %19244 = vst [vmem:[#allocation40_spill] sm:$0xff] %v15833_v24  ;;  %5025 = vmax.xlane.f32.xlu0 %v5024_v14  ;;  %v5030_v5 = vsel %vm4831_vm1, %v15833_v24, -inf }
 0x3c7   :  { %5022 = vmax.xlane.f32.xlu1 %v5021_v47  ;;  %v11170_v62 = vpop.f32.mrf.mxu0  ;;  %11366 = vmatpush3.bf16.xpose.msra.mxu1 %v4778_v15  ;;  %v19249_v15 = vld [vmem:[#allocation28_spill] sm:$0xff] }
 0x3c8   :  { %11374 = vmatpush3.bf16.msra.mxu0 %v19245_v35  ;;  %11877 = vmatprep.subr.msk.bf16.mxu1 %vm6518_vm2, %v1859_v31  ;;  %v5440_v35 = vmul.f32 1.442695, %v5280_v23  ;;  %v12005_v2 = vunpack.i.l.bf16 %v19249_v15  ;;  %v6634_v62 = vsel %vm6518_vm2, %v1859_v31, 0 }
 0x3c9   :  { %v15851_v21 = vpop.f32.mrf.mxu0  ;;  %11876 = vmatprep.subr.msk.bf16.mxu0 %vm6518_vm2, %v15845_v22 }
 0x3ca   :  { %19247 = vst [vmem:[#allocation72_spill] sm:$0xff] %v15851_v21  ;;  %v5033_v37 = vsel %vm4831_vm1, %v15851_v21, -inf  ;;  %v15869_v47 = vpop.eup %13326  ;;  %13334 = vpow2.f32 %v5440_v35 }
 0x3cb   :  { %5037 = vmax.xlane.f32.xlu1 %v5036_v51  ;;  %5034 = vmax.xlane.f32.xlu0 %v5033_v37  ;;  %v5738_v51 = vsel %vm4831_vm1, %v15869_v47, 0.0 }
 0x3ce   :  { %v4894_v14 = vpop.xlane.xlu0 %4893  ;;  %v15862_v25 = vpop.f32.mrf.mxu1  ;;  %11368 = vmatmul.mubr.msk.bf16.vlgmr.msra.gmra.mxu1 %vm1950_vm0, %v941_v18 }
 0x3cf   :  { %19248 = vst [vmem:[#allocation86_spill] sm:$0xff] %v15862_v25  ;;  %5031 = vmax.xlane.f32.xlu1 %v5030_v5  ;;  %5736 = vadd.xlane.f32.xlu0 %v5735_v44  ;;  %v5284_v61 = vsub.f32 %v15389_v39, %v4894_v14  ;;  %v5045_v37 = vsel %vm4831_vm1, %v15862_v25, -inf  ;;  %v15881_v18 = vpop.eup %13328  ;;  %v15883_v5 = vpack.c.bf16 %v12005_v2, %v12005_v2 }
 0x3d0   :  { %11388 = vmatpush3.bf16.msra.mxu1 %v6634_v62  ;;  %v15873_v56 = vpop.f32.mrf.mxu1  ;;  %v5732_v2 = vsel %vm4831_vm1, %v15881_v18, 0.0 }
 0x3d1   :  { %19250 = vst [vmem:[#allocation57_spill] sm:$0xff] %v15873_v56  ;;  %11389 = vmatprep.subr.bf16.mxu1 %v19251_v19  ;;  %v5448_v39 = vmul.f32 1.442695, %v5284_v61  ;;  %v5039_v62 = vsel %vm4831_vm1, %v15873_v56, -inf }
 0x3d2   :  { %v11178_v23 = vpop.f32.mrf.mxu1  ;;  %v4888_v31 = vpop.xlane.xlu0 %4887 }
 0x3d3   :  { %5739 = vadd.xlane.f32.xlu1 %v5738_v51  ;;  %5046 = vmax.xlane.f32.xlu0 %v5045_v37  ;;  %v15885_v32 = vpop.f32.mrf.mxu0  ;;  %v5282_v14 = vsub.f32 %v15397_v10, %v4888_v31  ;;  %v15897_v23 = vpop.eup %13330  ;;  %13336 = vpow2.f32 %v5448_v39 }
 0x3d4   :  { %19252 = vst [vmem:[#allocation100_spill] sm:$0xff] %v15885_v32  ;;  %11390 = vmatpush3.bf16.msra.mxu1 %v19251_v19  ;;  %v4891_v44 = vpop.xlane.xlu1 %4890  ;;  %v5747_v61 = vsel %vm4831_vm1, %v15897_v23, 0.0  ;;  %v5054_v10 = vsel %vm4831_vm1, %v15885_v32, -inf  ;;  %v15903_v31 = vpop.f32.mrf.mxu1 }
 0x3d5   :  { %v15888_v35 = vpop.f32.mrf.mxu0  ;;  %11879 = vmatprep.subr.msk.bf16.mxu1 %vm6518_vm2, %v15883_v5  ;;  %v5444_v51 = vmul.f32 1.442695, %v5282_v14  ;;  %19254 = vst [vmem:[#allocation54_spill] sm:$0xff] %v15903_v31  ;;  %v15905_v28 = vpop.eup %13332  ;;  %v5042_v39 = vsel %vm4831_vm1, %v15903_v31, -inf }
 0x3d6   :  { %19253 = vst [vmem:[#allocation41_spill] sm:$0xff] %v15888_v35  ;;  %v5048_v14 = vsel %vm4831_vm1, %v15888_v35, -inf  ;;  %v5741_v31 = vsel %vm4831_vm1, %v15905_v28, 0.0 }
 0x3d7   :  { %5733 = vadd.xlane.f32.xlu1 %v5732_v2  ;;  %5040 = vmax.xlane.f32.xlu0 %v5039_v62  ;;  %v11186_v19 = vpop.f32.mrf.mxu0  ;;  %13338 = vpow2.f32 %v5444_v51  ;;  %v5283_v2 = vsub.f32 %v15408_v0, %v4891_v44 }
 0x3d8   :  { %v15914_v19 = vpop.eup %13334 }
 0x3d9   :  { %v4903_v37 = vpop.xlane.xlu1 %4902  ;;  %v15918_v56 = vpop.f32.mrf.mxu0  ;;  %v5446_v51 = vmul.f32 1.442695, %v5283_v2  ;;  %v5744_v35 = vsel %vm4831_vm1, %v15914_v19, 0.0 }
 0x3da   :  { %19257 = vst [vmem:[#allocation42_spill] sm:$0xff] %v15918_v56  ;;  %v5287_v0 = vsub.f32 %v15421_v36, %v4903_v37  ;;  %v5051_v2 = vsel %vm4831_vm1, %v15918_v56, -inf }
 0x3db   :  { %5748 = vadd.xlane.f32.xlu1 %v5747_v61  ;;  %5055 = vmax.xlane.f32.xlu0 %v5054_v10  ;;  %13340 = vpow2.f32 %v5446_v51 }
 0x3dc   :  { %v5454_v36 = vmul.f32 1.442695, %v5287_v0 }
 0x3de   :  { %v15908_v62 = vpop.f32.mrf.mxu1  ;;  %v4897_v61 = vpop.xlane.xlu1 %4896  ;;  %13342 = vpow2.f32 %v5454_v36 }
 0x3df   :  { %19255 = vst [vmem:[#allocation85_spill] sm:$0xff] %v15908_v62  ;;  %v4912_v32 = vpop.xlane.xlu0 %4911  ;;  %5043 = vmax.xlane.f32.xlu1 %v5042_v39  ;;  %5049 = vmax.xlane.f32.xlu0 %v5048_v14  ;;  %v5285_v14 = vsub.f32 %v15430_v57, %v4897_v61  ;;  %v5063_v37 = vsel %vm4831_vm1, %v15908_v62, -inf }
 0x3e0   :  { %v15916_v10 = vpop.f32.mrf.mxu1  ;;  %v5290_v56 = vsub.f32 %v15435_v17, %v4912_v32 }
 0x3e1   :  { %19256 = vst [vmem:[#allocation71_spill] sm:$0xff] %v15916_v10  ;;  %v5450_v11 = vmul.f32 1.442695, %v5285_v14  ;;  %v5057_v51 = vsel %vm4831_vm1, %v15916_v10, -inf }
 0x3e2   :  { %v11194_v44 = vpop.f32.mrf.mxu1 }
 0x3e3   :  { %v4900_v25 = vpop.xlane.xlu0 %4899  ;;  %5742 = vadd.xlane.f32.xlu1 %v5741_v31  ;;  %5745 = vadd.xlane.f32.xlu0 %v5744_v35  ;;  %v15925_v39 = vpop.f32.mrf.mxu0  ;;  %13344 = vpow2.f32 %v5450_v11 }
 0x3e4   :  { %19258 = vst [vmem:[#allocation73_spill] sm:$0xff] %v15925_v39  ;;  %v15928_v21 = vpop.xlane.xlu1 %4908  ;;  %v15936_v44 = vpop.eup %13336  ;;  %v5286_v61 = vsub.f32 %v15448_v49, %v4900_v25 }
 0x3e5   :  { %v15930_v24 = vpop.f32.mrf.mxu0  ;;  %19260 = vst [vmem:[#allocation102_spill] sm:$0xff] %v15936_v44  ;;  %v5756_v0 = vsel %vm4831_vm1, %v15936_v44, 0.0  ;;  %v15943_v62 = vpop.eup %13338 }
 0x3e6   :  { %19259 = vst [vmem:[#allocation88_spill] sm:$0xff] %v15930_v24  ;;  %19261 = vst [vmem:[#allocation12_spill] sm:$0xff] %v15943_v62  ;;  %v5452_v36 = vmul.f32 1.442695, %v5286_v61  ;;  %v5750_v25 = vsel %vm4831_vm1, %v15943_v62, 0.0 }
 0x3e7   :  { %v4906_v31 = vpop.xlane.xlu0 %4905  ;;  %5064 = vmax.xlane.f32.xlu0 %v5063_v37  ;;  %5052 = vmax.xlane.f32.xlu1 %v5051_v2  ;;  %v11202_v35 = vpop.f32.mrf.mxu0  ;;  %v5072_v2 = vsel %vm4831_vm1, %v15925_v39, -inf }
 0x3e8   :  { %v5701_v57 = vpop.xlane.xlu1 %5700  ;;  %v15946_v37 = vpop.f32.mrf.mxu1  ;;  %v5460_v35 = vmul.f32 1.442695, %v5290_v56  ;;  %v5288_v17 = vsub.f32 %v15445_v46, %v4906_v31 }
 0x3e9   :  { %19262 = vst [vmem:[#allocation22_spill] sm:$0xff] %v15946_v37  ;;  %v5060_v61 = vsel %vm4831_vm1, %v15946_v37, -inf  ;;  %v15963_v56 = vpop.eup %13340 }
 0x3ea   :  { %19266 = vst [vmem:[#allocation117_spill] sm:$0xff] %v15963_v56  ;;  %v5456_v46 = vmul.f32 1.442695, %v5288_v17 }
 0x3eb   :  { %v5704_v34 = vpop.xlane.xlu0 %5703  ;;  %5058 = vmax.xlane.f32.xlu0 %v5057_v51  ;;  %5757 = vadd.xlane.f32.xlu1 %v5756_v0  ;;  %v5066_v0 = vsel %vm4831_vm1, %v15930_v24, -inf  ;;  %v15975_v24 = vpop.eup %13342 }
 0x3ec   :  { %v4921_v14 = vpop.xlane.xlu1 %4920  ;;  %13346 = vrcp.f32 %v5704_v34  ;;  %v15957_v34 = vpop.f32.mrf.mxu0  ;;  %19269 = vst [vmem:[#allocation120_spill] sm:$0xff] %v15975_v24  ;;  %v5765_v37 = vsel %vm4831_vm1, %v15975_v24, 0.0 }
 0x3ed   :  { %13348 = vrcp.f32 %v5701_v57  ;;  %19265 = vst [vmem:[#allocation23_spill] sm:$0xff] %v15957_v34  ;;  %v5069_v39 = vsel %vm4831_vm1, %v15957_v34, -inf  ;;  %v5293_v34 = vsub.f32 %v15477_v29, %v4921_v14 }
 0x3ee   :  { %v15948_v49 = vpop.f32.mrf.mxu1 }
 0x3ef   :  { %19263 = vst [vmem:[#allocation17_spill] sm:$0xff] %v15948_v49  ;;  %v5698_v32 = vpop.xlane.xlu0 %5697  ;;  %5751 = vadd.xlane.f32.xlu1 %v5750_v25  ;;  %5073 = vmax.xlane.f32.xlu0 %v5072_v2  ;;  %v5466_v44 = vmul.f32 1.442695, %v5293_v34 }
 0x3f0   :  { %13350 = vrcp.f32 %v5698_v32  ;;  %v4915_v11 = vpop.xlane.xlu1 %4914  ;;  %v15955_v51 = vpop.f32.mrf.mxu1 }
 0x3f1   :  { %19264 = vst [vmem:[#allocation28_spill] sm:$0xff] %v15955_v51  ;;  %13352 = vpow2.f32 %v5452_v36  ;;  %v5289_v36 = vsub.f32 %v15458_v7, %v15928_v21  ;;  %v5081_v21 = vsel %vm4831_vm1, %v15948_v49, -inf  ;;  %v5075_v24 = vsel %vm4831_vm1, %v15955_v51, -inf }
 0x3f2   :  { %v11210_v57 = vpop.f32.mrf.mxu1  ;;  %13354 = vpow2.f32 %v5460_v35 }
 0x3f3   :  { %v4930_v31 = vpop.xlane.xlu0 %4929  ;;  %5061 = vmax.xlane.f32.xlu1 %v5060_v61  ;;  %5067 = vmax.xlane.f32.xlu0 %v5066_v0  ;;  %v15965_v25 = vpop.f32.mrf.mxu0  ;;  %v5753_v57 = vsel %vm4831_vm1, %v15963_v56, 0.0  ;;  %13356 = vpow2.f32 %v5456_v46  ;;  %v5458_v10 = vmul.f32 1.442695, %v5289_v36 }
 0x3f4   :  { %19267 = vst [vmem:[#allocation118_spill] sm:$0xff] %v15965_v25  ;;  %v5713_v2 = vpop.xlane.xlu1 %5712  ;;  %v15977_v0 = vpop.eup %13344 }
 0x3f5   :  { %v15969_v32 = vpop.f32.mrf.mxu0  ;;  %19270 = vst [vmem:[#allocation121_spill] sm:$0xff] %v15977_v0  ;;  %13358 = vpow2.f32 %v5458_v10  ;;  %v5759_v29 = vsel %vm4831_vm1, %v15977_v0, 0.0  ;;  %v5296_v10 = vsub.f32 %v15497_v55, %v4930_v31  ;;  %v6577_v31 = vsel %vm6518_vm2, %v15845_v22, 0 }
 0x3f6   :  { %19268 = vst [vmem:[#allocation119_spill] sm:$0xff] %v15969_v32  ;;  %13360 = vrcp.f32 %v5713_v2  ;;  %v5090_v22 = vsel %vm4831_vm1, %v15965_v25, -inf }
 0x3f7   :  { %v4918_v35 = vpop.xlane.xlu0 %4917  ;;  %5754 = vadd.xlane.f32.xlu0 %v5753_v57  ;;  %5070 = vmax.xlane.f32.xlu1 %v5069_v39  ;;  %v11218_v17 = vpop.f32.mrf.mxu0  ;;  %v5472_v34 = vmul.f32 1.442695, %v5296_v10 }
 0x3f8   :  { %v5707_v61 = vpop.xlane.xlu1 %5706  ;;  %v15986_v39 = vpop.f32.mrf.mxu1  ;;  %v5291_v17 = vsub.f32 %v15486_v26, %v4915_v11 }
 0x3f9   :  { %v13347_v7 = vpop.eup %13346  ;;  %19271 = vst [vmem:[#allocation122_spill] sm:$0xff] %v15986_v39  ;;  %13362 = vrcp.f32 %v5707_v61 }
 0x3fa   :  { %v13349_v56 = vpop.eup %13348  ;;  %v6274_v36 = vmul.f32 %v13347_v7, %v15474_v16 }
 0x3fb   :  { %v15984_v62 = vpop.xlane.xlu0 %4923  ;;  %5082 = vmax.xlane.f32.xlu0 %v5081_v21  ;;  %5766 = vadd.xlane.f32.xlu1 %v5765_v37  ;;  %v6273_v14 = vmul.f32 %v13349_v56, %v15462_v50  ;;  %v16008_v50 = vpop.f32.mrf.mxu0  ;;  %v5462_v56 = vmul.f32 1.442695, %v5291_v17 }
 0x3fc   :  { %v15988_v46 = vpop.xlane.xlu1 %4926  ;;  %v6417_v0 = vpack.c.bf16 %v6274_v36, %v6274_v36  ;;  %19276 = vst [vmem:[#allocation127_spill] sm:$0xff] %v16008_v50  ;;  %v5294_v36 = vsub.f32 %v15505_v43, %v15984_v62  ;;  %v5084_v43 = vsel %vm4831_vm1, %v15969_v32, -inf }
 0x3fd   :  { %v13351_v57 = vpop.eup %13350 }
 0x3fe   :  { %v15992_v49 = vpop.f32.mrf.mxu1  ;;  %v6272_v37 = vmul.f32 %v13351_v57, %v15492_v6  ;;  %v16000_v21 = vpop.eup %13352  ;;  %v5292_v6 = vsub.f32 %v15521_v54, %v4918_v35  ;;  %v19279_v57 = vld [vmem:[#allocation25_spill] sm:$0xff]  ;;  %v5468_v62 = vmul.f32 1.442695, %v5294_v36 }
 0x3ff   :  { %19272 = vst [vmem:[#allocation123_spill] sm:$0xff] %v15992_v49  ;;  %19273 = vst [vmem:[#allocation124_spill] sm:$0xff] %v16000_v21  ;;  %v5710_v16 = vpop.xlane.xlu0 %5709  ;;  %5076 = vmax.xlane.f32.xlu0 %v5075_v24  ;;  %5760 = vadd.xlane.f32.xlu1 %v5759_v29  ;;  %v16003_v26 = vpop.eup %13354  ;;  %v5762_v24 = vsel %vm4831_vm1, %v16000_v21, 0.0  ;;  %v19281_v29 = vld [vmem:[#allocation19_spill] sm:$0xff] }
 0x400   :  { %19274 = vst [vmem:[#allocation125_spill] sm:$0xff] %v16003_v26  ;;  %v5722_v11 = vpop.xlane.xlu1 %5721  ;;  %v16005_v7 = vpop.f32.mrf.mxu1  ;;  %v6416_v51 = vpack.c.bf16 %v6273_v14, %v6272_v37  ;;  %13364 = vrcp.f32 %v5710_v16  ;;  %v5774_v54 = vsel %vm4831_vm1, %v16003_v26, 0.0  ;;  %v1861_v37 = vpack.c.bf16 %v19281_v29, %v19281_v29 }
 0x401   :  { %19275 = vst [vmem:[#allocation126_spill] sm:$0xff] %v16005_v7  ;;  %13366 = vpow2.f32 %v5466_v44  ;;  %v5464_v44 = vmul.f32 1.442695, %v5292_v6 }
 0x402   :  { %11375 = vmatprep.mubr.msk.bf16.mxu0 %vm4831_vm1, %v6416_v51  ;;  %v11226_v55 = vpop.f32.mrf.mxu1  ;;  %v16022_v51 = vpop.eup %13356  ;;  %13368 = vpow2.f32 %v5462_v56 }
 0x403   :  { %11376 = vmatmul.mubr.msk.bf16.vlgmr.msra.gmra.mxu0 %vm4831_vm1, %v6417_v0  ;;  %v16016_v2 = vpop.xlane.xlu0 %4947  ;;  %5763 = vadd.xlane.f32.xlu0 %v5762_v24  ;;  %v16020_v35 = vpop.f32.mrf.mxu0  ;;  %19278 = vst [vmem:[#allocation129_spill] sm:$0xff] %v16022_v51  ;;  %13370 = vpow2.f32 %v5472_v34  ;;  %v5768_v14 = vsel %vm4831_vm1, %v16022_v51, 0.0 }
 0x404   :  { %19277 = vst [vmem:[#allocation128_spill] sm:$0xff] %v16020_v35  ;;  %11380 = vmatpush3.bf16.msra.mxu0 %v6577_v31  ;;  %5775 = vadd.xlane.f32.xlu1 %v5774_v54  ;;  %v16024_v61 = vpop.xlane.xlu1 %4938  ;;  %13372 = vrcp.f32 %v5722_v11  ;;  %v16039_v6 = vpop.eup %13358  ;;  %v5078_v11 = vsel %vm4831_vm1, %v15986_v39, -inf  ;;  %v5295_v54 = vsub.f32 %v15543_v20, %v15988_v46 }
 0x405   :  { %11381 = vmatprep.subr.bf16.mxu0 %v19279_v57  ;;  %v16027_v0 = vpop.f32.mrf.mxu0  ;;  %13374 = vpow2.f32 %v5464_v44  ;;  %19282 = vst [vmem:[#allocation130_spill] sm:$0xff] %v16039_v6  ;;  %v13361_v55 = vpop.eup %13360 }
 0x406   :  { %19280 = vst [vmem:[#allocation25_spill] sm:$0xff] %v16027_v0  ;;  %v16047_v24 = vpop.f32.mrf.mxu1  ;;  %v13363_v31 = vpop.eup %13362  ;;  %v6277_v36 = vmul.f32 %v13361_v55, %v15511_v3 }
 0x407   :  { %v5719_v17 = vpop.xlane.xlu0 %5718  ;;  %5091 = vmax.xlane.f32.xlu0 %v5090_v22  ;;  %v11234_v10 = vpop.f32.mrf.mxu0  ;;  %19283 = vst [vmem:[#allocation131_spill] sm:$0xff] %v16047_v24  ;;  %v6275_v46 = vmul.f32 %v13363_v31, %v15525_v42 }
 0x408   :  { %11382 = vmatpush3.bf16.msra.mxu0 %v19279_v57  ;;  %5769 = vadd.xlane.f32.xlu1 %v5768_v14  ;;  %v5716_v16 = vpop.xlane.xlu1 %5715  ;;  %13376 = vrcp.f32 %v5719_v17  ;;  %v5771_v57 = vsel %vm4831_vm1, %v16039_v6, 0.0  ;;  %v5087_v14 = vsel %vm4831_vm1, %v16008_v50, -inf  ;;  %v6419_v32 = vpack.c.bf16 %v6277_v36, %v6277_v36 }
 0x409   :  { %11878 = vmatprep.subr.msk.bf16.mxu0 %vm6518_vm2, %v1861_v37  ;;  %13378 = vrcp.f32 %v5716_v16  ;;  %v16070_v3 = vpop.f32.mrf.mxu0 }
 0x40a   :  { %13380 = vpow2.f32 %v5468_v62  ;;  %19287 = vst [vmem:[#allocation135_spill] sm:$0xff] %v16070_v3 }
 0x40b   :  { %v16043_v56 = vpop.xlane.xlu0 %4935  ;;  %5085 = vmax.xlane.f32.xlu0 %v5084_v43 }
 0x40c   :  { %5079 = vmax.xlane.f32.xlu1 %v5078_v11  ;;  %v16049_v34 = vpop.xlane.xlu1 %4932  ;;  %v5470_v11 = vmul.f32 1.442695, %v5295_v54 }
 0x40d   :  { %v13365_v22 = vpop.eup %13364 }
 0x40e   :  { %v16053_v44 = vpop.f32.mrf.mxu1  ;;  %v16062_v10 = vpop.eup %13366  ;;  %v6276_v43 = vmul.f32 %v13365_v22, %v15552_v53  ;;  %13382 = vpow2.f32 %v5470_v11  ;;  %v5297_v11 = vsub.f32 %v15546_v60, %v16049_v34  ;;  %v19296_v60 = vld [vmem:[#allocation65_spill] sm:$0xff] }
 0x40f   :  { %19284 = vst [vmem:[#allocation132_spill] sm:$0xff] %v16053_v44  ;;  %v16058_v17 = vpop.xlane.xlu0 %4941  ;;  %5772 = vadd.xlane.f32.xlu0 %v5771_v57  ;;  %19285 = vst [vmem:[#allocation133_spill] sm:$0xff] %v16062_v10  ;;  %v5099_v57 = vsel %vm4831_vm1, %v15992_v49, -inf  ;;  %v16074_v29 = vpop.eup %13368  ;;  %v5783_v42 = vsel %vm4831_vm1, %v16062_v10, 0.0  ;;  %v19298_v10 = vld [vmem:[#allocation35_spill] sm:$0xff] }
 0x410   :  { %5088 = vmax.xlane.f32.xlu1 %v5087_v14  ;;  %v16064_v16 = vpop.xlane.xlu1 %4944  ;;  %v16066_v20 = vpop.f32.mrf.mxu1  ;;  %v6418_v62 = vpack.c.bf16 %v6276_v43, %v6275_v46  ;;  %19288 = vst [vmem:[#allocation136_spill] sm:$0xff] %v16074_v29  ;;  %v5299_v14 = vsub.f32 %v15535_v8, %v16024_v61  ;;  %v19291_v46 = vld [vmem:[#allocation58_spill] sm:$0xff]  ;;  %v6691_v8 = vsel %vm6518_vm2, %v1861_v37, 0  ;;  %v19292_v61 = vld [vmem:[#allocation27_spill] sm:$0xff]  ;;  %v5777_v37 = vsel %vm4831_vm1, %v16074_v29, 0.0 }
 0x411   :  { %19286 = vst [vmem:[#allocation134_spill] sm:$0xff] %v16066_v20  ;;  %v16082_v31 = vpop.eup %13370  ;;  %v12186_v43 = vunpack.i.h.bf16 %v19291_v46  ;;  %v1860_v36 = vpack.c.bf16 %v19292_v61, %v14269_v41  ;;  %v5302_v29 = vsub.f32 %v19298_v10, %v16016_v2 }
 0x412   :  { %v11242_v55 = vpop.f32.mrf.mxu1  ;;  %19290 = vst [vmem:[#allocation138_spill] sm:$0xff] %v16082_v31  ;;  %11383 = vmatprep.mubr.msk.bf16.mxu0 %vm4831_vm1, %v6418_v62  ;;  %v13373_v22 = vpop.eup %13372  ;;  %v5093_v62 = vsel %vm4831_vm1, %v16005_v7, -inf  ;;  %v5478_v49 = vmul.f32 1.442695, %v5299_v14 }
 0x413   :  { %v5728_v39 = vpop.xlane.xlu0 %5727  ;;  %5100 = vmax.xlane.f32.xlu0 %v5099_v57  ;;  %v16080_v53 = vpop.f32.mrf.mxu0  ;;  %11384 = vmatmul.mubr.msk.bf16.vlgmr.msra.gmra.mxu0 %vm4831_vm1, %v6419_v32  ;;  %v6280_v7 = vmul.f32 %v13373_v22, %v15558_v9  ;;  %v16104_v14 = vpack.c.bf16 %v12186_v43, %v12186_v43  ;;  %v5474_v9 = vmul.f32 1.442695, %v5297_v11  ;;  %v5792_v22 = vsel %vm4831_vm1, %v16082_v31, 0.0 }
 0x414   :  { %19289 = vst [vmem:[#allocation137_spill] sm:$0xff] %v16080_v53  ;;  %5784 = vadd.xlane.f32.xlu1 %v5783_v42  ;;  %v5731_v54 = vpop.xlane.xlu1 %5730  ;;  %v16092_v57 = vpop.eup %13374  ;;  %11396 = vmatpush3.bf16.msra.mxu0 %v6691_v8  ;;  %13384 = vrcp.f32 %v5728_v39  ;;  %v19295_v8 = vld [vmem:[#allocation56_spill] sm:$0xff] }
 0x415   :  { %v16090_v55 = vpop.f32.mrf.mxu0  ;;  %19294 = vst [vmem:[#allocation139_spill] sm:$0xff] %v16092_v57  ;;  %v13377_v42 = vpop.eup %13376  ;;  %11397 = vmatprep.subr.bf16.mxu0 %v1860_v36  ;;  %13386 = vrcp.f32 %v5731_v54  ;;  %v12066_v39 = vunpack.i.h.bf16 %v19295_v8  ;;  %v19297_v54 = vld [vmem:[#allocation79_spill] sm:$0xff] }
 0x416   :  { %19293 = vst [vmem:[#allocation58_spill] sm:$0xff] %v16090_v55  ;;  %v13379_v41 = vpop.eup %13378  ;;  %v6279_v25 = vmul.f32 %v13377_v42, %v19297_v54  ;;  %v16123_v10 = vpop.f32.mrf.mxu1 }
 0x417   :  { %v16098_v32 = vpop.xlane.xlu0 %4965  ;;  %5094 = vmax.xlane.f32.xlu0 %v5093_v62  ;;  %v11250_v61 = vpop.f32.mrf.mxu0  ;;  %v6278_v34 = vmul.f32 %v13379_v41, %v19296_v60  ;;  %v12065_v62 = vunpack.i.l.bf16 %v19295_v8  ;;  %19301 = vst [vmem:[#allocation65_spill] sm:$0xff] %v16123_v10  ;;  %v5108_v60 = vsel %vm4831_vm1, %v16020_v35, -inf }
 0x418   :  { %5778 = vadd.xlane.f32.xlu1 %v5777_v37  ;;  %v5725_v50 = vpop.xlane.xlu1 %5724  ;;  %v19299_v61 = vld [vmem:[#allocation36_spill] sm:$0xff]  ;;  %11398 = vmatpush3.bf16.msra.mxu0 %v1860_v36  ;;  %v5780_v37 = vsel %vm4831_vm1, %v16092_v57, 0.0  ;;  %v16121_v2 = vpop.eup %13380  ;;  %v19302_v36 = vld [vmem:[#allocation87_spill] sm:$0xff] }
 0x419   :  { %13388 = vrcp.f32 %v5725_v50  ;;  %v5298_v6 = vsub.f32 %v19299_v61, %v16043_v56  ;;  %11880 = vmatprep.subr.msk.bf16.mxu0 %vm6518_vm2, %v16104_v14  ;;  %v6420_v50 = vpack.c.bf16 %v6279_v25, %v6278_v34  ;;  %19300 = vst [vmem:[#allocation56_spill] sm:$0xff] %v16121_v2  ;;  %v6421_v56 = vpack.c.bf16 %v6280_v7, %v6280_v7  ;;  %v19304_v7 = vld [vmem:[#allocation48_spill] sm:$0xff] }
 0x41a   :  { %13390 = vpow2.f32 %v5478_v49  ;;  %v6748_v49 = vsel %vm6518_vm2, %v15883_v5, 0  ;;  %v12305_v42 = vunpack.i.l.bf16 %v19302_v36  ;;  %v1862_v11 = vpack.c.bf16 %v12066_v39, %v12065_v62  ;;  %v16146_v62 = vpop.f32.mrf.mxu0 }
 0x41b   :  { %v16117_v41 = vpop.xlane.xlu0 %4953  ;;  %5781 = vadd.xlane.f32.xlu0 %v5780_v37  ;;  %11391 = vmatprep.mubr.msk.bf16.mxu1 %vm4831_vm1, %v6420_v50  ;;  %v5476_v25 = vmul.f32 1.442695, %v5298_v6  ;;  %v5484_v34 = vmul.f32 1.442695, %v5302_v29  ;;  %13392 = vpow2.f32 %v5474_v9  ;;  %v5300_v54 = vsub.f32 %v19304_v7, %v16058_v17  ;;  %19306 = vst [vmem:[#allocation36_spill] sm:$0xff] %v16146_v62  ;;  %v16148_v29 = vpop.eup %13382 }
 0x41c   :  { %5793 = vadd.xlane.f32.xlu1 %v5792_v22  ;;  %v16125_v43 = vpop.xlane.xlu1 %4956  ;;  %11392 = vmatmul.mubr.msk.bf16.vlgmr.msra.gmra.mxu1 %vm4831_vm1, %v6421_v56  ;;  %v5786_v5 = vsel %vm4831_vm1, %v16121_v2, 0.0  ;;  %19307 = vst [vmem:[#allocation87_spill] sm:$0xff] %v16148_v29  ;;  %v16150_v37 = vpack.c.bf16 %v12305_v42, %v12305_v42  ;;  %v5102_v9 = vsel %vm4831_vm1, %v16027_v0, -inf  ;;  %v19312_v2 = vld [vmem:[#allocation101_spill] sm:$0xff] }
 0x41d   :  { %11404 = vmatpush3.bf16.msra.mxu1 %v6748_v49  ;;  %13394 = vpow2.f32 %v5476_v25  ;;  %v5480_v22 = vmul.f32 1.442695, %v5300_v54  ;;  %v5096_v49 = vsel %vm4831_vm1, %v16047_v24, -inf }
 0x41e   :  { %v16132_v8 = vpop.f32.mrf.mxu1  ;;  %11405 = vmatprep.subr.bf16.mxu1 %v1862_v11  ;;  %13396 = vpow2.f32 %v5484_v34 }
 0x41f   :  { %19303 = vst [vmem:[#allocation79_spill] sm:$0xff] %v16132_v8  ;;  %v16138_v61 = vpop.xlane.xlu0 %4959  ;;  %5109 = vmax.xlane.f32.xlu0 %v5108_v60  ;;  %13398 = vpow2.f32 %v5480_v22  ;;  %v12006_v22 = vunpack.i.h.bf16 %v19249_v15 }
 0x420   :  { %5787 = vadd.xlane.f32.xlu1 %v5786_v5  ;;  %v16142_v6 = vpop.xlane.xlu1 %4950  ;;  %v16144_v39 = vpop.f32.mrf.mxu1  ;;  %v19311_v5 = vld [vmem:[#allocation96_spill] sm:$0xff] }
 0x421   :  { %19305 = vst [vmem:[#allocation35_spill] sm:$0xff] %v16144_v39  ;;  %v13385_v50 = vpop.eup %13384  ;;  %11406 = vmatpush3.bf16.msra.mxu1 %v1862_v11  ;;  %v19310_v11 = vld [vmem:[#allocation68_spill] sm:$0xff] }
 0x422   :  { %v11258_v17 = vpop.f32.mrf.mxu1  ;;  %v13387_v7 = vpop.eup %13386  ;;  %11881 = vmatprep.subr.msk.bf16.mxu1 %vm6518_vm2, %v16150_v37  ;;  %v5301_v54 = vsub.f32 %v19310_v11, %v16064_v16  ;;  %v6282_v31 = vmul.f32 %v13385_v50, %v19312_v2  ;;  %v12185_v16 = vunpack.i.l.bf16 %v19291_v46 }
 0x423   :  { %v16154_v56 = vpop.xlane.xlu0 %4983  ;;  %5103 = vmax.xlane.f32.xlu0 %v5102_v9  ;;  %v16158_v60 = vpop.f32.mrf.mxu0  ;;  %v6283_v17 = vmul.f32 %v13387_v7, %v19311_v5  ;;  %v5789_v9 = vsel %vm4831_vm1, %v16148_v29, 0.0 }
 0x424   :  { %19308 = vst [vmem:[#allocation48_spill] sm:$0xff] %v16158_v60  ;;  %5097 = vmax.xlane.f32.xlu1 %v5096_v49  ;;  %v16162_v42 = vpop.xlane.xlu1 %4962  ;;  %v5105_v49 = vsel %vm4831_vm1, %v16070_v3, -inf  ;;  %v5482_v5 = vmul.f32 1.442695, %v5301_v54  ;;  %v5117_v3 = vsel %vm4831_vm1, %v16053_v44, -inf  ;;  %v1864_v50 = vpack.c.bf16 %v12185_v16, %v12006_v22 }
 0x425   :  { %v16164_v25 = vpop.f32.mrf.mxu0 }
 0x426   :  { %19309 = vst [vmem:[#allocation140_spill] sm:$0xff] %v16164_v25  ;;  %v13389_v34 = vpop.eup %13388  ;;  %13400 = vpow2.f32 %v5482_v5 }
 0x427   :  { %v16171_v24 = vpop.xlane.xlu0 %4971  ;;  %5790 = vadd.xlane.f32.xlu0 %v5789_v9  ;;  %v11266_v0 = vpop.f32.mrf.mxu0  ;;  %v6281_v35 = vmul.f32 %v13389_v34, %v15643_v12  ;;  %v6423_v9 = vpack.c.bf16 %v6283_v17, %v6283_v17  ;;  %v5305_v12 = vsub.f32 %v15598_v45, %v16125_v43  ;;  %v6805_v45 = vsel %vm6518_vm2, %v16104_v14, 0 }
 0x428   :  { %v16177_v57 = vpop.eup %13390  ;;  %5106 = vmax.xlane.f32.xlu1 %v5105_v49  ;;  %v16180_v7 = vpop.xlane.xlu1 %4974  ;;  %v5111_v34 = vsel %vm4831_vm1, %v16066_v20, -inf  ;;  %v5303_v49 = vsub.f32 %v15607_v63, %v16142_v6  ;;  %v19322_v63 = vld [vmem:[#allocation37_spill] sm:$0xff] }
 0x429   :  { %19313 = vst [vmem:[#allocation68_spill] sm:$0xff] %v16177_v57  ;;  %v6422_v11 = vpack.c.bf16 %v6282_v31, %v6281_v35  ;;  %v5801_v46 = vsel %vm4831_vm1, %v16177_v57, 0.0  ;;  %v16192_v2 = vpop.eup %13392  ;;  %v19315_v35 = vld [vmem:[#allocation59_spill] sm:$0xff]  ;;  %v16195_v31 = vpop.f32.mrf.mxu1  ;;  %v5490_v17 = vmul.f32 1.442695, %v5305_v12  ;;  %v5304_v6 = vsub.f32 %v19322_v63, %v16117_v41 }
 0x42a   :  { %19314 = vst [vmem:[#allocation96_spill] sm:$0xff] %v16192_v2  ;;  %v12246_v15 = vunpack.i.h.bf16 %v19315_v35  ;;  %19316 = vst [vmem:[#allocation101_spill] sm:$0xff] %v16195_v31  ;;  %v16206_v54 = vpop.eup %13394  ;;  %v5795_v14 = vsel %vm4831_vm1, %v16192_v2, 0.0 }
 0x42b   :  { %v16187_v0 = vpop.xlane.xlu0 %4977  ;;  %11399 = vmatprep.mubr.msk.bf16.mxu0 %vm4831_vm1, %v6422_v11  ;;  %5118 = vmax.xlane.f32.xlu0 %v5117_v3  ;;  %19318 = vst [vmem:[#allocation141_spill] sm:$0xff] %v16206_v54  ;;  %v16214_v16 = vpop.eup %13396  ;;  %13402 = vpow2.f32 %v5490_v17 }
 0x42c   :  { %5802 = vadd.xlane.f32.xlu1 %v5801_v46  ;;  %11400 = vmatmul.mubr.msk.bf16.vlgmr.msra.gmra.mxu0 %vm4831_vm1, %v6423_v9  ;;  %v16200_v43 = vpop.xlane.xlu1 %4968  ;;  %19319 = vst [vmem:[#allocation142_spill] sm:$0xff] %v16214_v16  ;;  %v16216_v22 = vpack.c.bf16 %v12246_v15, %v12246_v15  ;;  %v16222_v46 = vpop.f32.mrf.mxu0  ;;  %v19323_v15 = vld [vmem:[#allocation82_spill] sm:$0xff]  ;;  %v5810_v20 = vsel %vm4831_vm1, %v16214_v16, 0.0 }
 0x42d   :  { %11412 = vmatpush3.bf16.msra.mxu0 %v6805_v45  ;;  %19321 = vst [vmem:[#allocation144_spill] sm:$0xff] %v16222_v46  ;;  %v5798_v45 = vsel %vm4831_vm1, %v16206_v54, 0.0  ;;  %v16236_v44 = vpop.eup %13398  ;;  %v5488_v54 = vmul.f32 1.442695, %v5304_v6  ;;  %v5120_v6 = vsel %vm4831_vm1, %v16090_v55, -inf }
 0x42e   :  { %11413 = vmatprep.subr.bf16.mxu0 %v1864_v50  ;;  %v16202_v3 = vpop.f32.mrf.mxu1  ;;  %19325 = vst [vmem:[#allocation82_spill] sm:$0xff] %v16236_v44 }
 0x42f   :  { %19317 = vst [vmem:[#allocation59_spill] sm:$0xff] %v16202_v3  ;;  %v16210_v11 = vpop.xlane.xlu0 %5001  ;;  %5112 = vmax.xlane.f32.xlu0 %v5111_v34  ;;  %v5308_v34 = vsub.f32 %v19323_v15, %v16098_v32  ;;  %v5126_v32 = vsel %vm4831_vm1, %v16080_v53, -inf  ;;  %v5804_v15 = vsel %vm4831_vm1, %v16236_v44, 0.0 }
 0x430   :  { %5796 = vadd.xlane.f32.xlu1 %v5795_v14  ;;  %v16218_v5 = vpop.xlane.xlu1 %4980  ;;  %v16220_v9 = vpop.f32.mrf.mxu1  ;;  %v5486_v14 = vmul.f32 1.442695, %v5303_v49  ;;  %v19327_v49 = vld [vmem:[#allocation53_spill] sm:$0xff] }
 0x431   :  { %19320 = vst [vmem:[#allocation143_spill] sm:$0xff] %v16220_v9  ;;  %11414 = vmatpush3.bf16.msra.mxu0 %v1864_v50  ;;  %v5496_v17 = vmul.f32 1.442695, %v5308_v34 }
 0x432   :  { %11882 = vmatprep.subr.msk.bf16.mxu0 %vm6518_vm2, %v16216_v22  ;;  %v11274_v12 = vpop.f32.mrf.mxu1  ;;  %13404 = vpow2.f32 %v5486_v14 }
 0x433   :  { %5799 = vadd.xlane.f32.xlu0 %v5798_v45  ;;  %v16234_v50 = vpop.f32.mrf.mxu0  ;;  %v16240_v63 = vpop.xlane.xlu0 %4989  ;;  %v5306_v45 = vsub.f32 %v19327_v49, %v16138_v61  ;;  %13406 = vpow2.f32 %v5488_v54  ;;  %v5114_v61 = vsel %vm4831_vm1, %v16123_v10, -inf  ;;  %v5307_v54 = vsub.f32 %v15668_v40, %v16162_v42 }
 0x434   :  { %19324 = vst [vmem:[#allocation37_spill] sm:$0xff] %v16234_v50  ;;  %5811 = vadd.xlane.f32.xlu1 %v5810_v20  ;;  %v16238_v41 = vpop.xlane.xlu1 %4992  ;;  %v16254_v2 = vpop.eup %13400  ;;  %13408 = vpow2.f32 %v5496_v17 }
 0x435   :  { %v16242_v12 = vpop.f32.mrf.mxu0  ;;  %19328 = vst [vmem:[#allocation53_spill] sm:$0xff] %v16254_v2  ;;  %v5492_v34 = vmul.f32 1.442695, %v5306_v45  ;;  %v16260_v14 = vpop.f32.mrf.mxu1  ;;  %v5807_v17 = vsel %vm4831_vm1, %v16254_v2, 0.0  ;;  %v5494_v42 = vmul.f32 1.442695, %v5307_v54 }
 0x436   :  { %19326 = vst [vmem:[#allocation145_spill] sm:$0xff] %v16242_v12  ;;  %19329 = vst [vmem:[#allocation146_spill] sm:$0xff] %v16260_v14  ;;  %v5129_v54 = vsel %vm4831_vm1, %v16144_v39, -inf }
 0x437   :  { %5127 = vmax.xlane.f32.xlu0 %v5126_v32  ;;  %v11282_v20 = vpop.f32.mrf.mxu0  ;;  %v16256_v53 = vpop.xlane.xlu0 %4995  ;;  %13410 = vpow2.f32 %v5492_v34  ;;  %v5135_v34 = vsel %vm4831_vm1, %v16132_v8, -inf }
 0x438   :  { %5805 = vadd.xlane.f32.xlu1 %v5804_v15  ;;  %v16250_v16 = vpop.xlane.xlu1 %4986  ;;  %v5123_v15 = vsel %vm4831_vm1, %v16146_v62, -inf  ;;  %v16274_v20 = vpop.eup %13402  ;;  %13412 = vpow2.f32 %v5494_v42  ;;  %v19340_v42 = vld [vmem:[#allocation38_spill] sm:$0xff] }
 0x439   :  { %19331 = vst [vmem:[#allocation148_spill] sm:$0xff] %v16274_v20  ;;  %v16280_v40 = vpop.f32.mrf.mxu0  ;;  %v5819_v10 = vsel %vm4831_vm1, %v16274_v20, 0.0  ;;  %v5310_v51 = vsub.f32 %v19340_v42, %v16171_v24 }
 0x43a   :  { %19333 = vst [vmem:[#allocation150_spill] sm:$0xff] %v16280_v40 }
 0x43b   :  { %5121 = vmax.xlane.f32.xlu0 %v5120_v6  ;;  %v5500_v42 = vmul.f32 1.442695, %v5310_v51 }
 0x43c   :  { %5115 = vmax.xlane.f32.xlu1 %v5114_v61  ;;  %v16262_v32 = vpop.xlane.xlu1 %4998 }
 0x43e   :  { %v16266_v49 = vpop.f32.mrf.mxu1  ;;  %v16270_v45 = vpop.xlane.xlu0 %5019 }
 0x43f   :  { %19330 = vst [vmem:[#allocation147_spill] sm:$0xff] %v16266_v49  ;;  %5808 = vadd.xlane.f32.xlu0 %v5807_v17  ;;  %v5311_v17 = vsub.f32 %v15656_v48, %v16180_v7 }
 0x440   :  { %5124 = vmax.xlane.f32.xlu1 %v5123_v15  ;;  %v16276_v6 = vpop.xlane.xlu1 %5010  ;;  %v16278_v61 = vpop.f32.mrf.mxu1 }
 0x441   :  { %19332 = vst [vmem:[#allocation149_spill] sm:$0xff] %v16278_v61  ;;  %v16290_v15 = vpop.eup %13404  ;;  %v5502_v7 = vmul.f32 1.442695, %v5311_v17  ;;  %v19341_v17 = vld [vmem:[#allocation81_spill] sm:$0xff] }
 0x442   :  { %v11290_v55 = vpop.f32.mrf.mxu1  ;;  %19335 = vst [vmem:[#allocation152_spill] sm:$0xff] %v16290_v15  ;;  %v16294_v44 = vpop.xlane.xlu0 %5007  ;;  %v5314_v26 = vsub.f32 %v19341_v17, %v16154_v56  ;;  %v5144_v56 = vsel %vm4831_vm1, %v16158_v60, -inf }
 0x443   :  { %5136 = vmax.xlane.f32.xlu0 %v5135_v34  ;;  %v16288_v62 = vpop.f32.mrf.mxu0  ;;  %v16300_v48 = vpop.eup %13406  ;;  %v19338_v34 = vld [vmem:[#allocation50_spill] sm:$0xff]  ;;  %13414 = vpow2.f32 %v5502_v7  ;;  %v19345_v7 = vld [vmem:[#allocation67_spill] sm:$0xff] }
 0x444   :  { %19334 = vst [vmem:[#allocation151_spill] sm:$0xff] %v16288_v62  ;;  %5820 = vadd.xlane.f32.xlu1 %v5819_v10  ;;  %v16292_v2 = vpop.xlane.xlu1 %5004  ;;  %19337 = vst [vmem:[#allocation154_spill] sm:$0xff] %v16300_v48  ;;  %v5309_v8 = vsub.f32 %v19338_v34, %v16200_v43  ;;  %v5813_v10 = vsel %vm4831_vm1, %v16290_v15, 0.0  ;;  %v16306_v57 = vpop.eup %13408  ;;  %v5816_v39 = vsel %vm4831_vm1, %v16300_v48, 0.0 }
 0x445   :  { %v16296_v55 = vpop.f32.mrf.mxu0  ;;  %19339 = vst [vmem:[#allocation50_spill] sm:$0xff] %v16306_v57  ;;  %v16320_v34 = vpop.eup %13410 }
 0x446   :  { %19336 = vst [vmem:[#allocation153_spill] sm:$0xff] %v16296_v55  ;;  %v5498_v43 = vmul.f32 1.442695, %v5309_v8  ;;  %19342 = vst [vmem:[#allocation38_spill] sm:$0xff] %v16320_v34  ;;  %v5508_v8 = vmul.f32 1.442695, %v5314_v26 }
 0x447   :  { %5130 = vmax.xlane.f32.xlu0 %v5129_v54  ;;  %v11298_v20 = vpop.f32.mrf.mxu0  ;;  %v16316_v54 = vpop.xlane.xlu0 %5013  ;;  %v5822_v17 = vsel %vm4831_vm1, %v16320_v34, 0.0  ;;  %v5138_v26 = vsel %vm4831_vm1, %v16164_v25, -inf }
 0x448   :  { %5814 = vadd.xlane.f32.xlu1 %v5813_v10  ;;  %v16308_v29 = vpop.xlane.xlu1 %5016  ;;  %v5828_v20 = vsel %vm4831_vm1, %v16306_v57, 0.0  ;;  %v16322_v10 = vpop.f32.mrf.mxu1  ;;  %13416 = vpow2.f32 %v5498_v43 }
 0x449   :  { %19343 = vst [vmem:[#allocation81_spill] sm:$0xff] %v16322_v10  ;;  %v16340_v15 = vpop.f32.mrf.mxu0  ;;  %13418 = vpow2.f32 %v5500_v42 }
 0x44a   :  { %19347 = vst [vmem:[#allocation156_spill] sm:$0xff] %v16340_v15  ;;  %13420 = vpow2.f32 %v5508_v8 }
 0x44b   :  { %5817 = vadd.xlane.f32.xlu0 %v5816_v39  ;;  %v5312_v39 = vsub.f32 %v19345_v7, %v16187_v0  ;;  %v16344_v0 = vpop.eup %13412 }
 0x44c   :  { %5829 = vadd.xlane.f32.xlu1 %v5828_v20  ;;  %v16324_v24 = vpop.xlane.xlu1 %5028  ;;  %19348 = vst [vmem:[#allocation157_spill] sm:$0xff] %v16344_v0  ;;  %v5825_v8 = vsel %vm4831_vm1, %v16344_v0, 0.0 }
 0x44d   :  { %v5504_v43 = vmul.f32 1.442695, %v5312_v39  ;;  %v5141_v39 = vsel %vm4831_vm1, %v16222_v46, -inf }
 0x44e   :  { %v16326_v48 = vpop.f32.mrf.mxu1 }
 0x44f   :  { %19344 = vst [vmem:[#allocation155_spill] sm:$0xff] %v16326_v48  ;;  %5145 = vmax.xlane.f32.xlu0 %v5144_v56  ;;  %v16334_v57 = vpop.xlane.xlu0 %5025  ;;  %v5132_v56 = vsel %vm4831_vm1, %v16195_v31, -inf  ;;  %13422 = vpow2.f32 %v5504_v43 }
 0x450   :  { %5823 = vadd.xlane.f32.xlu1 %v5822_v17  ;;  %v16336_v20 = vpop.xlane.xlu1 %5022  ;;  %v16338_v51 = vpop.f32.mrf.mxu1 }
 0x451   :  { %19346 = vst [vmem:[#allocation67_spill] sm:$0xff] %v16338_v51  ;;  %v16362_v31 = vpop.eup %13414 }
 0x452   :  { %v11306_v60 = vpop.f32.mrf.mxu1  ;;  %v5837_v43 = vsel %vm4831_vm1, %v16362_v31, 0.0 }
 0x453   :  { %5139 = vmax.xlane.f32.xlu0 %v5138_v26  ;;  %v16348_v7 = vpop.f32.mrf.mxu0  ;;  %v19351_v60 = vld [vmem:[#allocation70_spill] sm:$0xff] }
 0x454   :  { %5133 = vmax.xlane.f32.xlu1 %v5132_v56  ;;  %v16350_v17 = vpop.xlane.xlu1 %5037  ;;  %v16352_v34 = vpop.xlane.xlu0 %5034  ;;  %v5313_v25 = vsub.f32 %v19351_v60, %v16218_v5  ;;  %19352 = vst [vmem:[#allocation70_spill] sm:$0xff] %v16362_v31  ;;  %v5317_v5 = vsub.f32 %v15708_v4, %v16238_v41  ;;  %v5315_v41 = vsub.f32 %v15717_v38, %v16250_v16 }
 0x455   :  { %19349 = vst [vmem:[#allocation158_spill] sm:$0xff] %v16352_v34  ;;  %v16354_v42 = vpop.f32.mrf.mxu0  ;;  %v16370_v60 = vpop.f32.mrf.mxu1 }
 0x456   :  { %19350 = vst [vmem:[#allocation159_spill] sm:$0xff] %v16354_v42  ;;  %v5506_v21 = vmul.f32 1.442695, %v5313_v25  ;;  %v5153_v42 = vsel %vm4831_vm1, %v16202_v3, -inf  ;;  %19353 = vst [vmem:[#allocation160_spill] sm:$0xff] %v16370_v60  ;;  %v5147_v3 = vsel %vm4831_vm1, %v16220_v9, -inf }
 0x457   :  { %5826 = vadd.xlane.f32.xlu0 %v5825_v8  ;;  %v11314_v26 = vpop.f32.mrf.mxu0  ;;  %v16374_v8 = vpop.eup %13416  ;;  %v5514_v4 = vmul.f32 1.442695, %v5317_v5  ;;  %v19360_v5 = vld [vmem:[#allocation55_spill] sm:$0xff] }
 0x458   :  { %5142 = vmax.xlane.f32.xlu1 %v5141_v39  ;;  %v16364_v56 = vpop.xlane.xlu1 %5031  ;;  %v5737_v34 = vpop.xlane.xlu0 %5736  ;;  %19354 = vst [vmem:[#allocation161_spill] sm:$0xff] %v16374_v8  ;;  %13424 = vpow2.f32 %v5506_v21 }
 0x459   :  { %v16382_v46 = vpop.eup %13418  ;;  %v16392_v0 = vpop.f32.mrf.mxu0 }
 0x45a   :  { %19357 = vst [vmem:[#allocation164_spill] sm:$0xff] %v16382_v46  ;;  %v5834_v38 = vsel %vm4831_vm1, %v16382_v46, 0.0 }
 0x45b   :  { %5154 = vmax.xlane.f32.xlu0 %v5153_v42  ;;  %v5831_v42 = vsel %vm4831_vm1, %v16374_v8, 0.0 }
 0x45c   :  { %5838 = vadd.xlane.f32.xlu1 %v5837_v43  ;;  %v5740_v39 = vpop.xlane.xlu1 %5739  ;;  %v16376_v26 = vpop.xlane.xlu0 %5046 }
 0x45d   :  { %19355 = vst [vmem:[#allocation162_spill] sm:$0xff] %v16376_v26  ;;  %13426 = vrcp.f32 %v5740_v39  ;;  %v16388_v43 = vpop.eup %13420  ;;  %v5316_v26 = vsub.f32 %v19360_v5, %v16240_v63 }
 0x45e   :  { %v16378_v25 = vpop.f32.mrf.mxu1  ;;  %19358 = vst [vmem:[#allocation165_spill] sm:$0xff] %v16388_v43  ;;  %13428 = vrcp.f32 %v5737_v34  ;;  %v5510_v34 = vmul.f32 1.442695, %v5315_v41 }
 0x45f   :  { %19356 = vst [vmem:[#allocation163_spill] sm:$0xff] %v16378_v25  ;;  %5148 = vmax.xlane.f32.xlu0 %v5147_v3  ;;  %v19361_v3 = vld [vmem:[#allocation84_spill] sm:$0xff]  ;;  %v5512_v46 = vmul.f32 1.442695, %v5316_v26 }
 0x460   :  { %5832 = vadd.xlane.f32.xlu1 %v5831_v42  ;;  %v5734_v21 = vpop.xlane.xlu1 %5733  ;;  %v16390_v31 = vpop.xlane.xlu0 %5040  ;;  %v5320_v16 = vsub.f32 %v19361_v3, %v16210_v11  ;;  %v5846_v42 = vsel %vm4831_vm1, %v16388_v43, 0.0  ;;  %v5318_v11 = vsub.f32 %v15735_v33, %v16256_v53  ;;  %v5156_v33 = vsel %vm4831_vm1, %v16242_v12, -inf }
 0x461   :  { %v16394_v9 = vpop.f32.mrf.mxu1  ;;  %13430 = vrcp.f32 %v5734_v21 }
 0x462   :  { %19359 = vst [vmem:[#allocation166_spill] sm:$0xff] %v16394_v9  ;;  %13432 = vpow2.f32 %v5514_v4  ;;  %v16406_v9 = vpop.eup %13422  ;;  %v5162_v4 = vsel %vm4831_vm1, %v16234_v50, -inf  ;;  %v5520_v41 = vmul.f32 1.442695, %v5320_v16  ;;  %v5516_v26 = vmul.f32 1.442695, %v5318_v11 }
 0x463   :  { %v11322_v39 = vpop.f32.mrf.mxu1  ;;  %5835 = vadd.xlane.f32.xlu0 %v5834_v38  ;;  %v16404_v8 = vpop.f32.mrf.mxu0  ;;  %19362 = vst [vmem:[#allocation55_spill] sm:$0xff] %v16406_v9  ;;  %13434 = vpow2.f32 %v5510_v34  ;;  %v5840_v38 = vsel %vm4831_vm1, %v16406_v9, 0.0  ;;  %v5150_v34 = vsel %vm4831_vm1, %v16260_v14, -inf  ;;  %v19366_v14 = vld [vmem:[#allocation43_spill] sm:$0xff] }
 0x464   :  { %5847 = vadd.xlane.f32.xlu1 %v5846_v42  ;;  %v5749_v63 = vpop.xlane.xlu1 %5748  ;;  %v16408_v21 = vpop.xlane.xlu0 %5055  ;;  %13436 = vpow2.f32 %v5512_v46  ;;  %v5319_v46 = vsub.f32 %v15768_v1, %v16262_v32 }
 0x465   :  { %v16410_v5 = vpop.f32.mrf.mxu0  ;;  %v16424_v53 = vpop.eup %13424  ;;  %13438 = vpow2.f32 %v5520_v41 }
 0x466   :  { %19363 = vst [vmem:[#allocation84_spill] sm:$0xff] %v16424_v53  ;;  %v16426_v16 = vpop.f32.mrf.mxu1  ;;  %13440 = vrcp.f32 %v5749_v63  ;;  %v5843_v41 = vsel %vm4831_vm1, %v16424_v53, 0.0  ;;  %v12126_v53 = vunpack.i.h.bf16 %v19366_v14 }
 0x467   :  { %5163 = vmax.xlane.f32.xlu0 %v5162_v4  ;;  %v11330_v3 = vpop.f32.mrf.mxu0  ;;  %13442 = vpow2.f32 %v5516_v26 }
 0x468   :  { %5841 = vadd.xlane.f32.xlu1 %v5840_v38  ;;  %v16418_v39 = vpop.xlane.xlu1 %5043  ;;  %v16420_v42 = vpop.xlane.xlu0 %5049 }
 0x46a   :  { %v13427_v4 = vpop.eup %13426 }
 0x46b   :  { %5157 = vmax.xlane.f32.xlu0 %v5156_v33  ;;  %v13429_v50 = vpop.eup %13428  ;;  %v6286_v9 = vmul.f32 %v13427_v4, %v15869_v47  ;;  %v5159_v33 = vsel %vm4831_vm1, %v16280_v40, -inf  ;;  %v12125_v47 = vunpack.i.l.bf16 %v19366_v14  ;;  %v16449_v4 = vpop.f32.mrf.mxu0 }
 0x46c   :  { %5151 = vmax.xlane.f32.xlu1 %v5150_v34  ;;  %v5743_v38 = vpop.xlane.xlu1 %5742  ;;  %v5746_v3 = vpop.xlane.xlu0 %5745  ;;  %v6285_v26 = vmul.f32 %v13429_v50, %v15860_v59 }
 0x46d   :  { %13444 = vrcp.f32 %v5743_v38  ;;  %v6425_v43 = vpack.c.bf16 %v6286_v9, %v6286_v9 }
 0x46e   :  { %v16432_v11 = vpop.f32.mrf.mxu1  ;;  %v13431_v12 = vpop.eup %13430  ;;  %13446 = vrcp.f32 %v5746_v3  ;;  %v5171_v3 = vsel %vm4831_vm1, %v16266_v49, -inf  ;;  %v19373_v49 = vld [vmem:[#allocation98_spill] sm:$0xff] }
 0x46f   :  { %19364 = vst [vmem:[#allocation167_spill] sm:$0xff] %v16432_v11  ;;  %5844 = vadd.xlane.f32.xlu0 %v5843_v41  ;;  %v16439_v34 = vpop.eup %13432  ;;  %v6284_v32 = vmul.f32 %v13431_v12, %v15881_v18  ;;  %v5518_v41 = vmul.f32 1.442695, %v5319_v46 }
 0x470   :  { %19365 = vst [vmem:[#allocation168_spill] sm:$0xff] %v16439_v34  ;;  %5160 = vmax.xlane.f32.xlu1 %v5159_v33  ;;  %v16441_v63 = vpop.xlane.xlu0 %5064  ;;  %v16443_v1 = vpop.xlane.xlu1 %5052  ;;  %v5323_v33 = vsub.f32 %v15760_v58, %v16276_v6  ;;  %v5855_v59 = vsel %vm4831_vm1, %v16439_v34, 0.0  ;;  %v6862_v58 = vsel %vm6518_vm2, %v16150_v37, 0  ;;  %v1866_v6 = vpack.c.bf16 %v12126_v53, %v12125_v47 }
 0x471   :  { %v16451_v38 = vpop.f32.mrf.mxu1  ;;  %v6424_v40 = vpack.c.bf16 %v6285_v26, %v6284_v32  ;;  %v16461_v12 = vpop.eup %13434  ;;  %v19369_v32 = vld [vmem:[#allocation89_spill] sm:$0xff]  ;;  %13448 = vpow2.f32 %v5518_v41 }
 0x472   :  { %19368 = vst [vmem:[#allocation169_spill] sm:$0xff] %v16461_v12  ;;  %v12535_v26 = vunpack.i.l.bf16 %v19369_v32  ;;  %v5526_v34 = vmul.f32 1.442695, %v5323_v33  ;;  %v5849_v37 = vsel %vm4831_vm1, %v16461_v12, 0.0  ;;  %v19375_v33 = vld [vmem:[#allocation52_spill] sm:$0xff] }
 0x473   :  { %v11338_v18 = vpop.f32.mrf.mxu1  ;;  %5172 = vmax.xlane.f32.xlu0 %v5171_v3  ;;  %v16459_v50 = vpop.f32.mrf.mxu0  ;;  %11407 = vmatprep.mubr.msk.bf16.mxu1 %vm4831_vm1, %v6424_v40  ;;  %v19371_v3 = vld [vmem:[#allocation39_spill] sm:$0xff]  ;;  %v5165_v40 = vsel %vm4831_vm1, %v16278_v61, -inf }
 0x474   :  { %19367 = vst [vmem:[#allocation43_spill] sm:$0xff] %v16459_v50  ;;  %5856 = vadd.xlane.f32.xlu1 %v5855_v59  ;;  %v16464_v14 = vpop.xlane.xlu0 %5058  ;;  %v5758_v46 = vpop.xlane.xlu1 %5757  ;;  %11408 = vmatmul.mubr.msk.bf16.vlgmr.msra.gmra.mxu1 %vm4831_vm1, %v6425_v43  ;;  %v5326_v18 = vsub.f32 %v19371_v3, %v16270_v45  ;;  %v5321_v43 = vsub.f32 %v19373_v49, %v16292_v2  ;;  %13450 = vpow2.f32 %v5526_v34 }
 0x475   :  { %v16470_v9 = vpop.f32.mrf.mxu0  ;;  %11420 = vmatpush3.bf16.msra.mxu1 %v6862_v58  ;;  %v16476_v59 = vpop.eup %13436  ;;  %v16486_v58 = vpack.c.bf16 %v12535_v26, %v12535_v26 }
 0x476   :  { %19370 = vst [vmem:[#allocation89_spill] sm:$0xff] %v16470_v9  ;;  %19372 = vst [vmem:[#allocation39_spill] sm:$0xff] %v16476_v59  ;;  %11421 = vmatprep.subr.bf16.mxu1 %v1866_v6  ;;  %v16482_v47 = vpop.eup %13438  ;;  %v5532_v61 = vmul.f32 1.442695, %v5326_v18  ;;  %v5322_v9 = vsub.f32 %v19375_v33, %v16294_v44  ;;  %v5852_v2 = vsel %vm4831_vm1, %v16476_v59, 0.0  ;;  %v12306_v33 = vunpack.i.h.bf16 %v19302_v36 }
 0x477   :  { %5166 = vmax.xlane.f32.xlu0 %v5165_v40  ;;  %v11346_v53 = vpop.f32.mrf.mxu0  ;;  %19374 = vst [vmem:[#allocation98_spill] sm:$0xff] %v16482_v47  ;;  %v13441_v3 = vpop.eup %13440  ;;  %v5522_v40 = vmul.f32 1.442695, %v5321_v43  ;;  %v5864_v26 = vsel %vm4831_vm1, %v16482_v47, 0.0  ;;  %v5324_v47 = vsub.f32 %v15787_v52, %v16316_v54  ;;  %v6919_v52 = vsel %vm6518_vm2, %v16216_v22, 0 }
 0x478   :  { %5850 = vadd.xlane.f32.xlu1 %v5849_v37  ;;  %v5752_v45 = vpop.xlane.xlu1 %5751  ;;  %v16484_v41 = vpop.xlane.xlu0 %5073  ;;  %v6289_v34 = vmul.f32 %v13441_v3, %v15897_v23  ;;  %13452 = vpow2.f32 %v5532_v61  ;;  %v5524_v59 = vmul.f32 1.442695, %v5322_v9  ;;  %v12245_v23 = vunpack.i.l.bf16 %v19315_v35 }
 0x479   :  { %11422 = vmatpush3.bf16.msra.mxu1 %v1866_v6  ;;  %v16492_v49 = vpop.eup %13442  ;;  %v16494_v53 = vpop.f32.mrf.mxu1  ;;  %13454 = vpow2.f32 %v5522_v40  ;;  %v5174_v35 = vsel %vm4831_vm1, %v16296_v55, -inf }
 0x47a   :  { %19376 = vst [vmem:[#allocation52_spill] sm:$0xff] %v16492_v49  ;;  %11883 = vmatprep.subr.msk.bf16.mxu1 %vm6518_vm2, %v16486_v58  ;;  %v13445_v18 = vpop.eup %13444  ;;  %v5858_v36 = vsel %vm4831_vm1, %v16492_v49, 0.0  ;;  %13456 = vrcp.f32 %v5758_v46  ;;  %v16519_v3 = vpop.f32.mrf.mxu0  ;;  %v1868_v54 = vpack.c.bf16 %v12245_v23, %v12306_v33  ;;  %v5177_v23 = vsel %vm4831_vm1, %v16340_v15, -inf  ;;  %v19392_v49 = vld [vmem:[#allocation12_spill] sm:$0xff] }
 0x47b   :  { %5853 = vadd.xlane.f32.xlu0 %v5852_v2  ;;  %v13447_v37 = vpop.eup %13446  ;;  %v6287_v43 = vmul.f32 %v13445_v18, %v15905_v28  ;;  %13458 = vrcp.f32 %v5752_v45  ;;  %v19379_v18 = vld [vmem:[#allocation106_spill] sm:$0xff] }
 0x47c   :  { %5865 = vadd.xlane.f32.xlu1 %v5864_v26  ;;  %v16500_v44 = vpop.xlane.xlu1 %5061  ;;  %v16502_v6 = vpop.xlane.xlu0 %5067  ;;  %v6288_v2 = vmul.f32 %v13447_v37, %v15914_v19  ;;  %v5180_v26 = vsel %vm4831_vm1, %v16288_v62, -inf  ;;  %v6427_v19 = vpack.c.bf16 %v6289_v34, %v6289_v34  ;;  %13460 = vpow2.f32 %v5524_v59 }
 0x47d   :  { %v12541_v37 = vunpack.i.h.bf16 %v19379_v18  ;;  %v5528_v34 = vmul.f32 1.442695, %v5324_v47  ;;  %v5168_v59 = vsel %vm4831_vm1, %v16322_v10, -inf }
 0x47e   :  { %v16507_v12 = vpop.f32.mrf.mxu1  ;;  %v6426_v28 = vpack.c.bf16 %v6288_v2, %v6287_v43  ;;  %v16528_v46 = vpop.eup %13448  ;;  %v5325_v2 = vsub.f32 %v15804_v27, %v16308_v29 }
 0x47f   :  { %19377 = vst [vmem:[#allocation170_spill] sm:$0xff] %v16507_v12  ;;  %5181 = vmax.xlane.f32.xlu0 %v5180_v26  ;;  %19378 = vst [vmem:[#allocation171_spill] sm:$0xff] %v16528_v46  ;;  %v5861_v26 = vsel %vm4831_vm1, %v16528_v46, 0.0 }
 0x480   :  { %5859 = vadd.xlane.f32.xlu1 %v5858_v36  ;;  %v5755_v61 = vpop.xlane.xlu0 %5754  ;;  %v16517_v9 = vpop.xlane.xlu1 %5070  ;;  %11415 = vmatprep.mubr.msk.bf16.mxu0 %vm4831_vm1, %v6426_v28  ;;  %v16544_v36 = vpack.c.bf16 %v12541_v37, %v12541_v37  ;;  %v5530_v29 = vmul.f32 1.442695, %v5325_v2  ;;  %v5329_v37 = vsub.f32 %v15815_v13, %v16324_v24  ;;  %v5183_v24 = vsel %vm4831_vm1, %v16338_v51, -inf }
 0x481   :  { %v16521_v40 = vpop.f32.mrf.mxu1  ;;  %11416 = vmatmul.mubr.msk.bf16.vlgmr.msra.gmra.mxu0 %vm4831_vm1, %v6427_v19  ;;  %13462 = vrcp.f32 %v5755_v61  ;;  %v16548_v61 = vpop.eup %13450 }
 0x482   :  { %11428 = vmatpush3.bf16.msra.mxu0 %v6919_v52  ;;  %13464 = vpow2.f32 %v5528_v34  ;;  %19382 = vst [vmem:[#allocation173_spill] sm:$0xff] %v16548_v61  ;;  %v5189_v52 = vsel %vm4831_vm1, %v16326_v48, -inf  ;;  %v19389_v48 = vld [vmem:[#allocation102_spill] sm:$0xff] }
 0x483   :  { %v11354_v45 = vpop.f32.mrf.mxu1  ;;  %5175 = vmax.xlane.f32.xlu0 %v5174_v35  ;;  %v16534_v43 = vpop.f32.mrf.mxu0  ;;  %11429 = vmatprep.subr.bf16.mxu0 %v1868_v54 }
 0x484   :  { %19380 = vst [vmem:[#allocation106_spill] sm:$0xff] %v16534_v43  ;;  %5169 = vmax.xlane.f32.xlu1 %v5168_v59  ;;  %v16536_v22 = vpop.xlane.xlu0 %5082  ;;  %v5767_v33 = vpop.xlane.xlu1 %5766 }
 0x485   :  { %v16540_v47 = vpop.f32.mrf.mxu0  ;;  %v16556_v35 = vpop.eup %13452  ;;  %13466 = vrcp.f32 %v5767_v33 }
 0x486   :  { %19381 = vst [vmem:[#allocation172_spill] sm:$0xff] %v16540_v47  ;;  %11430 = vmatpush3.bf16.msra.mxu0 %v1868_v54  ;;  %19383 = vst [vmem:[#allocation174_spill] sm:$0xff] %v16556_v35  ;;  %v5873_v54 = vsel %vm4831_vm1, %v16548_v61, 0.0  ;;  %v16562_v34 = vpop.eup %13454  ;;  %v16564_v45 = vpop.f32.mrf.mxu1 }
 0x487   :  { %5862 = vadd.xlane.f32.xlu0 %v5861_v26  ;;  %v11362_v28 = vpop.f32.mrf.mxu0  ;;  %11884 = vmatprep.subr.msk.bf16.mxu0 %vm6518_vm2, %v16544_v36  ;;  %19384 = vst [vmem:[#allocation175_spill] sm:$0xff] %v16562_v34  ;;  %19385 = vst [vmem:[#allocation176_spill] sm:$0xff] %v16564_v45  ;;  %v13457_v2 = vpop.eup %13456 }
 0x488   :  { %5178 = vmax.xlane.f32.xlu1 %v5177_v23  ;;  %v16550_v19 = vpop.xlane.xlu0 %5076  ;;  %v5761_v27 = vpop.xlane.xlu1 %5760  ;;  %v5328_v28 = vsub.f32 %v15831_v30, %v16334_v57  ;;  %v6292_v55 = vmul.f32 %v13457_v2, %v19389_v48 }
 0x489   :  { %13468 = vrcp.f32 %v5761_v27  ;;  %v13459_v23 = vpop.eup %13458  ;;  %v19388_v27 = vld [vmem:[#allocation83_spill] sm:$0xff] }
 0x48a   :  { %13470 = vpow2.f32 %v5530_v29  ;;  %v16572_v33 = vpop.eup %13460  ;;  %v5867_v29 = vsel %vm4831_vm1, %v16562_v34, 0.0  ;;  %v6290_v10 = vmul.f32 %v13459_v23, %v19392_v49  ;;  %v19394_v34 = vld [vmem:[#allocation69_spill] sm:$0xff]  ;;  %v6429_v49 = vpack.c.bf16 %v6292_v55, %v6292_v55  ;;  %v19396_v23 = vld [vmem:[#allocation107_spill] sm:$0xff] }
 0x48b   :  { %5190 = vmax.xlane.f32.xlu0 %v5189_v52  ;;  %19387 = vst [vmem:[#allocation178_spill] sm:$0xff] %v16572_v33  ;;  %v5538_v52 = vmul.f32 1.442695, %v5329_v37  ;;  %v5332_v62 = vsub.f32 %v19394_v34, %v16350_v17  ;;  %v5870_v48 = vsel %vm4831_vm1, %v16572_v33, 0.0  ;;  %v5198_v55 = vsel %vm4831_vm1, %v16348_v7, -inf }
 0x48c   :  { %5874 = vadd.xlane.f32.xlu1 %v5873_v54  ;;  %v5764_v59 = vpop.xlane.xlu0 %5763  ;;  %v5327_v54 = vsub.f32 %v19388_v27, %v16336_v20  ;;  %v19393_v20 = vld [vmem:[#allocation117_spill] sm:$0xff]  ;;  %v5536_v27 = vmul.f32 1.442695, %v5328_v28 }
 0x48d   :  { %v5776_v26 = vpop.xlane.xlu1 %5775  ;;  %13472 = vrcp.f32 %v5764_v59  ;;  %v19391_v59 = vld [vmem:[#allocation105_spill] sm:$0xff]  ;;  %v5544_v28 = vmul.f32 1.442695, %v5332_v62 }
 0x48e   :  { %v16568_v13 = vpop.f32.mrf.mxu1  ;;  %v13463_v61 = vpop.eup %13462  ;;  %v12531_v51 = vunpack.i.h.bf16 %v19391_v59  ;;  %v12530_v46 = vunpack.i.l.bf16 %v19391_v59  ;;  %13474 = vpow2.f32 %v5538_v52  ;;  %v5534_v2 = vmul.f32 1.442695, %v5327_v54  ;;  %v19397_v52 = vld [vmem:[#allocation40_spill] sm:$0xff] }
 0x48f   :  { %19386 = vst [vmem:[#allocation177_spill] sm:$0xff] %v16568_v13  ;;  %5184 = vmax.xlane.f32.xlu0 %v5183_v24  ;;  %v6291_v24 = vmul.f32 %v13463_v61, %v19393_v20  ;;  %v5882_v59 = vsel %vm4831_vm1, %v16556_v35, 0.0  ;;  %13476 = vpow2.f32 %v5536_v27  ;;  %v5330_v54 = vsub.f32 %v19397_v52, %v16364_v56  ;;  %v19399_v56 = vld [vmem:[#allocation159_spill] sm:$0xff]  ;;  %v19416_v35 = vld [vmem:[#allocation129_spill] sm:$0xff] }
 0x490   :  { %5868 = vadd.xlane.f32.xlu1 %v5867_v29  ;;  %v16579_v30 = vpop.xlane.xlu0 %5091  ;;  %v16581_v57 = vpop.f32.mrf.mxu1  ;;  %v1870_v34 = vpack.c.bf16 %v12531_v51, %v12530_v46  ;;  %13478 = vpow2.f32 %v5534_v2  ;;  %v12540_v52 = vunpack.i.l.bf16 %v19379_v18 }
 0x491   :  { %19390 = vst [vmem:[#allocation83_spill] sm:$0xff] %v16581_v57  ;;  %v5770_v37 = vpop.xlane.xlu1 %5769  ;;  %v6428_v29 = vpack.c.bf16 %v6291_v24, %v6290_v10  ;;  %v16593_v57 = vpop.eup %13464  ;;  %v12550_v10 = vunpack.i.l.bf16 %v19396_v23  ;;  %13480 = vrcp.f32 %v5776_v26  ;;  %v5186_v26 = vsel %vm4831_vm1, %v16370_v60, -inf }
 0x492   :  { %v11370_v15 = vpop.f32.mrf.mxu1  ;;  %19395 = vst [vmem:[#allocation102_spill] sm:$0xff] %v16593_v57  ;;  %v13467_v20 = vpop.eup %13466  ;;  %13482 = vrcp.f32 %v5770_v37 }
 0x493   :  { %5871 = vadd.xlane.f32.xlu0 %v5870_v48  ;;  %11423 = vmatprep.mubr.msk.bf16.mxu1 %vm4831_vm1, %v6428_v29  ;;  %v6976_v15 = vsel %vm6518_vm2, %v16486_v58, 0  ;;  %v5876_v58 = vsel %vm4831_vm1, %v16593_v57, 0.0  ;;  %v16614_v27 = vpack.c.bf16 %v12550_v10, %v12550_v10  ;;  %13484 = vpow2.f32 %v5544_v28  ;;  %v19402_v28 = vld [vmem:[#allocation124_spill] sm:$0xff] }
 0x494   :  { %5883 = vadd.xlane.f32.xlu1 %v5882_v59  ;;  %v16595_v61 = vpop.xlane.xlu0 %5085  ;;  %11424 = vmatmul.mubr.msk.bf16.vlgmr.msra.gmra.mxu1 %vm4831_vm1, %v6429_v49  ;;  %v5192_v48 = vsel %vm4831_vm1, %v19399_v56, -inf  ;;  %v5540_v29 = vmul.f32 1.442695, %v5330_v54  ;;  %v19400_v59 = vld [vmem:[#allocation120_spill] sm:$0xff]  ;;  %v19403_v54 = vld [vmem:[#allocation158_spill] sm:$0xff] }
 0x495   :  { %v16600_v17 = vpop.xlane.xlu1 %5079  ;;  %11436 = vmatpush3.bf16.msra.mxu1 %v6976_v15  ;;  %v6295_v49 = vmul.f32 %v13467_v20, %v19400_v59  ;;  %v19401_v15 = vld [vmem:[#allocation121_spill] sm:$0xff]  ;;  %v12536_v59 = vunpack.i.h.bf16 %v19369_v32  ;;  %v7033_v32 = vsel %vm6518_vm2, %v16544_v36, 0 }
 0x496   :  { %11437 = vmatprep.subr.bf16.mxu1 %v1870_v34  ;;  %v13469_v62 = vpop.eup %13468 }
 0x497   :  { %5199 = vmax.xlane.f32.xlu0 %v5198_v55  ;;  %v16612_v24 = vpop.eup %13470  ;;  %v6293_v10 = vmul.f32 %v13469_v62, %v19401_v15  ;;  %v5195_v62 = vsel %vm4831_vm1, %v16392_v0, -inf }
 0x498   :  { %5877 = vadd.xlane.f32.xlu1 %v5876_v58  ;;  %v5773_v51 = vpop.xlane.xlu0 %5772  ;;  %19398 = vst [vmem:[#allocation105_spill] sm:$0xff] %v16612_v24  ;;  %v19404_v58 = vld [vmem:[#allocation72_spill] sm:$0xff] }
 0x499   :  { %v16610_v46 = vpop.xlane.xlu1 %5088  ;;  %11438 = vmatpush3.bf16.msra.mxu1 %v1870_v34  ;;  %13486 = vrcp.f32 %v5773_v51  ;;  %v5331_v34 = vsub.f32 %v19404_v58, %v19403_v54  ;;  %v19407_v58 = vld [vmem:[#allocation162_spill] sm:$0xff] }
 0x49a   :  { %v13473_v2 = vpop.eup %13472  ;;  %11885 = vmatprep.subr.msk.bf16.mxu1 %vm6518_vm2, %v16614_v27  ;;  %13488 = vpow2.f32 %v5540_v29 }
 0x49b   :  { %5193 = vmax.xlane.f32.xlu0 %v5192_v48  ;;  %v6294_v55 = vmul.f32 %v13473_v2, %v19402_v28  ;;  %v5879_v48 = vsel %vm4831_vm1, %v16612_v24, 0.0  ;;  %v16635_v15 = vpop.eup %13474  ;;  %v19406_v2 = vld [vmem:[#allocation108_spill] sm:$0xff]  ;;  %v5542_v28 = vmul.f32 1.442695, %v5331_v34 }
 0x49c   :  { %5187 = vmax.xlane.f32.xlu1 %v5186_v26  ;;  %v16623_v37 = vpop.xlane.xlu0 %5100  ;;  %v6431_v26 = vpack.c.bf16 %v6295_v49, %v6295_v49  ;;  %19405 = vst [vmem:[#allocation12_spill] sm:$0xff] %v16635_v15  ;;  %v1872_v49 = vpack.c.bf16 %v12540_v52, %v12536_v59  ;;  %v16646_v54 = vpop.eup %13476  ;;  %v5891_v34 = vsel %vm4831_vm1, %v16635_v15, 0.0 }
 0x49d   :  { %v5785_v20 = vpop.xlane.xlu1 %5784  ;;  %v6430_v51 = vpack.c.bf16 %v6294_v55, %v6293_v10  ;;  %v12666_v10 = vunpack.i.h.bf16 %v19406_v2  ;;  %v5207_v55 = vsel %vm4831_vm1, %v16378_v25, -inf  ;;  %v19410_v25 = vld [vmem:[#allocation57_spill] sm:$0xff] }
 0x49e   :  { %13490 = vrcp.f32 %v5785_v20  ;;  %v19411_v20 = vld [vmem:[#allocation166_spill] sm:$0xff] }
 0x49f   :  { %5880 = vadd.xlane.f32.xlu0 %v5879_v48  ;;  %11431 = vmatprep.mubr.msk.bf16.mxu0 %vm4831_vm1, %v6430_v51  ;;  %v19408_v51 = vld [vmem:[#allocation86_spill] sm:$0xff]  ;;  %v16654_v59 = vpack.c.bf16 %v12666_v10, %v12666_v10 }
 0x4a0   :  { %5196 = vmax.xlane.f32.xlu1 %v5195_v62  ;;  %v16638_v18 = vpop.xlane.xlu0 %5094  ;;  %11432 = vmatmul.mubr.msk.bf16.vlgmr.msra.gmra.mxu0 %vm4831_vm1, %v6431_v26  ;;  %v5335_v48 = vsub.f32 %v19408_v51, %v19407_v58  ;;  %v16652_v26 = vpop.eup %13478  ;;  %v5333_v58 = vsub.f32 %v19410_v25, %v16390_v31  ;;  %v19414_v31 = vld [vmem:[#allocation125_spill] sm:$0xff] }
 0x4a1   :  { %v5779_v29 = vpop.xlane.xlu1 %5778  ;;  %11444 = vmatpush3.bf16.msra.mxu0 %v7033_v32  ;;  %19409 = vst [vmem:[#allocation117_spill] sm:$0xff] %v16652_v26  ;;  %v13481_v52 = vpop.eup %13480  ;;  %v5885_v10 = vsel %vm4831_vm1, %v16652_v26, 0.0  ;;  %v5888_v26 = vsel %vm4831_vm1, %v16646_v54, 0.0 }
 0x4a2   :  { %11445 = vmatprep.subr.bf16.mxu0 %v1872_v49  ;;  %13492 = vrcp.f32 %v5779_v29  ;;  %v13483_v32 = vpop.eup %13482  ;;  %v5550_v15 = vmul.f32 1.442695, %v5335_v48  ;;  %v19413_v29 = vld [vmem:[#allocation100_spill] sm:$0xff]  ;;  %v6298_v25 = vmul.f32 %v13481_v52, %v19414_v31  ;;  %v5546_v60 = vmul.f32 1.442695, %v5333_v58 }
 0x4a3   :  { %5208 = vmax.xlane.f32.xlu0 %v5207_v55  ;;  %13494 = vpow2.f32 %v5542_v28  ;;  %v5201_v55 = vsel %vm4831_vm1, %v19411_v20, -inf  ;;  %v16660_v51 = vpop.eup %13484 }
 0x4a4   :  { %5892 = vadd.xlane.f32.xlu1 %v5891_v34  ;;  %v5782_v36 = vpop.xlane.xlu0 %5781  ;;  %19412 = vst [vmem:[#allocation69_spill] sm:$0xff] %v16660_v51  ;;  %v5338_v34 = vsub.f32 %v19413_v29, %v16408_v21  ;;  %v6296_v21 = vmul.f32 %v13483_v32, %v19416_v35  ;;  %v19417_v29 = vld [vmem:[#allocation130_spill] sm:$0xff]  ;;  %v5900_v31 = vsel %vm4831_vm1, %v16660_v51, 0.0  ;;  %v6433_v33 = vpack.c.bf16 %v6298_v25, %v6298_v25 }
 0x4a5   :  { %v5794_v62 = vpop.xlane.xlu1 %5793  ;;  %11446 = vmatpush3.bf16.msra.mxu0 %v1872_v49  ;;  %13496 = vrcp.f32 %v5782_v36  ;;  %v19415_v36 = vld [vmem:[#allocation90_spill] sm:$0xff]  ;;  %v5216_v25 = vsel %vm4831_vm1, %v16404_v8, -inf }
 0x4a6   :  { %11886 = vmatprep.subr.msk.bf16.mxu0 %vm6518_vm2, %v16654_v59  ;;  %v13487_v28 = vpop.eup %13486  ;;  %v12546_v24 = vunpack.i.h.bf16 %v19415_v36  ;;  %v12545_v48 = vunpack.i.l.bf16 %v19415_v36  ;;  %13498 = vpow2.f32 %v5550_v15  ;;  %v5556_v52 = vmul.f32 1.442695, %v5338_v34  ;;  %v19420_v32 = vld [vmem:[#allocation110_spill] sm:$0xff]  ;;  %v19421_v34 = vld [vmem:[#allocation41_spill] sm:$0xff] }
 0x4a7   :  { %5202 = vmax.xlane.f32.xlu0 %v5201_v55  ;;  %v6297_v56 = vmul.f32 %v13487_v28, %v19417_v29  ;;  %v19418_v55 = vld [vmem:[#allocation54_spill] sm:$0xff]  ;;  %v16681_v36 = vpop.eup %13488  ;;  %v12675_v58 = vunpack.i.l.bf16 %v19420_v32  ;;  %13500 = vpow2.f32 %v5546_v60  ;;  %v5336_v28 = vsub.f32 %v19421_v34, %v16420_v42 }
 0x4a8   :  { %5886 = vadd.xlane.f32.xlu1 %v5885_v10  ;;  %v16669_v49 = vpop.xlane.xlu0 %5109  ;;  %v5334_v20 = vsub.f32 %v19418_v55, %v16418_v39  ;;  %19419 = vst [vmem:[#allocation107_spill] sm:$0xff] %v16681_v36  ;;  %v7090_v39 = vsel %vm6518_vm2, %v16614_v27, 0  ;;  %13502 = vpow2.f32 %v5556_v52  ;;  %v19423_v29 = vld [vmem:[#allocation42_spill] sm:$0xff]  ;;  %v5210_v52 = vsel %vm4831_vm1, %v16410_v5, -inf }
 0x4a9   :  { %v5788_v57 = vpop.xlane.xlu1 %5787  ;;  %v6432_v10 = vpack.c.bf16 %v6297_v56, %v6296_v21  ;;  %v1874_v56 = vpack.c.bf16 %v12546_v24, %v12545_v48  ;;  %v5894_v21 = vsel %vm4831_vm1, %v16681_v36, 0.0  ;;  %13504 = vrcp.f32 %v5794_v62 }
 0x4aa   :  { %13506 = vrcp.f32 %v5788_v57  ;;  %v5552_v48 = vmul.f32 1.442695, %v5336_v28  ;;  %v5337_v55 = vsub.f32 %v19423_v29, %v16443_v1  ;;  %v5204_v57 = vsel %vm4831_vm1, %v16426_v16, -inf }
 0x4ab   :  { %5889 = vadd.xlane.f32.xlu0 %v5888_v26  ;;  %11439 = vmatprep.mubr.msk.bf16.mxu1 %vm4831_vm1, %v6432_v10  ;;  %v5548_v26 = vmul.f32 1.442695, %v5334_v20  ;;  %v13491_v27 = vpop.eup %13490  ;;  %v16698_v20 = vpack.c.bf16 %v12675_v58, %v12675_v58  ;;  %v19424_v10 = vld [vmem:[#allocation133_spill] sm:$0xff]  ;;  %v12665_v28 = vunpack.i.l.bf16 %v19406_v2 }
 0x4ac   :  { %5901 = vadd.xlane.f32.xlu1 %v5900_v31  ;;  %v16683_v35 = vpop.xlane.xlu0 %5103  ;;  %11440 = vmatmul.mubr.msk.bf16.vlgmr.msra.gmra.mxu1 %vm4831_vm1, %v6433_v33  ;;  %v6301_v31 = vmul.f32 %v13491_v27, %v19424_v10 }
 0x4ad   :  { %v16689_v15 = vpop.xlane.xlu1 %5097  ;;  %11452 = vmatpush3.bf16.msra.mxu1 %v7090_v39  ;;  %13508 = vpow2.f32 %v5548_v26  ;;  %v19425_v39 = vld [vmem:[#allocation136_spill] sm:$0xff]  ;;  %v19426_v26 = vld [vmem:[#allocation139_spill] sm:$0xff] }
 0x4ae   :  { %11453 = vmatprep.subr.bf16.mxu1 %v1874_v56  ;;  %v6435_v29 = vpack.c.bf16 %v6301_v31, %v6301_v31  ;;  %v19429_v31 = vld [vmem:[#allocation85_spill] sm:$0xff] }
 0x4af   :  { %5217 = vmax.xlane.f32.xlu0 %v5216_v25  ;;  %v13493_v24 = vpop.eup %13492 }
 0x4b0   :  { %5895 = vadd.xlane.f32.xlu1 %v5894_v21  ;;  %v5791_v60 = vpop.xlane.xlu0 %5790  ;;  %v16702_v33 = vpop.eup %13494  ;;  %v6299_v1 = vmul.f32 %v13493_v24, %v19425_v39  ;;  %v19428_v24 = vld [vmem:[#allocation111_spill] sm:$0xff]  ;;  %v5225_v39 = vsel %vm4831_vm1, %v16432_v11, -inf }
 0x4b1   :  { %v16700_v42 = vpop.xlane.xlu1 %5106  ;;  %19422 = vst [vmem:[#allocation40_spill] sm:$0xff] %v16702_v33  ;;  %11454 = vmatpush3.bf16.msra.mxu1 %v1874_v56  ;;  %13510 = vrcp.f32 %v5791_v60  ;;  %v5554_v56 = vmul.f32 1.442695, %v5337_v55  ;;  %v5897_v27 = vsel %vm4831_vm1, %v16702_v33, 0.0  ;;  %v12551_v60 = vunpack.i.h.bf16 %v19396_v23 }
 0x4b2   :  { %v13497_v62 = vpop.eup %13496  ;;  %11887 = vmatprep.subr.msk.bf16.mxu1 %vm6518_vm2, %v16698_v20  ;;  %13512 = vpow2.f32 %v5552_v48  ;;  %v12681_v48 = vunpack.i.h.bf16 %v19428_v24  ;;  %v7147_v55 = vsel %vm6518_vm2, %v16654_v59, 0 }
 0x4b3   :  { %5211 = vmax.xlane.f32.xlu0 %v5210_v52  ;;  %v6300_v34 = vmul.f32 %v13497_v62, %v19426_v26  ;;  %v5213_v52 = vsel %vm4831_vm1, %v16449_v4, -inf  ;;  %v16723_v10 = vpop.eup %13498  ;;  %v1876_v62 = vpack.c.bf16 %v12665_v28, %v12551_v60  ;;  %13514 = vpow2.f32 %v5554_v56  ;;  %v19431_v26 = vld [vmem:[#allocation22_spill] sm:$0xff] }
 0x4b4   :  { %5205 = vmax.xlane.f32.xlu1 %v5204_v57  ;;  %v16713_v58 = vpop.xlane.xlu0 %5118  ;;  %19427 = vst [vmem:[#allocation120_spill] sm:$0xff] %v16723_v10  ;;  %v5341_v57 = vsub.f32 %v19429_v31, %v16441_v63  ;;  %v5909_v59 = vsel %vm4831_vm1, %v16723_v10, 0.0  ;;  %v19438_v10 = vld [vmem:[#allocation87_spill] sm:$0xff] }
 0x4b5   :  { %v5803_v25 = vpop.xlane.xlu1 %5802  ;;  %v6434_v21 = vpack.c.bf16 %v6300_v34, %v6299_v1  ;;  %v16736_v1 = vpop.eup %13500  ;;  %v5340_v34 = vsub.f32 %v19431_v26, %v16500_v44 }
 0x4b6   :  { %19430 = vst [vmem:[#allocation121_spill] sm:$0xff] %v16736_v1  ;;  %13516 = vrcp.f32 %v5803_v25  ;;  %v16742_v28 = vpop.eup %13502  ;;  %v5219_v25 = vsel %vm4831_vm1, %v16451_v38, -inf }
 0x4b7   :  { %5898 = vadd.xlane.f32.xlu0 %v5897_v27  ;;  %11447 = vmatprep.mubr.msk.bf16.mxu0 %vm4831_vm1, %v6434_v21  ;;  %v13505_v56 = vpop.eup %13504  ;;  %v16744_v21 = vpack.c.bf16 %v12681_v48, %v12681_v48  ;;  %v5560_v31 = vmul.f32 1.442695, %v5340_v34  ;;  %v5903_v48 = vsel %vm4831_vm1, %v16736_v1, 0.0 }
 0x4b8   :  { %5214 = vmax.xlane.f32.xlu1 %v5213_v52  ;;  %v16726_v2 = vpop.xlane.xlu0 %5112  ;;  %11448 = vmatmul.mubr.msk.bf16.vlgmr.msra.gmra.mxu0 %vm4831_vm1, %v6435_v29  ;;  %v13507_v60 = vpop.eup %13506  ;;  %v5562_v29 = vmul.f32 1.442695, %v5341_v57  ;;  %v19432_v52 = vld [vmem:[#allocation71_spill] sm:$0xff] }
 0x4b9   :  { %v5797_v23 = vpop.xlane.xlu1 %5796  ;;  %11460 = vmatpush3.bf16.msra.mxu0 %v7147_v55  ;;  %v5339_v44 = vsub.f32 %v19432_v52, %v16464_v14  ;;  %v19434_v14 = vld [vmem:[#allocation138_spill] sm:$0xff]  ;;  %v16763_v52 = vpop.f32.mrf.mxu0 }
 0x4ba   :  { %11461 = vmatprep.subr.bf16.mxu0 %v1876_v62  ;;  %13518 = vrcp.f32 %v5797_v23  ;;  %v16750_v55 = vpop.eup %13508  ;;  %v19433_v23 = vld [vmem:[#allocation88_spill] sm:$0xff]  ;;  %19436 = vst [vmem:[#allocation124_spill] sm:$0xff] %v16763_v52 }
 0x4bb   :  { %5226 = vmax.xlane.f32.xlu0 %v5225_v39  ;;  %v5342_v39 = vsub.f32 %v19433_v23, %v16502_v6  ;;  %v19437_v23 = vld [vmem:[#allocation56_spill] sm:$0xff]  ;;  %v5558_v33 = vmul.f32 1.442695, %v5339_v44  ;;  %v5906_v1 = vsel %vm4831_vm1, %v16750_v55, 0.0 }
 0x4bc   :  { %5910 = vadd.xlane.f32.xlu1 %v5909_v59  ;;  %v5800_v63 = vpop.xlane.xlu0 %5799  ;;  %v19435_v59 = vld [vmem:[#allocation109_spill] sm:$0xff]  ;;  %v6302_v11 = vmul.f32 %v13507_v60, %v19437_v23 }
 0x4bd   :  { %v5812_v27 = vpop.xlane.xlu1 %5811  ;;  %11462 = vmatpush3.bf16.msra.mxu0 %v1876_v62  ;;  %13520 = vrcp.f32 %v5800_v63  ;;  %v6304_v62 = vmul.f32 %v13505_v56, %v19434_v14  ;;  %v12671_v63 = vunpack.i.h.bf16 %v19435_v59  ;;  %v12670_v34 = vunpack.i.l.bf16 %v19435_v59 }
 0x4be   :  { %11888 = vmatprep.subr.msk.bf16.mxu0 %vm6518_vm2, %v16744_v21  ;;  %v13511_v57 = vpop.eup %13510  ;;  %13522 = vpow2.f32 %v5562_v29  ;;  %v5918_v59 = vsel %vm4831_vm1, %v16742_v28, 0.0 }
 0x4bf   :  { %5220 = vmax.xlane.f32.xlu0 %v5219_v25  ;;  %v6303_v25 = vmul.f32 %v13511_v57, %v19438_v10  ;;  %v16769_v56 = vpop.eup %13512  ;;  %13524 = vpow2.f32 %v5560_v31  ;;  %v6437_v51 = vpack.c.bf16 %v6304_v62, %v6304_v62  ;;  %v7204_v10 = vsel %vm6518_vm2, %v16698_v20, 0 }
 0x4c0   :  { %5904 = vadd.xlane.f32.xlu1 %v5903_v48  ;;  %v16759_v26 = vpop.xlane.xlu0 %5127  ;;  %19439 = vst [vmem:[#allocation158_spill] sm:$0xff] %v16769_v56  ;;  %v5564_v48 = vmul.f32 1.442695, %v5342_v39  ;;  %v1878_v31 = vpack.c.bf16 %v12671_v63, %v12670_v34  ;;  %v19442_v39 = vld [vmem:[#allocation113_spill] sm:$0xff]  ;;  %13526 = vpow2.f32 %v5558_v33  ;;  %v5912_v62 = vsel %vm4831_vm1, %v16769_v56, 0.0 }
 0x4c1   :  { %v5806_v6 = vpop.xlane.xlu1 %5805  ;;  %v6436_v36 = vpack.c.bf16 %v6303_v25, %v6302_v11  ;;  %v12690_v11 = vunpack.i.l.bf16 %v19442_v39  ;;  %v5222_v63 = vsel %vm4831_vm1, %v16494_v53, -inf }
 0x4c2   :  { %13528 = vpow2.f32 %v5564_v48  ;;  %v19445_v48 = vld [vmem:[#allocation17_spill] sm:$0xff] }
 0x4c3   :  { %v16771_v14 = vpop.f32.mrf.mxu0  ;;  %5907 = vadd.xlane.f32.xlu0 %v5906_v1  ;;  %11455 = vmatprep.mubr.msk.bf16.mxu1 %vm4831_vm1, %v6436_v36  ;;  %v19443_v1 = vld [vmem:[#allocation73_spill] sm:$0xff]  ;;  %v16790_v36 = vpop.eup %13514  ;;  %13530 = vrcp.f32 %v5812_v27  ;;  %v16796_v23 = vpack.c.bf16 %v12690_v11, %v12690_v11  ;;  %v19447_v11 = vld [vmem:[#allocation96_spill] sm:$0xff] }
 0x4c4   :  { %19440 = vst [vmem:[#allocation72_spill] sm:$0xff] %v16771_v14  ;;  %5919 = vadd.xlane.f32.xlu1 %v5918_v59  ;;  %v16775_v60 = vpop.xlane.xlu0 %5121  ;;  %v5344_v57 = vsub.f32 %v19443_v1, %v16484_v41  ;;  %11456 = vmatmul.mubr.msk.bf16.vlgmr.msra.gmra.mxu1 %vm4831_vm1, %v6437_v51  ;;  %19444 = vst [vmem:[#allocation162_spill] sm:$0xff] %v16790_v36  ;;  %v13517_v34 = vpop.eup %13516  ;;  %13532 = vrcp.f32 %v5806_v6  ;;  %v5347_v59 = vsub.f32 %v19445_v48, %v16536_v22  ;;  %v19449_v14 = vld [vmem:[#allocation89_spill] sm:$0xff] }
 0x4c5   :  { %v16780_v29 = vpop.xlane.xlu1 %5115  ;;  %v16782_v44 = vpop.f32.mrf.mxu0  ;;  %11468 = vmatpush3.bf16.msra.mxu1 %v7204_v10  ;;  %v5234_v10 = vsel %vm4831_vm1, %v16459_v50, -inf  ;;  %v5915_v27 = vsel %vm4831_vm1, %v16790_v36, 0.0  ;;  %v12676_v48 = vunpack.i.h.bf16 %v19420_v32 }
 0x4c6   :  { %19441 = vst [vmem:[#allocation108_spill] sm:$0xff] %v16782_v44  ;;  %11469 = vmatprep.subr.bf16.mxu1 %v1878_v31  ;;  %v5568_v25 = vmul.f32 1.442695, %v5344_v57  ;;  %v19448_v57 = vld [vmem:[#allocation141_spill] sm:$0xff] }
 0x4c7   :  { %v11378_v20 = vpop.f32.mrf.mxu0  ;;  %5913 = vadd.xlane.f32.xlu0 %v5912_v62  ;;  %v13519_v41 = vpop.eup %13518  ;;  %v19446_v62 = vld [vmem:[#allocation68_spill] sm:$0xff] }
 0x4c8   :  { %5223 = vmax.xlane.f32.xlu1 %v5222_v63  ;;  %v5809_v33 = vpop.xlane.xlu0 %5808  ;;  %v6307_v20 = vmul.f32 %v13517_v34, %v19446_v62  ;;  %v6305_v22 = vmul.f32 %v13519_v41, %v19447_v11  ;;  %v12680_v34 = vunpack.i.l.bf16 %v19428_v24  ;;  %v5231_v41 = vsel %vm4831_vm1, %v16519_v3, -inf }
 0x4c9   :  { %v16794_v51 = vpop.xlane.xlu1 %5124  ;;  %11470 = vmatpush3.bf16.msra.mxu1 %v1878_v31  ;;  %13534 = vrcp.f32 %v5809_v33  ;;  %v5574_v33 = vmul.f32 1.442695, %v5347_v59 }
 0x4ca   :  { %v13521_v1 = vpop.eup %13520  ;;  %11889 = vmatprep.subr.msk.bf16.mxu1 %vm6518_vm2, %v16796_v23  ;;  %13536 = vpow2.f32 %v5568_v25  ;;  %v6439_v36 = vpack.c.bf16 %v6307_v20, %v6307_v20  ;;  %v19453_v25 = vld [vmem:[#allocation91_spill] sm:$0xff]  ;;  %v1880_v20 = vpack.c.bf16 %v12680_v34, %v12676_v48 }
 0x4cb   :  { %5235 = vmax.xlane.f32.xlu0 %v5234_v10  ;;  %v6306_v63 = vmul.f32 %v13521_v1, %v19448_v57  ;;  %v5228_v10 = vsel %vm4831_vm1, %v19449_v14, -inf  ;;  %v16815_v44 = vpop.eup %13522  ;;  %v12696_v59 = vunpack.i.h.bf16 %v19453_v25  ;;  %v7261_v1 = vsel %vm6518_vm2, %v16744_v21, 0 }
 0x4cc   :  { %5916 = vadd.xlane.f32.xlu1 %v5915_v27  ;;  %v16807_v6 = vpop.xlane.xlu0 %5136  ;;  %19450 = vst [vmem:[#allocation86_spill] sm:$0xff] %v16815_v44  ;;  %v19451_v27 = vld [vmem:[#allocation28_spill] sm:$0xff]  ;;  %v16821_v32 = vpop.eup %13524  ;;  %13538 = vpow2.f32 %v5574_v33  ;;  %v5927_v11 = vsel %vm4831_vm1, %v16815_v44, 0.0  ;;  %v19465_v44 = vld [vmem:[#allocation127_spill] sm:$0xff] }
 0x4cd   :  { %v5821_v31 = vpop.xlane.xlu1 %5820  ;;  %v6438_v62 = vpack.c.bf16 %v6306_v63, %v6305_v22  ;;  %v5345_v50 = vsub.f32 %v19451_v27, %v16550_v19  ;;  %19452 = vst [vmem:[#allocation57_spill] sm:$0xff] %v16821_v32  ;;  %v16832_v22 = vpop.eup %13526  ;;  %v16840_v34 = vpack.c.bf16 %v12696_v59, %v12696_v59  ;;  %v19458_v27 = vld [vmem:[#allocation23_spill] sm:$0xff] }
 0x4ce   :  { %19454 = vst [vmem:[#allocation100_spill] sm:$0xff] %v16832_v22  ;;  %v16834_v63 = vpop.f32.mrf.mxu0  ;;  %13540 = vrcp.f32 %v5821_v31  ;;  %v5343_v31 = vsub.f32 %v19458_v27, %v16517_v9  ;;  %v19461_v9 = vld [vmem:[#allocation142_spill] sm:$0xff]  ;;  %v19462_v27 = vld [vmem:[#allocation112_spill] sm:$0xff] }
 0x4cf   :  { %5229 = vmax.xlane.f32.xlu0 %v5228_v10  ;;  %11463 = vmatprep.mubr.msk.bf16.mxu0 %vm4831_vm1, %v6438_v62  ;;  %v5570_v57 = vmul.f32 1.442695, %v5345_v50  ;;  %19455 = vst [vmem:[#allocation125_spill] sm:$0xff] %v16834_v63  ;;  %v16838_v62 = vpop.eup %13528 }
 0x4d0   :  { %5232 = vmax.xlane.f32.xlu1 %v5231_v41  ;;  %v16824_v24 = vpop.xlane.xlu0 %5130  ;;  %11464 = vmatmul.mubr.msk.bf16.vlgmr.msra.gmra.mxu0 %vm4831_vm1, %v6439_v36  ;;  %v5924_v36 = vsel %vm4831_vm1, %v16821_v32, 0.0  ;;  %19456 = vst [vmem:[#allocation90_spill] sm:$0xff] %v16838_v62  ;;  %v13531_v48 = vpop.eup %13530  ;;  %v5921_v41 = vsel %vm4831_vm1, %v16832_v22, 0.0  ;;  %v5930_v59 = vsel %vm4831_vm1, %v16838_v62, 0.0  ;;  %v19464_v32 = vld [vmem:[#allocation53_spill] sm:$0xff]  ;;  %v5349_v62 = vsub.f32 %v19465_v44, %v16610_v46 }
 0x4d1   :  { %v5815_v19 = vpop.xlane.xlu1 %5814  ;;  %11476 = vmatpush3.bf16.msra.mxu0 %v7261_v1  ;;  %v13533_v50 = vpop.eup %13532  ;;  %v19459_v1 = vld [vmem:[#allocation118_spill] sm:$0xff]  ;;  %v7318_v46 = vsel %vm6518_vm2, %v16796_v23, 0 }
 0x4d2   :  { %11477 = vmatprep.subr.bf16.mxu0 %v1880_v20  ;;  %13542 = vrcp.f32 %v5815_v19  ;;  %v5350_v19 = vsub.f32 %v19459_v1, %v16579_v30 }
 0x4d3   :  { %5928 = vadd.xlane.f32.xlu0 %v5927_v11  ;;  %v16842_v33 = vpop.f32.mrf.mxu0 }
 0x4d4   :  { %5925 = vadd.xlane.f32.xlu1 %v5924_v36  ;;  %v5818_v21 = vpop.xlane.xlu0 %5817  ;;  %19457 = vst [vmem:[#allocation129_spill] sm:$0xff] %v16842_v33  ;;  %v12685_v33 = vunpack.i.l.bf16 %v19462_v27 }
 0x4d5   :  { %v5830_v10 = vpop.xlane.xlu1 %5829  ;;  %11478 = vmatpush3.bf16.msra.mxu0 %v1880_v20  ;;  %13544 = vrcp.f32 %v5818_v21  ;;  %v16850_v11 = vpop.f32.mrf.mxu0  ;;  %v6310_v20 = vmul.f32 %v13531_v48, %v19461_v9  ;;  %v5243_v48 = vsel %vm4831_vm1, %v16507_v12, -inf  ;;  %v5580_v9 = vmul.f32 1.442695, %v5350_v19 }
 0x4d6   :  { %13546 = vpow2.f32 %v5570_v57  ;;  %19460 = vst [vmem:[#allocation130_spill] sm:$0xff] %v16850_v11  ;;  %11890 = vmatprep.subr.msk.bf16.mxu0 %vm6518_vm2, %v16840_v34  ;;  %v13535_v36 = vpop.eup %13534  ;;  %v12686_v57 = vunpack.i.h.bf16 %v19462_v27  ;;  %v19463_v11 = vld [vmem:[#allocation82_spill] sm:$0xff]  ;;  %v5240_v27 = vsel %vm4831_vm1, %v16564_v45, -inf }
 0x4d7   :  { %5922 = vadd.xlane.f32.xlu0 %v5921_v41  ;;  %v11386_v30 = vpop.f32.mrf.mxu0  ;;  %v6308_v63 = vmul.f32 %v13533_v50, %v19463_v11  ;;  %v6309_v22 = vmul.f32 %v13535_v36, %v19464_v32  ;;  %v5566_v41 = vmul.f32 1.442695, %v5343_v31  ;;  %v6441_v50 = vpack.c.bf16 %v6310_v20, %v6310_v20  ;;  %v19467_v31 = vld [vmem:[#allocation44_spill] sm:$0xff] }
 0x4d8   :  { %5931 = vadd.xlane.f32.xlu1 %v5930_v59  ;;  %v16857_v21 = vpop.xlane.xlu0 %5145  ;;  %v16867_v59 = vpop.eup %13536  ;;  %v12705_v11 = vunpack.i.l.bf16 %v19467_v31  ;;  %v5578_v36 = vmul.f32 1.442695, %v5349_v62 }
 0x4d9   :  { %v5824_v1 = vpop.xlane.xlu1 %5823  ;;  %v6440_v56 = vpack.c.bf16 %v6309_v22, %v6308_v63  ;;  %v16871_v30 = vpop.f32.mrf.mxu1  ;;  %v1882_v22 = vpack.c.bf16 %v12686_v57, %v12685_v33  ;;  %13548 = vpow2.f32 %v5566_v41  ;;  %v19468_v63 = vld [vmem:[#allocation122_spill] sm:$0xff]  ;;  %v5936_v20 = vsel %vm4831_vm1, %v16867_v59, 0.0 }
 0x4da   :  { %19466 = vst [vmem:[#allocation54_spill] sm:$0xff] %v16871_v30  ;;  %v5346_v19 = vsub.f32 %v19468_v63, %v16600_v17  ;;  %13550 = vpow2.f32 %v5580_v9  ;;  %v5249_v33 = vsel %vm4831_vm1, %v16763_v52, -inf  ;;  %v19472_v9 = vld [vmem:[#allocation119_spill] sm:$0xff]  ;;  %v19474_v52 = vld [vmem:[#allocation148_spill] sm:$0xff] }
 0x4db   :  { %5244 = vmax.xlane.f32.xlu0 %v5243_v48  ;;  %11471 = vmatprep.mubr.msk.bf16.mxu1 %vm4831_vm1, %v6440_v56  ;;  %v19470_v56 = vld [vmem:[#allocation123_spill] sm:$0xff]  ;;  %13552 = vrcp.f32 %v5830_v10  ;;  %v5348_v63 = vsub.f32 %v19472_v9, %v16595_v61  ;;  %v19476_v9 = vld [vmem:[#allocation154_spill] sm:$0xff] }
 0x4dc   :  { %5241 = vmax.xlane.f32.xlu1 %v5240_v27  ;;  %v16873_v32 = vpop.xlane.xlu0 %5139  ;;  %v16883_v48 = vpop.f32.mrf.mxu1  ;;  %11472 = vmatmul.mubr.msk.bf16.vlgmr.msra.gmra.mxu1 %vm4831_vm1, %v6441_v50  ;;  %v5353_v23 = vsub.f32 %v19470_v56, %v16623_v37  ;;  %v16896_v50 = vpack.c.bf16 %v12705_v11, %v12705_v11  ;;  %13554 = vrcp.f32 %v5824_v1 }
 0x4dd   :  { %v16879_v44 = vpop.xlane.xlu1 %5133  ;;  %19469 = vst [vmem:[#allocation110_spill] sm:$0xff] %v16883_v48  ;;  %v16888_v27 = vpop.eup %13538  ;;  %11484 = vmatpush3.bf16.msra.mxu1 %v7318_v46  ;;  %v5572_v46 = vmul.f32 1.442695, %v5346_v19  ;;  %13556 = vpow2.f32 %v5578_v36  ;;  %v5237_v48 = vsel %vm4831_vm1, %v16521_v40, -inf  ;;  %v19475_v19 = vld [vmem:[#allocation152_spill] sm:$0xff] }
 0x4de   :  { %v13541_v17 = vpop.eup %13540  ;;  %11485 = vmatprep.subr.bf16.mxu1 %v1882_v22  ;;  %v16894_v62 = vpop.f32.mrf.mxu1  ;;  %v5945_v61 = vsel %vm4831_vm1, %v16888_v27, 0.0 }
 0x4df   :  { %5937 = vadd.xlane.f32.xlu0 %v5936_v20  ;;  %19471 = vst [vmem:[#allocation41_spill] sm:$0xff] %v16894_v62  ;;  %v13543_v41 = vpop.eup %13542  ;;  %v19473_v20 = vld [vmem:[#allocation126_spill] sm:$0xff]  ;;  %v5586_v62 = vmul.f32 1.442695, %v5353_v23  ;;  %v6313_v11 = vmul.f32 %v13541_v17, %v19474_v52  ;;  %v12691_v52 = vunpack.i.h.bf16 %v19442_v39 }
 0x4e0   :  { %5250 = vmax.xlane.f32.xlu1 %v5249_v33  ;;  %v5827_v57 = vpop.xlane.xlu0 %5826  ;;  %v5351_v56 = vsub.f32 %v19473_v20, %v16638_v18  ;;  %v11394_v10 = vpop.f32.mrf.mxu1  ;;  %v6311_v36 = vmul.f32 %v13543_v41, %v19475_v19  ;;  %v5246_v19 = vsel %vm4831_vm1, %v16540_v47, -inf }
 0x4e1   :  { %v16900_v37 = vpop.xlane.xlu1 %5142  ;;  %11486 = vmatpush3.bf16.msra.mxu1 %v1882_v22  ;;  %13558 = vrcp.f32 %v5827_v57  ;;  %v12695_v22 = vunpack.i.l.bf16 %v19453_v25  ;;  %v5252_v10 = vsel %vm4831_vm1, %v16534_v43, -inf  ;;  %v6443_v45 = vpack.c.bf16 %v6313_v11, %v6313_v11  ;;  %v19478_v25 = vld [vmem:[#allocation74_spill] sm:$0xff]  ;;  %v16934_v11 = vpop.f32.mrf.mxu0 }
 0x4e2   :  { %v13545_v33 = vpop.eup %13544  ;;  %11891 = vmatprep.subr.msk.bf16.mxu1 %vm6518_vm2, %v16896_v50  ;;  %13560 = vpow2.f32 %v5572_v46  ;;  %v5582_v57 = vmul.f32 1.442695, %v5351_v56  ;;  %v19479_v56 = vld [vmem:[#allocation128_spill] sm:$0xff]  ;;  %19480 = vst [vmem:[#allocation42_spill] sm:$0xff] %v16934_v11  ;;  %v19491_v11 = vld [vmem:[#allocation157_spill] sm:$0xff] }
 0x4e3   :  { %5238 = vmax.xlane.f32.xlu0 %v5237_v48  ;;  %v16909_v1 = vpop.eup %13546  ;;  %v6312_v23 = vmul.f32 %v13545_v33, %v19476_v9  ;;  %v5576_v48 = vmul.f32 1.442695, %v5348_v63  ;;  %13562 = vpow2.f32 %v5586_v62  ;;  %v12711_v63 = vunpack.i.h.bf16 %v19478_v25 }
 0x4e4   :  { %5946 = vadd.xlane.f32.xlu1 %v5945_v61  ;;  %v16913_v18 = vpop.xlane.xlu0 %5154  ;;  %v19477_v61 = vld [vmem:[#allocation135_spill] sm:$0xff]  ;;  %v5939_v41 = vsel %vm4831_vm1, %v16909_v1, 0.0  ;;  %v7375_v62 = vsel %vm6518_vm2, %v16840_v34, 0  ;;  %v5356_v33 = vsub.f32 %v19479_v56, %v16669_v49  ;;  %v5261_v34 = vsel %vm4831_vm1, %v16568_v13, -inf }
 0x4e5   :  { %v5839_v17 = vpop.xlane.xlu1 %5838  ;;  %v6442_v20 = vpack.c.bf16 %v6312_v23, %v6311_v36  ;;  %v5355_v12 = vsub.f32 %v19477_v61, %v16700_v42  ;;  %13564 = vpow2.f32 %v5576_v48  ;;  %v1884_v42 = vpack.c.bf16 %v12695_v22, %v12691_v52  ;;  %v19484_v61 = vld [vmem:[#allocation131_spill] sm:$0xff] }
 0x4e6   :  { %13566 = vpow2.f32 %v5582_v57  ;;  %v16938_v36 = vpop.eup %13548  ;;  %v16948_v57 = vpack.c.bf16 %v12711_v63, %v12711_v63 }
 0x4e7   :  { %5253 = vmax.xlane.f32.xlu0 %v5252_v10  ;;  %11479 = vmatprep.mubr.msk.bf16.mxu0 %vm4831_vm1, %v6442_v20  ;;  %v5590_v9 = vmul.f32 1.442695, %v5355_v12  ;;  %13568 = vrcp.f32 %v5839_v17  ;;  %v16944_v52 = vpop.eup %13550  ;;  %v19483_v12 = vld [vmem:[#allocation25_spill] sm:$0xff]  ;;  %v5592_v10 = vmul.f32 1.442695, %v5356_v33  ;;  %v19487_v33 = vld [vmem:[#allocation83_spill] sm:$0xff] }
 0x4e8   :  { %5940 = vadd.xlane.f32.xlu1 %v5939_v41  ;;  %v16926_v39 = vpop.xlane.xlu0 %5148  ;;  %11480 = vmatmul.mubr.msk.bf16.vlgmr.msra.gmra.mxu0 %vm4831_vm1, %v6443_v45  ;;  %v19481_v45 = vld [vmem:[#allocation132_spill] sm:$0xff]  ;;  %v13553_v48 = vpop.eup %13552  ;;  %v5354_v20 = vsub.f32 %v19483_v12, %v16683_v35  ;;  %v5352_v41 = vsub.f32 %v19484_v61, %v16689_v15  ;;  %v5255_v15 = vsel %vm4831_vm1, %v19487_v33, -inf }
 0x4e9   :  { %v5833_v46 = vpop.xlane.xlu1 %5832  ;;  %11492 = vmatpush3.bf16.msra.mxu0 %v7375_v62  ;;  %v5359_v23 = vsub.f32 %v19481_v45, %v16713_v58  ;;  %v13555_v17 = vpop.eup %13554  ;;  %v19488_v45 = vld [vmem:[#allocation29_spill] sm:$0xff]  ;;  %v19492_v33 = vld [vmem:[#allocation36_spill] sm:$0xff] }
 0x4ea   :  { %11493 = vmatprep.subr.bf16.mxu0 %v1884_v42  ;;  %13570 = vrcp.f32 %v5833_v46  ;;  %v5933_v46 = vsel %vm4831_vm1, %v16938_v36, 0.0  ;;  %v16958_v56 = vpop.eup %13556  ;;  %v5584_v13 = vmul.f32 1.442695, %v5352_v41  ;;  %v5361_v43 = vsub.f32 %v19492_v33, %v16794_v51  ;;  %v19493_v41 = vld [vmem:[#allocation60_spill] sm:$0xff] }
 0x4eb   :  { %5247 = vmax.xlane.f32.xlu0 %v5246_v19  ;;  %v5598_v63 = vmul.f32 1.442695, %v5359_v23  ;;  %v19486_v19 = vld [vmem:[#allocation134_spill] sm:$0xff]  ;;  %v12700_v23 = vunpack.i.l.bf16 %v19488_v45  ;;  %v12720_v51 = vunpack.i.l.bf16 %v19493_v41 }
 0x4ec   :  { %5262 = vmax.xlane.f32.xlu1 %v5261_v34  ;;  %v5836_v49 = vpop.xlane.xlu0 %5835  ;;  %v16946_v22 = vpop.f32.mrf.mxu0  ;;  %v5357_v35 = vsub.f32 %v19486_v19, %v16726_v2  ;;  %v12701_v34 = vunpack.i.h.bf16 %v19488_v45  ;;  %v19490_v19 = vld [vmem:[#allocation38_spill] sm:$0xff] }
 0x4ed   :  { %19482 = vst [vmem:[#allocation133_spill] sm:$0xff] %v16946_v22  ;;  %v5848_v58 = vpop.xlane.xlu1 %5847  ;;  %11494 = vmatpush3.bf16.msra.mxu0 %v1884_v42  ;;  %13572 = vrcp.f32 %v5836_v49  ;;  %v19489_v49 = vld [vmem:[#allocation50_spill] sm:$0xff]  ;;  %v6314_v22 = vmul.f32 %v13555_v17, %v19490_v19 }
 0x4ee   :  { %v16954_v62 = vpop.f32.mrf.mxu0  ;;  %13574 = vpow2.f32 %v5590_v9  ;;  %11892 = vmatprep.subr.msk.bf16.mxu0 %vm6518_vm2, %v16948_v57  ;;  %v13559_v42 = vpop.eup %13558  ;;  %v6316_v12 = vmul.f32 %v13553_v48, %v19489_v49  ;;  %v5954_v48 = vsel %vm4831_vm1, %v16944_v52, 0.0  ;;  %v5594_v49 = vmul.f32 1.442695, %v5357_v35 }
 0x4ef   :  { %19485 = vst [vmem:[#allocation136_spill] sm:$0xff] %v16954_v62  ;;  %5934 = vadd.xlane.f32.xlu0 %v5933_v46  ;;  %v5588_v62 = vmul.f32 1.442695, %v5354_v20  ;;  %v6315_v46 = vmul.f32 %v13559_v42, %v19491_v11  ;;  %13576 = vpow2.f32 %v5592_v10  ;;  %v5951_v20 = vsel %vm4831_vm1, %v16958_v56, 0.0  ;;  %v19494_v42 = vld [vmem:[#allocation137_spill] sm:$0xff] }
 0x4f0   :  { %5256 = vmax.xlane.f32.xlu1 %v5255_v15  ;;  %v16968_v61 = vpop.xlane.xlu0 %5163  ;;  %v11402_v9 = vpop.f32.mrf.mxu0  ;;  %13578 = vpow2.f32 %v5598_v63  ;;  %v6445_v11 = vpack.c.bf16 %v6316_v12, %v6316_v12  ;;  %v7432_v63 = vsel %vm6518_vm2, %v16896_v50, 0  ;;  %v5362_v45 = vsub.f32 %v19494_v42, %v16759_v26  ;;  %v19495_v50 = vld [vmem:[#allocation79_spill] sm:$0xff] }
 0x4f1   :  { %v5842_v2 = vpop.xlane.xlu1 %5841  ;;  %v16977_v15 = vpop.eup %13560  ;;  %v6444_v9 = vpack.c.bf16 %v6315_v46, %v6314_v22  ;;  %13580 = vpow2.f32 %v5588_v62  ;;  %v1886_v22 = vpack.c.bf16 %v12701_v34, %v12700_v23  ;;  %v5602_v12 = vmul.f32 1.442695, %v5361_v43 }
 0x4f2   :  { %v16981_v17 = vpop.eup %13562  ;;  %13582 = vpow2.f32 %v5584_v13  ;;  %v5942_v62 = vsel %vm4831_vm1, %v16977_v15, 0.0  ;;  %v5365_v46 = vsub.f32 %v19495_v50, %v16807_v6  ;;  %v17004_v23 = vpack.c.bf16 %v12720_v51, %v12720_v51 }
 0x4f3   :  { %5955 = vadd.xlane.f32.xlu0 %v5954_v48  ;;  %11487 = vmatprep.mubr.msk.bf16.mxu1 %vm4831_vm1, %v6444_v9  ;;  %v16991_v33 = vpop.eup %13564  ;;  %13584 = vpow2.f32 %v5594_v49  ;;  %v5963_v13 = vsel %vm4831_vm1, %v16981_v17, 0.0  ;;  %v19496_v48 = vld [vmem:[#allocation65_spill] sm:$0xff]  ;;  %v5604_v6 = vmul.f32 1.442695, %v5362_v45  ;;  %v12706_v51 = vunpack.i.h.bf16 %v19467_v31 }
 0x4f4   :  { %5952 = vadd.xlane.f32.xlu1 %v5951_v20  ;;  %v16983_v10 = vpop.xlane.xlu0 %5157  ;;  %11488 = vmatmul.mubr.msk.bf16.vlgmr.msra.gmra.mxu1 %vm4831_vm1, %v6445_v11  ;;  %v16998_v19 = vpop.eup %13566  ;;  %13586 = vrcp.f32 %v5848_v58  ;;  %v5358_v9 = vsub.f32 %v19496_v48, %v16780_v29  ;;  %v19497_v20 = vld [vmem:[#allocation35_spill] sm:$0xff]  ;;  %v5948_v58 = vsel %vm4831_vm1, %v16991_v33, 0.0  ;;  %v5610_v42 = vmul.f32 1.442695, %v5365_v46 }
 0x4f5   :  { %v16989_v35 = vpop.xlane.xlu1 %5151  ;;  %11500 = vmatpush3.bf16.msra.mxu1 %v7432_v63  ;;  %v13569_v34 = vpop.eup %13568  ;;  %13588 = vrcp.f32 %v5842_v2  ;;  %v5363_v11 = vsub.f32 %v19497_v20, %v16824_v24  ;;  %v5957_v29 = vsel %vm4831_vm1, %v16998_v19, 0.0  ;;  %v12710_v45 = vunpack.i.l.bf16 %v19478_v25 }
 0x4f6   :  { %11501 = vmatprep.subr.bf16.mxu1 %v1886_v22  ;;  %13590 = vpow2.f32 %v5602_v12  ;;  %v19500_v12 = vld [vmem:[#allocation161_spill] sm:$0xff]  ;;  %v5258_v25 = vsel %vm4831_vm1, %v16871_v30, -inf }
 0x4f7   :  { %5943 = vadd.xlane.f32.xlu0 %v5942_v62  ;;  %v13571_v26 = vpop.eup %13570  ;;  %v19498_v62 = vld [vmem:[#allocation70_spill] sm:$0xff] }
 0x4f8   :  { %5964 = vadd.xlane.f32.xlu1 %v5963_v13  ;;  %v5845_v43 = vpop.xlane.xlu0 %5844  ;;  %v6319_v50 = vmul.f32 %v13569_v34, %v19498_v62  ;;  %v6317_v46 = vmul.f32 %v13571_v26, %v19500_v12  ;;  %v5596_v34 = vmul.f32 1.442695, %v5358_v9 }
 0x4f9   :  { %v17008_v49 = vpop.xlane.xlu1 %5160  ;;  %11502 = vmatpush3.bf16.msra.mxu1 %v1886_v22  ;;  %13592 = vrcp.f32 %v5845_v43  ;;  %v19501_v22 = vld [vmem:[#allocation164_spill] sm:$0xff]  ;;  %v19502_v43 = vld [vmem:[#allocation58_spill] sm:$0xff] }
 0x4fa   :  { %v13573_v63 = vpop.eup %13572  ;;  %11893 = vmatprep.subr.msk.bf16.mxu1 %vm6518_vm2, %v17004_v23  ;;  %v5360_v48 = vsub.f32 %v19502_v43, %v16775_v60  ;;  %13594 = vpow2.f32 %v5604_v6  ;;  %v6447_v26 = vpack.c.bf16 %v6319_v50, %v6319_v50  ;;  %v1888_v6 = vpack.c.bf16 %v12710_v45, %v12706_v51  ;;  %v19507_v43 = vld [vmem:[#allocation59_spill] sm:$0xff] }
 0x4fb   :  { %5949 = vadd.xlane.f32.xlu0 %v5948_v58  ;;  %v17017_v2 = vpop.eup %13574  ;;  %v6318_v13 = vmul.f32 %v13573_v63, %v19501_v22  ;;  %v5606_v58 = vmul.f32 1.442695, %v5363_v11  ;;  %13596 = vpow2.f32 %v5610_v42  ;;  %v19505_v11 = vld [vmem:[#allocation30_spill] sm:$0xff]  ;;  %v19506_v22 = vld [vmem:[#allocation48_spill] sm:$0xff] }
 0x4fc   :  { %19499 = vst [vmem:[#allocation139_spill] sm:$0xff] %v17017_v2  ;;  %5958 = vadd.xlane.f32.xlu1 %v5957_v29  ;;  %v17023_v24 = vpop.xlane.xlu0 %5172  ;;  %v17031_v62 = vpop.eup %13576  ;;  %v19503_v29 = vld [vmem:[#allocation144_spill] sm:$0xff]  ;;  %v5969_v9 = vsel %vm4831_vm1, %v17017_v2, 0.0  ;;  %v12726_v12 = vunpack.i.h.bf16 %v19505_v11  ;;  %13598 = vpow2.f32 %v5596_v34  ;;  %v5600_v42 = vmul.f32 1.442695, %v5360_v48 }
 0x4fd   :  { %v5857_v20 = vpop.xlane.xlu1 %5856  ;;  %v6446_v31 = vpack.c.bf16 %v6318_v13, %v6317_v46  ;;  %v5367_v47 = vsub.f32 %v19503_v29, %v16900_v37  ;;  %v17037_v63 = vpop.eup %13578  ;;  %v7489_v37 = vsel %vm6518_vm2, %v16948_v57, 0  ;;  %13600 = vpow2.f32 %v5606_v58 }
 0x4fe   :  { %19504 = vst [vmem:[#allocation111_spill] sm:$0xff] %v17037_v63  ;;  %v17046_v46 = vpop.eup %13580  ;;  %v5368_v13 = vsub.f32 %v19506_v22, %v16857_v21  ;;  %v5972_v51 = vsel %vm4831_vm1, %v17031_v62, 0.0  ;;  %v5371_v48 = vsub.f32 %v19507_v43, %v16913_v18  ;;  %13602 = vrcp.f32 %v5857_v20  ;;  %v19513_v43 = vld [vmem:[#allocation165_spill] sm:$0xff] }
 0x4ff   :  { %5259 = vmax.xlane.f32.xlu0 %v5258_v25  ;;  %11495 = vmatprep.mubr.msk.bf16.mxu0 %vm4831_vm1, %v6446_v31  ;;  %v17052_v45 = vpop.eup %13582  ;;  %v5614_v34 = vmul.f32 1.442695, %v5367_v47  ;;  %v5981_v57 = vsel %vm4831_vm1, %v17037_v63, 0.0  ;;  %v17060_v25 = vpack.c.bf16 %v12726_v12, %v12726_v12  ;;  %v19509_v47 = vld [vmem:[#allocation140_spill] sm:$0xff]  ;;  %v5966_v2 = vsel %vm4831_vm1, %v17046_v46, 0.0 }
 0x500   :  { %5970 = vadd.xlane.f32.xlu1 %v5969_v9  ;;  %v17040_v60 = vpop.xlane.xlu0 %5166  ;;  %11496 = vmatmul.mubr.msk.bf16.vlgmr.msra.gmra.mxu0 %vm4831_vm1, %v6447_v26  ;;  %v17058_v58 = vpop.eup %13584  ;;  %v5366_v29 = vsub.f32 %v19509_v47, %v16873_v32  ;;  %v5616_v20 = vmul.f32 1.442695, %v5368_v13  ;;  %v19510_v9 = vld [vmem:[#allocation101_spill] sm:$0xff]  ;;  %v5622_v12 = vmul.f32 1.442695, %v5371_v48 }
 0x501   :  { %v5851_v50 = vpop.xlane.xlu1 %5850  ;;  %11508 = vmatpush3.bf16.msra.mxu0 %v7489_v37  ;;  %19508 = vst [vmem:[#allocation85_spill] sm:$0xff] %v17058_v58  ;;  %v13587_v31 = vpop.eup %13586  ;;  %v5364_v37 = vsub.f32 %v19510_v9, %v16879_v44  ;;  %v5975_v32 = vsel %vm4831_vm1, %v17058_v58, 0.0  ;;  %v19516_v58 = vld [vmem:[#allocation150_spill] sm:$0xff] }
 0x502   :  { %11509 = vmatprep.subr.bf16.mxu0 %v1888_v6  ;;  %13604 = vrcp.f32 %v5851_v50  ;;  %v13589_v18 = vpop.eup %13588  ;;  %v5960_v50 = vsel %vm4831_vm1, %v17052_v45, 0.0  ;;  %v5612_v48 = vmul.f32 1.442695, %v5366_v29  ;;  %v5373_v63 = vsub.f32 %v19516_v58, %v17008_v49 }
 0x503   :  { %5973 = vadd.xlane.f32.xlu0 %v5972_v51  ;;  %13606 = vpow2.f32 %v5600_v42  ;;  %v17068_v22 = vpop.eup %13590  ;;  %v19511_v42 = vld [vmem:[#allocation143_spill] sm:$0xff]  ;;  %v7546_v58 = vsel %vm6518_vm2, %v17004_v23, 0 }
 0x504   :  { %5982 = vadd.xlane.f32.xlu1 %v5981_v57  ;;  %v5854_v21 = vpop.xlane.xlu0 %5853  ;;  %v5369_v51 = vsub.f32 %v19511_v42, %v16926_v39  ;;  %v6322_v57 = vmul.f32 %v13587_v31, %v19513_v43  ;;  %v19514_v39 = vld [vmem:[#allocation55_spill] sm:$0xff]  ;;  %v19515_v42 = vld [vmem:[#allocation84_spill] sm:$0xff]  ;;  %v5987_v29 = vsel %vm4831_vm1, %v17068_v22, 0.0 }
 0x505   :  { %v5866_v26 = vpop.xlane.xlu1 %5865  ;;  %11510 = vmatpush3.bf16.msra.mxu0 %v1888_v6  ;;  %13608 = vrcp.f32 %v5854_v21  ;;  %v19512_v6 = vld [vmem:[#allocation114_spill] sm:$0xff]  ;;  %v6320_v9 = vmul.f32 %v13589_v18, %v19514_v39  ;;  %v19521_v23 = vld [vmem:[#allocation147_spill] sm:$0xff] }
 0x506   :  { %13610 = vpow2.f32 %v5614_v34  ;;  %11894 = vmatprep.subr.msk.bf16.mxu0 %vm6518_vm2, %v17060_v25  ;;  %v13593_v44 = vpop.eup %13592  ;;  %v12716_v13 = vunpack.i.h.bf16 %v19512_v6  ;;  %v12715_v34 = vunpack.i.l.bf16 %v19512_v6 }
 0x507   :  { %5961 = vadd.xlane.f32.xlu0 %v5960_v50  ;;  %v6321_v30 = vmul.f32 %v13593_v44, %v19515_v42  ;;  %13612 = vpow2.f32 %v5616_v20  ;;  %v5608_v50 = vmul.f32 1.442695, %v5364_v37  ;;  %v17087_v31 = vpop.eup %13594  ;;  %v6449_v44 = vpack.c.bf16 %v6322_v57, %v6322_v57  ;;  %v19518_v37 = vld [vmem:[#allocation76_spill] sm:$0xff] }
 0x508   :  { %5976 = vadd.xlane.f32.xlu1 %v5975_v32  ;;  %v17078_v21 = vpop.xlane.xlu0 %5181  ;;  %13614 = vpow2.f32 %v5622_v12  ;;  %v5618_v32 = vmul.f32 1.442695, %v5369_v51  ;;  %v17091_v18 = vpop.eup %13596  ;;  %v12735_v49 = vunpack.i.l.bf16 %v19518_v37  ;;  %v19519_v51 = vld [vmem:[#allocation37_spill] sm:$0xff]  ;;  %v5626_v57 = vmul.f32 1.442695, %v5373_v63 }
 0x509   :  { %v5860_v47 = vpop.xlane.xlu1 %5859  ;;  %v6448_v43 = vpack.c.bf16 %v6321_v30, %v6320_v9  ;;  %19517 = vst [vmem:[#allocation22_spill] sm:$0xff] %v17091_v18  ;;  %13616 = vpow2.f32 %v5612_v48  ;;  %v1890_v30 = vpack.c.bf16 %v12716_v13, %v12715_v34  ;;  %v5374_v6 = vsub.f32 %v19519_v51, %v16968_v61 }
 0x50a   :  { %13618 = vpow2.f32 %v5608_v50  ;;  %v5990_v48 = vsel %vm4831_vm1, %v17087_v31, 0.0  ;;  %v5377_v9 = vsub.f32 %v19521_v23, %v17023_v24  ;;  %v5999_v13 = vsel %vm4831_vm1, %v17091_v18, 0.0  ;;  %v19522_v50 = vld [vmem:[#allocation146_spill] sm:$0xff]  ;;  %v19524_v23 = vld [vmem:[#allocation168_spill] sm:$0xff] }
 0x50b   :  { %5967 = vadd.xlane.f32.xlu0 %v5966_v2  ;;  %11503 = vmatprep.mubr.msk.bf16.mxu1 %vm4831_vm1, %v6448_v43  ;;  %v17101_v2 = vpop.eup %13598  ;;  %13620 = vpow2.f32 %v5618_v32  ;;  %v17114_v42 = vpack.c.bf16 %v12735_v49, %v12735_v49  ;;  %v5370_v43 = vsub.f32 %v19522_v50, %v16989_v35  ;;  %v5628_v24 = vmul.f32 1.442695, %v5374_v6  ;;  %v19528_v50 = vld [vmem:[#allocation145_spill] sm:$0xff] }
 0x50c   :  { %5988 = vadd.xlane.f32.xlu1 %v5987_v29  ;;  %v17093_v20 = vpop.xlane.xlu0 %5175  ;;  %11504 = vmatmul.mubr.msk.bf16.vlgmr.msra.gmra.mxu1 %vm4831_vm1, %v6449_v44  ;;  %v17108_v39 = vpop.eup %13600  ;;  %13622 = vrcp.f32 %v5866_v26  ;;  %v19523_v44 = vld [vmem:[#allocation149_spill] sm:$0xff]  ;;  %v5978_v26 = vsel %vm4831_vm1, %v17101_v2, 0.0  ;;  %v12725_v6 = vunpack.i.l.bf16 %v19505_v11 }
 0x50d   :  { %v17099_v12 = vpop.xlane.xlu1 %5169  ;;  %19520 = vst [vmem:[#allocation71_spill] sm:$0xff] %v17108_v39  ;;  %11516 = vmatpush3.bf16.msra.mxu1 %v7546_v58  ;;  %v13603_v34 = vpop.eup %13602  ;;  %13624 = vrcp.f32 %v5860_v47  ;;  %v5375_v58 = vsub.f32 %v19523_v44, %v17040_v60  ;;  %v5993_v35 = vsel %vm4831_vm1, %v17108_v39, 0.0  ;;  %v5372_v44 = vsub.f32 %v19528_v50, %v16983_v10 }
 0x50e   :  { %11517 = vmatprep.subr.bf16.mxu1 %v1890_v30  ;;  %13626 = vpow2.f32 %v5626_v57  ;;  %v6325_v49 = vmul.f32 %v13603_v34, %v19524_v23  ;;  %v19526_v57 = vld [vmem:[#allocation169_spill] sm:$0xff] }
 0x50f   :  { %5991 = vadd.xlane.f32.xlu0 %v5990_v48  ;;  %v13605_v63 = vpop.eup %13604  ;;  %v5634_v48 = vmul.f32 1.442695, %v5377_v9  ;;  %v5630_v23 = vmul.f32 1.442695, %v5375_v58  ;;  %v19531_v58 = vld [vmem:[#allocation47_spill] sm:$0xff] }
 0x510   :  { %6000 = vadd.xlane.f32.xlu1 %v5999_v13  ;;  %v5863_v61 = vpop.xlane.xlu0 %5862  ;;  %v17118_v29 = vpop.eup %13606  ;;  %v6323_v9 = vmul.f32 %v13605_v63, %v19526_v57  ;;  %v19527_v13 = vld [vmem:[#allocation39_spill] sm:$0xff]  ;;  %v6451_v18 = vpack.c.bf16 %v6325_v49, %v6325_v49  ;;  %v19529_v63 = vld [vmem:[#allocation156_spill] sm:$0xff] }
 0x511   :  { %v5179_v32 = vpop.xlane.xlu1 %5178  ;;  %11518 = vmatpush3.bf16.msra.mxu1 %v1890_v30  ;;  %13628 = vrcp.f32 %v5863_v61  ;;  %v12721_v30 = vunpack.i.h.bf16 %v19493_v41  ;;  %v5620_v61 = vmul.f32 1.442695, %v5370_v43  ;;  %v5984_v39 = vsel %vm4831_vm1, %v17118_v29, 0.0  ;;  %v19532_v49 = vld [vmem:[#allocation151_spill] sm:$0xff] }
 0x512   :  { %v13609_v51 = vpop.eup %13608  ;;  %11895 = vmatprep.subr.msk.bf16.mxu1 %vm6518_vm2, %v17114_v42  ;;  %13630 = vpow2.f32 %v5628_v24  ;;  %v5379_v57 = vsub.f32 %v19529_v63, %v5179_v32  ;;  %v19534_v63 = vld [vmem:[#allocation81_spill] sm:$0xff] }
 0x513   :  { %5979 = vadd.xlane.f32.xlu0 %v5978_v26  ;;  %v17127_v47 = vpop.eup %13610  ;;  %v6324_v34 = vmul.f32 %v13609_v51, %v19527_v13  ;;  %13632 = vpow2.f32 %v5634_v48  ;;  %v1892_v24 = vpack.c.bf16 %v12725_v6, %v12721_v30  ;;  %v12741_v51 = vunpack.i.h.bf16 %v19531_v58 }
 0x514   :  { %19525 = vst [vmem:[#allocation88_spill] sm:$0xff] %v17127_v47  ;;  %5994 = vadd.xlane.f32.xlu1 %v5993_v35  ;;  %v17132_v60 = vpop.xlane.xlu0 %5190  ;;  %v17141_v35 = vpop.eup %13612  ;;  %v6005_v41 = vsel %vm4831_vm1, %v17127_v47, 0.0  ;;  %13634 = vpow2.f32 %v5620_v61  ;;  %v5380_v13 = vsub.f32 %v19532_v49, %v17078_v21  ;;  %v5638_v30 = vmul.f32 1.442695, %v5379_v57 }
 0x515   :  { %v5875_v26 = vpop.xlane.xlu1 %5874  ;;  %v6450_v11 = vpack.c.bf16 %v6324_v34, %v6323_v9  ;;  %v17146_v43 = vpop.eup %13614  ;;  %v5624_v9 = vmul.f32 1.442695, %v5372_v44  ;;  %13636 = vpow2.f32 %v5630_v23  ;;  %v6008_v6 = vsel %vm4831_vm1, %v17141_v35, 0.0 }
 0x516   :  { %19530 = vst [vmem:[#allocation138_spill] sm:$0xff] %v17146_v43  ;;  %v17155_v48 = vpop.eup %13616  ;;  %13638 = vrcp.f32 %v5875_v26  ;;  %v17167_v21 = vpack.c.bf16 %v12741_v51, %v12741_v51  ;;  %v5376_v26 = vsub.f32 %v19534_v63, %v17099_v12 }
 0x517   :  { %5985 = vadd.xlane.f32.xlu0 %v5984_v39  ;;  %11511 = vmatprep.mubr.msk.bf16.mxu0 %vm4831_vm1, %v6450_v11  ;;  %v7603_v39 = vsel %vm6518_vm2, %v17060_v25, 0  ;;  %v17161_v34 = vpop.eup %13618  ;;  %v6017_v25 = vsel %vm4831_vm1, %v17146_v43, 0.0  ;;  %v5640_v11 = vmul.f32 1.442695, %v5380_v13  ;;  %v19540_v43 = vld [vmem:[#allocation153_spill] sm:$0xff] }
 0x518   :  { %6006 = vadd.xlane.f32.xlu1 %v6005_v41  ;;  %v17149_v10 = vpop.xlane.xlu0 %5184  ;;  %11512 = vmatmul.mubr.msk.bf16.vlgmr.msra.gmra.mxu0 %vm4831_vm1, %v6451_v18  ;;  %v17165_v18 = vpop.eup %13620  ;;  %v5996_v57 = vsel %vm4831_vm1, %v17161_v34, 0.0 }
 0x519   :  { %v5869_v32 = vpop.xlane.xlu1 %5868  ;;  %11524 = vmatpush3.bf16.msra.mxu0 %v7603_v39  ;;  %19533 = vst [vmem:[#allocation109_spill] sm:$0xff] %v17165_v18  ;;  %v13623_v50 = vpop.eup %13622  ;;  %v6011_v51 = vsel %vm4831_vm1, %v17165_v18, 0.0  ;;  %v19536_v39 = vld [vmem:[#allocation98_spill] sm:$0xff]  ;;  %v5378_v18 = vsub.f32 %v19540_v43, %v17093_v20  ;;  %v19544_v20 = vld [vmem:[#allocation155_spill] sm:$0xff] }
 0x51a   :  { %11525 = vmatprep.subr.bf16.mxu0 %v1892_v24  ;;  %13640 = vrcp.f32 %v5869_v32  ;;  %v13625_v23 = vpop.eup %13624  ;;  %v6328_v32 = vmul.f32 %v13623_v50, %v19536_v39  ;;  %v6002_v50 = vsel %vm4831_vm1, %v17155_v48, 0.0  ;;  %v5383_v43 = vsub.f32 %v19544_v20, %v17132_v60 }
 0x51b   :  { %6009 = vadd.xlane.f32.xlu0 %v6008_v6  ;;  %13642 = vpow2.f32 %v5624_v9  ;;  %v17173_v41 = vpop.eup %13626 }
 0x51c   :  { %6018 = vadd.xlane.f32.xlu1 %v6017_v25  ;;  %v5872_v61 = vpop.xlane.xlu0 %5871  ;;  %19535 = vst [vmem:[#allocation56_spill] sm:$0xff] %v17173_v41  ;;  %v19538_v25 = vld [vmem:[#allocation52_spill] sm:$0xff] }
 0x51d   :  { %v5884_v44 = vpop.xlane.xlu1 %5883  ;;  %11526 = vmatpush3.bf16.msra.mxu0 %v1892_v24  ;;  %13644 = vrcp.f32 %v5872_v61  ;;  %v19537_v24 = vld [vmem:[#allocation62_spill] sm:$0xff]  ;;  %v19539_v61 = vld [vmem:[#allocation171_spill] sm:$0xff] }
 0x51e   :  { %13646 = vpow2.f32 %v5638_v30  ;;  %11896 = vmatprep.subr.msk.bf16.mxu0 %vm6518_vm2, %v17167_v21  ;;  %v13629_v9 = vpop.eup %13628  ;;  %v12731_v49 = vunpack.i.h.bf16 %v19537_v24  ;;  %v12730_v13 = vunpack.i.l.bf16 %v19537_v24  ;;  %v6326_v30 = vmul.f32 %v13625_v23, %v19538_v25 }
 0x51f   :  { %5997 = vadd.xlane.f32.xlu0 %v5996_v57  ;;  %v6327_v63 = vmul.f32 %v13629_v9, %v19539_v61  ;;  %13648 = vpow2.f32 %v5640_v11  ;;  %v5632_v57 = vmul.f32 1.442695, %v5376_v26  ;;  %v6023_v24 = vsel %vm4831_vm1, %v17173_v41, 0.0  ;;  %v19543_v11 = vld [vmem:[#allocation92_spill] sm:$0xff] }
 0x520   :  { %6012 = vadd.xlane.f32.xlu1 %v6011_v51  ;;  %v17180_v12 = vpop.xlane.xlu0 %5199  ;;  %v17190_v51 = vpop.eup %13630  ;;  %v6453_v23 = vpack.c.bf16 %v6328_v32, %v6328_v32  ;;  %v12750_v26 = vunpack.i.l.bf16 %v19543_v11  ;;  %v7660_v32 = vsel %vm6518_vm2, %v17114_v42, 0  ;;  %v19546_v42 = vld [vmem:[#allocation67_spill] sm:$0xff] }
 0x521   :  { %v5878_v6 = vpop.xlane.xlu1 %5877  ;;  %19541 = vst [vmem:[#allocation87_spill] sm:$0xff] %v17190_v51  ;;  %v6452_v39 = vpack.c.bf16 %v6327_v63, %v6326_v30  ;;  %v17194_v47 = vpop.eup %13632  ;;  %v1894_v30 = vpack.c.bf16 %v12731_v49, %v12730_v13  ;;  %13650 = vpow2.f32 %v5632_v57  ;;  %v5636_v63 = vmul.f32 1.442695, %v5378_v18 }
 0x522   :  { %19542 = vst [vmem:[#allocation113_spill] sm:$0xff] %v17194_v47  ;;  %v17204_v61 = vpop.eup %13634  ;;  %v6035_v60 = vsel %vm4831_vm1, %v17194_v47, 0.0  ;;  %13652 = vrcp.f32 %v5884_v44  ;;  %v17215_v57 = vpack.c.bf16 %v12750_v26, %v12750_v26  ;;  %v12736_v26 = vunpack.i.h.bf16 %v19518_v37  ;;  %v19550_v37 = vld [vmem:[#allocation175_spill] sm:$0xff] }
 0x523   :  { %6003 = vadd.xlane.f32.xlu0 %v6002_v50  ;;  %11519 = vmatprep.mubr.msk.bf16.mxu1 %vm4831_vm1, %v6452_v39  ;;  %v6026_v50 = vsel %vm4831_vm1, %v17190_v51, 0.0  ;;  %v5646_v39 = vmul.f32 1.442695, %v5383_v43  ;;  %13654 = vrcp.f32 %v5878_v6  ;;  %v19548_v43 = vld [vmem:[#allocation173_spill] sm:$0xff] }
 0x524   :  { %6024 = vadd.xlane.f32.xlu1 %v6023_v24  ;;  %v17196_v9 = vpop.xlane.xlu0 %5193  ;;  %11520 = vmatmul.mubr.msk.bf16.vlgmr.msra.gmra.mxu1 %vm4831_vm1, %v6453_v23  ;;  %v17211_v24 = vpop.eup %13636  ;;  %v5381_v23 = vsub.f32 %v19546_v42, %v17149_v10  ;;  %13656 = vpow2.f32 %v5636_v63 }
 0x525   :  { %v17202_v25 = vpop.xlane.xlu1 %5187  ;;  %19545 = vst [vmem:[#allocation73_spill] sm:$0xff] %v17211_v24  ;;  %11532 = vmatpush3.bf16.msra.mxu1 %v7660_v32  ;;  %v13639_v49 = vpop.eup %13638  ;;  %v5386_v32 = vsub.f32 %v16348_v7, %v17180_v12  ;;  %v6029_v10 = vsel %vm4831_vm1, %v17211_v24, 0.0  ;;  %v12740_v7 = vunpack.i.l.bf16 %v19531_v58 }
 0x526   :  { %11533 = vmatprep.subr.bf16.mxu1 %v1894_v30  ;;  %v6331_v47 = vmul.f32 %v13639_v49, %v19548_v43  ;;  %v19551_v49 = vld [vmem:[#allocation178_spill] sm:$0xff] }
 0x527   :  { %6027 = vadd.xlane.f32.xlu0 %v6026_v50  ;;  %v13641_v13 = vpop.eup %13640  ;;  %v6014_v50 = vsel %vm4831_vm1, %v17204_v61, 0.0 }
 0x528   :  { %6036 = vadd.xlane.f32.xlu1 %v6035_v60  ;;  %v5881_v18 = vpop.xlane.xlu0 %5880  ;;  %v17219_v41 = vpop.eup %13642  ;;  %v6329_v63 = vmul.f32 %v13641_v13, %v19550_v37  ;;  %v6455_v43 = vpack.c.bf16 %v6331_v47, %v6331_v47 }
 0x529   :  { %v5197_v20 = vpop.xlane.xlu1 %5196  ;;  %19547 = vst [vmem:[#allocation17_spill] sm:$0xff] %v17219_v41  ;;  %11534 = vmatpush3.bf16.msra.mxu1 %v1894_v30  ;;  %13658 = vrcp.f32 %v5881_v18  ;;  %v5642_v18 = vmul.f32 1.442695, %v5381_v23  ;;  %v6020_v58 = vsel %vm4831_vm1, %v17219_v41, 0.0  ;;  %v19553_v23 = vld [vmem:[#allocation31_spill] sm:$0xff] }
 0x52a   :  { %v5385_v44 = vsub.f32 %v16392_v0, %v5197_v20  ;;  %v13645_v60 = vpop.eup %13644  ;;  %11897 = vmatprep.subr.msk.bf16.mxu1 %vm6518_vm2, %v17215_v57  ;;  %13660 = vpow2.f32 %v5646_v39  ;;  %v5652_v20 = vmul.f32 1.442695, %v5386_v32  ;;  %v1896_v39 = vpack.c.bf16 %v12740_v7, %v12736_v26  ;;  %v17257_v7 = vpop.f32.mrf.mxu1 }
 0x52b   :  { %6015 = vadd.xlane.f32.xlu0 %v6014_v50  ;;  %v17230_v6 = vpop.eup %13646  ;;  %v6330_v30 = vmul.f32 %v13645_v60, %v19551_v49  ;;  %v12756_v60 = vunpack.i.h.bf16 %v19553_v23  ;;  %v7717_v32 = vsel %vm6518_vm2, %v17167_v21, 0  ;;  %19557 = vst [vmem:[#allocation89_spill] sm:$0xff] %v17257_v7 }
 0x52c   :  { %19549 = vst [vmem:[#allocation68_spill] sm:$0xff] %v17230_v6  ;;  %v5650_v12 = vmul.f32 1.442695, %v5385_v44  ;;  %6030 = vadd.xlane.f32.xlu1 %v6029_v10  ;;  %v17235_v0 = vpop.xlane.xlu0 %5208  ;;  %v17241_v44 = vpop.eup %13648  ;;  %v6041_v10 = vsel %vm4831_vm1, %v17230_v6, 0.0 }
 0x52d   :  { %v5893_v42 = vpop.xlane.xlu1 %5892  ;;  %v6454_v50 = vpack.c.bf16 %v6330_v30, %v6329_v63  ;;  %19552 = vst [vmem:[#allocation96_spill] sm:$0xff] %v17241_v44  ;;  %v19555_v63 = vld [vmem:[#allocation160_spill] sm:$0xff]  ;;  %v6044_v30 = vsel %vm4831_vm1, %v17241_v44, 0.0  ;;  %v19564_v44 = vld [vmem:[#allocation105_spill] sm:$0xff] }
 0x52e   :  { %13662 = vpow2.f32 %v5650_v12  ;;  %v19554_v12 = vld [vmem:[#allocation166_spill] sm:$0xff]  ;;  %v5382_v49 = vsub.f32 %v19555_v63, %v17202_v25  ;;  %v17255_v26 = vpop.eup %13650 }
 0x52f   :  { %6021 = vadd.xlane.f32.xlu0 %v6020_v58  ;;  %11527 = vmatprep.mubr.msk.bf16.mxu0 %vm4831_vm1, %v6454_v50  ;;  %13664 = vpow2.f32 %v5642_v18  ;;  %19556 = vst [vmem:[#allocation141_spill] sm:$0xff] %v17255_v26  ;;  %v13653_v50 = vpop.eup %13652  ;;  %v17259_v58 = vpack.c.bf16 %v12756_v60, %v12756_v60 }
 0x530   :  { %6042 = vadd.xlane.f32.xlu1 %v6041_v10  ;;  %v5203_v13 = vpop.xlane.xlu0 %5202  ;;  %11528 = vmatmul.mubr.msk.bf16.vlgmr.msra.gmra.mxu0 %vm4831_vm1, %v6455_v43  ;;  %13666 = vpow2.f32 %v5652_v20  ;;  %v13655_v43 = vpop.eup %13654  ;;  %v5644_v10 = vmul.f32 1.442695, %v5382_v49 }
 0x531   :  { %v5387_v37 = vsub.f32 %v19554_v12, %v5203_v13  ;;  %v5887_v47 = vpop.xlane.xlu1 %5886  ;;  %11540 = vmatpush3.bf16.msra.mxu0 %v7717_v32  ;;  %13668 = vrcp.f32 %v5893_v42  ;;  %v19559_v13 = vld [vmem:[#allocation159_spill] sm:$0xff]  ;;  %v6032_v42 = vsel %vm4831_vm1, %v17255_v26, 0.0  ;;  %v17267_v12 = vpop.eup %13656 }
 0x532   :  { %11541 = vmatprep.subr.bf16.mxu0 %v1896_v39  ;;  %13670 = vrcp.f32 %v5887_v47  ;;  %v5384_v32 = vsub.f32 %v19559_v13, %v17196_v9  ;;  %v19561_v47 = vld [vmem:[#allocation174_spill] sm:$0xff] }
 0x533   :  { %v5654_v18 = vmul.f32 1.442695, %v5387_v37  ;;  %6045 = vadd.xlane.f32.xlu0 %v6044_v30  ;;  %v6334_v63 = vmul.f32 %v13653_v50, %v19561_v47  ;;  %v19562_v30 = vld [vmem:[#allocation95_spill] sm:$0xff]  ;;  %v19563_v13 = vld [vmem:[#allocation102_spill] sm:$0xff]  ;;  %v6038_v50 = vsel %vm4831_vm1, %v17267_v12, 0.0 }
 0x534   :  { %v5890_v21 = vpop.xlane.xlu0 %5889  ;;  %v17261_v20 = vpop.f32.mrf.mxu1  ;;  %v12745_v9 = vunpack.i.l.bf16 %v19562_v30  ;;  %v6332_v7 = vmul.f32 %v13655_v43, %v19563_v13  ;;  %v5648_v24 = vmul.f32 1.442695, %v5384_v32  ;;  %v19568_v32 = vld [vmem:[#allocation75_spill] sm:$0xff] }
 0x535   :  { %13672 = vpow2.f32 %v5654_v18  ;;  %19558 = vst [vmem:[#allocation28_spill] sm:$0xff] %v17261_v20  ;;  %v5902_v25 = vpop.xlane.xlu1 %5901  ;;  %11542 = vmatpush3.bf16.msra.mxu0 %v1896_v39  ;;  %v12746_v18 = vunpack.i.h.bf16 %v19562_v30 }
 0x536   :  { %13674 = vrcp.f32 %v5890_v21  ;;  %11898 = vmatprep.subr.msk.bf16.mxu0 %vm6518_vm2, %v17259_v58  ;;  %v17271_v60 = vpop.f32.mrf.mxu1  ;;  %v13659_v37 = vpop.eup %13658 }
 0x537   :  { %19560 = vst [vmem:[#allocation91_spill] sm:$0xff] %v17271_v60  ;;  %6033 = vadd.xlane.f32.xlu0 %v6032_v42  ;;  %v6333_v6 = vmul.f32 %v13659_v37, %v19564_v44  ;;  %v17278_v26 = vpop.eup %13660  ;;  %13676 = vpow2.f32 %v5644_v10  ;;  %v19566_v42 = vld [vmem:[#allocation163_spill] sm:$0xff]  ;;  %v12765_v37 = vunpack.i.l.bf16 %v19568_v32 }
 0x538   :  { %v5218_v49 = vpop.xlane.xlu0 %5217  ;;  %v11410_v39 = vpop.f32.mrf.mxu1  ;;  %19565 = vst [vmem:[#allocation23_spill] sm:$0xff] %v17278_v26  ;;  %v5389_v41 = vsub.f32 %v19566_v42, %v17235_v0  ;;  %13678 = vpow2.f32 %v5648_v24  ;;  %v6053_v44 = vsel %vm4831_vm1, %v17278_v26, 0.0  ;;  %v19618_v26 = vld [vmem:[#allocation20_spill] sm:$0xff] }
 0x539   :  { %v5896_v21 = vpop.xlane.xlu1 %5895  ;;  %v6456_v30 = vpack.c.bf16 %v6333_v6, %v6332_v7  ;;  %v6457_v39 = vpack.c.bf16 %v6334_v63, %v6334_v63  ;;  %v5392_v0 = vsub.f32 %v16404_v8, %v5218_v49  ;;  %v1898_v6 = vpack.c.bf16 %v12746_v18, %v12745_v9  ;;  %v17307_v9 = vpop.f32.mrf.mxu0 }
 0x53a   :  { %v17286_v51 = vpop.f32.mrf.mxu1  ;;  %v5658_v63 = vmul.f32 1.442695, %v5389_v41  ;;  %13680 = vrcp.f32 %v5902_v25  ;;  %v17305_v41 = vpack.c.bf16 %v12765_v37, %v12765_v37  ;;  %19570 = vst [vmem:[#allocation112_spill] sm:$0xff] %v17307_v9  ;;  %v19583_v9 = vld [vmem:[#allocation40_spill] sm:$0xff] }
 0x53b   :  { %v17284_v47 = vpop.eup %13662  ;;  %19567 = vst [vmem:[#allocation118_spill] sm:$0xff] %v17286_v51  ;;  %6039 = vadd.xlane.f32.xlu0 %v6038_v50  ;;  %11535 = vmatprep.mubr.msk.bf16.mxu1 %vm4831_vm1, %v6456_v30  ;;  %v7774_v50 = vsel %vm6518_vm2, %v17215_v57, 0  ;;  %13682 = vrcp.f32 %v5896_v21  ;;  %v5664_v30 = vmul.f32 1.442695, %v5392_v0 }
 0x53c   :  { %v5212_v43 = vpop.xlane.xlu0 %5211  ;;  %v6059_v10 = vsel %vm4831_vm1, %v17284_v47, 0.0  ;;  %v17296_v7 = vpop.eup %13664  ;;  %11536 = vmatmul.mubr.msk.bf16.vlgmr.msra.gmra.mxu1 %vm4831_vm1, %v6457_v39 }
 0x53d   :  { %v5206_v13 = vpop.xlane.xlu1 %5205  ;;  %v5390_v42 = vsub.f32 %v16410_v5, %v5212_v43  ;;  %6060 = vadd.xlane.f32.xlu1 %v6059_v10  ;;  %v17303_v8 = vpop.eup %13666  ;;  %11548 = vmatpush3.bf16.msra.mxu1 %v7774_v50  ;;  %v6047_v21 = vsel %vm4831_vm1, %v17296_v7, 0.0  ;;  %v19572_v10 = vld [vmem:[#allocation12_spill] sm:$0xff] }
 0x53e   :  { %19569 = vst [vmem:[#allocation142_spill] sm:$0xff] %v17303_v8  ;;  %v13669_v5 = vpop.eup %13668  ;;  %11549 = vmatprep.subr.bf16.mxu1 %v1898_v6  ;;  %v5388_v25 = vsub.f32 %v16426_v16, %v5206_v13 }
 0x53f   :  { %v5660_v49 = vmul.f32 1.442695, %v5390_v42  ;;  %6054 = vadd.xlane.f32.xlu0 %v6053_v44  ;;  %v13671_v24 = vpop.eup %13670  ;;  %v6337_v42 = vmul.f32 %v13669_v5, %v19572_v10 }
 0x540   :  { %v5899_v18 = vpop.xlane.xlu0 %5898 }
 0x541   :  { %13684 = vpow2.f32 %v5660_v49  ;;  %v5215_v57 = vpop.xlane.xlu1 %5214  ;;  %11550 = vmatpush3.bf16.msra.mxu1 %v1898_v6  ;;  %v17316_v37 = vpop.f32.mrf.mxu0  ;;  %v12755_v6 = vunpack.i.l.bf16 %v19553_v23 }
 0x542   :  { %v17309_v39 = vpop.eup %13672  ;;  %13686 = vpow2.f32 %v5658_v63  ;;  %v5391_v43 = vsub.f32 %v16449_v4, %v5215_v57  ;;  %19573 = vst [vmem:[#allocation53_spill] sm:$0xff] %v17316_v37  ;;  %11899 = vmatprep.subr.msk.bf16.mxu1 %vm6518_vm2, %v17305_v41  ;;  %v19574_v4 = vld [vmem:[#allocation117_spill] sm:$0xff]  ;;  %v5656_v57 = vmul.f32 1.442695, %v5388_v25  ;;  %v7831_v25 = vsel %vm6518_vm2, %v17259_v58, 0 }
 0x543   :  { %19571 = vst [vmem:[#allocation82_spill] sm:$0xff] %v17309_v39  ;;  %v13675_v44 = vpop.eup %13674  ;;  %13688 = vrcp.f32 %v5899_v18  ;;  %6048 = vadd.xlane.f32.xlu0 %v6047_v21  ;;  %v6065_v0 = vsel %vm4831_vm1, %v17309_v39, 0.0  ;;  %v6335_v13 = vmul.f32 %v13671_v24, %v19574_v4  ;;  %v17327_v49 = vpop.f32.mrf.mxu0  ;;  %v6062_v18 = vsel %vm4831_vm1, %v17303_v8, 0.0 }
 0x544   :  { %v5662_v50 = vmul.f32 1.442695, %v5391_v43  ;;  %v17322_v16 = vpop.xlane.xlu0 %5226  ;;  %6066 = vadd.xlane.f32.xlu1 %v6065_v0  ;;  %v6336_v63 = vmul.f32 %v13675_v44, %v16646_v54  ;;  %13690 = vpow2.f32 %v5664_v30  ;;  %19575 = vst [vmem:[#allocation127_spill] sm:$0xff] %v17327_v49  ;;  %v17333_v10 = vpop.eup %13676  ;;  %v12751_v24 = vunpack.i.h.bf16 %v19543_v11  ;;  %v19576_v30 = vld [vmem:[#allocation61_spill] sm:$0xff]  ;;  %v19582_v11 = vld [vmem:[#allocation107_spill] sm:$0xff] }
 0x545   :  { %v5911_v5 = vpop.xlane.xlu1 %5910  ;;  %v6459_v54 = vpack.c.bf16 %v6337_v42, %v6337_v42  ;;  %v11418_v44 = vpop.f32.mrf.mxu0  ;;  %v12771_v0 = vunpack.i.h.bf16 %v19576_v30  ;;  %v6050_v42 = vsel %vm4831_vm1, %v17333_v10, 0.0 }
 0x546   :  { %13692 = vpow2.f32 %v5662_v50  ;;  %v6458_v21 = vpack.c.bf16 %v6336_v63, %v6335_v13  ;;  %v1900_v63 = vpack.c.bf16 %v12755_v6, %v12751_v24 }
 0x547   :  { %6063 = vadd.xlane.f32.xlu0 %v6062_v18  ;;  %v17338_v4 = vpop.f32.mrf.mxu0  ;;  %13694 = vpow2.f32 %v5656_v57  ;;  %v17348_v18 = vpop.eup %13678  ;;  %v17350_v44 = vpack.c.bf16 %v12771_v0, %v12771_v0 }
 0x548   :  { %11543 = vmatprep.mubr.msk.bf16.mxu0 %vm4831_vm1, %v6458_v21  ;;  %v5221_v23 = vpop.xlane.xlu0 %5220  ;;  %19577 = vst [vmem:[#allocation44_spill] sm:$0xff] %v17338_v4  ;;  %13696 = vrcp.f32 %v5911_v5  ;;  %v6056_v24 = vsel %vm4831_vm1, %v17348_v18, 0.0 }
 0x549   :  { %11544 = vmatmul.mubr.msk.bf16.vlgmr.msra.gmra.mxu0 %vm4831_vm1, %v6459_v54  ;;  %v5393_v50 = vsub.f32 %v16451_v38, %v5221_v23  ;;  %v5905_v13 = vpop.xlane.xlu1 %5904  ;;  %v13681_v54 = vpop.eup %13680 }
 0x54a   :  { %11556 = vmatpush3.bf16.msra.mxu0 %v7831_v25  ;;  %13698 = vrcp.f32 %v5905_v13  ;;  %v13683_v38 = vpop.eup %13682  ;;  %v19580_v25 = vld [vmem:[#allocation69_spill] sm:$0xff] }
 0x54b   :  { %v5666_v21 = vmul.f32 1.442695, %v5393_v50  ;;  %11557 = vmatprep.subr.bf16.mxu0 %v1900_v63  ;;  %6051 = vadd.xlane.f32.xlu0 %v6050_v42  ;;  %v6340_v50 = vmul.f32 %v13681_v54, %v19580_v25  ;;  %v19581_v42 = vld [vmem:[#allocation45_spill] sm:$0xff]  ;;  %v6338_v43 = vmul.f32 %v13683_v38, %v19582_v11  ;;  %v19586_v38 = vld [vmem:[#allocation64_spill] sm:$0xff] }
 0x54c   :  { %v5908_v58 = vpop.xlane.xlu0 %5907 }
 0x54d   :  { %13700 = vpow2.f32 %v5666_v21  ;;  %v5920_v6 = vpop.xlane.xlu1 %5919  ;;  %v12760_v21 = vunpack.i.l.bf16 %v19581_v42 }
 0x54e   :  { %v17352_v57 = vpop.eup %13684  ;;  %11558 = vmatpush3.bf16.msra.mxu0 %v1900_v63  ;;  %13702 = vrcp.f32 %v5908_v58  ;;  %v12761_v63 = vunpack.i.h.bf16 %v19581_v42 }
 0x54f   :  { %19578 = vst [vmem:[#allocation122_spill] sm:$0xff] %v17352_v57  ;;  %v17356_v23 = vpop.eup %13686  ;;  %11900 = vmatprep.subr.msk.bf16.mxu0 %vm6518_vm2, %v17350_v44  ;;  %6057 = vadd.xlane.f32.xlu0 %v6056_v24  ;;  %v6074_v5 = vsel %vm4831_vm1, %v17352_v57, 0.0  ;;  %13704 = vrcp.f32 %v5920_v6 }
 0x550   :  { %19579 = vst [vmem:[#allocation123_spill] sm:$0xff] %v17356_v23  ;;  %v13689_v0 = vpop.eup %13688  ;;  %v5914_v13 = vpop.xlane.xlu0 %5913  ;;  %6075 = vadd.xlane.f32.xlu1 %v6074_v5  ;;  %v6071_v57 = vsel %vm4831_vm1, %v17356_v23, 0.0  ;;  %v6461_v5 = vpack.c.bf16 %v6340_v50, %v6340_v50 }
 0x551   :  { %v5224_v58 = vpop.xlane.xlu1 %5223  ;;  %v6339_v4 = vmul.f32 %v13689_v0, %v19583_v9  ;;  %v17367_v37 = vpop.eup %13690  ;;  %13706 = vrcp.f32 %v5914_v13  ;;  %v12780_v0 = vunpack.i.l.bf16 %v19586_v38 }
 0x552   :  { %19584 = vst [vmem:[#allocation119_spill] sm:$0xff] %v17367_v37  ;;  %v5394_v24 = vsub.f32 %v16494_v53, %v5224_v58  ;;  %v1902_v53 = vpack.c.bf16 %v12761_v63, %v12760_v21 }
 0x553   :  { %v17372_v39 = vpop.eup %13692  ;;  %v6460_v54 = vpack.c.bf16 %v6339_v4, %v6338_v43  ;;  %6072 = vadd.xlane.f32.xlu0 %v6071_v57  ;;  %v7888_v43 = vsel %vm6518_vm2, %v17305_v41, 0  ;;  %v6080_v4 = vsel %vm4831_vm1, %v17367_v37, 0.0  ;;  %v17394_v41 = vpack.c.bf16 %v12780_v0, %v12780_v0 }
 0x554   :  { %19585 = vst [vmem:[#allocation126_spill] sm:$0xff] %v17372_v39  ;;  %v5668_v25 = vmul.f32 1.442695, %v5394_v24  ;;  %v17374_v42 = vpop.xlane.xlu0 %5235  ;;  %v6077_v11 = vsel %vm4831_vm1, %v17372_v39, 0.0  ;;  %v17380_v58 = vpop.f32.mrf.mxu1  ;;  %v12770_v39 = vunpack.i.l.bf16 %v19576_v30 }
 0x555   :  { %11551 = vmatprep.mubr.msk.bf16.mxu1 %vm4831_vm1, %v6460_v54  ;;  %v5917_v9 = vpop.xlane.xlu1 %5916  ;;  %6078 = vadd.xlane.f32.xlu1 %v6077_v11  ;;  %19587 = vst [vmem:[#allocation148_spill] sm:$0xff] %v17380_v58  ;;  %v17387_v6 = vpop.eup %13694 }
 0x556   :  { %13708 = vpow2.f32 %v5668_v25  ;;  %11552 = vmatmul.mubr.msk.bf16.vlgmr.msra.gmra.mxu1 %vm4831_vm1, %v6461_v5  ;;  %19588 = vst [vmem:[#allocation152_spill] sm:$0xff] %v17387_v6  ;;  %v13697_v57 = vpop.eup %13696  ;;  %v17389_v50 = vpop.f32.mrf.mxu1  ;;  %v6068_v11 = vsel %vm4831_vm1, %v17387_v6, 0.0 }
 0x557   :  { %11564 = vmatpush3.bf16.msra.mxu1 %v7888_v43  ;;  %13710 = vrcp.f32 %v5917_v9  ;;  %6081 = vadd.xlane.f32.xlu0 %v6080_v4  ;;  %19589 = vst [vmem:[#allocation154_spill] sm:$0xff] %v17389_v50  ;;  %v13699_v63 = vpop.eup %13698  ;;  %v19591_v43 = vld [vmem:[#allocation120_spill] sm:$0xff] }
 0x558   :  { %11565 = vmatprep.subr.bf16.mxu1 %v1902_v53  ;;  %v5230_v13 = vpop.xlane.xlu0 %5229  ;;  %v11426_v5 = vpop.f32.mrf.mxu1  ;;  %v6343_v4 = vmul.f32 %v13697_v57, %v19591_v43 }
 0x559   :  { %v5396_v21 = vsub.f32 %v19449_v14, %v5230_v13  ;;  %v5233_v24 = vpop.xlane.xlu1 %5232  ;;  %v19593_v13 = vld [vmem:[#allocation121_spill] sm:$0xff] }
 0x55a   :  { %v17392_v54 = vpop.eup %13700  ;;  %v5397_v25 = vsub.f32 %v16519_v3, %v5233_v24  ;;  %v17402_v14 = vpop.f32.mrf.mxu1  ;;  %v6341_v5 = vmul.f32 %v13699_v63, %v19593_v13  ;;  %v12766_v24 = vunpack.i.h.bf16 %v19568_v32  ;;  %v19594_v63 = vld [vmem:[#allocation78_spill] sm:$0xff] }
 0x55b   :  { %19590 = vst [vmem:[#allocation135_spill] sm:$0xff] %v17392_v54  ;;  %v13703_v9 = vpop.eup %13702  ;;  %11566 = vmatpush3.bf16.msra.mxu1 %v1902_v53  ;;  %v5672_v37 = vmul.f32 1.442695, %v5396_v21  ;;  %6069 = vadd.xlane.f32.xlu0 %v6068_v11  ;;  %19592 = vst [vmem:[#allocation74_spill] sm:$0xff] %v17402_v14  ;;  %v6463_v11 = vpack.c.bf16 %v6343_v4, %v6343_v4  ;;  %v12786_v30 = vunpack.i.h.bf16 %v19594_v63  ;;  %v12785_v6 = vunpack.i.l.bf16 %v19594_v63 }
 0x55c   :  { %v5674_v23 = vmul.f32 1.442695, %v5397_v25  ;;  %11901 = vmatprep.subr.msk.bf16.mxu1 %vm6518_vm2, %v17394_v41  ;;  %v5929_v0 = vpop.xlane.xlu0 %5928  ;;  %v6342_v3 = vmul.f32 %v13703_v9, %v16750_v55  ;;  %v6083_v25 = vsel %vm4831_vm1, %v17392_v54, 0.0  ;;  %v13705_v32 = vpop.eup %13704  ;;  %v1904_v43 = vpack.c.bf16 %v12770_v39, %v12766_v24  ;;  %v19600_v54 = vld [vmem:[#allocation32_spill] sm:$0xff] }
 0x55d   :  { %13712 = vpow2.f32 %v5672_v37  ;;  %v5926_v57 = vpop.xlane.xlu1 %5925  ;;  %v7945_v37 = vsel %vm6518_vm2, %v17350_v44, 0  ;;  %v12776_v8 = vunpack.i.h.bf16 %v19600_v54 }
 0x55e   :  { %13714 = vpow2.f32 %v5674_v23  ;;  %v6462_v21 = vpack.c.bf16 %v6342_v3, %v6341_v5  ;;  %v13707_v4 = vpop.eup %13706  ;;  %v6346_v3 = vmul.f32 %v13705_v32, %v16742_v28  ;;  %v12775_v28 = vunpack.i.l.bf16 %v19600_v54 }
 0x55f   :  { %13716 = vrcp.f32 %v5929_v0  ;;  %6084 = vadd.xlane.f32.xlu0 %v6083_v25  ;;  %v1909_v25 = vpack.c.bf16 %v12786_v30, %v12786_v30  ;;  %v8002_v54 = vsel %vm6518_vm2, %v17394_v41, 0 }
 0x560   :  { %13718 = vrcp.f32 %v5926_v57  ;;  %11559 = vmatprep.mubr.msk.bf16.mxu0 %vm4831_vm1, %v6462_v21  ;;  %v5923_v55 = vpop.xlane.xlu0 %5922  ;;  %v17419_v9 = vpop.f32.mrf.mxu0 }
 0x561   :  { %11560 = vmatmul.mubr.msk.bf16.vlgmr.msra.gmra.mxu0 %vm4831_vm1, %v6463_v11  ;;  %13720 = vrcp.f32 %v5923_v55  ;;  %v17417_v23 = vpop.xlane.xlu1 %5931  ;;  %19595 = vst [vmem:[#allocation128_spill] sm:$0xff] %v17419_v9  ;;  %v19598_v11 = vld [vmem:[#allocation158_spill] sm:$0xff]  ;;  %v8059_v63 = vsel %vm6518_vm2, %v1909_v25, 0 }
 0x562   :  { %11572 = vmatpush3.bf16.msra.mxu0 %v7945_v37  ;;  %v17423_v13 = vpop.f32.mrf.mxu0  ;;  %v6344_v55 = vmul.f32 %v13707_v4, %v19598_v11  ;;  %v19599_v37 = vld [vmem:[#allocation162_spill] sm:$0xff] }
 0x563   :  { %v17421_v0 = vpop.eup %13708  ;;  %11573 = vmatprep.subr.bf16.mxu0 %v1904_v43  ;;  %19597 = vst [vmem:[#allocation25_spill] sm:$0xff] %v17423_v13 }
 0x564   :  { %19596 = vst [vmem:[#allocation132_spill] sm:$0xff] %v17421_v0  ;;  %v13711_v5 = vpop.eup %13710  ;;  %v17428_v44 = vpop.xlane.xlu0 %5244  ;;  %v6086_v21 = vsel %vm4831_vm1, %v17421_v0, 0.0  ;;  %v6465_v0 = vpack.c.bf16 %v6346_v3, %v6346_v3 }
 0x565   :  { %v17432_v39 = vpop.xlane.xlu1 %5241  ;;  %v11434_v24 = vpop.f32.mrf.mxu0  ;;  %6087 = vadd.xlane.f32.xlu1 %v6086_v21  ;;  %v6345_v53 = vmul.f32 %v13711_v5, %v19599_v37  ;;  %v19603_v21 = vld [vmem:[#allocation49_spill] sm:$0xff] }
 0x566   :  { %11574 = vmatpush3.bf16.msra.mxu0 %v1904_v43  ;;  %v12795_v11 = vunpack.i.l.bf16 %v19603_v21  ;;  %v1906_v43 = vpack.c.bf16 %v12776_v8, %v12775_v28  ;;  %v19607_v28 = vld [vmem:[#allocation100_spill] sm:$0xff] }
 0x567   :  { %11902 = vmatprep.subr.msk.bf16.mxu0 %vm6518_vm2, %v1909_v25  ;;  %v17439_v32 = vpop.f32.mrf.mxu0  ;;  %v6464_v57 = vpack.c.bf16 %v6345_v53, %v6344_v55 }
 0x568   :  { %19601 = vst [vmem:[#allocation131_spill] sm:$0xff] %v17439_v32  ;;  %v5938_v24 = vpop.xlane.xlu0 %5937  ;;  %v17458_v13 = vpack.c.bf16 %v12795_v11, %v12795_v11 }
 0x569   :  { %11567 = vmatprep.mubr.msk.bf16.mxu1 %vm4831_vm1, %v6464_v57  ;;  %v17444_v4 = vpop.xlane.xlu1 %5250  ;;  %13722 = vrcp.f32 %v5938_v24 }
 0x56a   :  { %v17446_v5 = vpop.eup %13712  ;;  %11568 = vmatmul.mubr.msk.bf16.vlgmr.msra.gmra.mxu1 %vm4831_vm1, %v6465_v0  ;;  %v19605_v0 = vld [vmem:[#allocation86_spill] sm:$0xff]  ;;  %13724 = vrcp.f32 %v17417_v23 }
 0x56b   :  { %19602 = vst [vmem:[#allocation134_spill] sm:$0xff] %v17446_v5  ;;  %v17452_v53 = vpop.eup %13714  ;;  %11580 = vmatpush3.bf16.msra.mxu1 %v8002_v54  ;;  %v6092_v3 = vsel %vm4831_vm1, %v17446_v5, 0.0  ;;  %v19608_v5 = vld [vmem:[#allocation57_spill] sm:$0xff] }
 0x56c   :  { %19604 = vst [vmem:[#allocation29_spill] sm:$0xff] %v17452_v53  ;;  %v13717_v55 = vpop.eup %13716  ;;  %11581 = vmatprep.subr.bf16.mxu1 %v1906_v43  ;;  %v17456_v57 = vpop.xlane.xlu0 %5238  ;;  %6093 = vadd.xlane.f32.xlu1 %v6092_v3  ;;  %v6095_v8 = vsel %vm4831_vm1, %v17452_v53, 0.0 }
 0x56d   :  { %v13719_v37 = vpop.eup %13718  ;;  %v5947_v30 = vpop.xlane.xlu1 %5946  ;;  %v6349_v32 = vmul.f32 %v13717_v55, %v19605_v0 }
 0x56e   :  { %v13721_v58 = vpop.eup %13720  ;;  %v17461_v41 = vpop.f32.mrf.mxu1  ;;  %v6348_v9 = vmul.f32 %v13719_v37, %v19608_v5 }
 0x56f   :  { %19606 = vst [vmem:[#allocation50_spill] sm:$0xff] %v17461_v41  ;;  %11582 = vmatpush3.bf16.msra.mxu1 %v1906_v43  ;;  %v6347_v54 = vmul.f32 %v13721_v58, %v19607_v28  ;;  %v12781_v43 = vunpack.i.h.bf16 %v19586_v38  ;;  %v6467_v50 = vpack.c.bf16 %v6349_v32, %v6349_v32  ;;  %v19610_v58 = vld [vmem:[#allocation97_spill] sm:$0xff]  ;;  %v19612_v32 = vld [vmem:[#allocation26_spill] sm:$0xff] }
 0x570   :  { %11903 = vmatprep.subr.msk.bf16.mxu1 %vm6518_vm2, %v17458_v13  ;;  %v17470_v3 = vpop.f32.mrf.mxu1  ;;  %v17472_v11 = vpop.xlane.xlu0 %5253  ;;  %6096 = vadd.xlane.f32.xlu1 %v6095_v8  ;;  %v12801_v5 = vunpack.i.h.bf16 %v19610_v58  ;;  %v19613_v8 = vld [vmem:[#allocation167_spill] sm:$0xff]  ;;  %v19620_v41 = vld [vmem:[#allocation90_spill] sm:$0xff] }
 0x571   :  { %19609 = vst [vmem:[#allocation38_spill] sm:$0xff] %v17470_v3  ;;  %v5941_v55 = vpop.xlane.xlu1 %5940  ;;  %v6466_v0 = vpack.c.bf16 %v6348_v9, %v6347_v54  ;;  %v1908_v14 = vpack.c.bf16 %v12785_v6, %v12781_v43 }
 0x572   :  { %v11442_v53 = vpop.f32.mrf.mxu1 }
 0x573   :  { %11575 = vmatprep.mubr.msk.bf16.mxu0 %vm4831_vm1, %v6466_v0  ;;  %v17489_v53 = vpack.c.bf16 %v12801_v5, %v12801_v5 }
 0x574   :  { %v17477_v37 = vpop.f32.mrf.mxu1  ;;  %11576 = vmatmul.mubr.msk.bf16.vlgmr.msra.gmra.mxu0 %vm4831_vm1, %v6467_v50  ;;  %v17481_v28 = vpop.xlane.xlu0 %5247  ;;  %v5395_v50 = vsub.f32 %v19613_v8, %v17322_v16 }
 0x575   :  { %19611 = vst [vmem:[#allocation157_spill] sm:$0xff] %v17477_v37  ;;  %11588 = vmatpush3.bf16.msra.mxu0 %v8059_v63  ;;  %v17485_v38 = vpop.xlane.xlu1 %5262  ;;  %12863 = vrot.lane.b32.xlu0 %v19612_v32, %s14015_s27 }
 0x576   :  { %11589 = vmatprep.subr.bf16.mxu0 %v1908_v14  ;;  %v5670_v43 = vmul.f32 1.442695, %v5395_v50  ;;  %v13723_v5 = vpop.eup %13722 }
 0x578   :  { %v5935_v25 = vpop.xlane.xlu0 %5934  ;;  %v17494_v6 = vpop.f32.mrf.mxu0 }
 0x579   :  { %11590 = vmatpush3.bf16.msra.mxu0 %v1908_v14  ;;  %19614 = vst [vmem:[#allocation36_spill] sm:$0xff] %v17494_v6  ;;  %v17496_v54 = vpop.xlane.xlu1 %5256  ;;  %13726 = vrcp.f32 %v5935_v25  ;;  %v19616_v14 = vld [vmem:[#allocation43_spill] sm:$0xff]  ;;  %v6352_v25 = vmul.f32 %v13723_v5, %v16867_v59  ;;  %v5399_v59 = vsub.f32 %v16521_v40, %v17456_v57  ;;  %v8116_v40 = vsel %vm6518_vm2, %v17458_v13, 0 }
 0x57a   :  { %11904 = vmatprep.subr.msk.bf16.mxu0 %vm6518_vm2, %v17489_v53  ;;  %v17500_v0 = vpop.f32.mrf.mxu0  ;;  %13728 = vrcp.f32 %v5947_v30  ;;  %v5398_v23 = vsub.f32 %v19616_v14, %v17374_v42 }
 0x57b   :  { %19615 = vst [vmem:[#allocation60_spill] sm:$0xff] %v17500_v0  ;;  %13730 = vrcp.f32 %v5941_v55  ;;  %v13725_v55 = vpop.eup %13724  ;;  %v6469_v37 = vpack.c.bf16 %v6352_v25, %v6352_v25 }
 0x57c   :  { %v5956_v16 = vpop.xlane.xlu0 %5955  ;;  %v11450_v24 = vpop.f32.mrf.mxu0  ;;  %13732 = vpow2.f32 %v5670_v43 }
 0x57d   :  { %v5953_v63 = vpop.xlane.xlu1 %5952  ;;  %v5676_v24 = vmul.f32 1.442695, %v5398_v23  ;;  %v19621_v23 = vld [vmem:[#allocation115_spill] sm:$0xff] }
 0x57e   :  { %v17506_v8 = vpop.f32.mrf.mxu0  ;;  %v12791_v0 = vunpack.i.h.bf16 %v19621_v23 }
 0x57f   :  { %19617 = vst [vmem:[#allocation137_spill] sm:$0xff] %v17506_v8 }
 0x580   :  { %v5944_v9 = vpop.xlane.xlu0 %5943 }
 0x581   :  { %13734 = vrcp.f32 %v5944_v9  ;;  %v5965_v50 = vpop.xlane.xlu1 %5964  ;;  %12868 = vrot.lane.b32.xlu1 %v19618_v26, %s14015_s27 }
 0x582   :  { %13736 = vrcp.f32 %v5956_v16  ;;  %v6350_v16 = vmul.f32 %v13725_v55, %v19620_v41  ;;  %v12796_v41 = vunpack.i.h.bf16 %v19603_v21  ;;  %v5678_v55 = vmul.f32 1.442695, %v5399_v59  ;;  %v19625_v59 = vld [vmem:[#allocation93_spill] sm:$0xff] }
 0x583   :  { %13738 = vrcp.f32 %v5953_v63 }
 0x584   :  { %v5950_v30 = vpop.xlane.xlu0 %5949  ;;  %v17512_v14 = vpop.f32.mrf.mxu1 }
 0x585   :  { %13740 = vrcp.f32 %v5950_v30  ;;  %v5959_v42 = vpop.xlane.xlu1 %5958  ;;  %v12790_v30 = vunpack.i.l.bf16 %v19621_v23 }
 0x586   :  { %13742 = vpow2.f32 %v5676_v24  ;;  %v13727_v43 = vpop.eup %13726  ;;  %v17515_v8 = vpop.f32.mrf.mxu1 }
 0x587   :  { %19619 = vst [vmem:[#allocation79_spill] sm:$0xff] %v17515_v8  ;;  %v6351_v63 = vmul.f32 %v13727_v43, %v16938_v36  ;;  %v13729_v49 = vpop.eup %13728  ;;  %v12800_v36 = vunpack.i.l.bf16 %v19610_v58  ;;  %v19623_v43 = vld [vmem:[#allocation33_spill] sm:$0xff]  ;;  %13744 = vrcp.f32 %v5965_v50  ;;  %v1910_v57 = vpack.c.bf16 %v12791_v0, %v12790_v30 }
 0x588   :  { %v17517_v9 = vpop.xlane.xlu0 %5259  ;;  %v11458_v20 = vpop.f32.mrf.mxu1  ;;  %v6355_v58 = vmul.f32 %v13729_v49, %v16888_v27  ;;  %13746 = vrcp.f32 %v5959_v42 }
 0x589   :  { %v5971_v6 = vpop.xlane.xlu1 %5970  ;;  %v6468_v3 = vpack.c.bf16 %v6351_v63, %v6350_v16  ;;  %v13731_v24 = vpop.eup %13730  ;;  %v12810_v16 = vunpack.i.l.bf16 %v19623_v43  ;;  %v1912_v13 = vpack.c.bf16 %v12800_v36, %v12796_v41  ;;  %v12806_v41 = vunpack.i.h.bf16 %v19625_v59  ;;  %v19626_v36 = vld [vmem:[#allocation46_spill] sm:$0xff] }
 0x58a   :  { %v17525_v5 = vpop.f32.mrf.mxu1  ;;  %v17527_v51 = vpop.eup %13732  ;;  %v6353_v63 = vmul.f32 %v13731_v24, %v16909_v1  ;;  %v6471_v49 = vpack.c.bf16 %v6355_v58, %v6355_v58 }
 0x58b   :  { %19622 = vst [vmem:[#allocation65_spill] sm:$0xff] %v17525_v5  ;;  %11583 = vmatprep.mubr.msk.bf16.mxu1 %vm4831_vm1, %v6468_v3  ;;  %v1915_v30 = vpack.c.bf16 %v12810_v16, %v12810_v16  ;;  %v6089_v1 = vsel %vm4831_vm1, %v17527_v51, 0.0 }
 0x58c   :  { %v5974_v60 = vpop.xlane.xlu0 %5973  ;;  %11584 = vmatmul.mubr.msk.bf16.vlgmr.msra.gmra.mxu1 %vm4831_vm1, %v6469_v37 }
 0x58d   :  { %v17534_v20 = vpop.xlane.xlu1 %5982  ;;  %11596 = vmatpush3.bf16.msra.mxu1 %v8116_v40 }
 0x58e   :  { %v13735_v25 = vpop.eup %13734  ;;  %11597 = vmatprep.subr.bf16.mxu1 %v1910_v57 }
 0x58f   :  { %v13737_v21 = vpop.eup %13736  ;;  %v6354_v3 = vmul.f32 %v13735_v25, %v16977_v15 }
 0x590   :  { %v13739_v23 = vpop.eup %13738  ;;  %v5962_v8 = vpop.xlane.xlu0 %5961  ;;  %v6358_v27 = vmul.f32 %v13737_v21, %v16944_v52  ;;  %v12805_v52 = vunpack.i.l.bf16 %v19625_v59  ;;  %v19627_v21 = vld [vmem:[#allocation63_spill] sm:$0xff] }
 0x591   :  { %13748 = vrcp.f32 %v5962_v8  ;;  %v17543_v50 = vpop.f32.mrf.mxu0  ;;  %v5977_v37 = vpop.xlane.xlu1 %5976  ;;  %v6470_v5 = vpack.c.bf16 %v6354_v3, %v6353_v63  ;;  %11598 = vmatpush3.bf16.msra.mxu1 %v1910_v57  ;;  %v6357_v42 = vmul.f32 %v13739_v23, %v16958_v56  ;;  %v8173_v56 = vsel %vm6518_vm2, %v17489_v53, 0 }
 0x592   :  { %v13741_v0 = vpop.eup %13740  ;;  %13750 = vrcp.f32 %v5974_v60  ;;  %11905 = vmatprep.subr.msk.bf16.mxu1 %vm6518_vm2, %v1915_v30  ;;  %v6473_v40 = vpack.c.bf16 %v6358_v27, %v6358_v27  ;;  %v12825_v58 = vunpack.i.l.bf16 %v19627_v21  ;;  %v8230_v53 = vsel %vm6518_vm2, %v1915_v30, 0 }
 0x593   :  { %13752 = vrcp.f32 %v5971_v6  ;;  %v17548_v15 = vpop.f32.mrf.mxu0  ;;  %11591 = vmatprep.mubr.msk.bf16.mxu0 %vm4831_vm1, %v6470_v5  ;;  %v6356_v8 = vmul.f32 %v13741_v0, %v16991_v33  ;;  %v17553_v24 = vpop.eup %13742  ;;  %v12816_v5 = vunpack.i.h.bf16 %v19626_v36  ;;  %v1914_v23 = vpack.c.bf16 %v12806_v41, %v12805_v52 }
 0x594   :  { %19624 = vst [vmem:[#allocation35_spill] sm:$0xff] %v17553_v24  ;;  %13754 = vpow2.f32 %v5678_v55  ;;  %6090 = vadd.xlane.f32.xlu0 %v6089_v1  ;;  %v5968_v6 = vpop.xlane.xlu0 %5967  ;;  %11592 = vmatmul.mubr.msk.bf16.vlgmr.msra.gmra.mxu0 %vm4831_vm1, %v6471_v49  ;;  %v6098_v57 = vsel %vm4831_vm1, %v17553_v24, 0.0  ;;  %v13745_v1 = vpop.eup %13744 }
 0x595   :  { %13756 = vrcp.f32 %v5968_v6  ;;  %v11466_v33 = vpop.f32.mrf.mxu0  ;;  %v5989_v25 = vpop.xlane.xlu1 %5988  ;;  %v6472_v16 = vpack.c.bf16 %v6357_v42, %v6356_v8  ;;  %11604 = vmatpush3.bf16.msra.mxu0 %v8173_v56  ;;  %v1917_v0 = vpack.c.bf16 %v12816_v5, %v12816_v5  ;;  %v1919_v8 = vpack.c.bf16 %v12825_v58, %v12825_v58 }
 0x596   :  { %11605 = vmatprep.subr.bf16.mxu0 %v1912_v13  ;;  %13758 = vrcp.f32 %v17534_v20  ;;  %v13747_v49 = vpop.eup %13746  ;;  %v6361_v30 = vmul.f32 %v13745_v1, %v16981_v17  ;;  %v12815_v5 = vunpack.i.l.bf16 %v19626_v36  ;;  %v12811_v58 = vunpack.i.h.bf16 %v19623_v43  ;;  %v19630_v1 = vld [vmem:[#allocation139_spill] sm:$0xff] }
 0x597   :  { %v17564_v55 = vpop.f32.mrf.mxu0  ;;  %11599 = vmatprep.mubr.msk.bf16.mxu1 %vm4831_vm1, %v6472_v16  ;;  %13760 = vrcp.f32 %v5977_v37  ;;  %v6359_v37 = vmul.f32 %v13747_v49, %v16998_v19 }
 0x598   :  { %6099 = vadd.xlane.f32.xlu0 %v6098_v57  ;;  %v5992_v3 = vpop.xlane.xlu0 %5991  ;;  %11600 = vmatmul.mubr.msk.bf16.vlgmr.msra.gmra.mxu1 %vm4831_vm1, %v6473_v40 }
 0x599   :  { %11612 = vmatpush3.bf16.msra.mxu1 %v8230_v53  ;;  %v6001_v27 = vpop.xlane.xlu1 %6000  ;;  %11606 = vmatpush3.bf16.msra.mxu0 %v1912_v13  ;;  %v19629_v53 = vld [vmem:[#allocation77_spill] sm:$0xff] }
 0x59a   :  { %11613 = vmatprep.subr.bf16.mxu1 %v1914_v23  ;;  %11906 = vmatprep.subr.msk.bf16.mxu0 %vm6518_vm2, %v1917_v0 }
 0x59c   :  { %v5980_v42 = vpop.xlane.xlu0 %5979  ;;  %v17577_v41 = vpop.f32.mrf.mxu1 }
 0x59d   :  { %13762 = vrcp.f32 %v5980_v42  ;;  %11614 = vmatpush3.bf16.msra.mxu1 %v1914_v23  ;;  %v5995_v59 = vpop.xlane.xlu1 %5994  ;;  %v12820_v23 = vunpack.i.l.bf16 %v19629_v53  ;;  %v19631_v42 = vld [vmem:[#allocation34_spill] sm:$0xff] }
 0x59e   :  { %v13749_v6 = vpop.eup %13748  ;;  %13764 = vrcp.f32 %v5992_v3  ;;  %11907 = vmatprep.subr.msk.bf16.mxu1 %vm6518_vm2, %v1919_v8  ;;  %v17583_v33 = vpop.f32.mrf.mxu1  ;;  %v6475_v3 = vpack.c.bf16 %v6361_v30, %v6361_v30  ;;  %v1916_v30 = vpack.c.bf16 %v12815_v5, %v12811_v58  ;;  %v8344_v5 = vsel %vm6518_vm2, %v1919_v8, 0 }
 0x59f   :  { %v13751_v20 = vpop.eup %13750  ;;  %13766 = vrcp.f32 %v5989_v25  ;;  %v6360_v13 = vmul.f32 %v13749_v6, %v17052_v45  ;;  %v12821_v45 = vunpack.i.h.bf16 %v19629_v53  ;;  %v12831_v6 = vunpack.i.h.bf16 %v19631_v42 }
 0x5a0   :  { %v13753_v52 = vpop.eup %13752  ;;  %v5986_v56 = vpop.xlane.xlu0 %5985  ;;  %v6364_v25 = vmul.f32 %v13751_v20, %v17031_v62  ;;  %v8287_v62 = vsel %vm6518_vm2, %v1917_v0, 0 }
 0x5a1   :  { %v17585_v16 = vpop.eup %13754  ;;  %13768 = vrcp.f32 %v5986_v56  ;;  %v6007_v17 = vpop.xlane.xlu1 %6006  ;;  %v6474_v40 = vpack.c.bf16 %v6360_v13, %v6359_v37  ;;  %v6363_v49 = vmul.f32 %v13753_v52, %v19630_v1  ;;  %v1921_v0 = vpack.c.bf16 %v12831_v6, %v12831_v6 }
 0x5a2   :  { %19628 = vst [vmem:[#allocation70_spill] sm:$0xff] %v17585_v16  ;;  %v13757_v57 = vpop.eup %13756  ;;  %v11474_v19 = vpop.f32.mrf.mxu1  ;;  %v6101_v43 = vsel %vm4831_vm1, %v17585_v16, 0.0  ;;  %v6477_v56 = vpack.c.bf16 %v6364_v25, %v6364_v25  ;;  %13770 = vrcp.f32 %v6001_v27  ;;  %v1918_v58 = vpack.c.bf16 %v12821_v45, %v12820_v23  ;;  %v19634_v45 = vld [vmem:[#allocation85_spill] sm:$0xff] }
 0x5a3   :  { %11607 = vmatprep.mubr.msk.bf16.mxu0 %vm4831_vm1, %v6474_v40  ;;  %v6362_v36 = vmul.f32 %v13757_v57, %v17046_v46  ;;  %v13759_v40 = vpop.eup %13758  ;;  %13772 = vrcp.f32 %v5995_v59  ;;  %v12826_v59 = vunpack.i.h.bf16 %v19627_v21 }
 0x5a4   :  { %v17595_v37 = vpop.f32.mrf.mxu1  ;;  %v6010_v13 = vpop.xlane.xlu0 %6009  ;;  %11608 = vmatmul.mubr.msk.bf16.vlgmr.msra.gmra.mxu0 %vm4831_vm1, %v6475_v3  ;;  %v19632_v3 = vld [vmem:[#allocation66_spill] sm:$0xff] }
 0x5a5   :  { %11620 = vmatpush3.bf16.msra.mxu0 %v8287_v62  ;;  %v6019_v46 = vpop.xlane.xlu1 %6018  ;;  %6102 = vadd.xlane.f32.xlu1 %v6101_v43  ;;  %v6476_v52 = vpack.c.bf16 %v6363_v49, %v6362_v36  ;;  %v13761_v57 = vpop.eup %13760  ;;  %v12835_v19 = vunpack.i.l.bf16 %v19632_v3  ;;  %v19633_v36 = vld [vmem:[#allocation111_spill] sm:$0xff]  ;;  %v12830_v62 = vunpack.i.l.bf16 %v19631_v42 }
 0x5a6   :  { %11621 = vmatprep.subr.bf16.mxu0 %v1916_v30  ;;  %v6367_v49 = vmul.f32 %v13759_v40, %v19633_v36  ;;  %v6365_v23 = vmul.f32 %v13761_v57, %v19634_v45  ;;  %v19635_v57 = vld [vmem:[#allocation14_spill] sm:$0xff] }
 0x5a7   :  { %11615 = vmatprep.mubr.msk.bf16.mxu1 %vm4831_vm1, %v6476_v52  ;;  %v1923_v52 = vpack.c.bf16 %v12835_v19, %v12835_v19  ;;  %v1920_v36 = vpack.c.bf16 %v12830_v62, %v12826_v59 }
 0x5a8   :  { %v5998_v53 = vpop.xlane.xlu0 %5997  ;;  %11616 = vmatmul.mubr.msk.bf16.vlgmr.msra.gmra.mxu1 %vm4831_vm1, %v6477_v56  ;;  %v17607_v1 = vpop.f32.mrf.mxu0 }
 0x5a9   :  { %13774 = vrcp.f32 %v5998_v53  ;;  %11622 = vmatpush3.bf16.msra.mxu0 %v1916_v30  ;;  %11628 = vmatpush3.bf16.msra.mxu1 %v8344_v5  ;;  %v6013_v27 = vpop.xlane.xlu1 %6012  ;;  %v6479_v5 = vpack.c.bf16 %v6367_v49, %v6367_v49  ;;  %v12836_v49 = vunpack.i.h.bf16 %v19632_v3  ;;  %v19637_v3 = vld [vmem:[#allocation116_spill] sm:$0xff] }
 0x5aa   :  { %v13763_v25 = vpop.eup %13762  ;;  %13776 = vrcp.f32 %v6010_v13  ;;  %11629 = vmatprep.subr.bf16.mxu1 %v1918_v58  ;;  %11908 = vmatprep.subr.msk.bf16.mxu0 %vm6518_vm2, %v1921_v0  ;;  %v17613_v8 = vpop.f32.mrf.mxu0  ;;  %v12845_v62 = vunpack.i.l.bf16 %v19637_v3 }
 0x5ab   :  { %v13765_v6 = vpop.eup %13764  ;;  %13778 = vrcp.f32 %v6007_v17  ;;  %v6366_v43 = vmul.f32 %v13763_v25, %v17101_v2  ;;  %v19636_v2 = vld [vmem:[#allocation80_spill] sm:$0xff] }
 0x5ac   :  { %v13767_v30 = vpop.eup %13766  ;;  %v6004_v56 = vpop.xlane.xlu0 %6003  ;;  %v6370_v17 = vmul.f32 %v13765_v6, %v17087_v31  ;;  %v12841_v19 = vunpack.i.h.bf16 %v19636_v2  ;;  %v12840_v31 = vunpack.i.l.bf16 %v19636_v2 }
 0x5ad   :  { %13780 = vrcp.f32 %v6004_v56  ;;  %v11482_v13 = vpop.f32.mrf.mxu0  ;;  %11630 = vmatpush3.bf16.msra.mxu1 %v1918_v58  ;;  %v6478_v40 = vpack.c.bf16 %v6366_v43, %v6365_v23  ;;  %v6025_v42 = vpop.xlane.xlu1 %6024  ;;  %v6369_v45 = vmul.f32 %v13767_v30, %v17068_v22  ;;  %v8401_v43 = vsel %vm6518_vm2, %v1921_v0, 0  ;;  %v19638_v30 = vld [vmem:[#allocation176_spill] sm:$0xff] }
 0x5ae   :  { %v13769_v53 = vpop.eup %13768  ;;  %11909 = vmatprep.subr.msk.bf16.mxu1 %vm6518_vm2, %v1923_v52  ;;  %12873 = vrot.lane.b32.xlu0 %v19635_v57, %s14016_s28  ;;  %v6481_v13 = vpack.c.bf16 %v6370_v17, %v6370_v17  ;;  %13782 = vrcp.f32 %v6019_v46  ;;  %v1925_v59 = vpack.c.bf16 %v12841_v19, %v12841_v19  ;;  %v8458_v0 = vsel %vm6518_vm2, %v1923_v52, 0  ;;  %v19639_v17 = vld [vmem:[#allocation22_spill] sm:$0xff]  ;;  %v19642_v52 = vld [vmem:[#allocation71_spill] sm:$0xff] }
 0x5af   :  { %v17624_v25 = vpop.f32.mrf.mxu0  ;;  %11623 = vmatprep.mubr.msk.bf16.mxu0 %vm4831_vm1, %v6478_v40  ;;  %v6368_v58 = vmul.f32 %v13769_v53, %v17118_v29  ;;  %v13771_v29 = vpop.eup %13770  ;;  %13784 = vrcp.f32 %v6013_v27  ;;  %v5400_v40 = vsub.f32 %v19638_v30, %v17432_v39  ;;  %v1922_v46 = vpack.c.bf16 %v12840_v31, %v12836_v49 }
 0x5b0   :  { %v6028_v23 = vpop.xlane.xlu0 %6027  ;;  %11624 = vmatmul.mubr.msk.bf16.vlgmr.msra.gmra.mxu0 %vm4831_vm1, %v6479_v5  ;;  %v13773_v22 = vpop.eup %13772  ;;  %v6373_v2 = vmul.f32 %v13771_v29, %v19639_v17 }
 0x5b1   :  { %11636 = vmatpush3.bf16.msra.mxu0 %v8401_v43  ;;  %v6480_v56 = vpack.c.bf16 %v6369_v45, %v6368_v58  ;;  %v17639_v53 = vpop.xlane.xlu1 %6036  ;;  %v19640_v58 = vld [vmem:[#allocation51_spill] sm:$0xff]  ;;  %v6371_v49 = vmul.f32 %v13773_v22, %v19642_v52  ;;  %v5680_v30 = vmul.f32 1.442695, %v5400_v40  ;;  %v19645_v40 = vld [vmem:[#allocation21_spill] sm:$0xff] }
 0x5b2   :  { %11637 = vmatprep.subr.bf16.mxu0 %v1920_v36  ;;  %v12851_v45 = vunpack.i.h.bf16 %v19640_v58  ;;  %v19641_v43 = vld [vmem:[#allocation103_spill] sm:$0xff]  ;;  %v6483_v60 = vpack.c.bf16 %v6373_v2, %v6373_v2  ;;  %v19646_v2 = vld [vmem:[#allocation88_spill] sm:$0xff] }
 0x5b3   :  { %11631 = vmatprep.mubr.msk.bf16.mxu1 %vm4831_vm1, %v6480_v56  ;;  %v1927_v56 = vpack.c.bf16 %v12845_v62, %v12845_v62  ;;  %v8515_v62 = vsel %vm6518_vm2, %v1925_v59, 0 }
 0x5b4   :  { %v6016_v5 = vpop.xlane.xlu0 %6015  ;;  %11632 = vmatmul.mubr.msk.bf16.vlgmr.msra.gmra.mxu1 %vm4831_vm1, %v6481_v13  ;;  %v17644_v19 = vpop.f32.mrf.mxu1  ;;  %v19643_v13 = vld [vmem:[#allocation170_spill] sm:$0xff] }
 0x5b5   :  { %13786 = vrcp.f32 %v6016_v5  ;;  %11638 = vmatpush3.bf16.msra.mxu0 %v1920_v36  ;;  %11644 = vmatpush3.bf16.msra.mxu1 %v8458_v0  ;;  %v5401_v29 = vsub.f32 %v19643_v13, %v17428_v44  ;;  %v6031_v52 = vpop.xlane.xlu1 %6030 }
 0x5b6   :  { %v13775_v27 = vpop.eup %13774  ;;  %13788 = vrcp.f32 %v6028_v23  ;;  %11645 = vmatprep.subr.bf16.mxu1 %v1922_v46  ;;  %11910 = vmatprep.subr.msk.bf16.mxu0 %vm6518_vm2, %v1925_v59  ;;  %v12850_v23 = vunpack.i.l.bf16 %v19640_v58  ;;  %v17655_v5 = vpop.f32.mrf.mxu1 }
 0x5b7   :  { %v13777_v39 = vpop.eup %13776  ;;  %13790 = vrcp.f32 %v6025_v42  ;;  %12878 = vrot.lane.b32.xlu1 %v19641_v43, %s14015_s27  ;;  %v6372_v36 = vmul.f32 %v13775_v27, %v17161_v34  ;;  %v19644_v27 = vld [vmem:[#allocation99_spill] sm:$0xff] }
 0x5b8   :  { %v13779_v31 = vpop.eup %13778  ;;  %v6022_v0 = vpop.xlane.xlu0 %6021  ;;  %v6376_v22 = vmul.f32 %v13777_v39, %v17141_v35  ;;  %v12856_v58 = vunpack.i.h.bf16 %v19644_v27  ;;  %v12855_v44 = vunpack.i.l.bf16 %v19644_v27  ;;  %v5682_v35 = vmul.f32 1.442695, %v5401_v29  ;;  %v19647_v39 = vld [vmem:[#allocation172_spill] sm:$0xff] }
 0x5b9   :  { %13792 = vrcp.f32 %v6022_v0  ;;  %11646 = vmatpush3.bf16.msra.mxu1 %v1922_v46  ;;  %v6482_v42 = vpack.c.bf16 %v6372_v36, %v6371_v49  ;;  %v11490_v34 = vpop.f32.mrf.mxu1  ;;  %v6375_v49 = vmul.f32 %v13779_v31, %v19646_v2  ;;  %v5402_v36 = vsub.f32 %v19647_v39, %v17481_v28 }
 0x5ba   :  { %v13781_v17 = vpop.eup %13780  ;;  %11911 = vmatprep.subr.msk.bf16.mxu1 %vm6518_vm2, %v1927_v56  ;;  %13794 = vpow2.f32 %v5680_v30  ;;  %v1924_v0 = vpack.c.bf16 %v12851_v45, %v12850_v23  ;;  %v12846_v34 = vunpack.i.h.bf16 %v19637_v3  ;;  %v6485_v31 = vpack.c.bf16 %v6376_v22, %v6376_v22  ;;  %v19649_v3 = vld [vmem:[#allocation106_spill] sm:$0xff] }
 0x5bb   :  { %12883 = vrot.lane.b32.xlu1 %v19645_v40, %s14016_s28  ;;  %11639 = vmatprep.mubr.msk.bf16.mxu0 %vm4831_vm1, %v6482_v42  ;;  %v6374_v46 = vmul.f32 %v13781_v17, %v17155_v48  ;;  %v17669_v13 = vpop.f32.mrf.mxu1  ;;  %v13783_v29 = vpop.eup %13782  ;;  %v1929_v30 = vpack.c.bf16 %v12856_v58, %v12856_v58  ;;  %13796 = vrcp.f32 %v6031_v52  ;;  %v8572_v28 = vsel %vm6518_vm2, %v1927_v56, 0  ;;  %v19650_v56 = vld [vmem:[#allocation138_spill] sm:$0xff] }
 0x5bc   :  { %v17671_v59 = vpop.xlane.xlu0 %6045  ;;  %11640 = vmatmul.mubr.msk.bf16.vlgmr.msra.gmra.mxu0 %vm4831_vm1, %v6483_v60  ;;  %v1926_v17 = vpack.c.bf16 %v12855_v44, %v12846_v34  ;;  %v13785_v27 = vpop.eup %13784  ;;  %v19648_v60 = vld [vmem:[#allocation94_spill] sm:$0xff]  ;;  %13798 = vpow2.f32 %v5682_v35  ;;  %v5404_v23 = vsub.f32 %v19649_v3, %v17472_v11  ;;  %v5684_v2 = vmul.f32 1.442695, %v5402_v36  ;;  %v19651_v11 = vld [vmem:[#allocation109_spill] sm:$0xff] }
 0x5bd   :  { %11652 = vmatpush3.bf16.msra.mxu0 %v8515_v62  ;;  %v6484_v48 = vpack.c.bf16 %v6375_v49, %v6374_v46  ;;  %v12860_v45 = vunpack.i.l.bf16 %v19648_v60  ;;  %v6043_v62 = vpop.xlane.xlu1 %6042  ;;  %v6379_v58 = vmul.f32 %v13783_v29, %v19650_v56  ;;  %v6377_v35 = vmul.f32 %v13785_v27, %v19651_v11  ;;  %v19653_v27 = vld [vmem:[#allocation87_spill] sm:$0xff] }
 0x5be   :  { %11653 = vmatprep.subr.bf16.mxu0 %v1924_v0  ;;  %v12861_v21 = vunpack.i.h.bf16 %v19648_v60 }
 0x5bf   :  { %11647 = vmatprep.mubr.msk.bf16.mxu1 %vm4831_vm1, %v6484_v48  ;;  %v1931_v34 = vpack.c.bf16 %v12860_v45, %v12860_v45  ;;  %v5688_v48 = vmul.f32 1.442695, %v5404_v23  ;;  %v6487_v56 = vpack.c.bf16 %v6379_v58, %v6379_v58  ;;  %v19654_v45 = vld [vmem:[#allocation17_spill] sm:$0xff] }
 0x5c0   :  { %v6034_v46 = vpop.xlane.xlu0 %6033  ;;  %11648 = vmatmul.mubr.msk.bf16.vlgmr.msra.gmra.mxu1 %vm4831_vm1, %v6485_v31  ;;  %v17683_v22 = vpop.f32.mrf.mxu0 }
 0x5c1   :  { %13800 = vrcp.f32 %v6034_v46  ;;  %11654 = vmatpush3.bf16.msra.mxu0 %v1924_v0  ;;  %11660 = vmatpush3.bf16.msra.mxu1 %v8572_v28 }
 0x5c2   :  { %v13787_v52 = vpop.eup %13786  ;;  %11661 = vmatprep.subr.bf16.mxu1 %v1926_v17  ;;  %11912 = vmatprep.subr.msk.bf16.mxu0 %vm6518_vm2, %v1929_v30  ;;  %13802 = vrcp.f32 %v6043_v62  ;;  %v17687_v49 = vpop.f32.mrf.mxu0  ;;  %v19652_v62 = vld [vmem:[#allocation124_spill] sm:$0xff] }
 0x5c3   :  { %v13789_v44 = vpop.eup %13788  ;;  %v6378_v39 = vmul.f32 %v13787_v52, %v17204_v61  ;;  %13804 = vpow2.f32 %v5684_v2  ;;  %v5403_v46 = vsub.f32 %v19652_v62, %v17444_v4  ;;  %v19655_v2 = vld [vmem:[#allocation56_spill] sm:$0xff]  ;;  %v8629_v4 = vsel %vm6518_vm2, %v1929_v30, 0 }
 0x5c4   :  { %v13791_v36 = vpop.eup %13790  ;;  %v6040_v31 = vpop.xlane.xlu0 %6039  ;;  %v6382_v11 = vmul.f32 %v13789_v44, %v19653_v27 }
 0x5c5   :  { %13806 = vrcp.f32 %v6040_v31  ;;  %v11498_v29 = vpop.f32.mrf.mxu0  ;;  %11662 = vmatpush3.bf16.msra.mxu1 %v1926_v17  ;;  %v6486_v28 = vpack.c.bf16 %v6378_v39, %v6377_v35  ;;  %v6381_v52 = vmul.f32 %v13791_v36, %v19655_v2  ;;  %v5686_v39 = vmul.f32 1.442695, %v5403_v46  ;;  %v19657_v31 = vld [vmem:[#allocation54_spill] sm:$0xff]  ;;  %v19661_v2 = vld [vmem:[#allocation141_spill] sm:$0xff] }
 0x5c6   :  { %v13793_v3 = vpop.eup %13792  ;;  %11913 = vmatprep.subr.msk.bf16.mxu1 %vm6518_vm2, %v1931_v34  ;;  %13808 = vpow2.f32 %v5688_v48  ;;  %v5406_v29 = vsub.f32 %v19657_v31, %v17517_v9  ;;  %v19659_v9 = vld [vmem:[#allocation177_spill] sm:$0xff] }
 0x5c7   :  { %v17697_v61 = vpop.f32.mrf.mxu0  ;;  %11655 = vmatprep.mubr.msk.bf16.mxu0 %vm4831_vm1, %v6486_v28  ;;  %v6380_v23 = vmul.f32 %v13793_v3, %v19654_v45  ;;  %v17708_v58 = vpop.eup %13794  ;;  %v6489_v28 = vpack.c.bf16 %v6382_v11, %v6382_v11  ;;  %v8686_v3 = vsel %vm6518_vm2, %v1931_v34, 0  ;;  %13810 = vpow2.f32 %v5686_v39  ;;  %v19660_v45 = vld [vmem:[#allocation73_spill] sm:$0xff] }
 0x5c8   :  { %v17704_v35 = vpop.xlane.xlu0 %6054  ;;  %11656 = vmatmul.mubr.msk.bf16.vlgmr.msra.gmra.mxu0 %vm4831_vm1, %v6487_v56  ;;  %19656 = vst [vmem:[#allocation161_spill] sm:$0xff] %v17708_v58  ;;  %v13797_v36 = vpop.eup %13796  ;;  %v6104_v30 = vsel %vm4831_vm1, %v17708_v58, 0.0  ;;  %v5407_v56 = vsub.f32 %v19659_v9, %v17485_v38  ;;  %v5692_v27 = vmul.f32 1.442695, %v5406_v29 }
 0x5c9   :  { %11668 = vmatpush3.bf16.msra.mxu0 %v8629_v4  ;;  %v6488_v44 = vpack.c.bf16 %v6381_v52, %v6380_v23  ;;  %v17717_v62 = vpop.eup %13798  ;;  %v6383_v23 = vmul.f32 %v13797_v36, %v19660_v45 }
 0x5ca   :  { %19658 = vst [vmem:[#allocation164_spill] sm:$0xff] %v17717_v62  ;;  %v6107_v31 = vsel %vm4831_vm1, %v17717_v62, 0.0  ;;  %v5694_v29 = vmul.f32 1.442695, %v5407_v56  ;;  %13812 = vpow2.f32 %v5692_v27 }
 0x5cb   :  { %11663 = vmatprep.mubr.msk.bf16.mxu1 %vm4831_vm1, %v6488_v44 }
 0x5cc   :  { %v6049_v48 = vpop.xlane.xlu0 %6048  ;;  %11664 = vmatmul.mubr.msk.bf16.vlgmr.msra.gmra.mxu1 %vm4831_vm1, %v6489_v28  ;;  %v17721_v11 = vpop.f32.mrf.mxu1  ;;  %13814 = vpow2.f32 %v5694_v29 }
 0x5cd   :  { %11676 = vmatpush3.bf16.msra.mxu1 %v8686_v3  ;;  %6105 = vadd.xlane.f32.xlu0 %v6104_v30  ;;  %v19663_v30 = vld [vmem:[#allocation68_spill] sm:$0xff]  ;;  %13816 = vrcp.f32 %v17639_v53  ;;  %v6061_v29 = vpop.xlane.xlu1 %6060 }
 0x5ce   :  { %v13801_v46 = vpop.eup %13800  ;;  %v17725_v4 = vpop.f32.mrf.mxu1 }
 0x5cf   :  { %v6384_v52 = vmul.f32 %v13801_v46, %v19661_v2  ;;  %v13803_v34 = vpop.eup %13802 }
 0x5d0   :  { %v17727_v44 = vpop.xlane.xlu0 %6063  ;;  %v17731_v28 = vpop.eup %13804  ;;  %v6387_v46 = vmul.f32 %v13803_v34, %v19663_v30 }
 0x5d1   :  { %19662 = vst [vmem:[#allocation58_spill] sm:$0xff] %v17731_v28  ;;  %6108 = vadd.xlane.f32.xlu0 %v6107_v31  ;;  %v6490_v39 = vpack.c.bf16 %v6384_v52, %v6383_v23  ;;  %v11506_v3 = vpop.f32.mrf.mxu1  ;;  %v6110_v45 = vsel %vm4831_vm1, %v17731_v28, 0.0  ;;  %v19670_v28 = vld [vmem:[#allocation104_spill] sm:$0xff] }
 0x5d2   :  { %v13807_v38 = vpop.eup %13806 }
 0x5d3   :  { %11671 = vmatprep.mubr.msk.bf16.mxu0 %vm4831_vm1, %v6490_v39  ;;  %v6386_v36 = vmul.f32 %v13807_v38, %v17267_v12  ;;  %v17738_v2 = vpop.eup %13808  ;;  %v17770_v53 = vpop.f32.mrf.mxu1 }
 0x5d4   :  { %v6052_v9 = vpop.xlane.xlu0 %6051  ;;  %19664 = vst [vmem:[#allocation144_spill] sm:$0xff] %v17738_v2  ;;  %v6116_v27 = vsel %vm4831_vm1, %v17738_v2, 0.0  ;;  %v17745_v12 = vpop.eup %13810 }
 0x5d5   :  { %6111 = vadd.xlane.f32.xlu0 %v6110_v45  ;;  %v6492_v0 = vpack.c.bf16 %v6387_v46, %v6386_v36  ;;  %19665 = vst [vmem:[#allocation30_spill] sm:$0xff] %v17745_v12  ;;  %13818 = vrcp.f32 %v6052_v9 }
 0x5d6   :  { %13820 = vrcp.f32 %v6049_v48 }
 0x5d7   :  { %11679 = vmatprep.mubr.msk.bf16.mxu1 %vm4831_vm1, %v6492_v0  ;;  %v6113_v0 = vsel %vm4831_vm1, %v17745_v12, 0.0  ;;  %v17755_v38 = vpop.eup %13812  ;;  %13822 = vrcp.f32 %v17671_v59 }
 0x5d8   :  { %v6058_v56 = vpop.xlane.xlu0 %6057  ;;  %v17743_v23 = vpop.f32.mrf.mxu0  ;;  %19666 = vst [vmem:[#allocation48_spill] sm:$0xff] %v17755_v38  ;;  %v6122_v46 = vsel %vm4831_vm1, %v17755_v38, 0.0 }
 0x5d9   :  { %6117 = vadd.xlane.f32.xlu0 %v6116_v27  ;;  %v17766_v45 = vpop.eup %13814  ;;  %v17768_v27 = vpop.xlane.xlu1 %6066  ;;  %13824 = vrcp.f32 %v6058_v56 }
 0x5da   :  { %v17747_v52 = vpop.f32.mrf.mxu0  ;;  %19667 = vst [vmem:[#allocation59_spill] sm:$0xff] %v17766_v45  ;;  %v6125_v9 = vsel %vm4831_vm1, %v17766_v45, 0.0  ;;  %v13817_v6 = vpop.eup %13816  ;;  %13826 = vrcp.f32 %v6061_v29 }
 0x5dc   :  { %v17751_v31 = vpop.xlane.xlu0 %6072  ;;  %v11514_v39 = vpop.f32.mrf.mxu0 }
 0x5dd   :  { %v17778_v17 = vpop.xlane.xlu1 %6075 }
 0x5de   :  { %v17758_v3 = vpop.f32.mrf.mxu0 }
 0x5df   :  { %6114 = vadd.xlane.f32.xlu1 %v6113_v0 }
 0x5e0   :  { %v17762_v30 = vpop.xlane.xlu0 %6081 }
 0x5e1   :  { %v17787_v20 = vpop.xlane.xlu1 %6078 }
 0x5e2   :  { %v13819_v34 = vpop.eup %13818 }
 0x5e3   :  { %6123 = vadd.xlane.f32.xlu1 %v6122_v46  ;;  %v13821_v62 = vpop.eup %13820  ;;  %v6390_v12 = vmul.f32 %v13819_v34, %v17333_v10 }
 0x5e4   :  { %v17772_v39 = vpop.xlane.xlu0 %6069  ;;  %v17774_v0 = vpop.f32.mrf.mxu1  ;;  %v6389_v38 = vmul.f32 %v13821_v62, %v17296_v7  ;;  %v19674_v62 = vld [vmem:[#allocation83_spill] sm:$0xff] }
 0x5e5   :  { %19668 = vst [vmem:[#allocation140_spill] sm:$0xff] %v17774_v0  ;;  %v19707_v0 = vld [vmem:[#allocation142_spill] sm:$0xff] }
 0x5e6   :  { %v17780_v48 = vpop.f32.mrf.mxu1  ;;  %v6494_v10 = vpack.c.bf16 %v6390_v12, %v6389_v38 }
 0x5e7   :  { %6126 = vadd.xlane.f32.xlu1 %v6125_v9  ;;  %v19669_v9 = vld [vmem:[#allocation113_spill] sm:$0xff] }
 0x5e8   :  { %v17782_v63 = vpop.xlane.xlu0 %6084  ;;  %v11522_v36 = vpop.f32.mrf.mxu1  ;;  %v6385_v2 = vmul.f32 %v13817_v6, %v19669_v9 }
 0x5ea   :  { %v17784_v42 = vpop.f32.mrf.mxu1  ;;  %v6491_v24 = vpack.c.bf16 %v6385_v2, %v6385_v2  ;;  %v5405_v2 = vsub.f32 %v19674_v62, %v17496_v54 }
 0x5ec   :  { %v12864_v46 = vpop.permute.xlu0 %12863  ;;  %v5690_v7 = vmul.f32 1.442695, %v5405_v2 }
 0x5ed   :  { %v12865_v45 = vunpack.i.l.bf16 %v12864_v46  ;;  %v12866_v38 = vunpack.i.h.bf16 %v12864_v46 }
 0x5ee   :  { %v17796_v16 = vpop.xlane.xlu1 %6087  ;;  %13828 = vpow2.f32 %v5690_v7  ;;  %v19681_v7 = vld [vmem:[#allocation27_spill] sm:$0xff] }
 0x5ef   :  { %12888 = vrot.lane.b32.xlu0 %v19670_v28, %s14016_s28  ;;  %v1928_v36 = vpack.c.bf16 %v12865_v45, %v12861_v21  ;;  %13830 = vrcp.f32 %v17704_v35 }
 0x5f0   :  { %v17798_v60 = vpop.f32.mrf.mxu0  ;;  %13832 = vrcp.f32 %v17772_v39 }
 0x5f1   :  { %19671 = vst [vmem:[#allocation101_spill] sm:$0xff] %v17798_v60  ;;  %11669 = vmatprep.subr.bf16.mxu0 %v1928_v36  ;;  %13834 = vrcp.f32 %v17768_v27 }
 0x5f2   :  { %11670 = vmatpush3.bf16.msra.mxu0 %v1928_v36  ;;  %v17801_v6 = vpop.f32.mrf.mxu0  ;;  %v19675_v36 = vld [vmem:[#allocation96_spill] sm:$0xff]  ;;  %13836 = vrcp.f32 %v17727_v44 }
 0x5f3   :  { %19672 = vst [vmem:[#allocation143_spill] sm:$0xff] %v17801_v6  ;;  %12893 = vrot.lane.b32.xlu0 %v19612_v32, %s14016_s28  ;;  %13838 = vrcp.f32 %v17787_v20  ;;  %v19710_v6 = vld [vmem:[#allocation79_spill] sm:$0xff] }
 0x5f4   :  { %v11530_v59 = vpop.f32.mrf.mxu0  ;;  %13840 = vrcp.f32 %v17778_v17  ;;  %v19699_v17 = vld [vmem:[#allocation50_spill] sm:$0xff] }
 0x5f5   :  { %11672 = vmatmul.mubr.msk.bf16.vlgmr.msra.gmra.mxu0 %vm4831_vm1, %v6491_v24  ;;  %v17808_v28 = vpop.xlane.xlu1 %6093  ;;  %v13823_v24 = vpop.eup %13822  ;;  %13842 = vrcp.f32 %v17751_v31 }
 0x5f6   :  { %11687 = vmatprep.mubr.msk.bf16.mxu0 %vm4831_vm1, %v6494_v10  ;;  %v17811_v56 = vpop.f32.mrf.mxu0  ;;  %v13825_v34 = vpop.eup %13824  ;;  %v6388_v10 = vmul.f32 %v13823_v24, %v19675_v36  ;;  %v19683_v36 = vld [vmem:[#allocation118_spill] sm:$0xff]  ;;  %13844 = vrcp.f32 %v17796_v16 }
 0x5f7   :  { %19673 = vst [vmem:[#allocation114_spill] sm:$0xff] %v17811_v56  ;;  %12898 = vrot.lane.b32.xlu0 %v19618_v26, %s14016_s28  ;;  %v13827_v9 = vpop.eup %13826  ;;  %v6392_v21 = vmul.f32 %v13825_v34, %v17348_v18  ;;  %v19677_v18 = vld [vmem:[#allocation18_spill] sm:$0xff]  ;;  %13846 = vrcp.f32 %v17762_v30 }
 0x5f8   :  { %12903 = vrot.lane.b32.xlu1 %v19635_v57, %s14017_s29  ;;  %v6393_v62 = vmul.f32 %v13827_v9, %v17284_v47  ;;  %v6493_v24 = vpack.c.bf16 %v6388_v10, %v6388_v10  ;;  %v19679_v47 = vld [vmem:[#allocation19_spill] sm:$0xff]  ;;  %13848 = vrcp.f32 %v17782_v63 }
 0x5f9   :  { %v17819_v32 = vpop.xlane.xlu1 %6096  ;;  %v19684_v10 = vld [vmem:[#allocation91_spill] sm:$0xff] }
 0x5fa   :  { %13850 = vrcp.f32 %v17819_v32 }
 0x5fb   :  { %13852 = vrcp.f32 %v17808_v28 }
 0x5fc   :  { %12908 = vrot.lane.b32.xlu1 %v19641_v43, %s14016_s28  ;;  %v17825_v29 = vpop.f32.mrf.mxu1 }
 0x5fd   :  { %v12869_v12 = vpop.permute.xlu1 %12868 }
 0x5fe   :  { %v12871_v26 = vunpack.i.h.bf16 %v12869_v12  ;;  %v12870_v45 = vunpack.i.l.bf16 %v12869_v12  ;;  %v7696_v59 = vpop.f32.mrf.mxu1  ;;  %v19676_v12 = vld [vmem:[#allocation15_spill] sm:$0xff] }
 0x600   :  { %v1933_v57 = vpack.c.bf16 %v12871_v26, %v12871_v26  ;;  %12913 = vrot.lane.b32.xlu1 %v19645_v40, %s14017_s29  ;;  %v1930_v43 = vpack.c.bf16 %v12870_v45, %v12866_v38  ;;  %v11538_v54 = vpop.f32.mrf.mxu1  ;;  %v6496_v40 = vpack.c.bf16 %v6393_v62, %v6392_v21  ;;  %v19678_v38 = vld [vmem:[#allocation24_spill] sm:$0xff]  ;;  %v17850_v21 = vpop.eup %13828  ;;  %v19686_v62 = vld [vmem:[#allocation157_spill] sm:$0xff] }
 0x601   :  { %v19680_v26 = vpack.i.bf16 %v19678_v38, %v19679_v47  ;;  %19682 = vst [vmem:[#allocation165_spill] sm:$0xff] %v17850_v21  ;;  %v12962_v47 = vpack.i.bf16 %v17770_v53, %v17725_v4  ;;  %v13831_v20 = vpop.eup %13830 }
 0x602   :  { %11677 = vmatprep.subr.bf16.mxu1 %v1930_v43  ;;  %11914 = vmatprep.subr.msk.bf16.mxu0 %vm6518_vm2, %v1933_v57  ;;  %v8743_v46 = vsel %vm6518_vm2, %v1933_v57, 0  ;;  %v7699_v9 = vpop.f32.mrf.mxu1  ;;  %v19685_v57 = vpack.i.bf16 %v19683_v36, %v19684_v10 }
 0x603   :  { %11678 = vmatpush3.bf16.msra.mxu1 %v1930_v43  ;;  %11684 = vmatpush3.bf16.msra.mxu0 %v8743_v46  ;;  %v6119_v43 = vsel %vm4831_vm1, %v17850_v21, 0.0  ;;  %v12972_v36 = vpack.i.bf16 %v7699_v9, %v7696_v59 }
 0x604   :  { %1834 = vrot.lane.b32.xlu1 %v19676_v12, %s14017_s29 }
 0x606   :  { %11680 = vmatmul.mubr.msk.bf16.vlgmr.msra.gmra.mxu1 %vm4831_vm1, %v6493_v24  ;;  %v19687_v24 = vld [vmem:[#allocation38_spill] sm:$0xff] }
 0x607   :  { %11695 = vmatprep.mubr.msk.bf16.mxu1 %vm4831_vm1, %v6496_v40  ;;  %v19688_v12 = vpack.i.bf16 %v19686_v62, %v19687_v24  ;;  %v19692_v24 = vld [vmem:[#allocation16_spill] sm:$0xff] }
 0x608   :  { %12923 = vrot.lane.b32.xlu1 %v19677_v18, %s14017_s29  ;;  %v19689_v18 = vpack.i.bf16 %v17595_v37, %v17583_v33  ;;  %v19701_v33 = vld [vmem:[#allocation23_spill] sm:$0xff] }
 0x609   :  { %v17840_v2 = vpop.f32.mrf.mxu0  ;;  %v6391_v21 = vmul.f32 %v13831_v20, %v19701_v33  ;;  %v19705_v33 = vpack.i.bf16 %v17613_v8, %v17577_v41  ;;  %v19712_v8 = vld [vmem:[#allocation126_spill] sm:$0xff] }
 0x60b   :  { %v17842_v34 = vpop.f32.mrf.mxu0 }
 0x60c   :  { %12928 = vrot.lane.b32.xlu1 %v19680_v26, %s14017_s29 }
 0x60d   :  { %v11546_v45 = vpop.f32.mrf.mxu0 }
 0x60f   :  { %v17874_v26 = vpop.f32.mrf.mxu0 }
 0x610   :  { %1838 = vrot.lane.b32.xlu1 %v19681_v7, %s14017_s29 }
 0x614   :  { %12933 = vrot.lane.b32.xlu1 %v19685_v57, %s14003_s12 }
 0x616   :  { %v17858_v54 = vpop.f32.mrf.mxu1  ;;  %6120 = vadd.xlane.f32.xlu0 %v6119_v43 }
 0x618   :  { %v17860_v46 = vpop.f32.mrf.mxu1  ;;  %12943 = vrot.lane.b32.xlu1 %v19688_v12, %s14018_s30  ;;  %v19693_v12 = vld [vmem:[#allocation13_spill] sm:$0xff] }
 0x61a   :  { %v11554_v40 = vpop.f32.mrf.mxu1 }
 0x61b   :  { %v19694_v40 = vpack.i.bf16 %v19692_v24, %v19693_v12  ;;  %v19698_v12 = vld [vmem:[#allocation60_spill] sm:$0xff] }
 0x61c   :  { %12953 = vrot.lane.b32.xlu1 %v19689_v18, %s14019_s8  ;;  %v17890_v43 = vpop.f32.mrf.mxu1 }
 0x61d   :  { %v17870_v38 = vpop.xlane.xlu0 %6090 }
 0x61e   :  { %13854 = vrcp.f32 %v17870_v38 }
 0x620   :  { %12963 = vrot.lane.b32.xlu1 %v12962_v47, %s14020_s9  ;;  %v19695_v47 = vld [vmem:[#allocation127_spill] sm:$0xff] }
 0x621   :  { %v17877_v45 = vpop.f32.mrf.mxu0  ;;  %v17879_v7 = vpop.xlane.xlu0 %6099 }
 0x622   :  { %19690 = vst [vmem:[#allocation55_spill] sm:$0xff] %v17877_v45 }
 0x623   :  { %v17881_v10 = vpop.f32.mrf.mxu0 }
 0x624   :  { %12973 = vrot.lane.b32.xlu1 %v12972_v36, %s14017_s29  ;;  %v19696_v36 = vld [vmem:[#allocation28_spill] sm:$0xff] }
 0x625   :  { %v11562_v37 = vpop.f32.mrf.mxu0  ;;  %v12874_v4 = vpop.permute.xlu0 %12873 }
 0x626   :  { %v12875_v53 = vunpack.i.l.bf16 %v12874_v4  ;;  %v19697_v37 = vpack.i.bf16 %v19695_v47, %v19696_v36 }
 0x627   :  { %v17887_v57 = vpop.f32.mrf.mxu0 }
 0x628   :  { %19691 = vst [vmem:[#allocation84_spill] sm:$0xff] %v17887_v57  ;;  %v1935_v62 = vpack.c.bf16 %v12875_v53, %v12875_v53 }
 0x62a   :  { %v17896_v9 = vpop.f32.mrf.mxu1  ;;  %11915 = vmatprep.subr.msk.bf16.mxu1 %vm6518_vm2, %v1935_v62  ;;  %v8800_v35 = vsel %vm6518_vm2, %v1935_v62, 0 }
 0x62b   :  { %11692 = vmatpush3.bf16.msra.mxu1 %v8800_v35 }
 0x62c   :  { %v7924_v39 = vpop.f32.mrf.mxu1  ;;  %12918 = vrot.lane.b32.xlu0 %v19694_v40, %s14017_s29  ;;  %v19700_v40 = vpack.i.bf16 %v19698_v12, %v19699_v17 }
 0x62e   :  { %v11570_v27 = vpop.f32.mrf.mxu1  ;;  %v17906_v18 = vpop.xlane.xlu1 %6102 }
 0x62f   :  { %v13833_v27 = vpop.eup %13832 }
 0x630   :  { %v7927_v44 = vpop.f32.mrf.mxu1  ;;  %12938 = vrot.lane.b32.xlu0 %v19697_v37, %s14003_s12  ;;  %v13835_v45 = vpop.eup %13834  ;;  %v19702_v37 = vld [vmem:[#allocation74_spill] sm:$0xff] }
 0x631   :  { %v12982_v53 = vpack.i.bf16 %v7927_v44, %v7924_v39  ;;  %v13837_v39 = vpop.eup %13836  ;;  %v12876_v44 = vunpack.i.h.bf16 %v12874_v4 }
 0x632   :  { %v12879_v62 = vpop.permute.xlu1 %12878  ;;  %v13839_v58 = vpop.eup %13838 }
 0x633   :  { %12983 = vrot.lane.b32.xlu1 %v12982_v53, %s14016_s28  ;;  %v12881_v35 = vunpack.i.h.bf16 %v12879_v62  ;;  %v12880_v59 = vunpack.i.l.bf16 %v12879_v62  ;;  %v19703_v53 = vld [vmem:[#allocation154_spill] sm:$0xff] }
 0x634   :  { %v11577_v24 = vpop.f32.mrf.mxu0  ;;  %12948 = vrot.lane.b32.xlu0 %v19700_v40, %s14018_s30  ;;  %v19704_v56 = vpack.i.bf16 %v19702_v37, %v19703_v53  ;;  %v13841_v40 = vpop.eup %13840  ;;  %v6394_v37 = vmul.f32 %v13837_v39, %v19707_v0  ;;  %v19713_v0 = vpack.i.bf16 %v17747_v52, %v17721_v11  ;;  %v13032_v11 = vpack.i.bf16 %v17840_v2, %v17874_v26  ;;  %v19719_v2 = vld [vmem:[#allocation36_spill] sm:$0xff]  ;;  %v19720_v26 = vld [vmem:[#allocation137_spill] sm:$0xff] }
 0x635   :  { %v1932_v57 = vpack.c.bf16 %v12881_v35, %v12880_v59  ;;  %v19706_v59 = vld [vmem:[#allocation152_spill] sm:$0xff]  ;;  %v6495_v35 = vpack.c.bf16 %v6391_v21, %v6391_v21  ;;  %v19714_v21 = vld [vmem:[#allocation122_spill] sm:$0xff] }
 0x636   :  { %v7981_v47 = vpop.f32.mrf.mxu0  ;;  %v12884_v36 = vpop.permute.xlu1 %12883  ;;  %v6396_v20 = vmul.f32 %v13833_v27, %v19706_v59  ;;  %v12977_v27 = vpack.i.bf16 %v17842_v34, %v17825_v29 }
 0x637   :  { %12998 = vrot.lane.b32.xlu1 %v19704_v56, %s14003_s12  ;;  %v12886_v62 = vunpack.i.h.bf16 %v12884_v36  ;;  %v12885_v60 = vunpack.i.l.bf16 %v12884_v36  ;;  %11685 = vmatprep.subr.bf16.mxu0 %v1932_v57  ;;  %v19708_v56 = vld [vmem:[#allocation82_spill] sm:$0xff]  ;;  %v19709_v36 = vld [vmem:[#allocation65_spill] sm:$0xff] }
 0x638   :  { %v11578_v12 = vpop.f32.mrf.mxu0  ;;  %12958 = vrot.lane.b32.xlu0 %v19705_v33, %s14019_s8  ;;  %11686 = vmatpush3.bf16.msra.mxu0 %v1932_v57  ;;  %v6395_v53 = vmul.f32 %v13835_v45, %v19708_v56  ;;  %v6399_v57 = vmul.f32 %v13839_v58, %v19712_v8  ;;  %v6398_v45 = vmul.f32 %v13841_v40, %v19714_v21  ;;  %v13843_v21 = vpop.eup %13842 }
 0x639   :  { %v1937_v4 = vpack.c.bf16 %v12886_v62, %v12886_v62  ;;  %v1934_v17 = vpack.c.bf16 %v12885_v60, %v12876_v44  ;;  %v19711_v12 = vpack.i.bf16 %v19709_v36, %v19710_v6  ;;  %v6497_v6 = vpack.c.bf16 %v6394_v37, %v6394_v37 }
 0x63a   :  { %v6498_v60 = vpack.c.bf16 %v6396_v20, %v6395_v53  ;;  %v19715_v58 = vpack.i.bf16 %v17669_v13, %v17655_v5  ;;  %v6500_v39 = vpack.c.bf16 %v6399_v57, %v6398_v45  ;;  %v7984_v52 = vpop.f32.mrf.mxu0  ;;  %v12987_v44 = vpack.i.bf16 %v7981_v47, %v17896_v9  ;;  %v19716_v5 = vld [vmem:[#allocation53_spill] sm:$0xff]  ;;  %v19717_v13 = vld [vmem:[#allocation44_spill] sm:$0xff] }
 0x63b   :  { %13008 = vrot.lane.b32.xlu1 %v19711_v12, %s14018_s30  ;;  %11688 = vmatmul.mubr.msk.bf16.vlgmr.msra.gmra.mxu0 %vm4831_vm1, %v6495_v35  ;;  %v8857_v41 = vsel %vm6518_vm2, %v1937_v4, 0  ;;  %v13042_v29 = vpack.i.bf16 %v11577_v24, %v7984_v52  ;;  %v19718_v34 = vpack.i.bf16 %v19716_v5, %v19717_v13  ;;  %v19721_v62 = vpack.i.bf16 %v19719_v2, %v19720_v26 }
 0x63c   :  { %11693 = vmatprep.subr.bf16.mxu1 %v1934_v17  ;;  %11916 = vmatprep.subr.msk.bf16.mxu0 %vm6518_vm2, %v1937_v4  ;;  %v19722_v24 = vpack.i.bf16 %v17607_v1, %v17624_v25  ;;  %v19723_v20 = vpack.i.bf16 %v17743_v23, %v17758_v3  ;;  %v19724_v56 = vpack.i.bf16 %v17784_v42, %v17780_v48  ;;  %v19725_v48 = vld [vmem:[#allocation128_spill] sm:$0xff] }
 0x63d   :  { %12968 = vrot.lane.b32.xlu0 %v19713_v0, %s14020_s9  ;;  %11694 = vmatpush3.bf16.msra.mxu1 %v1934_v17  ;;  %v13037_v53 = vpack.i.bf16 %v17890_v43, %v17860_v46  ;;  %v19726_v46 = vld [vmem:[#allocation131_spill] sm:$0xff] }
 0x63e   :  { %11700 = vmatpush3.bf16.msra.mxu0 %v8857_v41  ;;  %11703 = vmatprep.mubr.msk.bf16.mxu0 %vm4831_vm1, %v6498_v60  ;;  %v19727_v43 = vpack.i.bf16 %v19725_v48, %v19726_v46 }
 0x63f   :  { %13018 = vrot.lane.b32.xlu1 %v19715_v58, %s14019_s8 }
 0x640   :  { %11696 = vmatmul.mubr.msk.bf16.vlgmr.msra.gmra.mxu1 %vm4831_vm1, %v6497_v6 }
 0x641   :  { %12978 = vrot.lane.b32.xlu0 %v12977_v27, %s14017_s29  ;;  %11711 = vmatprep.mubr.msk.bf16.mxu1 %vm4831_vm1, %v6500_v39  ;;  %v13845_v27 = vpop.eup %13844 }
 0x643   :  { %13033 = vrot.lane.b32.xlu1 %v13032_v11, %s14017_s29 }
 0x645   :  { %12988 = vrot.lane.b32.xlu0 %v12987_v44, %s14016_s28  ;;  %v19728_v44 = vld [vmem:[#allocation123_spill] sm:$0xff] }
 0x647   :  { %13043 = vrot.lane.b32.xlu1 %v13042_v29, %s14016_s28  ;;  %v6397_v29 = vmul.f32 %v13843_v21, %v19728_v44 }
 0x649   :  { %12993 = vrot.lane.b32.xlu0 %v19718_v34, %s14003_s12  ;;  %v13847_v34 = vpop.eup %13846 }
 0x64c   :  { %v17966_v33 = vpop.f32.mrf.mxu1 }
 0x64d   :  { %13003 = vrot.lane.b32.xlu0 %v19721_v62, %s14018_s30  ;;  %v19729_v62 = vld [vmem:[#allocation25_spill] sm:$0xff] }
 0x64e   :  { %v8038_v9 = vpop.f32.mrf.mxu1 }
 0x650   :  { %v11586_v47 = vpop.f32.mrf.mxu1 }
 0x651   :  { %13013 = vrot.lane.b32.xlu0 %v19722_v24, %s14019_s8  ;;  %v13849_v47 = vpop.eup %13848 }
 0x652   :  { %v8041_v35 = vpop.f32.mrf.mxu1 }
 0x653   :  { %v13047_v12 = vpack.i.bf16 %v8041_v35, %v8038_v9  ;;  %v19730_v9 = vld [vmem:[#allocation148_spill] sm:$0xff] }
 0x654   :  { %v17972_v59 = vpop.f32.mrf.mxu0  ;;  %v19731_v24 = vpack.i.bf16 %v19729_v62, %v19730_v9  ;;  %v19732_v35 = vld [vmem:[#allocation132_spill] sm:$0xff] }
 0x655   :  { %13023 = vrot.lane.b32.xlu0 %v19723_v20, %s14020_s9  ;;  %v6402_v38 = vmul.f32 %v13845_v27, %v19732_v35 }
 0x656   :  { %v6106_v4 = vpop.xlane.xlu0 %6105  ;;  %v17978_v17 = vpop.f32.mrf.mxu0 }
 0x657   :  { %13856 = vrcp.f32 %v6106_v4 }
 0x658   :  { %v11601_v40 = vpop.f32.mrf.mxu1  ;;  %v11594_v37 = vpop.f32.mrf.mxu0  ;;  %13858 = vrcp.f32 %v17879_v7  ;;  %v19734_v7 = vld [vmem:[#allocation135_spill] sm:$0xff] }
 0x659   :  { %13028 = vrot.lane.b32.xlu0 %v19724_v56, %s14020_s9  ;;  %13860 = vrcp.f32 %v17906_v18 }
 0x65a   :  { %v17984_v1 = vpop.xlane.xlu0 %6108  ;;  %v8152_v25 = vpop.f32.mrf.mxu1 }
 0x65b   :  { %v17998_v42 = vpop.f32.mrf.mxu0 }
 0x65c   :  { %v11602_v23 = vpop.f32.mrf.mxu1 }
 0x65d   :  { %13038 = vrot.lane.b32.xlu0 %v13037_v53, %s14017_s29  ;;  %v6499_v23 = vpack.c.bf16 %v6397_v29, %v6397_v29 }
 0x65e   :  { %v17991_v3 = vpop.xlane.xlu0 %6111  ;;  %v8155_v36 = vpop.f32.mrf.mxu1 }
 0x65f   :  { %v13052_v41 = vpack.i.bf16 %v8155_v36, %v8152_v25 }
 0x661   :  { %13048 = vrot.lane.b32.xlu0 %v13047_v12, %s14016_s28  ;;  %13053 = vrot.lane.b32.xlu1 %v13052_v41, %s14015_s27 }
 0x662   :  { %v18000_v31 = vpop.xlane.xlu0 %6117 }
 0x664   :  { %v11609_v16 = vpop.f32.mrf.mxu0 }
 0x665   :  { %13068 = vrot.lane.b32.xlu1 %v19727_v43, %s14003_s12 }
 0x666   :  { %v12889_v30 = vpop.permute.xlu0 %12888  ;;  %v8209_v63 = vpop.f32.mrf.mxu0 }
 0x667   :  { %v12890_v8 = vunpack.i.l.bf16 %v12889_v30  ;;  %v13057_v57 = vpack.i.bf16 %v8209_v63, %v11601_v40  ;;  %v12891_v58 = vunpack.i.h.bf16 %v12889_v30  ;;  %v13851_v40 = vpop.eup %13850  ;;  %v6401_v30 = vmul.f32 %v13849_v47, %v19734_v7 }
 0x668   :  { %v6115_v60 = vpop.xlane.xlu1 %6114  ;;  %v11610_v0 = vpop.f32.mrf.mxu0  ;;  %v19735_v63 = vpack.i.bf16 %v17543_v50, %v17564_v55  ;;  %v19737_v50 = vld [vmem:[#allocation134_spill] sm:$0xff] }
 0x669   :  { %v1939_v32 = vpack.c.bf16 %v12890_v8, %v12890_v8  ;;  %v18007_v45 = vpop.f32.mrf.mxu1  ;;  %13058 = vrot.lane.b32.xlu0 %v13057_v57, %s14015_s27  ;;  %v13853_v41 = vpop.eup %13852  ;;  %13862 = vrcp.f32 %v6115_v60  ;;  %v19736_v8 = vld [vmem:[#allocation29_spill] sm:$0xff]  ;;  %v6502_v21 = vpack.c.bf16 %v6402_v38, %v6401_v30 }
 0x66a   :  { %v12894_v6 = vpop.permute.xlu0 %12893  ;;  %v8212_v28 = vpop.f32.mrf.mxu0  ;;  %v6405_v57 = vmul.f32 %v13851_v40, %v19736_v8  ;;  %13864 = vrcp.f32 %v17991_v3  ;;  %v6404_v55 = vmul.f32 %v13853_v41, %v19737_v50  ;;  %v19739_v3 = vpack.i.bf16 %v17683_v22, %v17697_v61  ;;  %v19751_v50 = vld [vmem:[#allocation30_spill] sm:$0xff] }
 0x66b   :  { %v12895_v39 = vunpack.i.l.bf16 %v12894_v6  ;;  %v13072_v11 = vpack.i.bf16 %v11609_v16, %v8212_v28  ;;  %v8266_v52 = vpop.f32.mrf.mxu1  ;;  %11917 = vmatprep.subr.msk.bf16.mxu1 %vm6518_vm2, %v1939_v32  ;;  %v8914_v13 = vsel %vm6518_vm2, %v1939_v32, 0  ;;  %v12896_v37 = vunpack.i.h.bf16 %v12894_v6  ;;  %v19733_v16 = vld [vmem:[#allocation119_spill] sm:$0xff]  ;;  %v13855_v29 = vpop.eup %13854 }
 0x66c   :  { %v18013_v5 = vpop.xlane.xlu1 %6123  ;;  %11708 = vmatpush3.bf16.msra.mxu1 %v8914_v13  ;;  %v6400_v48 = vmul.f32 %v13847_v34, %v19733_v16  ;;  %13866 = vrcp.f32 %v18000_v31  ;;  %v19740_v34 = vpack.i.bf16 %v17687_v49, %v17644_v19  ;;  %v19741_v31 = vpack.i.bf16 %v17881_v10, %v17858_v54  ;;  %v19742_v54 = vld [vmem:[#allocation143_spill] sm:$0xff]  ;;  %v19743_v10 = vld [vmem:[#allocation140_spill] sm:$0xff] }
 0x66d   :  { %v1936_v2 = vpack.c.bf16 %v12895_v39, %v12891_v58  ;;  %v11618_v26 = vpop.f32.mrf.mxu1  ;;  %13063 = vrot.lane.b32.xlu0 %v19731_v24, %s14003_s12  ;;  %13073 = vrot.lane.b32.xlu1 %v13072_v11, %s14015_s27  ;;  %v19738_v58 = vpack.i.bf16 %v17548_v15, %v17512_v14  ;;  %v6504_v39 = vpack.c.bf16 %v6405_v57, %v6404_v55  ;;  %13868 = vrcp.f32 %v17984_v1 }
 0x66e   :  { %v12899_v20 = vpop.permute.xlu0 %12898  ;;  %v6501_v6 = vpack.c.bf16 %v6400_v48, %v6400_v48  ;;  %v6403_v9 = vmul.f32 %v13855_v29, %v17527_v51  ;;  %v13122_v24 = vpack.i.bf16 %v17978_v17, %v17966_v33  ;;  %v19744_v40 = vpack.i.bf16 %v19742_v54, %v19743_v10  ;;  %v19745_v51 = vld [vmem:[#allocation161_spill] sm:$0xff] }
 0x66f   :  { %v12901_v56 = vunpack.i.h.bf16 %v12899_v20  ;;  %v12900_v25 = vunpack.i.l.bf16 %v12899_v20  ;;  %v8269_v53 = vpop.f32.mrf.mxu1  ;;  %11701 = vmatprep.subr.bf16.mxu0 %v1936_v2 }
 0x670   :  { %v13077_v36 = vpack.i.bf16 %v8269_v53, %v8266_v52  ;;  %v18024_v12 = vpop.xlane.xlu1 %6126  ;;  %v18026_v4 = vpop.f32.mrf.mxu0  ;;  %11702 = vmatpush3.bf16.msra.mxu0 %v1936_v2 }
 0x671   :  { %v1941_v46 = vpack.c.bf16 %v12901_v56, %v12901_v56  ;;  %v1938_v43 = vpack.c.bf16 %v12900_v25, %v12896_v37  ;;  %13088 = vrot.lane.b32.xlu1 %v19735_v63, %s14018_s30  ;;  %v13857_v2 = vpop.eup %13856  ;;  %13870 = vrcp.f32 %v18024_v12 }
 0x672   :  { %13078 = vrot.lane.b32.xlu0 %v13077_v36, %s14015_s27  ;;  %v18035_v18 = vpop.f32.mrf.mxu0  ;;  %v13859_v62 = vpop.eup %13858  ;;  %v6408_v56 = vmul.f32 %v13857_v2, %v19745_v51  ;;  %v19746_v36 = vld [vmem:[#allocation35_spill] sm:$0xff]  ;;  %13872 = vrcp.f32 %v18013_v5 }
 0x673   :  { %11704 = vmatmul.mubr.msk.bf16.vlgmr.msra.gmra.mxu0 %vm4831_vm1, %v6499_v23  ;;  %11709 = vmatprep.subr.bf16.mxu1 %v1938_v43  ;;  %v8971_v0 = vsel %vm6518_vm2, %v1941_v46, 0  ;;  %v13861_v35 = vpop.eup %13860  ;;  %v6503_v23 = vpack.c.bf16 %v6403_v9, %v6403_v9  ;;  %v6406_v41 = vmul.f32 %v13859_v62, %v19746_v36  ;;  %v13132_v30 = vpack.i.bf16 %v18035_v18, %v18007_v45 }
 0x674   :  { %v12904_v60 = vpop.permute.xlu1 %12903  ;;  %11918 = vmatprep.subr.msk.bf16.mxu0 %vm6518_vm2, %v1941_v46  ;;  %v11626_v32 = vpop.f32.mrf.mxu0  ;;  %11710 = vmatpush3.bf16.msra.mxu1 %v1938_v43  ;;  %v19747_v46 = vld [vmem:[#allocation70_spill] sm:$0xff] }
 0x675   :  { %v12905_v28 = vunpack.i.l.bf16 %v12904_v60  ;;  %v18043_v27 = vpop.f32.mrf.mxu1  ;;  %11716 = vmatpush3.bf16.msra.mxu0 %v8971_v0  ;;  %11719 = vmatprep.mubr.msk.bf16.mxu0 %vm4831_vm1, %v6502_v21  ;;  %v12906_v19 = vunpack.i.h.bf16 %v12904_v60  ;;  %v6407_v43 = vmul.f32 %v13861_v35, %v19747_v46  ;;  %v19748_v0 = vld [vmem:[#allocation101_spill] sm:$0xff]  ;;  %v19749_v21 = vld [vmem:[#allocation114_spill] sm:$0xff]  ;;  %v6505_v18 = vpack.c.bf16 %v6406_v41, %v6406_v41 }
 0x676   :  { %13083 = vrot.lane.b32.xlu0 %v19738_v58, %s14018_s30  ;;  %13098 = vrot.lane.b32.xlu1 %v19739_v3, %s14019_s8  ;;  %v18061_v61 = vpop.f32.mrf.mxu0  ;;  %v13863_v25 = vpop.eup %13862  ;;  %v19750_v60 = vpack.i.bf16 %v19748_v0, %v19749_v21  ;;  %v19757_v41 = vld [vmem:[#allocation125_spill] sm:$0xff] }
 0x677   :  { %v1943_v11 = vpack.c.bf16 %v12905_v28, %v12905_v28  ;;  %v18054_v52 = vpop.f32.mrf.mxu1  ;;  %11712 = vmatmul.mubr.msk.bf16.vlgmr.msra.gmra.mxu1 %vm4831_vm1, %v6501_v6  ;;  %v13865_v7 = vpop.eup %13864  ;;  %v6506_v32 = vpack.c.bf16 %v6408_v56, %v6407_v43  ;;  %v6411_v55 = vmul.f32 %v13863_v25, %v19751_v50  ;;  %v19752_v28 = vld [vmem:[#allocation58_spill] sm:$0xff] }
 0x678   :  { %v12909_v44 = vpop.permute.xlu1 %12908  ;;  %11727 = vmatprep.mubr.msk.bf16.mxu1 %vm4831_vm1, %v6504_v39  ;;  %v6410_v58 = vmul.f32 %v13865_v7, %v19752_v28 }
 0x679   :  { %v12911_v13 = vunpack.i.h.bf16 %v12909_v44  ;;  %v12910_v14 = vunpack.i.l.bf16 %v12909_v44  ;;  %v11634_v15 = vpop.f32.mrf.mxu1  ;;  %11919 = vmatprep.subr.msk.bf16.mxu1 %vm6518_vm2, %v1943_v11  ;;  %v9028_v22 = vsel %vm6518_vm2, %v1943_v11, 0  ;;  %v13867_v3 = vpop.eup %13866 }
 0x67a   :  { %13093 = vrot.lane.b32.xlu0 %v19740_v34, %s14019_s8  ;;  %13113 = vrot.lane.b32.xlu1 %v19741_v31, %s14017_s29  ;;  %v19753_v15 = vld [vmem:[#allocation55_spill] sm:$0xff]  ;;  %v6508_v31 = vpack.c.bf16 %v6411_v55, %v6410_v58  ;;  %v19759_v55 = vld [vmem:[#allocation164_spill] sm:$0xff] }
 0x67b   :  { %11724 = vmatpush3.bf16.msra.mxu1 %v9028_v22  ;;  %v1940_v26 = vpack.c.bf16 %v12911_v13, %v12910_v14  ;;  %v8383_v33 = vpop.f32.mrf.mxu1  ;;  %v19754_v22 = vld [vmem:[#allocation84_spill] sm:$0xff] }
 0x67c   :  { %v12914_v47 = vpop.permute.xlu1 %12913  ;;  %v18074_v20 = vpop.f32.mrf.mxu0  ;;  %v13142_v39 = vpack.i.bf16 %v8383_v33, %v18054_v52  ;;  %v19755_v34 = vpack.i.bf16 %v19753_v15, %v19754_v22  ;;  %v13127_v52 = vpack.i.bf16 %v17972_v59, %v17998_v42  ;;  %v13137_v59 = vpack.i.bf16 %v18026_v4, %v18061_v61 }
 0x67d   :  { %v12916_v49 = vunpack.i.h.bf16 %v12914_v47  ;;  %v12915_v38 = vunpack.i.l.bf16 %v12914_v47  ;;  %11717 = vmatprep.subr.bf16.mxu0 %v1940_v26 }
 0x67e   :  { %13103 = vrot.lane.b32.xlu0 %v19744_v40, %s14020_s9  ;;  %13123 = vrot.lane.b32.xlu1 %v13122_v24, %s14016_s28  ;;  %v8437_v37 = vpop.f32.mrf.mxu0 }
 0x67f   :  { %v1945_v17 = vpack.c.bf16 %v12916_v49, %v12916_v49  ;;  %11718 = vmatpush3.bf16.msra.mxu0 %v1940_v26  ;;  %v1942_v53 = vpack.c.bf16 %v12915_v38, %v12906_v19  ;;  %v19756_v26 = vld [vmem:[#allocation144_spill] sm:$0xff]  ;;  %v13147_v47 = vpack.i.bf16 %v8437_v37, %v18043_v27 }
 0x680   :  { %v1835_v16 = vpop.permute.xlu1 %1834  ;;  %v11642_v48 = vpop.f32.mrf.mxu0  ;;  %v6412_v62 = vmul.f32 %v13867_v3, %v19756_v26 }
 0x681   :  { %v1947_v63 = vpack.c.bf16 %v1835_v16, %v1835_v16  ;;  %v18086_v8 = vpop.f32.mrf.mxu1  ;;  %11725 = vmatprep.subr.bf16.mxu1 %v1942_v53  ;;  %11920 = vmatprep.subr.msk.bf16.mxu0 %vm6518_vm2, %v1945_v17  ;;  %v9085_v57 = vsel %vm6518_vm2, %v1945_v17, 0  ;;  %v19758_v48 = vld [vmem:[#allocation108_spill] sm:$0xff] }
 0x682   :  { %11720 = vmatmul.mubr.msk.bf16.vlgmr.msra.gmra.mxu0 %vm4831_vm1, %v6503_v23  ;;  %13108 = vrot.lane.b32.xlu0 %v19750_v60, %s14020_s9  ;;  %v8440_v14 = vpop.f32.mrf.mxu0  ;;  %v6509_v49 = vpack.c.bf16 %v6412_v62, %v6412_v62  ;;  %v19761_v62 = vld [vmem:[#allocation130_spill] sm:$0xff] }
 0x683   :  { %13133 = vrot.lane.b32.xlu1 %v13132_v30, %s14015_s27  ;;  %11726 = vmatpush3.bf16.msra.mxu1 %v1942_v53  ;;  %v8494_v45 = vpop.f32.mrf.mxu1  ;;  %v9142_v13 = vsel %vm6518_vm2, %v1947_v63, 0  ;;  %v13152_v54 = vpack.i.bf16 %v18074_v20, %v8440_v14 }
 0x684   :  { %11732 = vmatpush3.bf16.msra.mxu0 %v9085_v57  ;;  %11735 = vmatprep.mubr.msk.bf16.mxu0 %vm4831_vm1, %v6506_v32  ;;  %v12924_v6 = vpop.permute.xlu1 %12923  ;;  %v13869_v57 = vpop.eup %13868 }
 0x685   :  { %11921 = vmatprep.subr.msk.bf16.mxu1 %vm6518_vm2, %v1947_v63  ;;  %v12926_v11 = vunpack.i.h.bf16 %v12924_v6  ;;  %v12925_v44 = vunpack.i.l.bf16 %v12924_v6  ;;  %v11650_v29 = vpop.f32.mrf.mxu1  ;;  %v13871_v3 = vpop.eup %13870 }
 0x686   :  { %11728 = vmatmul.mubr.msk.bf16.vlgmr.msra.gmra.mxu1 %vm4831_vm1, %v6505_v18  ;;  %13118 = vrot.lane.b32.xlu0 %v19755_v34, %s14017_s29  ;;  %v13873_v14 = vpop.eup %13872 }
 0x687   :  { %v1946_v2 = vpack.c.bf16 %v12926_v11, %v12925_v44  ;;  %13143 = vrot.lane.b32.xlu1 %v13142_v39, %s14005_s17  ;;  %11740 = vmatpush3.bf16.msra.mxu1 %v9142_v13  ;;  %v8497_v19 = vpop.f32.mrf.mxu1 }
 0x688   :  { %11743 = vmatprep.mubr.msk.bf16.mxu1 %vm4831_vm1, %v6508_v31  ;;  %v18112_v9 = vpop.permute.xlu1 %12928  ;;  %v18114_v24 = vpop.f32.mrf.mxu0  ;;  %v13157_v4 = vpack.i.bf16 %v8497_v19, %v8494_v45  ;;  %v6409_v45 = vmul.f32 %v13869_v57, %v19759_v55 }
 0x689   :  { %11741 = vmatprep.subr.bf16.mxu1 %v1946_v2  ;;  %v12930_v21 = vunpack.i.l.bf16 %v18112_v9  ;;  %v12931_v11 = vunpack.i.h.bf16 %v18112_v9  ;;  %v19762_v9 = vld [vmem:[#allocation72_spill] sm:$0xff] }
 0x68a   :  { %13128 = vrot.lane.b32.xlu0 %v13127_v52, %s14016_s28  ;;  %v8551_v35 = vpop.f32.mrf.mxu0  ;;  %v6507_v39 = vpack.c.bf16 %v6409_v45, %v6409_v45  ;;  %v19760_v52 = vld [vmem:[#allocation59_spill] sm:$0xff] }
 0x68b   :  { %13148 = vrot.lane.b32.xlu1 %v13147_v47, %s14005_s17  ;;  %11742 = vmatpush3.bf16.msra.mxu1 %v1946_v2  ;;  %v13162_v53 = vpack.i.bf16 %v8551_v35, %v18086_v8  ;;  %v1949_v28 = vpack.c.bf16 %v12930_v21, %v12930_v21  ;;  %v6415_v26 = vmul.f32 %v13871_v3, %v19760_v52 }
 0x68c   :  { %v1839_v42 = vpop.permute.xlu1 %1838  ;;  %v11658_v38 = vpop.f32.mrf.mxu0 }
 0x68d   :  { %v18122_v10 = vpop.f32.mrf.mxu1  ;;  %v1948_v15 = vpack.c.bf16 %v1839_v42, %v12931_v11  ;;  %v9199_v31 = vsel %vm6518_vm2, %v1949_v28, 0 }
 0x68e   :  { %11744 = vmatmul.mubr.msk.bf16.vlgmr.msra.gmra.mxu1 %vm4831_vm1, %v6509_v49  ;;  %13138 = vrot.lane.b32.xlu0 %v13137_v59, %s14015_s27  ;;  %v18126_v27 = vpop.f32.mrf.mxu0 }
 0x68f   :  { %13153 = vrot.lane.b32.xlu1 %v13152_v54, %s14005_s17  ;;  %v13212_v40 = vpack.i.bf16 %v18114_v24, %v18126_v27  ;;  %v8608_v37 = vpop.f32.mrf.mxu1  ;;  %v19763_v54 = vld [vmem:[#allocation89_spill] sm:$0xff] }
 0x690   :  { %v12934_v51 = vpop.permute.xlu1 %12933 }
 0x691   :  { %v11666_v61 = vpop.f32.mrf.mxu1  ;;  %v12936_v56 = vunpack.i.h.bf16 %v12934_v51  ;;  %v12935_v25 = vunpack.i.l.bf16 %v12934_v51  ;;  %v19764_v51 = vld [vmem:[#allocation41_spill] sm:$0xff] }
 0x693   :  { %13158 = vrot.lane.b32.xlu1 %v13157_v4, %s14005_s17  ;;  %v8611_v20 = vpop.f32.mrf.mxu1  ;;  %v9778_v16 = vsel %vm1950_vm0, %v19757_v41, %v12936_v56  ;;  %v9777_v46 = vsel %vm1950_vm0, %v19758_v48, %v12935_v25  ;;  %v19765_v56 = vld [vmem:[#allocation165_spill] sm:$0xff]  ;;  %v6511_v41 = vpack.c.bf16 %v6415_v26, %v6415_v26 }
 0x694   :  { %v13167_v33 = vpack.i.bf16 %v8611_v20, %v8608_v37  ;;  %v12944_v17 = vpop.permute.xlu1 %12943  ;;  %v19766_v20 = vld [vmem:[#allocation48_spill] sm:$0xff] }
 0x695   :  { %v12946_v23 = vunpack.i.h.bf16 %v12944_v17  ;;  %v12945_v36 = vunpack.i.l.bf16 %v12944_v17 }
 0x696   :  { %13168 = vrot.lane.b32.xlu0 %v13167_v33, %s14014_s26  ;;  %v6414_v33 = vmul.f32 %v13873_v14, %v19766_v20 }
 0x697   :  { %v18140_v43 = vsel %vm9789_vm3, %v9777_v46, %v12945_v36  ;;  %v18143_v7 = vsel %vm9789_vm3, %v9778_v16, %v12946_v23  ;;  %13163 = vrot.lane.b32.xlu1 %v13162_v53, %s14005_s17 }
 0x698   :  { %v18146_v30 = vpop.permute.xlu1 %12953 }
 0x69c   :  { %v18148_v63 = vpop.permute.xlu1 %12963 }
 0x69f   :  { %v6121_v1 = vpop.xlane.xlu0 %6120 }
 0x6a0   :  { %13874 = vrcp.f32 %v6121_v1  ;;  %v18152_v8 = vpop.permute.xlu1 %12973 }
 0x6a3   :  { %v12919_v0 = vpop.permute.xlu0 %12918 }
 0x6a4   :  { %v12921_v60 = vunpack.i.h.bf16 %v12919_v0  ;;  %v12920_v32 = vunpack.i.l.bf16 %v12919_v0 }
 0x6a5   :  { %v18155_v50 = vpop.permute.xlu1 %12983 }
 0x6a6   :  { %v1944_v18 = vpack.c.bf16 %v12921_v60, %v12920_v32 }
 0x6a7   :  { %v12939_v6 = vpop.permute.xlu0 %12938 }
 0x6a8   :  { %11733 = vmatprep.subr.bf16.mxu0 %v1944_v18  ;;  %v12941_v12 = vunpack.i.h.bf16 %v12939_v6  ;;  %v12940_v5 = vunpack.i.l.bf16 %v12939_v6 }
 0x6a9   :  { %v12999_v58 = vpop.permute.xlu1 %12998  ;;  %11734 = vmatpush3.bf16.msra.mxu0 %v1944_v18 }
 0x6aa   :  { %11922 = vmatprep.subr.msk.bf16.mxu0 %vm6518_vm2, %v1949_v28  ;;  %v13001_v44 = vunpack.i.h.bf16 %v12999_v58  ;;  %v13000_v29 = vunpack.i.l.bf16 %v12999_v58  ;;  %v9780_v47 = vsel %vm1950_vm0, %v19761_v62, %v12941_v12  ;;  %v9779_v35 = vsel %vm1950_vm0, %v19762_v9, %v12940_v5 }
 0x6ab   :  { %v12949_v13 = vpop.permute.xlu0 %12948 }
 0x6ac   :  { %v12951_v22 = vunpack.i.h.bf16 %v12949_v13  ;;  %v12950_v34 = vunpack.i.l.bf16 %v12949_v13  ;;  %11736 = vmatmul.mubr.msk.bf16.vlgmr.msra.gmra.mxu0 %vm4831_vm1, %v6507_v39  ;;  %v9784_v37 = vsel %vm1950_vm0, %v19763_v54, %v13001_v44  ;;  %v9783_v4 = vsel %vm1950_vm0, %v19764_v51, %v13000_v29 }
 0x6ad   :  { %v13875_v2 = vpop.eup %13874  ;;  %v13009_v19 = vpop.permute.xlu1 %13008  ;;  %11748 = vmatpush3.bf16.msra.mxu0 %v9199_v31 }
 0x6ae   :  { %v9792_v49 = vsel %vm9789_vm3, %v9779_v35, %v12950_v34  ;;  %v9793_v59 = vsel %vm9789_vm3, %v9780_v47, %v12951_v22  ;;  %v13011_v42 = vunpack.i.h.bf16 %v13009_v19  ;;  %v13010_v38 = vunpack.i.l.bf16 %v13009_v19  ;;  %11749 = vmatprep.subr.bf16.mxu0 %v1948_v15  ;;  %v19767_v19 = vld [vmem:[#allocation129_spill] sm:$0xff] }
 0x6af   :  { %v12959_v61 = vpop.permute.xlu0 %12958  ;;  %v6413_v25 = vmul.f32 %v13875_v2, %v19765_v56 }
 0x6b0   :  { %v9796_v17 = vsel %vm9789_vm3, %v9783_v4, %v13010_v38  ;;  %v9797_v53 = vsel %vm9789_vm3, %v9784_v37, %v13011_v42  ;;  %v12961_v23 = vunpack.i.h.bf16 %v12959_v61  ;;  %v12960_v36 = vunpack.i.l.bf16 %v12959_v61 }
 0x6b1   :  { %v13019_v16 = vpop.permute.xlu1 %13018  ;;  %11750 = vmatpush3.bf16.msra.mxu0 %v1948_v15  ;;  %v6510_v48 = vpack.c.bf16 %v6414_v33, %v6413_v25 }
 0x6b2   :  { %v9804_v46 = vsel %vm4831_vm1, %v9792_v49, %v12960_v36  ;;  %v9805_v1 = vsel %vm4831_vm1, %v9793_v59, %v12961_v23  ;;  %v13021_v57 = vunpack.i.h.bf16 %v13019_v16  ;;  %v13020_v0 = vunpack.i.l.bf16 %v13019_v16  ;;  %v19768_v59 = vld [vmem:[#allocation42_spill] sm:$0xff] }
 0x6b3   :  { %11751 = vmatprep.mubr.msk.bf16.mxu0 %vm4831_vm1, %v6510_v48  ;;  %v12969_v21 = vpop.permute.xlu0 %12968 }
 0x6b4   :  { %v18181_v60 = vsel %vm4831_vm1, %v9796_v17, %v13020_v0  ;;  %v18184_v32 = vsel %vm4831_vm1, %v9797_v53, %v13021_v57  ;;  %v12971_v55 = vunpack.i.h.bf16 %v12969_v21  ;;  %v12970_v45 = vunpack.i.l.bf16 %v12969_v21  ;;  %11752 = vmatmul.mubr.msk.bf16.vlgmr.msra.gmra.mxu0 %vm4831_vm1, %v6511_v41 }
 0x6b5   :  { %v11673_v18 = vpop.f32.mrf.mxu0  ;;  %v13034_v35 = vpop.permute.xlu1 %13033 }
 0x6b6   :  { %v9817_v6 = vsel %vm9814_vm4, %v9804_v46, %v12970_v45  ;;  %v9818_v28 = vsel %vm9814_vm4, %v9805_v1, %v12971_v55  ;;  %v13036_v16 = vunpack.i.h.bf16 %v13034_v35  ;;  %v13035_v48 = vunpack.i.l.bf16 %v13034_v35 }
 0x6b7   :  { %v12979_v12 = vpop.permute.xlu0 %12978  ;;  %v8665_v5 = vpop.f32.mrf.mxu0 }
 0x6b8   :  { %v12981_v58 = vunpack.i.h.bf16 %v12979_v12  ;;  %v12980_v3 = vunpack.i.l.bf16 %v12979_v12  ;;  %v13172_v39 = vpack.i.bf16 %v8665_v5, %v18122_v10 }
 0x6b9   :  { %v11674_v11 = vpop.f32.mrf.mxu0  ;;  %v13044_v17 = vpop.permute.xlu1 %13043 }
 0x6ba   :  { %v9830_v44 = vsel %vm9827_vm5, %v9817_v6, %v12980_v3  ;;  %v9831_v29 = vsel %vm9827_vm5, %v9818_v28, %v12981_v58  ;;  %13173 = vrot.lane.b32.xlu1 %v13172_v39, %s14014_s26  ;;  %v13046_v1 = vunpack.i.h.bf16 %v13044_v17  ;;  %v13045_v57 = vunpack.i.l.bf16 %v13044_v17 }
 0x6bb   :  { %v12989_v13 = vpop.permute.xlu0 %12988  ;;  %v8668_v14 = vpop.f32.mrf.mxu0 }
 0x6bc   :  { %v12991_v15 = vunpack.i.h.bf16 %v12989_v13  ;;  %v12990_v22 = vunpack.i.l.bf16 %v12989_v13  ;;  %v13177_v34 = vpack.i.bf16 %v11673_v18, %v8668_v14 }
 0x6be   :  { %v9843_v31 = vsel %vm9840_vm6, %v9830_v44, %v12990_v22  ;;  %v9844_v2 = vsel %vm9840_vm6, %v9831_v29, %v12991_v15  ;;  %13178 = vrot.lane.b32.xlu0 %v13177_v34, %s14014_s26 }
 0x6bf   :  { %v12994_v10 = vpop.permute.xlu0 %12993 }
 0x6c0   :  { %v12996_v52 = vunpack.i.h.bf16 %v12994_v10  ;;  %v12995_v26 = vunpack.i.l.bf16 %v12994_v10 }
 0x6c2   :  { %v9782_v49 = vsel %vm1950_vm0, %v19767_v19, %v12996_v52  ;;  %v9781_v42 = vsel %vm1950_vm0, %v19768_v59, %v12995_v26 }
 0x6c3   :  { %v13004_v62 = vpop.permute.xlu0 %13003 }
 0x6c4   :  { %v13006_v47 = vunpack.i.h.bf16 %v13004_v62  ;;  %v13005_v9 = vunpack.i.l.bf16 %v13004_v62 }
 0x6c6   :  { %v9794_v38 = vsel %vm9789_vm3, %v9781_v42, %v13005_v9  ;;  %v9795_v54 = vsel %vm9789_vm3, %v9782_v49, %v13006_v47  ;;  %v18202_v37 = vpop.f32.mrf.mxu1 }
 0x6c7   :  { %v13014_v51 = vpop.permute.xlu0 %13013 }
 0x6c8   :  { %v13016_v4 = vunpack.i.h.bf16 %v13014_v51  ;;  %v13015_v61 = vunpack.i.l.bf16 %v13014_v51  ;;  %v8722_v56 = vpop.f32.mrf.mxu1 }
 0x6ca   :  { %v9806_v25 = vsel %vm4831_vm1, %v9794_v38, %v13015_v61  ;;  %v9807_v20 = vsel %vm4831_vm1, %v9795_v54, %v13016_v4  ;;  %v11682_v33 = vpop.f32.mrf.mxu1 }
 0x6cb   :  { %v13024_v53 = vpop.permute.xlu0 %13023 }
 0x6cc   :  { %v13026_v23 = vunpack.i.h.bf16 %v13024_v53  ;;  %v13025_v36 = vunpack.i.l.bf16 %v13024_v53  ;;  %v8725_v41 = vpop.f32.mrf.mxu1 }
 0x6cd   :  { %v13182_v46 = vpack.i.bf16 %v8725_v41, %v8722_v56  ;;  %v19769_v56 = vld [vmem:[#allocation133_spill] sm:$0xff] }
 0x6ce   :  { %v9819_v0 = vsel %vm9814_vm4, %v9806_v25, %v13025_v36  ;;  %v9820_v21 = vsel %vm9814_vm4, %v9807_v20, %v13026_v23  ;;  %v19770_v20 = vld [vmem:[#allocation112_spill] sm:$0xff] }
 0x6cf   :  { %v9832_v55 = vsel %vm9827_vm5, %v9819_v0, %v13035_v48  ;;  %v9833_v45 = vsel %vm9827_vm5, %v9820_v21, %v13036_v16  ;;  %v13029_v18 = vpop.permute.xlu0 %13028  ;;  %13183 = vrot.lane.b32.xlu1 %v13182_v46, %s14014_s26  ;;  %v19771_v46 = vld [vmem:[#allocation136_spill] sm:$0xff] }
 0x6d0   :  { %v13031_v6 = vunpack.i.h.bf16 %v13029_v18  ;;  %v13030_v28 = vunpack.i.l.bf16 %v13029_v18  ;;  %v18212_v12 = vsel %vm9840_vm6, %v9832_v55, %v13045_v57  ;;  %v18215_v5 = vsel %vm9840_vm6, %v9833_v45, %v13046_v1  ;;  %v19772_v57 = vld [vmem:[#allocation110_spill] sm:$0xff] }
 0x6d2   :  { %v9821_v58 = vsel %vm9814_vm4, %v18181_v60, %v13030_v28  ;;  %v9822_v3 = vsel %vm9814_vm4, %v18184_v32, %v13031_v6 }
 0x6d3   :  { %v13039_v39 = vpop.permute.xlu0 %13038  ;;  %v18223_v14 = vpop.permute.xlu1 %13053 }
 0x6d4   :  { %v13041_v11 = vunpack.i.h.bf16 %v13039_v39  ;;  %v13040_v44 = vunpack.i.l.bf16 %v13039_v39 }
 0x6d6   :  { %v9834_v29 = vsel %vm9827_vm5, %v9821_v58, %v13040_v44  ;;  %v9835_v13 = vsel %vm9827_vm5, %v9822_v3, %v13041_v11 }
 0x6d7   :  { %v13049_v15 = vpop.permute.xlu0 %13048  ;;  %v13069_v26 = vpop.permute.xlu1 %13068 }
 0x6d8   :  { %v13051_v22 = vunpack.i.h.bf16 %v13049_v15  ;;  %v13050_v34 = vunpack.i.l.bf16 %v13049_v15  ;;  %v13071_v49 = vunpack.i.h.bf16 %v13069_v26  ;;  %v13070_v59 = vunpack.i.l.bf16 %v13069_v26 }
 0x6da   :  { %v9847_v10 = vsel %vm9840_vm6, %v9834_v29, %v13050_v34  ;;  %v9848_v52 = vsel %vm9840_vm6, %v9835_v13, %v13051_v22  ;;  %v9788_v25 = vsel %vm1950_vm0, %v19769_v56, %v13071_v49 }
 0x6db   :  { %v13059_v60 = vpop.permute.xlu0 %13058 }
 0x6dc   :  { %v13061_v62 = vunpack.i.h.bf16 %v13059_v60  ;;  %v13060_v32 = vunpack.i.l.bf16 %v13059_v60 }
 0x6de   :  { %v18228_v47 = vsel %vm9853_vm7, %v9844_v2, %v13061_v62  ;;  %v18231_v9 = vsel %vm9853_vm7, %v9843_v31, %v13060_v32  ;;  %v9787_v2 = vsel %vm1950_vm0, %v19770_v20, %v13070_v59 }
 0x6df   :  { %v13064_v35 = vpop.permute.xlu0 %13063  ;;  %v18233_v19 = vpop.permute.xlu1 %13073 }
 0x6e0   :  { %v13066_v33 = vunpack.i.h.bf16 %v13064_v35  ;;  %v13065_v31 = vunpack.i.l.bf16 %v13064_v35 }
 0x6e2   :  { %v9786_v1 = vsel %vm1950_vm0, %v19771_v46, %v13066_v33  ;;  %v9785_v0 = vsel %vm1950_vm0, %v19772_v57, %v13065_v31 }
 0x6e3   :  { %v13089_v38 = vpop.permute.xlu1 %13088 }
 0x6e4   :  { %v13079_v42 = vpop.permute.xlu0 %13078  ;;  %v13091_v4 = vunpack.i.h.bf16 %v13089_v38  ;;  %v13090_v61 = vunpack.i.l.bf16 %v13089_v38 }
 0x6e5   :  { %v13081_v54 = vunpack.i.h.bf16 %v13079_v42  ;;  %v13080_v51 = vunpack.i.l.bf16 %v13079_v42 }
 0x6e6   :  { %v9800_v23 = vsel %vm9789_vm3, %v9787_v2, %v13090_v61  ;;  %v9801_v36 = vsel %vm9789_vm3, %v9788_v25, %v13091_v4 }
 0x6e7   :  { %v18240_v17 = vsel %vm9853_vm7, %v9847_v10, %v13080_v51  ;;  %v18243_v53 = vsel %vm9853_vm7, %v9848_v52, %v13081_v54 }
 0x6e8   :  { %v13084_v41 = vpop.permute.xlu0 %13083  ;;  %v13099_v28 = vpop.permute.xlu1 %13098 }
 0x6e9   :  { %v13086_v16 = vunpack.i.h.bf16 %v13084_v41  ;;  %v13085_v48 = vunpack.i.l.bf16 %v13084_v41  ;;  %v13101_v29 = vunpack.i.h.bf16 %v13099_v28  ;;  %v13100_v13 = vunpack.i.l.bf16 %v13099_v28 }
 0x6eb   :  { %v9799_v21 = vsel %vm9789_vm3, %v9786_v1, %v13086_v16  ;;  %v9798_v55 = vsel %vm9789_vm3, %v9785_v0, %v13085_v48  ;;  %v9812_v60 = vsel %vm4831_vm1, %v9800_v23, %v13100_v13  ;;  %v9813_v26 = vsel %vm4831_vm1, %v9801_v36, %v13101_v29 }
 0x6ec   :  { %v13094_v45 = vpop.permute.xlu0 %13093 }
 0x6ed   :  { %v13096_v18 = vunpack.i.h.bf16 %v13094_v45  ;;  %v13095_v6 = vunpack.i.l.bf16 %v13094_v45 }
 0x6ef   :  { %v9810_v58 = vsel %vm4831_vm1, %v9798_v55, %v13095_v6  ;;  %v9811_v3 = vsel %vm4831_vm1, %v9799_v21, %v13096_v18 }
 0x6f0   :  { %v13104_v39 = vpop.permute.xlu0 %13103 }
 0x6f1   :  { %v13106_v11 = vunpack.i.h.bf16 %v13104_v39  ;;  %v13105_v44 = vunpack.i.l.bf16 %v13104_v39 }
 0x6f3   :  { %v18256_v15 = vsel %vm9814_vm4, %v9810_v58, %v13105_v44  ;;  %v18259_v22 = vsel %vm9814_vm4, %v9811_v3, %v13106_v11 }
 0x6f4   :  { %v13109_v34 = vpop.permute.xlu0 %13108 }
 0x6f5   :  { %v13111_v10 = vunpack.i.h.bf16 %v13109_v34  ;;  %v13110_v52 = vunpack.i.l.bf16 %v13109_v34 }
 0x6f7   :  { %v9825_v62 = vsel %vm9814_vm4, %v9812_v60, %v13110_v52  ;;  %v9826_v32 = vsel %vm9814_vm4, %v9813_v26, %v13111_v10 }
 0x6f8   :  { %v13119_v35 = vpop.permute.xlu0 %13118 }
 0x6f9   :  { %v13121_v49 = vunpack.i.h.bf16 %v13119_v35  ;;  %v13120_v59 = vunpack.i.l.bf16 %v13119_v35 }
 0x6fb   :  { %v9838_v42 = vsel %vm9827_vm5, %v9825_v62, %v13120_v59  ;;  %v9839_v38 = vsel %vm9827_vm5, %v9826_v32, %v13121_v49  ;;  %v18267_v54 = vpop.f32.mrf.mxu0  ;;  %v13294_v62 = vld [vmem:[#allocation7 + $0x28] sm:$0xff]   ;;  %v13295_v32 = vld [vmem:[#allocation7 + $0x20] sm:$0xff]   ;;  %v13296_v59 = vld [vmem:[#allocation7 + $0x18] sm:$0xff]  }
 0x6fc   :  { %v13129_v51 = vpop.permute.xlu0 %13128  ;;  %11755 = vmatprep.subr.bf16.mxu1 %v13294_v62 }
 0x6fd   :  { %v13131_v4 = vunpack.i.h.bf16 %v13129_v51  ;;  %v13130_v61 = vunpack.i.l.bf16 %v13129_v51  ;;  %v18269_v56 = vpop.f32.mrf.mxu0  ;;  %11756 = vmatpush3.bf16.msra.mxu1 %v13294_v62 }
 0x6fe   :  { %v13222_v25 = vpack.i.bf16 %v18269_v56, %v18202_v37  ;;  %11757 = vmatprep.subr.bf16.mxu1 %v13295_v32 }
 0x6ff   :  { %v9851_v20 = vsel %vm9840_vm6, %v9838_v42, %v13130_v61  ;;  %v9852_v2 = vsel %vm9840_vm6, %v9839_v38, %v13131_v4  ;;  %v11690_v33 = vpop.f32.mrf.mxu0  ;;  %v13297_v4 = vld [vmem:[#allocation7 + $0x10] sm:$0xff]  }
 0x700   :  { %v13139_v31 = vpop.permute.xlu0 %13138  ;;  %v11697_v23 = vpop.f32.mrf.mxu1 }
 0x701   :  { %v13141_v36 = vunpack.i.h.bf16 %v13139_v31  ;;  %v13140_v41 = vunpack.i.l.bf16 %v13139_v31  ;;  %v18275_v16 = vpop.f32.mrf.mxu0  ;;  %11758 = vmatpush3.bf16.msra.mxu1 %v13295_v32 }
 0x702   :  { %v13232_v48 = vpack.i.bf16 %v18267_v54, %v18275_v16  ;;  %v8836_v46 = vpop.f32.mrf.mxu1  ;;  %11759 = vmatprep.subr.bf16.mxu1 %v13296_v59 }
 0x703   :  { %v18280_v1 = vsel %vm9853_vm7, %v9851_v20, %v13140_v41  ;;  %v18283_v57 = vsel %vm9853_vm7, %v9852_v2, %v13141_v36  ;;  %v13298_v20 = vld [vmem:[#allocation7 + $0x8] sm:$0xff]   ;;  %v13299_v2 = vld [vmem:[#allocation7] sm:$0xff]  }
 0x704   :  { %v11698_v0 = vpop.f32.mrf.mxu1 }
 0x705   :  { %11760 = vmatpush3.bf16.msra.mxu1 %v13296_v59 }
 0x706   :  { %v8839_v21 = vpop.f32.mrf.mxu1  ;;  %11761 = vmatprep.subr.bf16.mxu1 %v13297_v4 }
 0x707   :  { %v13187_v55 = vpack.i.bf16 %v8839_v21, %v8836_v46 }
 0x708   :  { %v13169_v16 = vpop.permute.xlu0 %13168 }
 0x709   :  { %13188 = vrot.lane.b32.xlu0 %v13187_v55, %s14013_s25  ;;  %11762 = vmatpush3.bf16.msra.mxu1 %v13297_v4 }
 0x70a   :  { %11763 = vmatprep.subr.bf16.mxu1 %v13298_v20 }
 0x70d   :  { %11764 = vmatpush3.bf16.msra.mxu1 %v13298_v20 }
 0x70e   :  { %11765 = vmatprep.subr.bf16.mxu1 %v13299_v2 }
 0x711   :  { %11766 = vmatpush3.bf16.msra.mxu1 %v13299_v2 }
 0x733   :  { %v11705_v45 = vpop.f32.mrf.mxu0 }
 0x735   :  { %v8893_v18 = vpop.f32.mrf.mxu0 }
 0x736   :  { %v13192_v6 = vpack.i.bf16 %v8893_v18, %v11697_v23 }
 0x737   :  { %v11706_v28 = vpop.f32.mrf.mxu0  ;;  %v11713_v58 = vpop.f32.mrf.mxu1 }
 0x738   :  { %13193 = vrot.lane.b32.xlu1 %v13192_v6, %s14013_s25 }
 0x739   :  { %v8896_v3 = vpop.f32.mrf.mxu0  ;;  %v8950_v39 = vpop.f32.mrf.mxu1 }
 0x73a   :  { %v13197_v11 = vpack.i.bf16 %v11705_v45, %v8896_v3  ;;  %v12956_v3 = vunpack.i.h.bf16 %v18146_v30 }
 0x73b   :  { %v11714_v44 = vpop.f32.mrf.mxu1 }
 0x73c   :  { %13198 = vrot.lane.b32.xlu0 %v13197_v11, %s14013_s25  ;;  %v12966_v11 = vunpack.i.h.bf16 %v18148_v63  ;;  %v12965_v44 = vunpack.i.l.bf16 %v18148_v63  ;;  %v13055_v63 = vunpack.i.l.bf16 %v18223_v14 }
 0x73d   :  { %v8953_v29 = vpop.f32.mrf.mxu1 }
 0x73e   :  { %v13202_v13 = vpack.i.bf16 %v8953_v29, %v8950_v39  ;;  %v12955_v39 = vunpack.i.l.bf16 %v18146_v30  ;;  %v9803_v30 = vsel %vm4831_vm1, %v18143_v7, %v12956_v3 }
 0x740   :  { %13203 = vrot.lane.b32.xlu1 %v13202_v13, %s14013_s25  ;;  %v12976_v13 = vunpack.i.h.bf16 %v18152_v8 }
 0x742   :  { %v11721_v34 = vpop.f32.mrf.mxu0 }
 0x744   :  { %v9007_v10 = vpop.f32.mrf.mxu0 }
 0x745   :  { %v13242_v45 = vpack.i.bf16 %v9007_v10, %v11713_v58  ;;  %v12986_v10 = vunpack.i.h.bf16 %v18155_v50 }
 0x746   :  { %v11722_v52 = vpop.f32.mrf.mxu0  ;;  %v11729_v60 = vpop.f32.mrf.mxu1 }
 0x747   :  { %v12985_v52 = vunpack.i.l.bf16 %v18155_v50 }
 0x748   :  { %v9064_v26 = vpop.f32.mrf.mxu1  ;;  %v9010_v33 = vpop.f32.mrf.mxu0 }
 0x749   :  { %v13247_v18 = vpack.i.bf16 %v11721_v34, %v9010_v33  ;;  %v12975_v34 = vunpack.i.l.bf16 %v18152_v8  ;;  %v9816_v8 = vsel %vm9814_vm4, %v9803_v30, %v12966_v11 }
 0x74a   :  { %v11730_v35 = vpop.f32.mrf.mxu1 }
 0x74c   :  { %v9067_v49 = vpop.f32.mrf.mxu1 }
 0x74d   :  { %v13207_v42 = vpack.i.bf16 %v9067_v49, %v9064_v26  ;;  %v13056_v26 = vunpack.i.h.bf16 %v18223_v14 }
 0x74e   :  { %v11745_v38 = vpop.f32.mrf.mxu1 }
 0x74f   :  { %13208 = vrot.lane.b32.xlu0 %v13207_v42, %s14012_s24  ;;  %v13171_v42 = vunpack.i.h.bf16 %v13169_v16 }
 0x750   :  { %v9178_v51 = vpop.f32.mrf.mxu1 }
 0x752   :  { %v11746_v61 = vpop.f32.mrf.mxu1 }
 0x753   :  { %13213 = vrot.lane.b32.xlu0 %v13212_v40, %s14005_s17 }
 0x754   :  { %v9181_v24 = vpop.f32.mrf.mxu1 }
 0x755   :  { %v13237_v21 = vpack.i.bf16 %v9181_v24, %v9178_v51 }
 0x76c   :  { %v11737_v31 = vpop.f32.mrf.mxu0 }
 0x76e   :  { %v9121_v23 = vpop.f32.mrf.mxu0 }
 0x76f   :  { %v13217_v36 = vpack.i.bf16 %v9121_v23, %v11729_v60  ;;  %v9802_v60 = vsel %vm4831_vm1, %v18140_v43, %v12955_v39  ;;  %v9829_v43 = vsel %vm9827_vm5, %v9816_v8, %v12976_v13 }
 0x770   :  { %v11738_v41 = vpop.f32.mrf.mxu0  ;;  %v9815_v62 = vsel %vm9814_vm4, %v9802_v60, %v12965_v44  ;;  %v9842_v51 = vsel %vm9840_vm6, %v9829_v43, %v12986_v10 }
 0x771   :  { %13218 = vrot.lane.b32.xlu1 %v13217_v36, %s14012_s24  ;;  %v9828_v59 = vsel %vm9827_vm5, %v9815_v62, %v12975_v34  ;;  %v9855_v20 = vsel %vm9853_vm7, %v9842_v51, %v13056_v26 }
 0x772   :  { %v9124_v46 = vpop.f32.mrf.mxu0  ;;  %v9841_v7 = vsel %vm9840_vm6, %v9828_v59, %v12985_v52 }
 0x773   :  { %v13227_v0 = vpack.i.bf16 %v11737_v31, %v9124_v46  ;;  %v9854_v61 = vsel %vm9853_vm7, %v9841_v7, %v13055_v63 }
 0x774   :  { %v11753_v27 = vpop.f32.mrf.mxu0 }
 0x775   :  { %13223 = vrot.lane.b32.xlu1 %v13222_v25, %s14014_s26  ;;  %13228 = vrot.lane.b32.xlu0 %v13227_v0, %s14012_s24  ;;  %v18309_v25 = vpop.permute.xlu1 %13113 }
 0x776   :  { %v9235_v40 = vpop.f32.mrf.mxu0  ;;  %v13116_v3 = vunpack.i.h.bf16 %v18309_v25  ;;  %v13115_v39 = vunpack.i.l.bf16 %v18309_v25 }
 0x777   :  { %v13252_v37 = vpack.i.bf16 %v9235_v40, %v11745_v38  ;;  %v13170_v38 = vunpack.i.l.bf16 %v13169_v16  ;;  %v13076_v16 = vunpack.i.h.bf16 %v18233_v19 }
 0x778   :  { %v11754_v55 = vpop.f32.mrf.mxu0  ;;  %v9836_v44 = vsel %vm9827_vm5, %v18256_v15, %v13115_v39 }
 0x779   :  { %13233 = vrot.lane.b32.xlu0 %v13232_v48, %s14014_s26  ;;  %13238 = vrot.lane.b32.xlu1 %v13237_v21, %s14012_s24  ;;  %v18311_v28 = vpop.permute.xlu1 %13123  ;;  %v18315_v48 = vpop.permute.xlu0 %13178  ;;  %v9859_v26 = vsel %vm9853_vm7, %v18215_v5, %v13076_v16 }
 0x77a   :  { %v9238_v6 = vpop.f32.mrf.mxu0  ;;  %v13126_v52 = vunpack.i.h.bf16 %v18311_v28  ;;  %v13125_v60 = vunpack.i.l.bf16 %v18311_v28  ;;  %v13180_v5 = vunpack.i.l.bf16 %v18315_v48 }
 0x77b   :  { %v13257_v56 = vpack.i.bf16 %v11753_v27, %v9238_v6 }
 0x77d   :  { %13248 = vrot.lane.b32.xlu0 %v13247_v18, %s14013_s25  ;;  %13243 = vrot.lane.b32.xlu1 %v13242_v45, %s14013_s25  ;;  %v18313_v54 = vpop.permute.xlu1 %13133  ;;  %v13189_v29 = vpop.permute.xlu0 %13188 }
 0x77e   :  { %v13191_v14 = vunpack.i.h.bf16 %v13189_v29  ;;  %v13190_v4 = vunpack.i.l.bf16 %v13189_v29  ;;  %v9837_v29 = vsel %vm9827_vm5, %v18259_v22, %v13116_v3  ;;  %v18373_v22 = vsel %vm9840_vm6, %v9836_v44, %v13125_v60 }
 0x77f   :  { %v18376_v62 = vsel %vm9840_vm6, %v9837_v29, %v13126_v52 }
 0x781   :  { %13258 = vrot.lane.b32.xlu0 %v13257_v56, %s14012_s24  ;;  %13253 = vrot.lane.b32.xlu1 %v13252_v37, %s14012_s24  ;;  %v13144_v58 = vpop.permute.xlu1 %13143 }
 0x782   :  { %v13146_v32 = vunpack.i.h.bf16 %v13144_v58  ;;  %v13145_v35 = vunpack.i.l.bf16 %v13144_v58  ;;  %v13075_v58 = vunpack.i.l.bf16 %v18233_v19 }
 0x784   :  { %v9867_v2 = vsel %vm9866_vm8, %v9854_v61, %v13145_v35  ;;  %v9868_v33 = vsel %vm9866_vm8, %v9855_v20, %v13146_v32  ;;  %v9858_v25 = vsel %vm9853_vm7, %v18212_v12, %v13075_v58  ;;  %v13181_v35 = vunpack.i.h.bf16 %v18315_v48 }
 0x785   :  { %v13149_v49 = vpop.permute.xlu1 %13148  ;;  %v9880_v23 = vsel %vm9879_vm9, %v9867_v2, %v13170_v38  ;;  %v9881_v36 = vsel %vm9879_vm9, %v9868_v33, %v13171_v42 }
 0x786   :  { %v9894_v24 = vsel %vm9892_vm10, %v9881_v36, %v13191_v14  ;;  %v9893_v27 = vsel %vm9892_vm10, %v9880_v23, %v13190_v4  ;;  %v13151_v11 = vunpack.i.h.bf16 %v13149_v49  ;;  %v13150_v13 = vunpack.i.l.bf16 %v13149_v49 }
 0x788   :  { %v9870_v8 = vsel %vm9866_vm8, %v18228_v47, %v13151_v11  ;;  %v9869_v32 = vsel %vm9866_vm8, %v18231_v9, %v13150_v13 }
 0x789   :  { %v13154_v0 = vpop.permute.xlu1 %13153 }
 0x78a   :  { %v13155_v34 = vunpack.i.l.bf16 %v13154_v0  ;;  %v13156_v28 = vunpack.i.h.bf16 %v13154_v0 }
 0x78c   :  { %v9871_v12 = vsel %vm9866_vm8, %v9858_v25, %v13155_v34  ;;  %v9872_v4 = vsel %vm9866_vm8, %v9859_v26, %v13156_v28 }
 0x78d   :  { %v18350_v45 = vpop.permute.xlu1 %13158  ;;  %v9884_v33 = vsel %vm9879_vm9, %v9871_v12, %v13180_v5 }
 0x78e   :  { %v13161_v48 = vunpack.i.h.bf16 %v18350_v45  ;;  %v13160_v2 = vunpack.i.l.bf16 %v18350_v45  ;;  %v13136_v45 = vunpack.i.h.bf16 %v18313_v54 }
 0x790   :  { %v9873_v16 = vsel %vm9866_vm8, %v18240_v17, %v13160_v2  ;;  %v9874_v58 = vsel %vm9866_vm8, %v18243_v53, %v13161_v48  ;;  %v9863_v12 = vsel %vm9853_vm7, %v18376_v62, %v13136_v45  ;;  %v13900_v45 = vld [vmem:[#allocation2 + $0x10] sm:$0xff] }
 0x791   :  { %v18352_v18 = vpop.permute.xlu1 %13163 }
 0x792   :  { %v13166_v3 = vunpack.i.h.bf16 %v18352_v18 }
 0x795   :  { %v13174_v6 = vpop.permute.xlu1 %13173 }
 0x796   :  { %v13176_v19 = vunpack.i.h.bf16 %v13174_v6  ;;  %v13175_v30 = vunpack.i.l.bf16 %v13174_v6  ;;  %v13135_v6 = vunpack.i.l.bf16 %v18313_v54 }
 0x798   :  { %v9882_v43 = vsel %vm9879_vm9, %v9869_v32, %v13175_v30  ;;  %v9883_v42 = vsel %vm9879_vm9, %v9870_v8, %v13176_v19  ;;  %v9862_v32 = vsel %vm9853_vm7, %v18373_v22, %v13135_v6 }
 0x799   :  { %v18354_v37 = vpop.permute.xlu1 %13183 }
 0x7aa   :  { %v13194_v56 = vpop.permute.xlu1 %13193 }
 0x7ab   :  { %v13196_v15 = vunpack.i.h.bf16 %v13194_v56  ;;  %v13195_v63 = vunpack.i.l.bf16 %v13194_v56 }
 0x7ad   :  { %v9896_v47 = vsel %vm9892_vm10, %v9883_v42, %v13196_v15  ;;  %v9895_v51 = vsel %vm9892_vm10, %v9882_v43, %v13195_v63  ;;  %v9876_v42 = vsel %vm9866_vm8, %v9863_v12, %v13166_v3 }
 0x7ae   :  { %v18333_v50 = vpop.permute.xlu0 %13198 }
 0x7af   :  { %v13201_v9 = vunpack.i.h.bf16 %v18333_v50  ;;  %v13200_v14 = vunpack.i.l.bf16 %v18333_v50  ;;  %v13185_v50 = vunpack.i.l.bf16 %v18354_v37 }
 0x7b1   :  { %v9886_v13 = vsel %vm9879_vm9, %v9873_v16, %v13185_v50  ;;  %v13901_v16 = vld [vmem:[#allocation2] sm:$0xff] }
 0x7b2   :  { %v18364_v10 = vpop.permute.xlu1 %13203 }
 0x7c1   :  { %v13209_v31 = vpop.permute.xlu0 %13208 }
 0x7c2   :  { %v13211_v41 = vunpack.i.h.bf16 %v13209_v31  ;;  %v13210_v46 = vunpack.i.l.bf16 %v13209_v31  ;;  %v9885_v31 = vsel %vm9879_vm9, %v9872_v4, %v13181_v35 }
 0x7c4   :  { %v9907_v40 = vsel %vm9905_vm11, %v9894_v24, %v13211_v41  ;;  %v9906_v21 = vsel %vm9905_vm11, %v9893_v27, %v13210_v46  ;;  %v13186_v46 = vunpack.i.h.bf16 %v18354_v37  ;;  %v9898_v27 = vsel %vm9892_vm10, %v9885_v31, %v13201_v9 }
 0x7c5   :  { %v9918_v55 = vpack.c.bf16 %v9907_v40, %v9906_v21  ;;  %v18385_v49 = vpop.permute.xlu0 %13213  ;;  %v9897_v40 = vsel %vm9892_vm10, %v9884_v33, %v13200_v14  ;;  %v13206_v21 = vunpack.i.h.bf16 %v18364_v10 }
 0x7c6   :  { %v9887_v29 = vsel %vm9879_vm9, %v9874_v58, %v13186_v46  ;;  %v13216_v60 = vunpack.i.h.bf16 %v18385_v49  ;;  %v13215_v53 = vunpack.i.l.bf16 %v18385_v49 }
 0x7c7   :  { %11767 = vmatprep.mubr.msk.bf16.mxu1 %vm9979_vm12, %v9918_v55  ;;  %v13205_v55 = vunpack.i.l.bf16 %v18364_v10  ;;  %v13165_v10 = vunpack.i.l.bf16 %v18352_v18  ;;  %v9900_v52 = vsel %vm9892_vm10, %v9887_v29, %v13206_v21 }
 0x7c9   :  { %v9899_v17 = vsel %vm9892_vm10, %v9886_v13, %v13205_v55  ;;  %v9875_v43 = vsel %vm9866_vm8, %v9862_v32, %v13165_v10  ;;  %v13903_v10 = vld [vmem:[#allocation2 + $0x8] sm:$0xff]  ;;  %v13906_v32 = vld [vmem:[#allocation2 + $0x38] sm:$0xff] }
 0x7e3   :  { %v13219_v59 = vpop.permute.xlu1 %13218 }
 0x7e4   :  { %v13221_v38 = vunpack.i.h.bf16 %v13219_v59  ;;  %v13220_v7 = vunpack.i.l.bf16 %v13219_v59 }
 0x7e6   :  { %v9909_v61 = vsel %vm9905_vm11, %v9896_v47, %v13221_v38  ;;  %v9908_v20 = vsel %vm9905_vm11, %v9895_v51, %v13220_v7  ;;  %v9878_v38 = vsel %vm9866_vm8, %v18283_v57, %v13216_v60  ;;  %v9877_v7 = vsel %vm9866_vm8, %v18280_v1, %v13215_v53  ;;  %v13904_v53 = vld [vmem:[#allocation2 + $0x30] sm:$0xff] }
 0x7e7   :  { %v9919_v23 = vpack.c.bf16 %v9909_v61, %v9908_v20  ;;  %v13224_v36 = vpop.permute.xlu1 %13223  ;;  %v13229_v41 = vpop.permute.xlu0 %13228 }
 0x7e8   :  { %v13231_v0 = vunpack.i.h.bf16 %v13229_v41  ;;  %v13230_v24 = vunpack.i.l.bf16 %v13229_v41  ;;  %v13226_v19 = vunpack.i.h.bf16 %v13224_v36  ;;  %v13225_v26 = vunpack.i.l.bf16 %v13224_v36 }
 0x7e9   :  { %11768 = vmatmul.mubr.msk.bf16.vlgmr.msra.gmra.mxu1 %vm9979_vm12, %v9919_v23 }
 0x7ea   :  { %v9911_v56 = vsel %vm9905_vm11, %v9898_v27, %v13231_v0  ;;  %v9910_v37 = vsel %vm9905_vm11, %v9897_v40, %v13230_v24  ;;  %v9889_v22 = vsel %vm9879_vm9, %v9876_v42, %v13226_v19  ;;  %v9888_v62 = vsel %vm9879_vm9, %v9875_v43, %v13225_v26  ;;  %v10534_v27 = vld [vmem:[%s18658_s4] ss:$0 sm:$0xff] }
 0x7eb   :  { %v9920_v39 = vpack.c.bf16 %v9911_v56, %v9910_v37  ;;  %v13234_v11 = vpop.permute.xlu0 %13233  ;;  %v13239_v44 = vpop.permute.xlu1 %13238  ;;  %v19773_v0 = vlaneseq }
 0x7ec   :  { %v13241_v54 = vunpack.i.h.bf16 %v13239_v44  ;;  %v13240_v34 = vunpack.i.l.bf16 %v13239_v44  ;;  %v13236_v15 = vunpack.i.h.bf16 %v13234_v11  ;;  %v13235_v63 = vunpack.i.l.bf16 %v13234_v11  ;;  %v13902_v44 = vld [vmem:[#allocation2 + $0x18] sm:$0xff] }
 0x7ed   :  { %11771 = vmatprep.mubr.msk.bf16.mxu1 %vm9979_vm12, %v9920_v39  ;;  %v18452_v24 = vand.u32 127, %v19773_v0 }
 0x7ee   :  { %v9913_v30 = vsel %vm9905_vm11, %v9900_v52, %v13241_v54  ;;  %v9912_v25 = vsel %vm9905_vm11, %v9899_v17, %v13240_v34  ;;  %v9890_v47 = vsel %vm9879_vm9, %v9877_v7, %v13235_v63  ;;  %v9891_v51 = vsel %vm9879_vm9, %v9878_v38, %v13236_v15 }
 0x7ef   :  { %v9921_v8 = vpack.c.bf16 %v9913_v30, %v9912_v25  ;;  %v13249_v18 = vpop.permute.xlu0 %13248  ;;  %v13244_v28 = vpop.permute.xlu1 %13243  ;;  %vm10093_vm13 = vcmp.lt.s32.totalorder %v18452_v24, 96 }
 0x7f0   :  { %v13251_v35 = vunpack.i.h.bf16 %v13249_v18  ;;  %v13250_v5 = vunpack.i.l.bf16 %v13249_v18  ;;  %v13246_v49 = vunpack.i.h.bf16 %v13244_v28  ;;  %v13245_v59 = vunpack.i.l.bf16 %v13244_v28  ;;  %v13905_v18 = vld [vmem:[#allocation2 + $0x20] sm:$0xff] }
 0x7f1   :  { %11772 = vmatmul.mubr.msk.bf16.gmra.mxu1 %vm9979_vm12, %v9921_v8 }
 0x7f2   :  { %v9903_v2 = vsel %vm9892_vm10, %v9890_v47, %v13250_v5  ;;  %v9904_v57 = vsel %vm9892_vm10, %v9891_v51, %v13251_v35  ;;  %v9902_v1 = vsel %vm9892_vm10, %v9889_v22, %v13246_v49  ;;  %v9901_v33 = vsel %vm9892_vm10, %v9888_v62, %v13245_v59  ;;  %v13907_v49 = vld [vmem:[#allocation2 + $0x28] sm:$0xff] }
 0x7f3   :  { %v13259_v9 = vpop.permute.xlu0 %13258  ;;  %v13254_v14 = vpop.permute.xlu1 %13253 }
 0x7f4   :  { %v13261_v4 = vunpack.i.h.bf16 %v13259_v9  ;;  %v13260_v48 = vunpack.i.l.bf16 %v13259_v9  ;;  %v13256_v61 = vunpack.i.h.bf16 %v13254_v14  ;;  %v13255_v20 = vunpack.i.l.bf16 %v13254_v14  ;;  %v13908_v9 = vld [vmem:[#allocation2 + $0x40] sm:$0xff] }
 0x7f6   :  { %v9916_v31 = vsel %vm9905_vm11, %v9903_v2, %v13260_v48  ;;  %v9917_v23 = vsel %vm9905_vm11, %v9904_v57, %v13261_v4  ;;  %v9914_v36 = vsel %vm9905_vm11, %v9901_v33, %v13255_v20  ;;  %v9915_v41 = vsel %vm9905_vm11, %v9902_v1, %v13256_v61  ;;  %v13909_v48 = vld [vmem:[#allocation2 + $0x50] sm:$0xff]  ;;  %v13910_v1 = vld [vmem:[#allocation2 + $0x48] sm:$0xff] }
 0x7f7   :  { %v9923_v46 = vpack.c.bf16 %v9917_v23, %v9916_v31  ;;  %v9922_v50 = vpack.c.bf16 %v9915_v41, %v9914_v36  ;;  %v13911_v31 = vld [vmem:[#allocation2 + $0x58] sm:$0xff] }
 0x7f9   :  { %11775 = vmatprep.mubr.msk.bf16.mxu1 %vm9979_vm12, %v9922_v50 }
 0x7fa   :  { %11776 = vmatmul.mubr.msk.bf16.gmra.mxu1 %vm9979_vm12, %v9923_v46 }
 0x8a9   :  { %v11769_v40 = vpop.f32.mrf.mxu1 }
 0x8aa   :  { %v10041_v21 = vadd.f32 %v11769_v40, %v10534_v27 }
 0x8ab   :  { %v10032_v55 = vpop.f32.mrf.mxu1 }
 0x8ac   :  { %v18458_v6 = vadd.f32 %v13900_v45, %v10041_v21  ;;  %v10033_v56 = vadd.f32 %v10534_v27, %v10032_v55 }
 0x8ad   :  { %v11770_v37 = vpop.f32.mrf.mxu1 }
 0x8ae   :  { %v18460_v58 = vadd.f32 %v13901_v16, %v10033_v56  ;;  %v10044_v3 = vadd.f32 %v11770_v37, %v10534_v27  ;;  %v10096_v39 = vsel %vm10093_vm13, %v18458_v6, 0.0 }
 0x8af   :  { %10110 = vadd.xlane.f32.xlu0 %v10096_v39  ;;  %v10035_v11 = vpop.f32.mrf.mxu1 }
 0x8b0   :  { %v18465_v29 = vadd.f32 %v13902_v44, %v10044_v3  ;;  %v10036_v13 = vadd.f32 %v10534_v27, %v10035_v11  ;;  %v10094_v54 = vsel %vm10093_vm13, %v18460_v58, 0.0 }
 0x8b1   :  { %v11773_v34 = vpop.f32.mrf.mxu1  ;;  %10106 = vadd.xlane.f32.xlu1 %v10094_v54 }
 0x8b2   :  { %v18470_v52 = vadd.f32 %v13903_v10, %v10036_v13  ;;  %v10057_v17 = vadd.f32 %v11773_v34, %v10534_v27  ;;  %v10097_v26 = vsel %vm10093_vm13, %v18465_v29, 0.0 }
 0x8b3   :  { %v10048_v60 = vpop.f32.mrf.mxu1 }
 0x8b4   :  { %v18472_v19 = vadd.f32 %v13904_v53, %v10057_v17  ;;  %v10049_v30 = vadd.f32 %v10534_v27, %v10048_v60  ;;  %v10095_v25 = vsel %vm10093_vm13, %v18470_v52, 0.0 }
 0x8b5   :  { %v11774_v15 = vpop.f32.mrf.mxu1  ;;  %10108 = vadd.xlane.f32.xlu0 %v10095_v25  ;;  %10112 = vadd.xlane.f32.xlu1 %v10097_v26 }
 0x8b6   :  { %v10060_v63 = vadd.f32 %v11774_v15, %v10534_v27  ;;  %v18480_v28 = vadd.f32 %v13905_v18, %v10049_v30  ;;  %v10100_v5 = vsel %vm10093_vm13, %v18472_v19, 0.0 }
 0x8b7   :  { %v10051_v8 = vpop.f32.mrf.mxu1 }
 0x8b8   :  { %v18482_v12 = vadd.f32 %v13906_v32, %v10060_v63  ;;  %v10052_v35 = vadd.f32 %v10534_v27, %v10051_v8  ;;  %v10098_v7 = vsel %vm10093_vm13, %v18480_v28, 0.0 }
 0x8b9   :  { %10118 = vadd.xlane.f32.xlu0 %v10100_v5 }
 0x8ba   :  { %v18487_v59 = vadd.f32 %v13907_v49, %v10052_v35  ;;  %v11777_v43 = vpop.f32.mrf.mxu1  ;;  %v10101_v42 = vsel %vm10093_vm13, %v18482_v12, 0.0 }
 0x8bb   :  { %10120 = vadd.xlane.f32.xlu1 %v10101_v42  ;;  %v10073_v22 = vadd.f32 %v11777_v43, %v10534_v27 }
 0x8bc   :  { %v10064_v38 = vpop.f32.mrf.mxu1  ;;  %v10099_v51 = vsel %vm10093_vm13, %v18487_v59, 0.0 }
 0x8bd   :  { %v10065_v62 = vadd.f32 %v10534_v27, %v10064_v38  ;;  %10114 = vadd.xlane.f32.xlu0 %v10098_v7  ;;  %v18500_v61 = vadd.f32 %v13909_v48, %v10073_v22 }
 0x8be   :  { %v11778_v47 = vpop.f32.mrf.mxu1 }
 0x8bf   :  { %v18498_v14 = vadd.f32 %v13908_v9, %v10065_v62  ;;  %10116 = vadd.xlane.f32.xlu1 %v10099_v51  ;;  %v10076_v20 = vadd.f32 %v11778_v47, %v10534_v27  ;;  %v10104_v36 = vsel %vm10093_vm13, %v18500_v61, 0.0 }
 0x8c0   :  { %v10067_v4 = vpop.f32.mrf.mxu1 }
 0x8c1   :  { %v10068_v2 = vadd.f32 %v10534_v27, %v10067_v4  ;;  %v10102_v57 = vsel %vm10093_vm13, %v18498_v14, 0.0  ;;  %v18507_v23 = vadd.f32 %v13911_v31, %v10076_v20 }
 0x8c2   :  { %10122 = vadd.xlane.f32.xlu0 %v10102_v57 }
 0x8c3   :  { %v18505_v33 = vadd.f32 %v13910_v1, %v10068_v2  ;;  %v10105_v46 = vsel %vm10093_vm13, %v18507_v23, 0.0 }
 0x8c5   :  { %v10103_v41 = vsel %vm10093_vm13, %v18505_v33, 0.0 }
 0x8c6   :  { %10126 = vadd.xlane.f32.xlu0 %v10104_v36  ;;  %10124 = vadd.xlane.f32.xlu1 %v10103_v41 }
 0x8ca   :  { %10128 = vadd.xlane.f32.xlu1 %v10105_v46 }
 0x938   :  { %v10111_v50 = vpop.xlane.xlu0 %10110 }
 0x939   :  { %v10132_v0 = vmul.f32 0.010416667, %v10111_v50 }
 0x93a   :  { %v10107_v27 = vpop.xlane.xlu1 %10106 }
 0x93b   :  { %v10144_v40 = vsub.f32 %v18458_v6, %v10132_v0  ;;  %v10130_v21 = vmul.f32 0.010416667, %v10107_v27 }
 0x93d   :  { %v18521_v55 = vsel %vm10093_vm13, %v10144_v40, 0.0  ;;  %v10142_v45 = vsub.f32 %v18460_v58, %v10130_v21 }
 0x93e   :  { %v10109_v56 = vpop.xlane.xlu0 %10108  ;;  %v10113_v37 = vpop.xlane.xlu1 %10112  ;;  %v10168_v16 = vmul.f32 %v18521_v55, %v18521_v55 }
 0x93f   :  { %v18528_v3 = vsel %vm10093_vm13, %v10142_v45, 0.0  ;;  %v10131_v39 = vmul.f32 0.010416667, %v10109_v56  ;;  %v10133_v11 = vmul.f32 0.010416667, %v10113_v37 }
 0x940   :  { %10182 = vadd.xlane.f32.xlu0 %v10168_v16  ;;  %v10166_v58 = vmul.f32 %v18528_v3, %v18528_v3 }
 0x941   :  { %v10143_v6 = vsub.f32 %v18470_v52, %v10131_v39  ;;  %v10145_v44 = vsub.f32 %v18465_v29, %v10133_v11 }
 0x942   :  { %v10119_v13 = vpop.xlane.xlu0 %10118 }
 0x943   :  { %v18536_v54 = vsel %vm10093_vm13, %v10145_v44, 0.0  ;;  %v10136_v34 = vmul.f32 0.010416667, %v10119_v13  ;;  %v18542_v60 = vsel %vm10093_vm13, %v10143_v6, 0.0 }
 0x944   :  { %10178 = vadd.xlane.f32.xlu0 %v10166_v58  ;;  %v10121_v10 = vpop.xlane.xlu1 %10120  ;;  %v10169_v17 = vmul.f32 %v18536_v54, %v18536_v54  ;;  %v10167_v8 = vmul.f32 %v18542_v60, %v18542_v60 }
 0x945   :  { %v10148_v29 = vsub.f32 %v18472_v19, %v10136_v34  ;;  %v10137_v52 = vmul.f32 0.010416667, %v10121_v10 }
 0x946   :  { %v10115_v53 = vpop.xlane.xlu0 %10114  ;;  %10184 = vadd.xlane.f32.xlu1 %v10169_v17 }
 0x947   :  { %v18547_v30 = vsel %vm10093_vm13, %v10148_v29, 0.0  ;;  %v10149_v25 = vsub.f32 %v18482_v12, %v10137_v52  ;;  %v10134_v26 = vmul.f32 0.010416667, %v10115_v53  ;;  %v18605_v29 = vld [vmem:[%s18659_s5] ss:$0 sm:$0xff]  ;;  %s14021_s5 = smov [#allocation8]  }
 0x948   :  { %v10117_v15 = vpop.xlane.xlu1 %10116  ;;  %v10172_v63 = vmul.f32 %v18547_v30, %v18547_v30 }
 0x949   :  { %v18556_v19 = vsel %vm10093_vm13, %v10149_v25, 0.0  ;;  %v10146_v18 = vsub.f32 %v18480_v28, %v10134_v26  ;;  %v10135_v32 = vmul.f32 0.010416667, %v10117_v15  ;;  %v18611_v15 = vld [vmem:[%s18660_s6] ss:$0 sm:$0xff]  ;;  %s10305_s6 = sshll.u32 %s14021_s5, 4  ;;  %s10306_s6 = int_to_ptr.vmem [resolvable:$true] %s10305_s6 }
 0x94a   :  { %10190 = vadd.xlane.f32.xlu0 %v10172_v63  ;;  %10180 = vadd.xlane.f32.xlu1 %v10167_v8  ;;  %v10173_v42 = vmul.f32 %v18556_v19, %v18556_v19  ;;  %s13972_s16 = scalar_lea.vmem %s10306_s6, 1536  ;;  %p13977_p2 = scmp.lt.s32.totalorder %s10306_s6, %s10306_s6 }
 0x94b   :  { %v18561_v12 = vsel %vm10093_vm13, %v10146_v18, 0.0  ;;  %v10147_v35 = vsub.f32 %v18487_v59, %v10135_v32  ;;  %v10123_v5 = vpop.xlane.xlu0 %10122  ;;  %p13973_p1 = scmp.ne.s32.totalorder %s10306_s6, %s13972_s16  ;;  %p13978_p3 = scmp.lt.s32.totalorder %s13972_s16, %s13972_s16 }
 0x94c   :  { %v10138_v49 = vmul.f32 0.010416667, %v10123_v5  ;;  %v10170_v43 = vmul.f32 %v18561_v12, %v18561_v12 }
 0x94d   :  { %v18570_v28 = vsel %vm10093_vm13, %v10147_v35, 0.0  ;;  %p13979_p4 = por %p13978_p3, %p13977_p2 }
 0x94e   :  { %v10150_v38 = vsub.f32 %v18498_v14, %v10138_v49  ;;  %10186 = vadd.xlane.f32.xlu0 %v10170_v43  ;;  %10192 = vadd.xlane.f32.xlu1 %v10173_v42  ;;  %v10171_v51 = vmul.f32 %v18570_v28, %v18570_v28 }
 0x94f   :  { %v10127_v7 = vpop.xlane.xlu0 %10126  ;;  %v10125_v22 = vpop.xlane.xlu1 %10124  ;;  %p13980_p5 = pnand %p13979_p4, %p13973_p1 }
 0x950   :  { %v18575_v59 = vsel %vm10093_vm13, %v10150_v38, 0.0  ;;  %v10140_v62 = vmul.f32 0.010416667, %v10127_v7  ;;  %v10139_v47 = vmul.f32 0.010416667, %v10125_v22 }
 0x951   :  { %v10174_v9 = vmul.f32 %v18575_v59, %v18575_v59 }
 0x952   :  { %v10152_v4 = vsub.f32 %v18500_v61, %v10140_v62  ;;  %v10151_v14 = vsub.f32 %v18505_v33, %v10139_v47  ;;  %10188 = vadd.xlane.f32.xlu1 %v10171_v51 }
 0x953   :  { %10194 = vadd.xlane.f32.xlu0 %v10174_v9  ;;  %v10129_v48 = vpop.xlane.xlu1 %10128 }
 0x954   :  { %v18585_v20 = vsel %vm10093_vm13, %v10152_v4, 0.0  ;;  %v18589_v2 = vsel %vm10093_vm13, %v10151_v14, 0.0  ;;  %v10141_v57 = vmul.f32 0.010416667, %v10129_v48 }
 0x955   :  { %v10176_v1 = vmul.f32 %v18585_v20, %v18585_v20  ;;  %v10175_v61 = vmul.f32 %v18589_v2, %v18589_v2 }
 0x956   :  { %v10153_v33 = vsub.f32 %v18507_v23, %v10141_v57 }
 0x957   :  { %10198 = vadd.xlane.f32.xlu0 %v10176_v1  ;;  %10196 = vadd.xlane.f32.xlu1 %v10175_v61 }
 0x958   :  { %v18598_v31 = vsel %vm10093_vm13, %v10153_v33, 0.0 }
 0x959   :  { %v10177_v36 = vmul.f32 %v18598_v31, %v18598_v31 }
 0x95b   :  { %10200 = vadd.xlane.f32.xlu1 %v10177_v36 }
 0x9c9   :  { %v10183_v41 = vpop.xlane.xlu0 %10182 }
 0x9ca   :  { %v10204_v46 = vmul.f32 0.010416667, %v10183_v41 }
 0x9cc   :  { %v10216_v50 = vadd.f32 1e-05, %v10204_v46 }
 0x9cd   :  { %v10179_v0 = vpop.xlane.xlu0 %10178 }
 0x9ce   :  { %13876 = vrsqrt.f32 %v10216_v50  ;;  %v10202_v27 = vmul.f32 0.010416667, %v10179_v0 }
 0x9cf   :  { %v10185_v40 = vpop.xlane.xlu1 %10184 }
 0x9d0   :  { %v10214_v21 = vadd.f32 1e-05, %v10202_v27  ;;  %v10205_v45 = vmul.f32 0.010416667, %v10185_v40 }
 0x9d2   :  { %13878 = vrsqrt.f32 %v10214_v21  ;;  %v10217_v23 = vadd.f32 1e-05, %v10205_v45 }
 0x9d3   :  { %v10191_v56 = vpop.xlane.xlu0 %10190  ;;  %v10181_v37 = vpop.xlane.xlu1 %10180 }
 0x9d4   :  { %13880 = vrsqrt.f32 %v10217_v23  ;;  %v10208_v24 = vmul.f32 0.010416667, %v10191_v56  ;;  %v10203_v16 = vmul.f32 0.010416667, %v10181_v37 }
 0x9d6   :  { %v10220_v39 = vadd.f32 1e-05, %v10208_v24  ;;  %v10215_v11 = vadd.f32 1e-05, %v10203_v16 }
 0x9d7   :  { %v10187_v6 = vpop.xlane.xlu0 %10186  ;;  %v10193_v44 = vpop.xlane.xlu1 %10192 }
 0x9d8   :  { %13882 = vrsqrt.f32 %v10220_v39  ;;  %v10206_v13 = vmul.f32 0.010416667, %v10187_v6  ;;  %v10209_v58 = vmul.f32 0.010416667, %v10193_v44 }
 0x9d9   :  { %13884 = vrsqrt.f32 %v10215_v11 }
 0x9da   :  { %v10218_v34 = vadd.f32 1e-05, %v10206_v13  ;;  %v10221_v10 = vadd.f32 1e-05, %v10209_v58 }
 0x9db   :  { %v13877_v17 = vpop.eup %13876  ;;  %v10189_v52 = vpop.xlane.xlu1 %10188 }
 0x9dc   :  { %v10240_v53 = vmul.f32 %v13877_v17, %v18521_v55  ;;  %13886 = vrsqrt.f32 %v10218_v34  ;;  %v10207_v25 = vmul.f32 0.010416667, %v10189_v52  ;;  %v10195_v26 = vpop.xlane.xlu0 %10194 }
 0x9dd   :  { %13888 = vrsqrt.f32 %v10221_v10  ;;  %v10210_v63 = vmul.f32 0.010416667, %v10195_v26 }
 0x9de   :  { %v10259_v8 = vmul.f32 %v18605_v29, %v10240_v53  ;;  %v10219_v18 = vadd.f32 1e-05, %v10207_v25 }
 0x9df   :  { %v13879_v32 = vpop.eup %13878  ;;  %v10222_v35 = vadd.f32 1e-05, %v10210_v63 }
 0x9e0   :  { %v10278_v5 = vadd.f32 %v18611_v15, %v10259_v8  ;;  %v10238_v49 = vmul.f32 %v13879_v32, %v18528_v3  ;;  %13890 = vrsqrt.f32 %v10219_v18  ;;  %v10199_v55 = vpop.xlane.xlu0 %10198  ;;  %v10197_v43 = vpop.xlane.xlu1 %10196 }
 0x9e1   :  { %v13881_v42 = vpop.eup %13880  ;;  %13892 = vrsqrt.f32 %v10222_v35  ;;  %v10212_v38 = vmul.f32 0.010416667, %v10199_v55  ;;  %v10211_v7 = vmul.f32 0.010416667, %v10197_v43 }
 0x9e2   :  { %10290 = vst [vmem:[#allocation8 + $0x10] sm:$0xff] %v10278_v5  ;;  %v10257_v22 = vmul.f32 %v18605_v29, %v10238_v49  ;;  %v10241_v62 = vmul.f32 %v13881_v42, %v18536_v54 }
 0x9e3   :  { %v10224_v47 = vadd.f32 1e-05, %v10212_v38  ;;  %v10223_v51 = vadd.f32 1e-05, %v10211_v7 }
 0x9e4   :  { %v10276_v9 = vadd.f32 %v18611_v15, %v10257_v22  ;;  %v10260_v4 = vmul.f32 %v18605_v29, %v10241_v62  ;;  %v10201_v14 = vpop.xlane.xlu1 %10200 }
 0x9e5   :  { %v13883_v3 = vpop.eup %13882  ;;  %13894 = vrsqrt.f32 %v10224_v47  ;;  %v10213_v48 = vmul.f32 0.010416667, %v10201_v14 }
 0x9e6   :  { %v13885_v57 = vpop.eup %13884  ;;  %10288 = vst [vmem:[#allocation8] sm:$0xff] %v10276_v9  ;;  %v10279_v1 = vadd.f32 %v18611_v15, %v10260_v4  ;;  %v10244_v61 = vmul.f32 %v13883_v3, %v18547_v30  ;;  %13896 = vrsqrt.f32 %v10223_v51 }
 0x9e7   :  { %v10239_v33 = vmul.f32 %v13885_v57, %v18542_v60  ;;  %v10225_v54 = vadd.f32 1e-05, %v10213_v48 }
 0x9e8   :  { %10291 = vst [vmem:[#allocation8 + $0x18] sm:$0xff] %v10279_v1  ;;  %v10263_v36 = vmul.f32 %v18605_v29, %v10244_v61 }
 0x9e9   :  { %v13887_v41 = vpop.eup %13886  ;;  %v10258_v46 = vmul.f32 %v18605_v29, %v10239_v33  ;;  %13898 = vrsqrt.f32 %v10225_v54 }
 0x9ea   :  { %v13889_v50 = vpop.eup %13888  ;;  %v10282_v0 = vadd.f32 %v18611_v15, %v10263_v36  ;;  %v10242_v27 = vmul.f32 %v13887_v41, %v18561_v12 }
 0x9eb   :  { %v10277_v40 = vadd.f32 %v18611_v15, %v10258_v46  ;;  %v10245_v30 = vmul.f32 %v13889_v50, %v18556_v19 }
 0x9ec   :  { %10294 = vst [vmem:[#allocation8 + $0x30] sm:$0xff] %v10282_v0  ;;  %v10261_v60 = vmul.f32 %v18605_v29, %v10242_v27 }
 0x9ed   :  { %v13891_v21 = vpop.eup %13890  ;;  %10289 = vst [vmem:[#allocation8 + $0x8] sm:$0xff] %v10277_v40  ;;  %v10264_v45 = vmul.f32 %v18605_v29, %v10245_v30 }
 0x9ee   :  { %v13893_v23 = vpop.eup %13892  ;;  %v10280_v56 = vadd.f32 %v18611_v15, %v10261_v60  ;;  %v10243_v37 = vmul.f32 %v13891_v21, %v18570_v28 }
 0x9ef   :  { %v10283_v24 = vadd.f32 %v18611_v15, %v10264_v45  ;;  %v10246_v12 = vmul.f32 %v13893_v23, %v18575_v59 }
 0x9f0   :  { %10292 = vst [vmem:[#allocation8 + $0x20] sm:$0xff] %v10280_v56  ;;  %v10262_v16 = vmul.f32 %v18605_v29, %v10243_v37 }
 0x9f1   :  { %10295 = vst [vmem:[#allocation8 + $0x38] sm:$0xff] %v10283_v24  ;;  %v10265_v19 = vmul.f32 %v18605_v29, %v10246_v12 }
 0x9f2   :  { %v13895_v39 = vpop.eup %13894  ;;  %v10281_v11 = vadd.f32 %v18611_v15, %v10262_v16 }
 0x9f3   :  { %v13897_v6 = vpop.eup %13896  ;;  %v10284_v44 = vadd.f32 %v18611_v15, %v10265_v19  ;;  %v10248_v13 = vmul.f32 %v13895_v39, %v18585_v20 }
 0x9f4   :  { %10293 = vst [vmem:[#allocation8 + $0x28] sm:$0xff] %v10281_v11  ;;  %v10247_v28 = vmul.f32 %v13897_v6, %v18589_v2 }
 0x9f5   :  { %10296 = vst [vmem:[#allocation8 + $0x40] sm:$0xff] %v10284_v44  ;;  %v10267_v59 = vmul.f32 %v18605_v29, %v10248_v13 }
 0x9f6   :  { %v13899_v58 = vpop.eup %13898  ;;  %v10266_v34 = vmul.f32 %v18605_v29, %v10247_v28 }
 0x9f7   :  { %v10286_v10 = vadd.f32 %v18611_v15, %v10267_v59  ;;  %v10249_v17 = vmul.f32 %v13899_v58, %v18598_v31 }
 0x9f8   :  { %v10285_v52 = vadd.f32 %v18611_v15, %v10266_v34 }
 0x9f9   :  { %10298 = vst [vmem:[#allocation8 + $0x50] sm:$0xff] %v10286_v10  ;;  %v10268_v20 = vmul.f32 %v18605_v29, %v10249_v17 }
 0x9fa   :  { %10297 = vst [vmem:[#allocation8 + $0x48] sm:$0xff] %v10285_v52 }
 0x9fb   :  { %v10287_v2 = vadd.f32 %v18611_v15, %v10268_v20 }
 0x9fd   :  { %10299 = vst [vmem:[#allocation8 + $0x58] sm:$0xff] %v10287_v2 }
 0x9fe   :  { %13983 = shalt.err (!%p13980_p5)
}
 0x9ff   :  { %10311 = dma.vmem_to_hbm [thread:$0]  %s10306_s6, 1536, %s18661_s7, [#allocation4], %s14002_s11, %s14002_s11, %s14003_s12  }
 0xa00   :  { %13996 = dma.done.wait [#allocation4], 1536  }
 0xa01   :  { %13997 = vsyncadd [#allocation4], 4294965760 }
 0xa02   :  { %10315 = vsyncpa [#allocation3], 1 }
 0xa03   :  { %10316 = vsyncpa [#allocation6], 1 }
 0xa04   :  { %10317 = vsyncpa [#allocation4], 1 }

</bundles_post_ra>
